<compile_context>
chip_gen: v7x
topology: tpu7x:2x2x1
jax: 0.10.0
libtpu: 0.0.40
codegen_flags: <defaults>
</compile_context>

<pallas_src>
import functools

import jax
import jax.numpy as jnp
from jax.experimental import pallas as pl
from jax.experimental.pallas import tpu as pltpu


def _round_up(a, b):
    return (a + b - 1) // b * b


def _cache_kernel(x_ref, tab_ref, out_ref, acc_ref, *,
                  scale, Np, D, tile_n, k_chunk):
    """K-chunked, feature-major kernel.

    x_ref:   (3, T)              f32  query points (lane = point index)
    tab_ref: (CD_pad, k_chunk)   f32  current table chunk,
                                      rows: [uvw(3D) | beta(D) | sigma(1) | 0]
    out_ref: (8, T)              f32  rows: [sigma | color_rgb | 4 pad rows]
    acc_ref: (CD_pad, T)         f32  gathered-feature accumulator (scratch)
    """
    k = pl.program_id(1)
    inv_cell = float(Np) / float(scale)          # == 1 / (scale / Np)

    x = x_ref[...]                                                   # (3, T)

    # torch .long() truncates toward zero; in-range values are >= 0 so this
    # matches, out-of-range rows are masked out by `inside` anyway.
    idx = jnp.clip((x * inv_cell + Np * 0.5).astype(jnp.int32), 0, Np - 1)
    flat = idx[0:1, :] * (Np * Np) + idx[1:2, :] * Np + idx[2:3, :]  # (1, T)

    # Chunk-local one-hot: compare against a (k_chunk, T) sublane iota shifted
    # into this chunk's row range.  Rows outside the chunk simply never match.
    flat_local = flat - k * k_chunk                                  # (1, T)
    row_ids = jax.lax.broadcasted_iota(jnp.int32, (k_chunk, tile_n), 0)
    oh = (row_ids == flat_local).astype(jnp.float32)                 # (kc, T)

    @pl.when(k == 0)
    def _():
        acc_ref[...] = jnp.zeros_like(acc_ref)

    # Gather via one-hot matmul on the MXU; tile_n (>=128) is the output lane
    # dimension, so the MXU result is lane-dense.
    acc_ref[...] += jnp.dot(tab_ref[...], oh,
                            preferred_element_type=jnp.float32)      # (CD_pad,T)

    @pl.when(k == pl.num_programs(1) - 1)
    def _():
        half = scale / 2.0
        ax = jnp.abs(x)
        inside = ((ax[0:1, :] < half) &
                  (ax[1:2, :] < half) &
                  (ax[2:3, :] < half)).astype(jnp.float32)           # (1, T)

        s = acc_ref[...]                                             # (CD_pad,T)

        # sigmoid via EUP tanh (keeps the f32 divide off the VALU).
        uvw = 0.5 * jnp.tanh(0.5 * s[0:3 * D, :]) + 0.5              # (3D, T)
        b = s[3 * D:4 * D, :]                                        # (D, T)
        s0 = s[4 * D:4 * D + 1, :]                                   # (1, T)

        # stable softplus == max(x,0) + log1p(exp(-|x|))
        sigma = jnp.maximum(s0, 0.0) + jnp.log1p(jnp.exp(-jnp.abs(s0)))

        # Fused color reduction: one VPU multiply + one segmented sublane sum.
        w = uvw.reshape(3, D, tile_n) * b[None, :, :]                # (3, D, T)
        color = w.sum(axis=1)                                        # (3, T)

        res = jnp.concatenate([sigma, color], axis=0) * inside       # (4, T)
        # Pad to 8 rows so the tile store is a full unmasked (8, 128) tile.
        out_ref[...] = jnp.concatenate(
            [res, jnp.zeros((4, tile_n), jnp.float32)], axis=0)


def cache_forward(x, d, sigma_uvw, beta, *, scale, tile_n=1024, k_chunk=None):
    """Pallas port of Cache.forward. `d` is unused (matches the torch code)."""
    del d  # TODO(synk): `d` is accepted but never used by the reference forward.
    Np = sigma_uvw.shape[0]
    Nd = beta.shape[0]
    C = sigma_uvw.shape[-1]
    D = beta.shape[-1]
    assert C == 1 + 3 * D
    # The torch forward indexes beta with the *position* grid index, so it
    # implicitly requires Nd >= Np; that lets us fold beta into the table.
    assert Nd >= Np
    assert tile_n % 128 == 0

    N = x.shape[0]
    NP3 = Np * Np * Np
    CD = 4 * D + 1
    CD_pad = _round_up(CD, 8)

    if k_chunk is None:
        k_chunk = min(1024, _round_up(NP3, 128))
    assert k_chunk % 128 == 0
    NP3_pad = _round_up(NP3, k_chunk)
    n_k = NP3_pad // k_chunk

    n_tiles = pl.cdiv(N, tile_n)
    n_pad = n_tiles * tile_n

    # Feature-major (lane-dense) input: (3, n_pad).
    x_t = jnp.pad(x.astype(jnp.float32).T, ((0, 0), (0, n_pad - N)))

    # Combined, pre-transposed table: rows [uvw(3D) | beta(D) | sigma(1)],
    # columns = flattened (i,j,k) grid index, zero-padded to (CD_pad, NP3_pad).
    sig_flat = sigma_uvw.astype(jnp.float32).reshape(NP3, C)            # (NP3, 1+3D)
    beta_b = jnp.broadcast_to(beta[:Np, :Np, None, :].astype(jnp.float32),
                              (Np, Np, Np, D)).reshape(NP3, D)          # (NP3, D)
    table = jnp.concatenate([sig_flat[:, 1:], beta_b, sig_flat[:, 0:1]],
                            axis=-1)                                    # (NP3, CD)
    table_t = jnp.pad(table.T, ((0, CD_pad - CD), (0, NP3_pad - NP3)))  # (CD_pad, NP3_pad)

    kernel = functools.partial(_cache_kernel, scale=float(scale),
                               Np=Np, D=D, tile_n=tile_n, k_chunk=k_chunk)

    # Generation-aware VMEM budget (v7x has only 64 MiB per TensorCore).
    try:
        info = pltpu.get_tpu_info()
        vmem_cap = int(getattr(info, "vmem_capacity_bytes", 64 << 20))
    except Exception:  # pragma: no cover - conservative fallback
        vmem_cap = 64 << 20
    hard_cap = (40 << 20) if vmem_cap <= (64 << 20) else (100 << 20)

    vmem_est = (2 * CD_pad * k_chunk * 4      # table chunk (double-buffered)
                + 2 * 3 * tile_n * 4          # x tiles (double-buffered)
                + 2 * 8 * tile_n * 4          # output tiles (double-buffered)
                + CD_pad * tile_n * 4         # accumulator scratch
                + 3 * k_chunk * tile_n * 4    # one-hot + compare temporaries
                + 4 * CD_pad * tile_n * 4)    # epilogue temporaries
    vmem_limit = int(min(max(2 * vmem_est, 16 << 20), hard_cap))

    cost = pl.CostEstimate(
        flops=int(2 * n_pad * NP3_pad * CD_pad),
        transcendentals=int(n_pad * (3 * D + 2)),
        bytes_accessed=int(n_tiles * CD_pad * NP3_pad * 4   # table re-streamed per point tile
                           + n_pad * 3 * 4 + n_pad * 8 * 4),
    )

    out = pl.pallas_call(
        kernel,
        out_shape=jax.ShapeDtypeStruct((8, n_pad), jnp.float32),
        grid_spec=pltpu.PrefetchScalarGridSpec(
            num_scalar_prefetch=0,
            grid=(n_tiles, n_k),                       # K (reduction) axis last
            in_specs=[
                pl.BlockSpec((3, tile_n), lambda i, k: (0, i)),
                pl.BlockSpec((CD_pad, k_chunk), lambda i, k: (0, k)),
            ],
            out_specs=pl.BlockSpec((8, tile_n), lambda i, k: (0, i)),
            scratch_shapes=[pltpu.VMEM((CD_pad, tile_n), jnp.float32)],
        ),
        compiler_params=pltpu.CompilerParams(
            dimension_semantics=("parallel", "arbitrary"),
            vmem_limit_bytes=vmem_limit),
        cost_estimate=cost,
    )(x_t, table_t)

    sigma = out[0:1, :N].T          # (N, 1)
    color = out[1:4, :N].T          # (N, 3)
    return color, sigma


def cache_forward_ref(x, sigma_uvw, beta, *, scale):
    """Pure-JAX reference for validation."""
    Np = sigma_uvw.shape[0]
    D = beta.shape[-1]
    N = x.shape[0]
    inside = ((jnp.abs(x[:, 0]) < scale / 2) &
              (jnp.abs(x[:, 1]) < scale / 2) &
              (jnp.abs(x[:, 2]) < scale / 2))
    idx = jnp.clip((x * (float(Np) / float(scale)) + Np / 2.0).astype(jnp.int32),
                   0, Np - 1)
    s = sigma_uvw[idx[:, 0], idx[:, 1], idx[:, 2]]
    b = beta[idx[:, 0], idx[:, 1]]
    sigma = jax.nn.softplus(s[:, 0:1]) * inside[:, None]
    uvw = jax.nn.sigmoid(s[:, 1:].reshape(N, 3, D)) * b[:, None, :]
    color = uvw.sum(-1) * inside[:, None]
    return color, sigma


if __name__ == "__main__":
    # Small, deterministic setup (the real module fills these tables by
    # evaluating a NeRF MLP on a grid; here we init them synthetically).
    scale = 3.0
    Np = 16       # position grid resolution -> NP3 = 4096 -> 4 K-chunks of 1024
    Nd = 16       # direction grid resolution (indexed with position idx)
    D = 8         # model.D
    N = 6000      # query points: 6 point tiles of 1024 (even count for 2 TCs)
    C = 1 + 3 * D

    key = jax.random.PRNGKey(0)
    k1, k2, k3, k4 = jax.random.split(key, 4)
    sigma_uvw = jax.random.normal(k1, (Np, Np, Np, C), dtype=jnp.float32)
    beta = jax.random.normal(k2, (Nd, Nd, D), dtype=jnp.float32)
    # Points spread so some fall outside the [-scale/2, scale/2] cube.
    x = jax.random.uniform(k3, (N, 3), minval=-scale, maxval=scale,
                           dtype=jnp.float32)
    d = jax.random.normal(k4, (N, 3), dtype=jnp.float32)   # unused by forward

    color, sigma = cache_forward(x, d, sigma_uvw, beta, scale=scale)
    jax.block_until_ready((color, sigma))

    color_ref, sigma_ref = cache_forward_ref(x, sigma_uvw, beta, scale=scale)
    assert color.shape == (N, 3) and sigma.shape == (N, 1)
    assert jnp.allclose(color, color_ref, atol=1e-5, rtol=1e-5)
    assert jnp.allclose(sigma, sigma_ref, atol=1e-5, rtol=1e-5)

    print("KERNEL_OK")
</pallas_src>

<mosaic_0001>
module attributes {stable_mosaic.version = 11 : i64} {
  func.func @_cache_kernel(%arg0: i32, %arg1: i32, %arg2: memref<3x1024xf32, #tpu.memory_space<vmem>>, %arg3: memref<40x1024xf32, #tpu.memory_space<vmem>>, %arg4: memref<8x1024xf32, #tpu.memory_space<vmem>>, %arg5: memref<40x1024xf32, #tpu.memory_space<vmem>>) attributes {dimension_semantics = [#tpu.dimension_semantics<parallel>, #tpu.dimension_semantics<arbitrary>], iteration_bounds = array<i64: 6, 4>, scalar_prefetch = 0 : i64, scratch_operands = 1 : i64, tpu.core_type = #tpu.core_type<tc>, window_params = [{transform_indices = @transform_0, window_bounds = array<i64: 3, 1024>}, {transform_indices = @transform_1, window_bounds = array<i64: 40, 1024>}, {transform_indices = @transform_2, window_bounds = array<i64: 8, 1024>}]} {
    %c0 = arith.constant 0 : index
    %c0_0 = arith.constant 0 : index
    %0 = vector.load %arg2[%c0, %c0_0] : memref<3x1024xf32, #tpu.memory_space<vmem>>, vector<3x1024xf32>
    %cst = arith.constant 5.33333349 : f32
    %1 = vector.broadcast %cst : f32 to vector<3x1024xf32>
    %2 = arith.mulf %0, %1 : vector<3x1024xf32>
    %cst_1 = arith.constant 8.000000e+00 : f32
    %3 = vector.broadcast %cst_1 : f32 to vector<3x1024xf32>
    %4 = arith.addf %2, %3 : vector<3x1024xf32>
    %5 = arith.fptosi %4 : vector<3x1024xf32> to vector<3x1024xi32>
    %c0_i32 = arith.constant 0 : i32
    %c15_i32 = arith.constant 15 : i32
    %6 = vector.broadcast %c0_i32 : i32 to vector<3x1024xi32>
    %7 = arith.maxsi %6, %5 : vector<3x1024xi32>
    %8 = vector.broadcast %c15_i32 : i32 to vector<3x1024xi32>
    %9 = arith.minsi %8, %7 : vector<3x1024xi32>
    %10 = vector.extract_strided_slice %9 {offsets = [0, 0], sizes = [1, 1024], strides = [1, 1]} : vector<3x1024xi32> to vector<1x1024xi32>
    %c256_i32 = arith.constant 256 : i32
    %11 = vector.broadcast %c256_i32 : i32 to vector<1x1024xi32>
    %12 = arith.muli %10, %11 : vector<1x1024xi32>
    %13 = vector.extract_strided_slice %9 {offsets = [1, 0], sizes = [1, 1024], strides = [1, 1]} : vector<3x1024xi32> to vector<1x1024xi32>
    %c16_i32 = arith.constant 16 : i32
    %14 = vector.broadcast %c16_i32 : i32 to vector<1x1024xi32>
    %15 = arith.muli %13, %14 : vector<1x1024xi32>
    %16 = arith.addi %12, %15 : vector<1x1024xi32>
    %17 = vector.extract_strided_slice %9 {offsets = [2, 0], sizes = [1, 1024], strides = [1, 1]} : vector<3x1024xi32> to vector<1x1024xi32>
    %18 = arith.addi %16, %17 : vector<1x1024xi32>
    %c1024_i32 = arith.constant 1024 : i32
    %19 = arith.muli %arg1, %c1024_i32 : i32
    %20 = vector.broadcast %19 : i32 to vector<1x1024xi32>
    %21 = arith.subi %18, %20 : vector<1x1024xi32>
    %22 = tpu.iota {dimensions = array<i32: 0>} : vector<1024x1024xi32>
    %23 = vector.broadcast %21 : vector<1x1024xi32> to vector<1024x1024xi32>
    %24 = arith.cmpi eq, %22, %23 : vector<1024x1024xi32>
    %25 = arith.extui %24 : vector<1024x1024xi1> to vector<1024x1024xi32>
    %26 = arith.sitofp %25 : vector<1024x1024xi32> to vector<1024x1024xf32>
    %c0_i32_2 = arith.constant 0 : i32
    %27 = arith.cmpi eq, %arg1, %c0_i32_2 : i32
    %28 = arith.extui %27 : i1 to i32
    %c0_i32_3 = arith.constant 0 : i32
    %29 = arith.cmpi ne, %28, %c0_i32_3 : i32
    scf.if %29 {
      %cst_12 = arith.constant 0.000000e+00 : f32
      %38 = vector.broadcast %cst_12 : f32 to vector<40x1024xf32>
      %c0_13 = arith.constant 0 : index
      %c0_14 = arith.constant 0 : index
      %39 = vector.load %arg5[%c0_13, %c0_14] : memref<40x1024xf32, #tpu.memory_space<vmem>>, vector<40x1024xf32>
      tpu.vector_store %arg5[%c0_13, %c0_14], %38 {strides = array<i32>} : memref<40x1024xf32, #tpu.memory_space<vmem>>, vector<40x1024xf32>,
    } else {
    }
    %c0_4 = arith.constant 0 : index
    %c0_5 = arith.constant 0 : index
    %30 = vector.load %arg5[%c0_4, %c0_5] : memref<40x1024xf32, #tpu.memory_space<vmem>>, vector<40x1024xf32>
    %c0_6 = arith.constant 0 : index
    %c0_7 = arith.constant 0 : index
    %31 = vector.load %arg3[%c0_6, %c0_7] : memref<40x1024xf32, #tpu.memory_space<vmem>>, vector<40x1024xf32>
    %cst_8 = arith.constant dense<0.000000e+00> : vector<40x1024xf32>
    %32 = tpu.matmul %31, %26, %cst_8 {dimension_numbers = #tpu.dot_dimension_numbers<[1], [0], [0], [1], [0, 0, 1, 1], [], []>} : vector<40x1024xf32>, vector<1024x1024xf32>, vector<40x1024xf32> -> vector<40x1024xf32>
    %33 = arith.addf %30, %32 : vector<40x1024xf32>
    %c0_9 = arith.constant 0 : index
    %c0_10 = arith.constant 0 : index
    %34 = vector.load %arg5[%c0_9, %c0_10] : memref<40x1024xf32, #tpu.memory_space<vmem>>, vector<40x1024xf32>
    tpu.vector_store %arg5[%c0_9, %c0_10], %33 {strides = array<i32>} : memref<40x1024xf32, #tpu.memory_space<vmem>>, vector<40x1024xf32>,
    %c3_i32 = arith.constant 3 : i32
    %35 = arith.cmpi eq, %arg1, %c3_i32 : i32
    %36 = arith.extui %35 : i1 to i32
    %c0_i32_11 = arith.constant 0 : i32
    %37 = arith.cmpi ne, %36, %c0_i32_11 : i32
    scf.if %37 {
      %38 = math.absf %0 : vector<3x1024xf32>
      %39 = vector.extract_strided_slice %38 {offsets = [0, 0], sizes = [1, 1024], strides = [1, 1]} : vector<3x1024xf32> to vector<1x1024xf32>
      %cst_12 = arith.constant 1.500000e+00 : f32
      %40 = vector.broadcast %cst_12 : f32 to vector<1x1024xf32>
      %41 = arith.cmpf olt, %39, %40 : vector<1x1024xf32>
      %42 = vector.extract_strided_slice %38 {offsets = [1, 0], sizes = [1, 1024], strides = [1, 1]} : vector<3x1024xf32> to vector<1x1024xf32>
      %cst_13 = arith.constant 1.500000e+00 : f32
      %43 = vector.broadcast %cst_13 : f32 to vector<1x1024xf32>
      %44 = arith.cmpf olt, %42, %43 : vector<1x1024xf32>
      %45 = arith.andi %41, %44 : vector<1x1024xi1>
      %46 = vector.extract_strided_slice %38 {offsets = [2, 0], sizes = [1, 1024], strides = [1, 1]} : vector<3x1024xf32> to vector<1x1024xf32>
      %cst_14 = arith.constant 1.500000e+00 : f32
      %47 = vector.broadcast %cst_14 : f32 to vector<1x1024xf32>
      %48 = arith.cmpf olt, %46, %47 : vector<1x1024xf32>
      %49 = arith.andi %45, %48 : vector<1x1024xi1>
      %50 = arith.extui %49 : vector<1x1024xi1> to vector<1x1024xi32>
      %51 = arith.sitofp %50 : vector<1x1024xi32> to vector<1x1024xf32>
      %c0_15 = arith.constant 0 : index
      %c0_16 = arith.constant 0 : index
      %52 = vector.load %arg5[%c0_15, %c0_16] : memref<40x1024xf32, #tpu.memory_space<vmem>>, vector<40x1024xf32>
      %53 = vector.extract_strided_slice %52 {offsets = [0, 0], sizes = [24, 1024], strides = [1, 1]} : vector<40x1024xf32> to vector<24x1024xf32>
      %cst_17 = arith.constant 5.000000e-01 : f32
      %54 = vector.broadcast %cst_17 : f32 to vector<24x1024xf32>
      %55 = arith.mulf %54, %53 : vector<24x1024xf32>
      %56 = math.tanh %55 : vector<24x1024xf32>
      %cst_18 = arith.constant 5.000000e-01 : f32
      %57 = vector.broadcast %cst_18 : f32 to vector<24x1024xf32>
      %58 = arith.mulf %57, %56 : vector<24x1024xf32>
      %cst_19 = arith.constant 5.000000e-01 : f32
      %59 = vector.broadcast %cst_19 : f32 to vector<24x1024xf32>
      %60 = arith.addf %58, %59 : vector<24x1024xf32>
      %61 = vector.extract_strided_slice %52 {offsets = [24, 0], sizes = [8, 1024], strides = [1, 1]} : vector<40x1024xf32> to vector<8x1024xf32>
      %62 = vector.extract_strided_slice %52 {offsets = [32, 0], sizes = [1, 1024], strides = [1, 1]} : vector<40x1024xf32> to vector<1x1024xf32>
      %cst_20 = arith.constant 0.000000e+00 : f32
      %63 = vector.broadcast %cst_20 : f32 to vector<1x1024xf32>
      %64 = arith.maximumf %62, %63 : vector<1x1024xf32>
      %65 = math.absf %62 : vector<1x1024xf32>
      %cst_21 = arith.constant 0.000000e+00 : f32
      %66 = vector.broadcast %cst_21 : f32 to vector<1x1024xf32>
      %67 = arith.subf %66, %65 : vector<1x1024xf32>
      %68 = math.exp %67 : vector<1x1024xf32>
      %69 = math.log1p %68 : vector<1x1024xf32>
      %70 = arith.addf %64, %69 : vector<1x1024xf32>
      %71 = vector.shape_cast %60 : vector<24x1024xf32> to vector<3x8x1024xf32>
      %72 = vector.shape_cast %61 : vector<8x1024xf32> to vector<1x8x1024xf32>
      %73 = vector.broadcast %72 : vector<1x8x1024xf32> to vector<3x8x1024xf32>
      %74 = arith.mulf %71, %73 : vector<3x8x1024xf32>
      %cst_22 = arith.constant dense<0.000000e+00> : vector<3x1024xf32>
      %75 = vector.multi_reduction <add>, %74, %cst_22 [1] : vector<3x8x1024xf32> to vector<3x1024xf32>
      %76 = tpu.concatenate %70, %75 in 0 : vector<1x1024xf32>, vector<3x1024xf32> -> vector<4x1024xf32>
      %77 = vector.broadcast %51 : vector<1x1024xf32> to vector<4x1024xf32>
      %78 = arith.mulf %76, %77 : vector<4x1024xf32>
      %cst_23 = arith.constant 0.000000e+00 : f32
      %79 = vector.broadcast %cst_23 : f32 to vector<4x1024xf32>
      %80 = tpu.concatenate %78, %79 in 0 : vector<4x1024xf32>, vector<4x1024xf32> -> vector<8x1024xf32>
      %c0_24 = arith.constant 0 : index
      %c0_25 = arith.constant 0 : index
      %81 = vector.load %arg4[%c0_24, %c0_25] : memref<8x1024xf32, #tpu.memory_space<vmem>>, vector<8x1024xf32>
      tpu.vector_store %arg4[%c0_24, %c0_25], %80 {strides = array<i32>} : memref<8x1024xf32, #tpu.memory_space<vmem>>, vector<8x1024xf32>,
    } else {
    }
    return
  }
  func.func @transform_0(%arg0: i32, %arg1: i32) -> (i32, i32) {
    %c0_i32 = arith.constant 0 : i32
    %c0_i32_0 = arith.constant 0 : i32
    return %c0_i32, %arg0 : i32, i32
  }
  func.func @transform_1(%arg0: i32, %arg1: i32) -> (i32, i32) {
    %c0_i32 = arith.constant 0 : i32
    %c0_i32_0 = arith.constant 0 : i32
    return %c0_i32, %arg1 : i32, i32
  }
  func.func @transform_2(%arg0: i32, %arg1: i32) -> (i32, i32) {
    %c0_i32 = arith.constant 0 : i32
    %c0_i32_0 = arith.constant 0 : i32
    return %c0_i32, %arg0 : i32, i32
  }
}

</mosaic_0001>

<bundles_post_ra>
// kernel: tpu_custom_call.1
= control target key start
LH: loop header
LB: loop body
LE: loop exit
PB: predicated region body
PF: predicated region fallthrough
CT: control target
= control target key end

     0   :  { %s16764_s0 = inlined_call_operand.hbm [shape: f32[3,6144], index: 0, kind: input, shape index: {}]   ;;  %s16765_s1 = inlined_call_operand.hbm [shape: f32[40,4096], index: 1, kind: input, shape index: {}]   ;;  %s16766_s2 = inlined_call_operand.hbm [shape: f32[8,6144], index: 2, kind: output, shape index: {}]  }
   0x1   :  { %17028 = sst [smem:[#allocation110_spill]] %s16764_s0 }
   0x2   :  { %7 = vsyncpa [#allocation4], 0 }
   0x3   :  { %9 = vsyncpa [#allocation4 + $0x1], 0 }
   0x4   :  { %10 = vsyncpa [#allocation7], 0 }
   0x5   :  { %12 = vsyncpa [#allocation7 + $0x1], 0 }
   0x6   :  { %13 = vsyncpa [#allocation5], 0 }
   0x7   :  { %15 = vsyncpa [#allocation5 + $0x1], 0  ;;  %s9725_s9 = smov 0   ;;  %s9727_s10 = smov 0  }
   0x8   :  { %s9729_s11 = smov 0   ;;  %s9731_s12 = smov 0  }
   0x9   :  { %s9733_s13 = smov 0   ;;  %s9735_s14 = smov 0  }
   0xa   :  { %s9737_s15 = smov 0   ;;  %s9739_s16 = smov 0  }
   0xb   :  { %s9741_s17 = smov 0   ;;  %s9743_s18 = smov 0  }
   0xc   :  { %s9745_s19 = smov 0  }
   0xd LB: > { %17029 = sst [smem:[#allocation12_spill]] %s9694_s18  ;;  %s6033_s20 = sadd.s32 4294967295, %s9698_s19   ;;  %s9698_s19 = sphi %s9745_s19, %s21_s19   ;;  %s9694_s18 = sphi %s9743_s18, %s18465_s18   ;;  %s9690_s17 = sphi %s9741_s17, %s18473_s17   ;;  %s9686_s16 = sphi %s9739_s16, %s18463_s16   ;;  %s9682_s15 = sphi %s9737_s15, %s18472_s15   ;;  %s9678_s14 = sphi %s9735_s14, %s18471_s14   ;;  %s9674_s13 = sphi %s9733_s13, %s18470_s13   ;;  %s9670_s12 = sphi %s9731_s12, %s18469_s12   ;;  %s9666_s11 = sphi %s9729_s11, %s18468_s11   ;;  %s9662_s10 = sphi %s9727_s10, %s18467_s10   ;;  %s9658_s9 = sphi %s9725_s9, %s18466_s9  }
   0xe   : > { %s6034_s21 = sadd.s32 4294967294, %s9698_s19   ;;  %s30_s22 = sadd.s32 1, %s9690_s17 }
   0xf   : > { %s33_s23 = sadd.s32 1, %s9694_s18  ;;  %p31_p0 = scmp.ge.s32.totalorder %s30_s22, 4 }
  0x10   : > { %s40_s24 = sadd.s32 1, %s9678_s14  ;;  %p47_p1 = scmp.ne.s32.totalorder %s9678_s14, %s9674_s13 }
  0x11   : > { %p48_p2 = scmp.eq.s32.totalorder %s9698_s19, 0  ;;  %s18475_s22 = smov (%p31_p0, %s30_s22), 0 }
  0x12   : > { %17030 = sst [smem:[#allocation13_spill]] %s18475_s22  ;;  %s18477_s23 = smov (!%p31_p0, %s33_s23), %s9694_s18 }
  0x13   : > { %p9796_p3 = por %p48_p2, %p47_p1  ;;  %p16767_p4 = scmp.ne.s32.totalorder %s9674_s13, %s9670_s12 }
  0x14   : > { %p35_p5 = scmp.ge.s32.totalorder %s18477_s23, 6  ;;  %p9802_p6 = scmp.eq.s32.totalorder %s6033_s20, 0 }
  0x15   : > { %s63_s27 = ssub.s32 %s9690_s17, %s18475_s22  ;;  %s66_s28 = sadd.s32 1, %s9666_s11 }
  0x16   : > { %s18479_s23 = smov (%p35_p5, %s18477_s23), 0  ;;  %p9816_p7 = por %p9802_p6, %p16767_p4 }
  0x17   : > { %17033 = sst [smem:[#allocation14_spill]] %s18479_s23  ;;  %p64_p8 = scmp.eq.s32.totalorder %s63_s27, 0 }
  0x18   : > { %s17034_s29 = scalar_select %p9816_p7, 1, 0 }
  0x19   : > { %s37_s30 = ssub.s32 %s9694_s18, %s18479_s23  ;;  %p73_p9 = scmp.ne.s32.totalorder %s9666_s11, %s9662_s10 }
  0x1a   : > { %p38_p10 = scmp.eq.s32.totalorder %s37_s30, 0  ;;  %p79_p11 = scmp.ne.s32.totalorder %s9662_s10, %s9658_s9 }
  0x1b   : > { %s9827_s3 = scalar_select %p64_p8, %s9666_s11, %s66_s28  }
  0x1c   : > { %s9830_s4 = scalar_select %p38_p10, %s9678_s14, %s40_s24  }
  0x1d   : > { %p9834_p12 = por %p73_p9, %p48_p2  ;;  %p9840_p13 = por %p79_p11, %p9802_p6 }
  0x1e   : > { %p103_p0 = scmp.eq.s32.totalorder %s6033_s20, 23  ;;  %p109_p5 = scmp.eq.s32.totalorder %s6034_s21, 23 }
  0x1f   : > { %s17036_s6 = scalar_select %p9840_p13, 1, 0 }
  0x20   : > { %p9295_p4 = scmp.lt.s32.totalorder %s9698_s19, 24  ;;  %p9848_p8 = por %p103_p0, %p47_p1 }
  0x21   : > { %p17038_p10 = scmp.ne.s32.totalorder %s9674_s13, %s9670_s12  ;;  %s129_s9 = sand.u32 1, %s9678_s14  }
  0x22   : > { %s17037_s7 = scalar_select %p9848_p8, 1, 0 }
  0x23   : > { %p9855_p2 = por %p109_p5, %p17038_p10  ;;  %s8121_s24 = sshll.u32 %s9694_s18, 9 }
  0x24   : > { %s6037_s26 = sshll.u32 %s129_s9, 5  ;;  %s17040_s0 = sld [smem:[#allocation110_spill]] }
  0x25   : > { %s17039_s8 = scalar_select %p9855_p2, 1, 0 }
  0x26   : > { %s133_s20 = scalar_lea.vmem [#allocation3], %s6037_s26  ;;  %p9868_p1 = pnand %p9295_p4, %p9796_p3 }
  0x27   : > { %s141_s21 = sshll.u32 %s133_s20, 4  ;;  %p9876_p6 = pnand %p9295_p4, %p9834_p12  ;;  %s9872_s21 = int_to_ptr.vmem [resolvable:$true] %s141_s21 }
  0x28   : > { %p9514_p0 = pneg %p9868_p1 }
  0x2a   : > { %s9864_s30 = scalar_lea.hbm %s17040_s0, %s8121_s24  ;;  %s130_s24 = scalar_lea.sflag [#allocation4], %s129_s9 }
  0x2b   : > { %s9512_s28 = scalar_lea.hbm %s9864_s30, 512  ;;  %s9517_s20 = scalar_lea.hbm %s17040_s0, 3072 }
  0x2c   : > { %p9513_p11 = scmp.ne.s32.totalorder %s9864_s30, %s9512_s28  ;;  %p9518_p4 = scmp.lt.u32.totalorder %s9864_s30, %s17040_s0 }
  0x2d   : > { %p9519_p12 = scmp.lt.u32.totalorder %s9517_s20, %s9512_s28  ;;  %p9521_p9 = scmp.lt.u32.totalorder %s9512_s28, %s9864_s30 }
  0x2e   : > { %p9515_p3 = pnand %p9514_p0, %p9513_p11 }
  0x2f   : > { %p9520_p10 = por %p9519_p12, %p9518_p4 }
  0x30   : > { %p9516_p5 = pneg %p9515_p3 }
  0x31   : > { %p9522_p2 = por %p9521_p9, %p9520_p10 }
  0x33   : > { %p9523_p8 = pnand %p9522_p2, %p9516_p5 }
  0x35   : > { %9526 = shalt.err (!%p9523_p8)
}
  0x36   : > { %s9527_s9 = scalar_lea.vmem %s9872_s21, 512  ;;  %s9700_s25 = smov [#allocation3]  }
  0x37   : > { %p9528_p11 = scmp.ne.s32.totalorder %s9872_s21, %s9527_s9  ;;  %s9532_s26 = sshll.u32 %s9700_s25, 4  ;;  %s9533_s26 = int_to_ptr.vmem [resolvable:$false] %s9532_s26 }
  0x38   : > { %s9534_s22 = scalar_lea.vmem %s9533_s26, 1024  ;;  %p9535_p7 = scmp.lt.s32.totalorder %s9872_s21, %s9533_s26 }
  0x39   : > { %p9530_p3 = pnand %p9528_p11, %p9514_p0  ;;  %p9536_p4 = scmp.lt.s32.totalorder %s9534_s22, %s9527_s9 }
  0x3b   : > { %p9531_p13 = pneg %p9530_p3  ;;  %p9537_p12 = por %p9536_p4, %p9535_p7 }
  0x3d   : > { %p9538_p9 = pnand %p9537_p12, %p9531_p13 }
  0x3f   : > { %9541 = shalt.err (!%p9538_p9)
}
  0x40   : > { %9287 = dma.hbm_to_vmem [thread:$0]  (!%p9868_p1), %s9864_s30, 512, %s9872_s21, %s130_s24  }
  0x41   : > { %p167_p8 = scmp.lt.s32.totalorder %s9698_s19, 25  ;;  %s148_s28 = sand.u32 1, %s9666_s11  }
  0x42   : > { %s8122_s20 = sshll.u32 %s9690_s17, 10  ;;  %p17043_p2 = scmp.ge.s32.totalorder %s9698_s19, 1 }
  0x43   : > { %s9268_s9 = smul.u32 320, %s148_s28  ;;  %s9918_s26 = scalar_lea.hbm %s16765_s1, %s8122_s20 }
  0x44   : > { %p9911_p0 = pnand %p17043_p2, %p167_p8  ;;  %s9922_s21 = scalar_lea.sflag [#allocation7], %s148_s28 }
  0x45   : > { %s152_s22 = scalar_lea.vmem [#allocation6], %s9268_s9  ;;  %s9542_s24 = scalar_lea.hbm %s9918_s26, 5120 }
  0x46   : > { %s159_s30 = sshll.u32 %s152_s22, 4  ;;  %p9543_p7 = scmp.ne.s32.totalorder %s9918_s26, %s9542_s24  ;;  %s9920_s30 = int_to_ptr.vmem [resolvable:$true] %s159_s30 }
  0x47   : > { %p9544_p13 = pneg %p9876_p6  ;;  %s9547_s23 = scalar_lea.hbm %s16765_s1, 20480 }
  0x48   : > { %p9548_p10 = scmp.lt.u32.totalorder %s9918_s26, %s16765_s1  ;;  %p9549_p11 = scmp.lt.u32.totalorder %s9547_s23, %s9542_s24 }
  0x49   : > { %p9545_p1 = pnand %p9544_p13, %p9543_p7  ;;  %p9551_p4 = scmp.lt.u32.totalorder %s9542_s24, %s9918_s26 }
  0x4a   : > { %p9550_p3 = por %p9549_p11, %p9548_p10 }
  0x4b   : > { %p9546_p5 = pneg %p9545_p1 }
  0x4c   : > { %p9552_p12 = por %p9551_p4, %p9550_p3 }
  0x4e   : > { %p9553_p9 = pnand %p9552_p12, %p9546_p5 }
  0x50   : > { %9556 = shalt.err (!%p9553_p9)
}
  0x51   : > { %s9557_s28 = scalar_lea.vmem %s9920_s30, 5120  ;;  %s9701_s9 = smov [#allocation6]  }
  0x52   : > { %p9558_p8 = scmp.ne.s32.totalorder %s9920_s30, %s9557_s28  ;;  %s9562_s22 = sshll.u32 %s9701_s9, 4  ;;  %s9563_s22 = int_to_ptr.vmem [resolvable:$false] %s9562_s22 }
  0x53   : > { %s9564_s0 = scalar_lea.vmem %s9563_s22, 10240  ;;  %p9565_p1 = scmp.lt.s32.totalorder %s9920_s30, %s9563_s22 }
  0x54   : > { %p9560_p2 = pnand %p9558_p8, %p9544_p13  ;;  %p9566_p10 = scmp.lt.s32.totalorder %s9564_s0, %s9557_s28 }
  0x56   : > { %p9561_p7 = pneg %p9560_p2  ;;  %p9567_p11 = por %p9566_p10, %p9565_p1 }
  0x58   : > { %p9568_p3 = pnand %p9567_p11, %p9561_p7 }
  0x5a   : > { %9571 = shalt.err (!%p9568_p3)
}
  0x5b   : > { %s9702_s18 = smov 4096   ;;  %s9703_s24 = smov 1024  }
  0x5c   : > { %s9704_s20 = smov 64   ;;  %171 = sbr.rel (%p9911_p0) target bundleno = 1106 (0x452), region = 28 }
  0x5d   : > { %9290 = dma.hbm_to_vmem [thread:$0]  (!%p9876_p6), %s9918_s26, 5120, %s9920_s30, %s9922_s21, %s9702_s18, %s9703_s24, %s9704_s20  }
  0x63   : > { %s9953_s25 = sand.u32 1, %s9674_s13   ;;  %p17045_p13 = scmp.ne.s32.totalorder %s17034_s29, 0 }
  0x64   : > { %s6043_s23 = sshll.u32 %s9953_s25, 5  ;;  %s174_s28 = scalar_lea.sflag [#allocation4], %s9953_s25 }
  0x65   : > { %s177_s9 = scalar_lea.vmem [#allocation3], %s6043_s23 }
  0x66   : > { %9645 = dma.done.wait (%p17045_p13), %s174_s28, 512  }
  0x67   : > { %9647 = vsyncadd (%p17045_p13), %s174_s28, 4294966784  ;;  %s182_s27 = sand.u32 1, %s9662_s10   ;;  %p17046_p6 = scmp.ne.s32.totalorder %s17036_s6, 0 }
  0x68   : > { %s9269_s26 = smul.u32 320, %s182_s27  ;;  %s183_s5 = scalar_lea.sflag [#allocation7], %s182_s27 }
  0x6a   : > { %s9962_s30 = scalar_lea.vmem [#allocation6], %s9269_s26 }
  0x6b   : > { %9649 = dma.done.wait (%p17046_p6), %s183_s5, 5120  }
  0x6c   : > { %9651 = vsyncadd (%p17046_p6), %s183_s5, 4294962176  ;;  %s6044_s21 = sshll.u32 %s9953_s25, 6  ;;  %v285_v0 = vlaneseq  ;;  %s6053_s29 = sshll.u32 %s9682_s15, 10  ;;  %v9993_v9 = vld [vmem:[%s177_s9] sm:$0x77] }
  0x6d   : > { %17047 = vst [vmem:[#allocation15_spill] sm:$0xff] %v9993_v9  ;;  %v9995_v10 = vld [vmem:[%s177_s9 + $0x8] sm:$0x77]  ;;  %v9997_v11 = vld [vmem:[%s177_s9 + $0x10] sm:$0x77]  ;;  %v10003_v15 = vstv %s6053_s29  ;;  %s12475_s6 = scalar_lea.vmem [#allocation8], %s6044_s21 }
  0x6e   : > { %v9969_v1 = vshrl.u32 %v285_v0, 7  ;;  %17048 = vst [vmem:[#allocation16_spill] sm:$0xff] %v9995_v10  ;;  %17049 = vst [vmem:[#allocation17_spill] sm:$0xff] %v9997_v11  ;;  %v9999_v12 = vld [vmem:[%s177_s9 + $0x18] sm:$0x77]  ;;  %p7078_p0 = scmp.ne.s32.totalorder %s9682_s15, 0 }
  0x6f   : > { %17050 = vst [vmem:[#allocation18_spill] sm:$0xff] %v9999_v12  ;;  %v219_v13 = vmul.f32 5.3333335, %v9993_v9  ;;  %v220_v14 = vmul.f32 5.3333335, %v9995_v10 }
  0x70   : > { %v9973_v2 = vadd.s32 8, %v9969_v1  ;;  %v9976_v3 = vadd.s32 16, %v9969_v1  ;;  %v9979_v4 = vadd.s32 24, %v9969_v1  ;;  %v9982_v5 = vadd.s32 32, %v9969_v1 }
  0x71   : > { %v9985_v6 = vadd.s32 40, %v9969_v1  ;;  %v9988_v7 = vadd.s32 48, %v9969_v1  ;;  %v9991_v8 = vadd.s32 56, %v9969_v1  ;;  %v221_v16 = vmul.f32 5.3333335, %v9997_v11 }
  0x72   : > { %v222_v17 = vmul.f32 5.3333335, %v9999_v12  ;;  %v10008_v18 = vadd.s32 64, %v9969_v1  ;;  %v10011_v19 = vadd.s32 72, %v9969_v1  ;;  %v223_v20 = vadd.f32 8.0, %v219_v13 }
  0x73   : > { %v224_v21 = vadd.f32 8.0, %v220_v14  ;;  %v10014_v22 = vadd.s32 80, %v9969_v1  ;;  %v10017_v23 = vadd.s32 88, %v9969_v1  ;;  %v225_v24 = vadd.f32 8.0, %v221_v16 }
  0x74   : > { %v226_v25 = vadd.f32 8.0, %v222_v17  ;;  %v10020_v26 = vadd.s32 96, %v9969_v1  ;;  %v10023_v27 = vadd.s32 104, %v9969_v1  ;;  %v9270_v28 = vtrunc.f32 %v223_v20 }
  0x75   : > { %v9272_v29 = vtrunc.f32 %v224_v21  ;;  %v10026_v30 = vadd.s32 112, %v9969_v1  ;;  %v10029_v31 = vadd.s32 120, %v9969_v1  ;;  %v9274_v32 = vtrunc.f32 %v225_v24 }
  0x76   : > { %v9276_v33 = vtrunc.f32 %v226_v25  ;;  %v10032_v34 = vadd.s32 128, %v9969_v1  ;;  %v10035_v35 = vadd.s32 136, %v9969_v1  ;;  %v9271_v36 = vcvt.f32.s32 %v9270_v28 }
  0x77   : > { %v9273_v37 = vcvt.f32.s32 %v9272_v29  ;;  %v10038_v38 = vadd.s32 144, %v9969_v1  ;;  %v10041_v39 = vadd.s32 152, %v9969_v1  ;;  %v9275_v40 = vcvt.f32.s32 %v9274_v32 }
  0x78   : > { %v9277_v41 = vcvt.f32.s32 %v9276_v33  ;;  %v10044_v42 = vadd.s32 160, %v9969_v1  ;;  %v10047_v43 = vadd.s32 168, %v9969_v1  ;;  %vm231_vm0 = vcmp.gt.s32.totalorder %v9271_v36, 0 }
  0x79   : > { %vm233_vm1 = vcmp.gt.s32.totalorder %v9273_v37, 0  ;;  %v10050_v44 = vadd.s32 176, %v9969_v1  ;;  %v10053_v45 = vadd.s32 184, %v9969_v1  ;;  %v232_v46 = vsel %vm231_vm0, %v9271_v36, 0 }
  0x7a   : > { %v234_v47 = vsel %vm233_vm1, %v9273_v37, 0  ;;  %vm235_vm2 = vcmp.gt.s32.totalorder %v9275_v40, 0  ;;  %vm237_vm3 = vcmp.gt.s32.totalorder %v9277_v41, 0  ;;  %vm239_vm4 = vcmp.lt.s32.totalorder %v232_v46, 15 }
  0x7b   : > { %v236_v48 = vsel %vm235_vm2, %v9275_v40, 0  ;;  %v238_v49 = vsel %vm237_vm3, %v9277_v41, 0  ;;  %vm241_vm5 = vcmp.lt.s32.totalorder %v234_v47, 15  ;;  %v240_v50 = vsel %vm239_vm4, %v232_v46, 15 }
  0x7c   : > { %v242_v51 = vsel %vm241_vm5, %v234_v47, 15  ;;  %vm243_vm6 = vcmp.lt.s32.totalorder %v236_v48, 15  ;;  %vm245_vm7 = vcmp.lt.s32.totalorder %v238_v49, 15  ;;  %v247_v54 = vmul.u32 256, %v240_v50 }
  0x7d   : > { %v244_v52 = vsel %vm243_vm6, %v236_v48, 15  ;;  %v246_v53 = vsel %vm245_vm7, %v238_v49, 15  ;;  %v248_v55 = vmul.u32 256, %v242_v51  ;;  %v10056_v58 = vadd.s32 192, %v9969_v1 }
  0x7e   : > { %v249_v56 = vmul.u32 256, %v244_v52  ;;  %v250_v57 = vmul.u32 256, %v246_v53  ;;  %v10059_v59 = vadd.s32 200, %v9969_v1  ;;  %v10062_v62 = vadd.s32 208, %v9969_v1 }
  0x7f   : > { %v251_v60 = vmul.u32 16, %v240_v50  ;;  %v252_v61 = vmul.u32 16, %v242_v51  ;;  %v10065_v63 = vadd.s32 216, %v9969_v1  ;;  %v6049_v14 = vrot.slane %v240_v50, 10 }
  0x80   : > { %v253_v0 = vmul.u32 16, %v244_v52  ;;  %v254_v13 = vmul.u32 16, %v246_v53  ;;  %v10068_v16 = vadd.s32 224, %v9969_v1  ;;  %v6050_v21 = vrot.slane %v242_v51, 10 }
  0x81   : > { %v6045_v17 = vrot.slane %v251_v60, 9  ;;  %v6046_v20 = vrot.slane %v252_v61, 9  ;;  %v6051_v24 = vrot.slane %v244_v52, 10  ;;  %v6052_v29 = vrot.slane %v246_v53, 10 }
  0x82   : > { %v6047_v25 = vrot.slane %v253_v0, 9  ;;  %v6048_v28 = vrot.slane %v254_v13, 9  ;;  %v10071_v32 = vadd.s32 232, %v9969_v1  ;;  %v10074_v37 = vadd.s32 240, %v9969_v1 }
  0x83   : > { %v263_v33 = vadd.s32 %v6045_v17, %v247_v54  ;;  %v264_v36 = vadd.s32 %v6046_v20, %v248_v55  ;;  %v10077_v40 = vadd.s32 248, %v9969_v1  ;;  %v10080_v47 = vadd.s32 256, %v9969_v1 }
  0x84   : > { %v265_v41 = vadd.s32 %v6047_v25, %v249_v56  ;;  %v266_v46 = vadd.s32 %v6048_v28, %v250_v57  ;;  %v10083_v48 = vadd.s32 264, %v9969_v1  ;;  %v10086_v51 = vadd.s32 272, %v9969_v1 }
  0x85   : > { %v275_v49 = vadd.s32 %v6049_v14, %v263_v33  ;;  %v276_v50 = vadd.s32 %v6050_v21, %v264_v36  ;;  %v10089_v52 = vadd.s32 280, %v9969_v1  ;;  %v10092_v55 = vadd.s32 288, %v9969_v1 }
  0x86   : > { %v277_v53 = vadd.s32 %v6051_v24, %v265_v41  ;;  %v278_v54 = vadd.s32 %v6052_v29, %v266_v46  ;;  %v10095_v56 = vadd.s32 296, %v9969_v1  ;;  %v10098_v57 = vadd.s32 304, %v9969_v1 }
  0x87   : > { %v10101_v60 = vadd.s32 312, %v9969_v1  ;;  %v10104_v61 = vadd.s32 320, %v9969_v1  ;;  %v10107_v0 = vadd.s32 328, %v9969_v1  ;;  %v10110_v13 = vsub.s32 %v275_v49, %v10003_v15 }
  0x88   : > { %v10113_v14 = vsub.s32 %v276_v50, %v10003_v15  ;;  %v10116_v17 = vadd.s32 336, %v9969_v1  ;;  %v10119_v20 = vadd.s32 344, %v9969_v1  ;;  %v10122_v21 = vsub.s32 %v277_v53, %v10003_v15 }
  0x89   : > { %v10125_v24 = vsub.s32 %v278_v54, %v10003_v15  ;;  %v10128_v25 = vadd.s32 352, %v9969_v1  ;;  %v10131_v28 = vadd.s32 360, %v9969_v1  ;;  %v10134_v29 = vadd.s32 368, %v9969_v1 }
  0x8a   : > { %v10137_v33 = vadd.s32 376, %v9969_v1  ;;  %v10140_v36 = vadd.s32 384, %v9969_v1  ;;  %v10143_v41 = vadd.s32 392, %v9969_v1  ;;  %v10146_v15 = vadd.s32 400, %v9969_v1 }
  0x8b   : > { %v10149_v46 = vadd.s32 408, %v9969_v1  ;;  %v10152_v49 = vadd.s32 416, %v9969_v1  ;;  %v10155_v50 = vadd.s32 424, %v9969_v1  ;;  %v10158_v53 = vadd.s32 432, %v9969_v1 }
  0x8c   : > { %17051 = vst [vmem:[#allocation19_spill] sm:$0xff] %v10137_v33  ;;  %17052 = vst [vmem:[#allocation20_spill] sm:$0xff] %v10140_v36  ;;  %v10161_v54 = vadd.s32 440, %v9969_v1  ;;  %v10164_v12 = vadd.s32 448, %v9969_v1  ;;  %v10167_v11 = vadd.s32 456, %v9969_v1  ;;  %v10170_v10 = vadd.s32 464, %v9969_v1 }
  0x8d   : > { %17053 = vst [vmem:[#allocation21_spill] sm:$0xff] %v10143_v41  ;;  %17054 = vst [vmem:[#allocation22_spill] sm:$0xff] %v10146_v15  ;;  %v10173_v9 = vadd.s32 472, %v9969_v1 }
  0x8e   : > { %17055 = vst [vmem:[#allocation23_spill] sm:$0xff] %v10149_v46  ;;  %17056 = vst [vmem:[#allocation24_spill] sm:$0xff] %v10152_v49 }
  0x8f   : > { %17057 = vst [vmem:[#allocation25_spill] sm:$0xff] %v10155_v50  ;;  %17058 = vst [vmem:[#allocation26_spill] sm:$0xff] %v10158_v53  ;;  %v10176_v50 = vadd.s32 480, %v9969_v1  ;;  %v10179_v53 = vadd.s32 488, %v9969_v1 }
  0x90   : > { %17059 = vst [vmem:[#allocation27_spill] sm:$0xff] %v10161_v54  ;;  %17060 = vst [vmem:[#allocation28_spill] sm:$0xff] %v10164_v12  ;;  %v10182_v54 = vadd.s32 496, %v9969_v1  ;;  %v10185_v12 = vadd.s32 504, %v9969_v1 }
  0x91   : > { %17061 = vst [vmem:[#allocation29_spill] sm:$0xff] %v10167_v11  ;;  %17062 = vst [vmem:[#allocation30_spill] sm:$0xff] %v10170_v10  ;;  %v10188_v11 = vadd.s32 512, %v9969_v1  ;;  %v10191_v10 = vadd.s32 520, %v9969_v1 }
  0x92   : > { %17063 = vst [vmem:[#allocation31_spill] sm:$0xff] %v10173_v9  ;;  %17064 = vst [vmem:[#allocation32_spill] sm:$0xff] %v10176_v50  ;;  %v10194_v9 = vadd.s32 528, %v9969_v1  ;;  %v10197_v50 = vadd.s32 536, %v9969_v1 }
  0x93   : > { %17065 = vst [vmem:[#allocation33_spill] sm:$0xff] %v10179_v53  ;;  %17066 = vst [vmem:[#allocation34_spill] sm:$0xff] %v10182_v54  ;;  %v10200_v53 = vadd.s32 544, %v9969_v1  ;;  %v10203_v54 = vadd.s32 552, %v9969_v1 }
  0x94   : > { %17067 = vst [vmem:[#allocation35_spill] sm:$0xff] %v10185_v12  ;;  %17068 = vst [vmem:[#allocation36_spill] sm:$0xff] %v10188_v11  ;;  %v10206_v12 = vadd.s32 560, %v9969_v1  ;;  %v10209_v11 = vadd.s32 568, %v9969_v1 }
  0x95   : > { %17069 = vst [vmem:[#allocation37_spill] sm:$0xff] %v10191_v10  ;;  %17070 = vst [vmem:[#allocation38_spill] sm:$0xff] %v10194_v9  ;;  %v10212_v10 = vadd.s32 576, %v9969_v1  ;;  %v10215_v9 = vadd.s32 584, %v9969_v1 }
  0x96   : > { %17071 = vst [vmem:[#allocation39_spill] sm:$0xff] %v10197_v50  ;;  %17072 = vst [vmem:[#allocation40_spill] sm:$0xff] %v10200_v53  ;;  %v10218_v50 = vadd.s32 592, %v9969_v1  ;;  %v10221_v53 = vadd.s32 600, %v9969_v1 }
  0x97   : > { %17073 = vst [vmem:[#allocation41_spill] sm:$0xff] %v10203_v54  ;;  %17074 = vst [vmem:[#allocation42_spill] sm:$0xff] %v10206_v12  ;;  %v10224_v54 = vadd.s32 608, %v9969_v1  ;;  %v10227_v12 = vadd.s32 616, %v9969_v1 }
  0x98   : > { %17075 = vst [vmem:[#allocation43_spill] sm:$0xff] %v10209_v11  ;;  %17076 = vst [vmem:[#allocation44_spill] sm:$0xff] %v10212_v10  ;;  %v10230_v11 = vadd.s32 624, %v9969_v1  ;;  %v10233_v10 = vadd.s32 632, %v9969_v1 }
  0x99   : > { %17077 = vst [vmem:[#allocation45_spill] sm:$0xff] %v10215_v9  ;;  %17078 = vst [vmem:[#allocation46_spill] sm:$0xff] %v10218_v50  ;;  %v10236_v9 = vadd.s32 640, %v9969_v1  ;;  %v10239_v50 = vadd.s32 648, %v9969_v1 }
  0x9a   : > { %17079 = vst [vmem:[#allocation47_spill] sm:$0xff] %v10221_v53  ;;  %17080 = vst [vmem:[#allocation48_spill] sm:$0xff] %v10224_v54  ;;  %v10242_v53 = vadd.s32 656, %v9969_v1  ;;  %v10245_v54 = vadd.s32 664, %v9969_v1 }
  0x9b   : > { %17081 = vst [vmem:[#allocation49_spill] sm:$0xff] %v10227_v12  ;;  %17082 = vst [vmem:[#allocation50_spill] sm:$0xff] %v10230_v11  ;;  %v10248_v12 = vadd.s32 672, %v9969_v1  ;;  %v10251_v11 = vadd.s32 680, %v9969_v1 }
  0x9c   : > { %17083 = vst [vmem:[#allocation51_spill] sm:$0xff] %v10233_v10  ;;  %17084 = vst [vmem:[#allocation52_spill] sm:$0xff] %v10236_v9  ;;  %v10254_v10 = vadd.s32 688, %v9969_v1  ;;  %v10257_v9 = vadd.s32 696, %v9969_v1 }
  0x9d   : > { %17085 = vst [vmem:[#allocation53_spill] sm:$0xff] %v10239_v50  ;;  %17086 = vst [vmem:[#allocation54_spill] sm:$0xff] %v10242_v53  ;;  %v10260_v50 = vadd.s32 704, %v9969_v1  ;;  %v10263_v53 = vadd.s32 712, %v9969_v1 }
  0x9e   : > { %17087 = vst [vmem:[#allocation55_spill] sm:$0xff] %v10245_v54  ;;  %17088 = vst [vmem:[#allocation56_spill] sm:$0xff] %v10248_v12  ;;  %v10266_v54 = vadd.s32 720, %v9969_v1  ;;  %v10269_v12 = vadd.s32 728, %v9969_v1 }
  0x9f   : > { %17089 = vst [vmem:[#allocation57_spill] sm:$0xff] %v10251_v11  ;;  %17090 = vst [vmem:[#allocation58_spill] sm:$0xff] %v10254_v10  ;;  %v10272_v11 = vadd.s32 736, %v9969_v1  ;;  %v10275_v10 = vadd.s32 744, %v9969_v1 }
  0xa0   : > { %17091 = vst [vmem:[#allocation59_spill] sm:$0xff] %v10257_v9  ;;  %17092 = vst [vmem:[#allocation60_spill] sm:$0xff] %v10260_v50  ;;  %v10278_v9 = vadd.s32 752, %v9969_v1  ;;  %v10281_v50 = vadd.s32 760, %v9969_v1 }
  0xa1   : > { %17093 = vst [vmem:[#allocation61_spill] sm:$0xff] %v10263_v53  ;;  %17094 = vst [vmem:[#allocation62_spill] sm:$0xff] %v10266_v54  ;;  %v10284_v53 = vadd.s32 768, %v9969_v1  ;;  %v10287_v54 = vadd.s32 776, %v9969_v1 }
  0xa2   : > { %17095 = vst [vmem:[#allocation63_spill] sm:$0xff] %v10269_v12  ;;  %17096 = vst [vmem:[#allocation64_spill] sm:$0xff] %v10272_v11  ;;  %v10290_v12 = vadd.s32 784, %v9969_v1  ;;  %v10293_v11 = vadd.s32 792, %v9969_v1 }
  0xa3   : > { %17097 = vst [vmem:[#allocation65_spill] sm:$0xff] %v10275_v10  ;;  %17098 = vst [vmem:[#allocation66_spill] sm:$0xff] %v10278_v9  ;;  %v10296_v10 = vadd.s32 800, %v9969_v1  ;;  %v10299_v9 = vadd.s32 808, %v9969_v1 }
  0xa4   : > { %17099 = vst [vmem:[#allocation67_spill] sm:$0xff] %v10281_v50  ;;  %17100 = vst [vmem:[#allocation68_spill] sm:$0xff] %v10284_v53  ;;  %v10302_v50 = vadd.s32 816, %v9969_v1  ;;  %v10305_v53 = vadd.s32 824, %v9969_v1 }
  0xa5   : > { %17101 = vst [vmem:[#allocation69_spill] sm:$0xff] %v10287_v54  ;;  %17102 = vst [vmem:[#allocation70_spill] sm:$0xff] %v10290_v12  ;;  %v10308_v54 = vadd.s32 832, %v9969_v1  ;;  %v10311_v12 = vadd.s32 840, %v9969_v1 }
  0xa6   : > { %17103 = vst [vmem:[#allocation71_spill] sm:$0xff] %v10293_v11  ;;  %17104 = vst [vmem:[#allocation72_spill] sm:$0xff] %v10296_v10  ;;  %v10314_v11 = vadd.s32 848, %v9969_v1  ;;  %v10317_v10 = vadd.s32 856, %v9969_v1 }
  0xa7   : > { %17105 = vst [vmem:[#allocation73_spill] sm:$0xff] %v10299_v9  ;;  %17106 = vst [vmem:[#allocation74_spill] sm:$0xff] %v10302_v50  ;;  %v10320_v9 = vadd.s32 864, %v9969_v1  ;;  %v10323_v50 = vadd.s32 872, %v9969_v1 }
  0xa8   : > { %17107 = vst [vmem:[#allocation75_spill] sm:$0xff] %v10305_v53  ;;  %17108 = vst [vmem:[#allocation76_spill] sm:$0xff] %v10308_v54  ;;  %v10326_v53 = vadd.s32 880, %v9969_v1  ;;  %v10329_v54 = vadd.s32 888, %v9969_v1 }
  0xa9   : > { %17109 = vst [vmem:[#allocation77_spill] sm:$0xff] %v10311_v12  ;;  %17110 = vst [vmem:[#allocation78_spill] sm:$0xff] %v10314_v11  ;;  %v10332_v12 = vadd.s32 896, %v9969_v1  ;;  %v10335_v11 = vadd.s32 904, %v9969_v1 }
  0xaa   : > { %17111 = vst [vmem:[#allocation79_spill] sm:$0xff] %v10317_v10  ;;  %17112 = vst [vmem:[#allocation80_spill] sm:$0xff] %v10320_v9  ;;  %v10338_v10 = vadd.s32 912, %v9969_v1  ;;  %v10341_v9 = vadd.s32 920, %v9969_v1 }
  0xab   : > { %17113 = vst [vmem:[#allocation81_spill] sm:$0xff] %v10323_v50  ;;  %17114 = vst [vmem:[#allocation82_spill] sm:$0xff] %v10326_v53  ;;  %v10344_v50 = vadd.s32 928, %v9969_v1  ;;  %v10347_v53 = vadd.s32 936, %v9969_v1 }
  0xac   : > { %17115 = vst [vmem:[#allocation83_spill] sm:$0xff] %v10329_v54  ;;  %17116 = vst [vmem:[#allocation84_spill] sm:$0xff] %v10332_v12  ;;  %v10350_v54 = vadd.s32 944, %v9969_v1  ;;  %v10353_v12 = vadd.s32 952, %v9969_v1 }
  0xad   : > { %17117 = vst [vmem:[#allocation85_spill] sm:$0xff] %v10335_v11  ;;  %17118 = vst [vmem:[#allocation86_spill] sm:$0xff] %v10338_v10  ;;  %v10356_v11 = vadd.s32 960, %v9969_v1  ;;  %v10359_v10 = vadd.s32 968, %v9969_v1 }
  0xae   : > { %17119 = vst [vmem:[#allocation87_spill] sm:$0xff] %v10341_v9  ;;  %17120 = vst [vmem:[#allocation88_spill] sm:$0xff] %v10344_v50  ;;  %v10362_v9 = vadd.s32 976, %v9969_v1  ;;  %v10365_v50 = vadd.s32 984, %v9969_v1 }
  0xaf   : > { %17121 = vst [vmem:[#allocation89_spill] sm:$0xff] %v10347_v53  ;;  %17122 = vst [vmem:[#allocation90_spill] sm:$0xff] %v10350_v54  ;;  %v10368_v53 = vsub.s32 0, %v9969_v1  ;;  %v10371_v54 = vsub.s32 4, %v9969_v1 }
  0xb0   : > { %17123 = vst [vmem:[#allocation91_spill] sm:$0xff] %v10353_v12  ;;  %17124 = vst [vmem:[#allocation92_spill] sm:$0xff] %v10356_v11  ;;  %v10374_v12 = vadd.s32 992, %v9969_v1  ;;  %v10377_v11 = vadd.s32 1000, %v9969_v1 }
  0xb1   : > { %17125 = vst [vmem:[#allocation93_spill] sm:$0xff] %v10359_v10  ;;  %17126 = vst [vmem:[#allocation94_spill] sm:$0xff] %v10362_v9  ;;  %v10380_v10 = vadd.s32 1008, %v9969_v1  ;;  %v10383_v9 = vadd.s32 1016, %v9969_v1  ;;  %v421_v49 = vrot.slane %v10110_v13, %v10371_v54  ;;  %v425_v46 = vrot.slane %v10113_v14, %v10368_v53 }
  0xb2   : > { %17127 = vst [vmem:[#allocation95_spill] sm:$0xff] %v10365_v50  ;;  %17128 = vst [vmem:[#allocation96_spill] sm:$0xff] %v10368_v53  ;;  %v417_v50 = vrot.slane %v10110_v13, %v10368_v53  ;;  %v445_v15 = vrot.slane %v10125_v24, %v10371_v54 }
  0xb3   : > { %17129 = vst [vmem:[#allocation97_spill] sm:$0xff] %v10371_v54  ;;  %17130 = vst [vmem:[#allocation98_spill] sm:$0xff] %v10374_v12  ;;  %v429_v12 = vrot.slane %v10113_v14, %v10371_v54  ;;  %v10405_v41 = vrot.slane %v421_v49, %v10368_v53  ;;  %v10408_v14 = vrot.slane %v425_v46, %v10368_v53 }
  0xb4   : > { %17131 = vst [vmem:[#allocation99_spill] sm:$0xff] %v10377_v11  ;;  %17132 = vst [vmem:[#allocation100_spill] sm:$0xff] %v10380_v10  ;;  %v433_v11 = vrot.slane %v10122_v21, %v10368_v53  ;;  %v437_v10 = vrot.slane %v10122_v21, %v10371_v54  ;;  %v10402_v13 = vrot.slane %v417_v50, %v10368_v53 }
  0xb5   : > { %17133 = vst [vmem:[#allocation101_spill] sm:$0xff] %v10383_v9  ;;  %v441_v9 = vrot.slane %v10125_v24, %v10368_v53  ;;  %v10411_v36 = vrot.slane %v429_v12, %v10368_v53  ;;  %v10423_v50 = vrot.slane %v445_v15, %v10368_v53  ;;  %vm479_vm9 = vcmp.eq.s32.totalorder %v9969_v1, %v10405_v41 }
  0xb6   : > { %v10414_v21 = vrot.slane %v433_v11, %v10368_v53  ;;  %v10417_v33 = vrot.slane %v437_v10, %v10368_v53  ;;  %vm478_vm8 = vcmp.eq.s32.totalorder %v9969_v1, %v10402_v13  ;;  %vm480_vm10 = vcmp.eq.s32.totalorder %v9969_v1, %v10408_v14 }
  0xb7   : > { %v10420_v24 = vrot.slane %v441_v9, %v10368_v53  ;;  %vm481_vm11 = vcmp.eq.s32.totalorder %v9969_v1, %v10411_v36  ;;  %vm486_vm0 = vcmp.eq.s32.totalorder %v9973_v2, %v10402_v13  ;;  %vm487_vm1 = vcmp.eq.s32.totalorder %v9973_v2, %v10405_v41 }
  0xb8   : > { %vm488_vm2 = vcmp.eq.s32.totalorder %v9973_v2, %v10408_v14  ;;  %vm489_vm3 = vcmp.eq.s32.totalorder %v9973_v2, %v10411_v36  ;;  %vm495_vm12 = vcmp.eq.s32.totalorder %v9976_v3, %v10405_v41  ;;  %3553 = sbr.rel (%p7078_p0) target bundleno = 206 (0xce), region = 40  ;;  %v9705_v15 = vmov (!%p7078_p0), 0.0  }
  0xb9   : > { %3554 = vst [vmem:[#allocation2] sm:$0xff] (!%p7078_p0), %v9705_v15  ;;  %3555 = vst [vmem:[#allocation2 + $0x8] sm:$0xff] (!%p7078_p0), %v9705_v15 }
  0xba   : > { %3556 = vst [vmem:[#allocation2 + $0x10] sm:$0xff] (!%p7078_p0), %v9705_v15  ;;  %3557 = vst [vmem:[#allocation2 + $0x18] sm:$0xff] (!%p7078_p0), %v9705_v15 }
  0xbb   : > { %3558 = vst [vmem:[#allocation2 + $0x20] sm:$0xff] (!%p7078_p0), %v9705_v15  ;;  %3559 = vst [vmem:[#allocation2 + $0x28] sm:$0xff] (!%p7078_p0), %v9705_v15 }
  0xbc   : > { %v17214_v12 = vld [vmem:[#allocation101_spill] sm:$0xff]  ;;  %3560 = vst [vmem:[#allocation2 + $0x30] sm:$0xff] (!%p7078_p0), %v9705_v15  ;;  %3561 = vst [vmem:[#allocation2 + $0x38] sm:$0xff] (!%p7078_p0), %v9705_v15 }
  0xbd   : > { %vm1495_vm13 = vcmp.eq.s32.totalorder %v17214_v12, %v10405_v41  ;;  %vm1496_vm14 = vcmp.eq.s32.totalorder %v17214_v12, %v10408_v14  ;;  %vm1497_vm15 = vcmp.eq.s32.totalorder %v17214_v12, %v10411_v36  ;;  %vm1499_vm5 = vcmp.eq.s32.totalorder %v17214_v12, %v10417_v33  ;;  %3562 = vst [vmem:[#allocation2 + $0x40] sm:$0xff] (!%p7078_p0), %v9705_v15 }
  0xbe   : > { %vm1501_vm7 = vcmp.eq.s32.totalorder %v17214_v12, %v10423_v50  ;;  %3563 = vst [vmem:[#allocation2 + $0x48] sm:$0xff] (!%p7078_p0), %v9705_v15  ;;  %3564 = vst [vmem:[#allocation2 + $0x50] sm:$0xff] (!%p7078_p0), %v9705_v15 }
  0xbf   : > { %3565 = vst [vmem:[#allocation2 + $0x58] sm:$0xff] %v9705_v15  ;;  %3566 = vst [vmem:[#allocation2 + $0x60] sm:$0xff] %v9705_v15 }
  0xc0   : > { %3567 = vst [vmem:[#allocation2 + $0x68] sm:$0xff] %v9705_v15  ;;  %3568 = vst [vmem:[#allocation2 + $0x70] sm:$0xff] %v9705_v15 }
  0xc1   : > { %3569 = vst [vmem:[#allocation2 + $0x78] sm:$0xff] %v9705_v15  ;;  %3570 = vst [vmem:[#allocation2 + $0x80] sm:$0xff] %v9705_v15 }
  0xc2   : > { %3571 = vst [vmem:[#allocation2 + $0x88] sm:$0xff] %v9705_v15  ;;  %3572 = vst [vmem:[#allocation2 + $0x90] sm:$0xff] %v9705_v15 }
  0xc3   : > { %3573 = vst [vmem:[#allocation2 + $0x98] sm:$0xff] %v9705_v15  ;;  %3574 = vst [vmem:[#allocation2 + $0xa0] sm:$0xff] %v9705_v15 }
  0xc4   : > { %3575 = vst [vmem:[#allocation2 + $0xa8] sm:$0xff] %v9705_v15  ;;  %3576 = vst [vmem:[#allocation2 + $0xb0] sm:$0xff] %v9705_v15 }
  0xc5   : > { %3577 = vst [vmem:[#allocation2 + $0xb8] sm:$0xff] %v9705_v15  ;;  %3578 = vst [vmem:[#allocation2 + $0xc0] sm:$0xff] %v9705_v15 }
  0xc6   : > { %3579 = vst [vmem:[#allocation2 + $0xc8] sm:$0xff] %v9705_v15  ;;  %3580 = vst [vmem:[#allocation2 + $0xd0] sm:$0xff] %v9705_v15 }
  0xc7   : > { %3581 = vst [vmem:[#allocation2 + $0xd8] sm:$0xff] %v9705_v15  ;;  %3582 = vst [vmem:[#allocation2 + $0xe0] sm:$0xff] %v9705_v15 }
  0xc8   : > { %3583 = vst [vmem:[#allocation2 + $0xe8] sm:$0xff] %v9705_v15  ;;  %3584 = vst [vmem:[#allocation2 + $0xf0] sm:$0xff] %v9705_v15 }
  0xc9   : > { %3585 = vst [vmem:[#allocation2 + $0xf8] sm:$0xff] %v9705_v15  ;;  %3586 = vst [vmem:[#allocation2 + $0x100] sm:$0xff] %v9705_v15 }
  0xca   : > { %3587 = vst [vmem:[#allocation2 + $0x108] sm:$0xff] %v9705_v15  ;;  %3588 = vst [vmem:[#allocation2 + $0x110] sm:$0xff] %v9705_v15 }
  0xcb   : > { %3589 = vst [vmem:[#allocation2 + $0x118] sm:$0xff] %v9705_v15  ;;  %3590 = vst [vmem:[#allocation2 + $0x120] sm:$0xff] %v9705_v15 }
  0xcc   : > { %3591 = vst [vmem:[#allocation2 + $0x128] sm:$0xff] %v9705_v15  ;;  %3592 = vst [vmem:[#allocation2 + $0x130] sm:$0xff] %v9705_v15 }
  0xcd   : > { %3593 = vst [vmem:[#allocation2 + $0x138] sm:$0xff] %v9705_v15 }
  0xce PF: > { %vm8124_vm6 = vmpackc.low %vm487_vm1, %vm479_vm9  ;;  %v3635_v46 = vld [vmem:[%s9962_s30 + $0x8] sm:$0xff]  ;;  %v9706_v49 = vmov 1.0|1.0   ;;  %vm17215_vm1 = vcmp.eq.s32.totalorder %v9979_v4, %v10405_v41  ;;  %v3634_v9 = vld [vmem:[%s9962_s30] sm:$0xff]  ;;  %p8103_p5 = scmp.ne.s32.totalorder %s9682_s15, 3 }
  0xcf   : > { %8125 = vmatprep.subr.msk.bf16.mxu0 %vm8124_vm6, %v9706_v49  ;;  %vm8380_vm4 = vmpackc.low %vm489_vm3, %vm481_vm11  ;;  %3738 = vmatprep.mubr.f32.mxu0 %v3635_v46  ;;  %v3643_v10 = vld [vmem:[%s9962_s30 + $0x48] sm:$0xff]  ;;  %v3642_v11 = vld [vmem:[%s9962_s30 + $0x40] sm:$0xff] }
  0xd0   : > { %8381 = vmatprep.subr.msk.bf16.mxu1 %vm8380_vm4, %v9706_v49  ;;  %vm8126_vm9 = vmpackc.low %vm486_vm0, %vm478_vm8  ;;  %4118 = vmatprep.mubr.f32.mxu1 %v3635_v46  ;;  %vm17216_vm8 = vcmp.eq.s32.totalorder %v9976_v3, %v10411_v36  ;;  %vm17217_vm0 = vcmp.eq.s32.totalorder %v9979_v4, %v10411_v36  ;;  %v3651_v12 = vld [vmem:[%s9962_s30 + $0x88] sm:$0xff]  ;;  %v3650_v15 = vld [vmem:[%s9962_s30 + $0x80] sm:$0xff] }
  0xd1   : > { %8127 = vmatpush1.bf16.msk.msra.mxu0 %vm8126_vm9, %v9706_v49  ;;  %vm8382_vm11 = vmpackc.low %vm488_vm2, %vm480_vm10  ;;  %vm17218_vm10 = vcmp.eq.s32.totalorder %v9976_v3, %v10402_v13  ;;  %vm17219_vm2 = vcmp.eq.s32.totalorder %v9979_v4, %v10402_v13  ;;  %vm17221_vm9 = vcmp.eq.s32.totalorder %v9979_v4, %v10408_v14  ;;  %v3659_v46 = vld [vmem:[%s9962_s30 + $0xc8] sm:$0xff]  ;;  %v17421_v54 = vld [vmem:[#allocation25_spill] sm:$0xff] }
  0xd2   : > { %8383 = vmatpush1.bf16.msk.msra.mxu1 %vm8382_vm11, %v9706_v49  ;;  %vm8128_vm3 = vmpackc.low %vm17215_vm1, %vm495_vm12  ;;  %vm17220_vm12 = vcmp.eq.s32.totalorder %v9976_v3, %v10408_v14  ;;  %vm17222_vm1 = vcmp.eq.s32.totalorder %v9982_v5, %v10405_v41  ;;  %v17429_v53 = vld [vmem:[#allocation26_spill] sm:$0xff] }
  0xd3   : > { %8129 = vmatprep.subr.msk.bf16.mxu0 %vm8128_vm3, %v9706_v49  ;;  %vm8384_vm4 = vmpackc.low %vm17217_vm0, %vm17216_vm8  ;;  %vm17223_vm3 = vcmp.eq.s32.totalorder %v9985_v6, %v10405_v41  ;;  %vm17224_vm0 = vcmp.eq.s32.totalorder %v9982_v5, %v10411_v36 }
  0xd4   : > { %8385 = vmatprep.subr.msk.bf16.mxu1 %vm8384_vm4, %v9706_v49  ;;  %vm8130_vm6 = vmpackc.low %vm17219_vm2, %vm17218_vm10  ;;  %vm17225_vm4 = vcmp.eq.s32.totalorder %v9985_v6, %v10411_v36  ;;  %vm17226_vm2 = vcmp.eq.s32.totalorder %v9982_v5, %v10402_v13 }
  0xd5   : > { %8131 = vmatpush1.bf16.msk.msra.mxu0 %vm8130_vm6, %v9706_v49  ;;  %vm8386_vm11 = vmpackc.low %vm17221_vm9, %vm17220_vm12  ;;  %vm17227_vm6 = vcmp.eq.s32.totalorder %v9985_v6, %v10402_v13  ;;  %vm17228_vm9 = vcmp.eq.s32.totalorder %v9982_v5, %v10408_v14 }
  0xd6   : > { %8387 = vmatpush1.bf16.msk.msra.mxu1 %vm8386_vm11, %v9706_v49  ;;  %vm8132_vm8 = vmpackc.low %vm17223_vm3, %vm17222_vm1  ;;  %vm17229_vm11 = vcmp.eq.s32.totalorder %v9985_v6, %v10408_v14  ;;  %vm17230_vm3 = vcmp.eq.s32.totalorder %v9988_v7, %v10405_v41 }
  0xd7   : > { %8133 = vmatprep.subr.msk.bf16.mxu0 %vm8132_vm8, %v9706_v49  ;;  %vm8388_vm10 = vmpackc.low %vm17225_vm4, %vm17224_vm0  ;;  %vm17231_vm8 = vcmp.eq.s32.totalorder %v9991_v8, %v10405_v41  ;;  %vm17232_vm4 = vcmp.eq.s32.totalorder %v9988_v7, %v10411_v36 }
  0xd8   : > { %8389 = vmatprep.subr.msk.bf16.mxu1 %vm8388_vm10, %v9706_v49  ;;  %vm8134_vm12 = vmpackc.low %vm17227_vm6, %vm17226_vm2  ;;  %vm17233_vm10 = vcmp.eq.s32.totalorder %v9991_v8, %v10411_v36  ;;  %vm17234_vm6 = vcmp.eq.s32.totalorder %v9988_v7, %v10402_v13 }
  0xd9   : > { %8135 = vmatpush1.bf16.msk.msra.mxu0 %vm8134_vm12, %v9706_v49  ;;  %vm8390_vm1 = vmpackc.low %vm17229_vm11, %vm17228_vm9  ;;  %vm17235_vm12 = vcmp.eq.s32.totalorder %v9991_v8, %v10402_v13  ;;  %vm17236_vm11 = vcmp.eq.s32.totalorder %v9988_v7, %v10408_v14 }
  0xda   : > { %8391 = vmatpush1.bf16.msk.msra.mxu1 %vm8390_vm1, %v9706_v49  ;;  %vm8136_vm0 = vmpackc.low %vm17231_vm8, %vm17230_vm3  ;;  %vm17237_vm1 = vcmp.eq.s32.totalorder %v9991_v8, %v10408_v14  ;;  %vm17238_vm8 = vcmp.eq.s32.totalorder %v10008_v18, %v10405_v41 }
  0xdb   : > { %8137 = vmatprep.subr.msk.bf16.mxu0 %vm8136_vm0, %v9706_v49  ;;  %vm8392_vm2 = vmpackc.low %vm17233_vm10, %vm17232_vm4  ;;  %vm17239_vm0 = vcmp.eq.s32.totalorder %v10011_v19, %v10405_v41  ;;  %vm17240_vm10 = vcmp.eq.s32.totalorder %v10008_v18, %v10411_v36 }
  0xdc   : > { %8393 = vmatprep.subr.msk.bf16.mxu1 %vm8392_vm2, %v9706_v49  ;;  %vm8138_vm9 = vmpackc.low %vm17235_vm12, %vm17234_vm6  ;;  %vm17241_vm2 = vcmp.eq.s32.totalorder %v10011_v19, %v10411_v36  ;;  %vm17242_vm12 = vcmp.eq.s32.totalorder %v10008_v18, %v10402_v13 }
  0xdd   : > { %8139 = vmatpush1.bf16.msk.msra.mxu0 %vm8138_vm9, %v9706_v49  ;;  %vm8394_vm3 = vmpackc.low %vm17237_vm1, %vm17236_vm11  ;;  %vm17243_vm9 = vcmp.eq.s32.totalorder %v10011_v19, %v10402_v13  ;;  %vm17244_vm1 = vcmp.eq.s32.totalorder %v10008_v18, %v10408_v14 }
  0xde   : > { %8395 = vmatpush1.bf16.msk.msra.mxu1 %vm8394_vm3, %v9706_v49  ;;  %vm8140_vm4 = vmpackc.low %vm17239_vm0, %vm17238_vm8  ;;  %vm17245_vm3 = vcmp.eq.s32.totalorder %v10011_v19, %v10408_v14  ;;  %vm17246_vm0 = vcmp.eq.s32.totalorder %v10014_v22, %v10405_v41 }
  0xdf   : > { %8141 = vmatprep.subr.msk.bf16.mxu0 %vm8140_vm4, %v9706_v49  ;;  %vm8396_vm6 = vmpackc.low %vm17241_vm2, %vm17240_vm10  ;;  %vm17247_vm4 = vcmp.eq.s32.totalorder %v10017_v23, %v10405_v41  ;;  %vm17248_vm2 = vcmp.eq.s32.totalorder %v10014_v22, %v10411_v36 }
  0xe0   : > { %8397 = vmatprep.subr.msk.bf16.mxu1 %vm8396_vm6, %v9706_v49  ;;  %vm8142_vm11 = vmpackc.low %vm17243_vm9, %vm17242_vm12  ;;  %vm17249_vm6 = vcmp.eq.s32.totalorder %v10017_v23, %v10411_v36  ;;  %vm17250_vm9 = vcmp.eq.s32.totalorder %v10014_v22, %v10402_v13 }
  0xe1   : > { %8143 = vmatpush1.bf16.msk.msra.mxu0 %vm8142_vm11, %v9706_v49  ;;  %vm8398_vm8 = vmpackc.low %vm17245_vm3, %vm17244_vm1  ;;  %vm17251_vm11 = vcmp.eq.s32.totalorder %v10017_v23, %v10402_v13  ;;  %vm17252_vm3 = vcmp.eq.s32.totalorder %v10014_v22, %v10408_v14 }
  0xe2   : > { %8399 = vmatpush1.bf16.msk.msra.mxu1 %vm8398_vm8, %v9706_v49  ;;  %vm8144_vm10 = vmpackc.low %vm17247_vm4, %vm17246_vm0  ;;  %vm17253_vm8 = vcmp.eq.s32.totalorder %v10017_v23, %v10408_v14  ;;  %vm17254_vm4 = vcmp.eq.s32.totalorder %v10020_v26, %v10405_v41 }
  0xe3   : > { %8145 = vmatprep.subr.msk.bf16.mxu0 %vm8144_vm10, %v9706_v49  ;;  %vm8400_vm12 = vmpackc.low %vm17249_vm6, %vm17248_vm2  ;;  %vm17255_vm10 = vcmp.eq.s32.totalorder %v10023_v27, %v10405_v41  ;;  %vm17256_vm6 = vcmp.eq.s32.totalorder %v10020_v26, %v10411_v36 }
  0xe4   : > { %8401 = vmatprep.subr.msk.bf16.mxu1 %vm8400_vm12, %v9706_v49  ;;  %vm8146_vm1 = vmpackc.low %vm17251_vm11, %vm17250_vm9  ;;  %vm17257_vm12 = vcmp.eq.s32.totalorder %v10023_v27, %v10411_v36  ;;  %vm17258_vm11 = vcmp.eq.s32.totalorder %v10020_v26, %v10402_v13 }
  0xe5   : > { %8147 = vmatpush1.bf16.msk.msra.mxu0 %vm8146_vm1, %v9706_v49  ;;  %vm8402_vm0 = vmpackc.low %vm17253_vm8, %vm17252_vm3  ;;  %vm17259_vm1 = vcmp.eq.s32.totalorder %v10023_v27, %v10402_v13  ;;  %vm17260_vm8 = vcmp.eq.s32.totalorder %v10020_v26, %v10408_v14 }
  0xe6   : > { %8403 = vmatpush1.bf16.msk.msra.mxu1 %vm8402_vm0, %v9706_v49  ;;  %vm8148_vm2 = vmpackc.low %vm17255_vm10, %vm17254_vm4  ;;  %vm17261_vm0 = vcmp.eq.s32.totalorder %v10023_v27, %v10408_v14  ;;  %vm17262_vm10 = vcmp.eq.s32.totalorder %v10026_v30, %v10405_v41 }
  0xe7   : > { %8149 = vmatprep.subr.msk.bf16.mxu0 %vm8148_vm2, %v9706_v49  ;;  %vm8404_vm9 = vmpackc.low %vm17257_vm12, %vm17256_vm6  ;;  %vm17263_vm2 = vcmp.eq.s32.totalorder %v10029_v31, %v10405_v41  ;;  %vm17264_vm12 = vcmp.eq.s32.totalorder %v10026_v30, %v10411_v36 }
  0xe8   : > { %8405 = vmatprep.subr.msk.bf16.mxu1 %vm8404_vm9, %v9706_v49  ;;  %vm8150_vm3 = vmpackc.low %vm17259_vm1, %vm17258_vm11  ;;  %vm17265_vm9 = vcmp.eq.s32.totalorder %v10029_v31, %v10411_v36  ;;  %vm17266_vm1 = vcmp.eq.s32.totalorder %v10026_v30, %v10402_v13 }
  0xe9   : > { %8151 = vmatpush1.bf16.msk.msra.mxu0 %vm8150_vm3, %v9706_v49  ;;  %vm8406_vm4 = vmpackc.low %vm17261_vm0, %vm17260_vm8  ;;  %vm17267_vm3 = vcmp.eq.s32.totalorder %v10029_v31, %v10402_v13  ;;  %vm17268_vm0 = vcmp.eq.s32.totalorder %v10026_v30, %v10408_v14 }
  0xea   : > { %8407 = vmatpush1.bf16.msk.msra.mxu1 %vm8406_vm4, %v9706_v49  ;;  %vm8152_vm6 = vmpackc.low %vm17263_vm2, %vm17262_vm10  ;;  %vm17269_vm4 = vcmp.eq.s32.totalorder %v10029_v31, %v10408_v14  ;;  %vm17270_vm2 = vcmp.eq.s32.totalorder %v10032_v34, %v10405_v41 }
  0xeb   : > { %8153 = vmatprep.subr.msk.bf16.mxu0 %vm8152_vm6, %v9706_v49  ;;  %vm8408_vm11 = vmpackc.low %vm17265_vm9, %vm17264_vm12  ;;  %vm17271_vm6 = vcmp.eq.s32.totalorder %v10035_v35, %v10405_v41  ;;  %vm17272_vm9 = vcmp.eq.s32.totalorder %v10032_v34, %v10411_v36 }
  0xec   : > { %8409 = vmatprep.subr.msk.bf16.mxu1 %vm8408_vm11, %v9706_v49  ;;  %vm8154_vm8 = vmpackc.low %vm17267_vm3, %vm17266_vm1  ;;  %vm17273_vm11 = vcmp.eq.s32.totalorder %v10035_v35, %v10411_v36  ;;  %vm17274_vm3 = vcmp.eq.s32.totalorder %v10032_v34, %v10402_v13 }
  0xed   : > { %8155 = vmatpush1.bf16.msk.msra.mxu0 %vm8154_vm8, %v9706_v49  ;;  %vm8410_vm10 = vmpackc.low %vm17269_vm4, %vm17268_vm0  ;;  %vm17275_vm8 = vcmp.eq.s32.totalorder %v10035_v35, %v10402_v13  ;;  %vm17276_vm4 = vcmp.eq.s32.totalorder %v10032_v34, %v10408_v14 }
  0xee   : > { %8411 = vmatpush1.bf16.msk.msra.mxu1 %vm8410_vm10, %v9706_v49  ;;  %vm8156_vm12 = vmpackc.low %vm17271_vm6, %vm17270_vm2  ;;  %vm17277_vm10 = vcmp.eq.s32.totalorder %v10035_v35, %v10408_v14  ;;  %vm17278_vm6 = vcmp.eq.s32.totalorder %v10038_v38, %v10405_v41 }
  0xef   : > { %8157 = vmatprep.subr.msk.bf16.mxu0 %vm8156_vm12, %v9706_v49  ;;  %vm8412_vm1 = vmpackc.low %vm17273_vm11, %vm17272_vm9  ;;  %vm17279_vm12 = vcmp.eq.s32.totalorder %v10041_v39, %v10405_v41  ;;  %vm17280_vm11 = vcmp.eq.s32.totalorder %v10038_v38, %v10411_v36 }
  0xf0   : > { %8413 = vmatprep.subr.msk.bf16.mxu1 %vm8412_vm1, %v9706_v49  ;;  %vm8158_vm0 = vmpackc.low %vm17275_vm8, %vm17274_vm3  ;;  %vm17281_vm1 = vcmp.eq.s32.totalorder %v10041_v39, %v10411_v36  ;;  %vm17282_vm8 = vcmp.eq.s32.totalorder %v10038_v38, %v10402_v13 }
  0xf1   : > { %8159 = vmatpush1.bf16.msk.msra.mxu0 %vm8158_vm0, %v9706_v49  ;;  %vm8414_vm2 = vmpackc.low %vm17277_vm10, %vm17276_vm4  ;;  %vm17283_vm0 = vcmp.eq.s32.totalorder %v10041_v39, %v10402_v13  ;;  %vm17284_vm10 = vcmp.eq.s32.totalorder %v10038_v38, %v10408_v14 }
  0xf2   : > { %8415 = vmatpush1.bf16.msk.msra.mxu1 %vm8414_vm2, %v9706_v49  ;;  %vm8160_vm9 = vmpackc.low %vm17279_vm12, %vm17278_vm6  ;;  %vm17285_vm2 = vcmp.eq.s32.totalorder %v10041_v39, %v10408_v14  ;;  %vm17286_vm12 = vcmp.eq.s32.totalorder %v10044_v42, %v10405_v41 }
  0xf3   : > { %8161 = vmatprep.subr.msk.bf16.mxu0 %vm8160_vm9, %v9706_v49  ;;  %vm8416_vm3 = vmpackc.low %vm17281_vm1, %vm17280_vm11  ;;  %vm17287_vm9 = vcmp.eq.s32.totalorder %v10047_v43, %v10405_v41  ;;  %vm17288_vm1 = vcmp.eq.s32.totalorder %v10044_v42, %v10411_v36 }
  0xf4   : > { %8417 = vmatprep.subr.msk.bf16.mxu1 %vm8416_vm3, %v9706_v49  ;;  %vm8162_vm4 = vmpackc.low %vm17283_vm0, %vm17282_vm8  ;;  %vm17289_vm3 = vcmp.eq.s32.totalorder %v10047_v43, %v10411_v36  ;;  %vm17290_vm0 = vcmp.eq.s32.totalorder %v10044_v42, %v10402_v13 }
  0xf5   : > { %8163 = vmatpush1.bf16.msk.msra.mxu0 %vm8162_vm4, %v9706_v49  ;;  %vm8418_vm6 = vmpackc.low %vm17285_vm2, %vm17284_vm10  ;;  %vm17291_vm4 = vcmp.eq.s32.totalorder %v10047_v43, %v10402_v13  ;;  %vm17292_vm2 = vcmp.eq.s32.totalorder %v10044_v42, %v10408_v14 }
  0xf6   : > { %8419 = vmatpush1.bf16.msk.msra.mxu1 %vm8418_vm6, %v9706_v49  ;;  %vm8164_vm11 = vmpackc.low %vm17287_vm9, %vm17286_vm12  ;;  %vm17293_vm6 = vcmp.eq.s32.totalorder %v10047_v43, %v10408_v14  ;;  %vm17294_vm9 = vcmp.eq.s32.totalorder %v10050_v44, %v10405_v41 }
  0xf7   : > { %8165 = vmatprep.subr.msk.bf16.mxu0 %vm8164_vm11, %v9706_v49  ;;  %vm8420_vm8 = vmpackc.low %vm17289_vm3, %vm17288_vm1  ;;  %vm17295_vm11 = vcmp.eq.s32.totalorder %v10053_v45, %v10405_v41  ;;  %vm17296_vm3 = vcmp.eq.s32.totalorder %v10050_v44, %v10411_v36 }
  0xf8   : > { %8421 = vmatprep.subr.msk.bf16.mxu1 %vm8420_vm8, %v9706_v49  ;;  %vm8166_vm10 = vmpackc.low %vm17291_vm4, %vm17290_vm0  ;;  %vm17297_vm8 = vcmp.eq.s32.totalorder %v10053_v45, %v10411_v36  ;;  %vm17298_vm4 = vcmp.eq.s32.totalorder %v10050_v44, %v10402_v13 }
  0xf9   : > { %8167 = vmatpush1.bf16.msk.msra.mxu0 %vm8166_vm10, %v9706_v49  ;;  %vm8422_vm12 = vmpackc.low %vm17293_vm6, %vm17292_vm2  ;;  %vm17299_vm10 = vcmp.eq.s32.totalorder %v10053_v45, %v10402_v13  ;;  %vm17300_vm6 = vcmp.eq.s32.totalorder %v10050_v44, %v10408_v14 }
  0xfa   : > { %8423 = vmatpush1.bf16.msk.msra.mxu1 %vm8422_vm12, %v9706_v49  ;;  %vm8168_vm1 = vmpackc.low %vm17295_vm11, %vm17294_vm9  ;;  %vm17301_vm12 = vcmp.eq.s32.totalorder %v10053_v45, %v10408_v14  ;;  %vm17302_vm11 = vcmp.eq.s32.totalorder %v10056_v58, %v10405_v41 }
  0xfb   : > { %8169 = vmatprep.subr.msk.bf16.mxu0 %vm8168_vm1, %v9706_v49  ;;  %vm8424_vm0 = vmpackc.low %vm17297_vm8, %vm17296_vm3  ;;  %vm17303_vm1 = vcmp.eq.s32.totalorder %v10059_v59, %v10405_v41  ;;  %vm17304_vm8 = vcmp.eq.s32.totalorder %v10056_v58, %v10411_v36 }
  0xfc   : > { %8425 = vmatprep.subr.msk.bf16.mxu1 %vm8424_vm0, %v9706_v49  ;;  %vm8170_vm2 = vmpackc.low %vm17299_vm10, %vm17298_vm4  ;;  %vm17305_vm0 = vcmp.eq.s32.totalorder %v10059_v59, %v10411_v36  ;;  %vm17306_vm10 = vcmp.eq.s32.totalorder %v10056_v58, %v10402_v13 }
  0xfd   : > { %8171 = vmatpush1.bf16.msk.msra.mxu0 %vm8170_vm2, %v9706_v49  ;;  %vm8426_vm9 = vmpackc.low %vm17301_vm12, %vm17300_vm6  ;;  %vm17307_vm2 = vcmp.eq.s32.totalorder %v10059_v59, %v10402_v13  ;;  %vm17308_vm12 = vcmp.eq.s32.totalorder %v10056_v58, %v10408_v14 }
  0xfe   : > { %8427 = vmatpush1.bf16.msk.msra.mxu1 %vm8426_vm9, %v9706_v49  ;;  %vm8172_vm3 = vmpackc.low %vm17303_vm1, %vm17302_vm11  ;;  %vm17309_vm9 = vcmp.eq.s32.totalorder %v10059_v59, %v10408_v14  ;;  %vm17310_vm1 = vcmp.eq.s32.totalorder %v10062_v62, %v10405_v41 }
  0xff   : > { %8173 = vmatprep.subr.msk.bf16.mxu0 %vm8172_vm3, %v9706_v49  ;;  %vm8428_vm4 = vmpackc.low %vm17305_vm0, %vm17304_vm8  ;;  %vm17311_vm3 = vcmp.eq.s32.totalorder %v10065_v63, %v10405_v41  ;;  %vm17312_vm0 = vcmp.eq.s32.totalorder %v10062_v62, %v10411_v36 }
 0x100   : > { %8429 = vmatprep.subr.msk.bf16.mxu1 %vm8428_vm4, %v9706_v49  ;;  %vm8174_vm6 = vmpackc.low %vm17307_vm2, %vm17306_vm10  ;;  %vm17313_vm4 = vcmp.eq.s32.totalorder %v10065_v63, %v10411_v36  ;;  %vm17314_vm2 = vcmp.eq.s32.totalorder %v10062_v62, %v10402_v13 }
 0x101   : > { %8175 = vmatpush1.bf16.msk.msra.mxu0 %vm8174_vm6, %v9706_v49  ;;  %vm8430_vm11 = vmpackc.low %vm17309_vm9, %vm17308_vm12  ;;  %vm17315_vm6 = vcmp.eq.s32.totalorder %v10065_v63, %v10402_v13  ;;  %vm17316_vm9 = vcmp.eq.s32.totalorder %v10062_v62, %v10408_v14 }
 0x102   : > { %8431 = vmatpush1.bf16.msk.msra.mxu1 %vm8430_vm11, %v9706_v49  ;;  %vm8176_vm8 = vmpackc.low %vm17311_vm3, %vm17310_vm1  ;;  %vm17317_vm11 = vcmp.eq.s32.totalorder %v10065_v63, %v10408_v14  ;;  %vm17318_vm3 = vcmp.eq.s32.totalorder %v10068_v16, %v10405_v41 }
 0x103   : > { %8177 = vmatprep.subr.msk.bf16.mxu0 %vm8176_vm8, %v9706_v49  ;;  %vm8432_vm10 = vmpackc.low %vm17313_vm4, %vm17312_vm0  ;;  %vm17319_vm8 = vcmp.eq.s32.totalorder %v10071_v32, %v10405_v41  ;;  %vm17320_vm4 = vcmp.eq.s32.totalorder %v10068_v16, %v10411_v36 }
 0x104   : > { %8433 = vmatprep.subr.msk.bf16.mxu1 %vm8432_vm10, %v9706_v49  ;;  %vm8178_vm12 = vmpackc.low %vm17315_vm6, %vm17314_vm2  ;;  %vm17321_vm10 = vcmp.eq.s32.totalorder %v10071_v32, %v10411_v36  ;;  %vm17322_vm6 = vcmp.eq.s32.totalorder %v10068_v16, %v10402_v13 }
 0x105   : > { %8179 = vmatpush1.bf16.msk.msra.mxu0 %vm8178_vm12, %v9706_v49  ;;  %vm8434_vm1 = vmpackc.low %vm17317_vm11, %vm17316_vm9  ;;  %vm17323_vm12 = vcmp.eq.s32.totalorder %v10071_v32, %v10402_v13  ;;  %vm17324_vm11 = vcmp.eq.s32.totalorder %v10068_v16, %v10408_v14 }
 0x106   : > { %8435 = vmatpush1.bf16.msk.msra.mxu1 %vm8434_vm1, %v9706_v49  ;;  %vm8180_vm0 = vmpackc.low %vm17319_vm8, %vm17318_vm3  ;;  %vm17325_vm1 = vcmp.eq.s32.totalorder %v10071_v32, %v10408_v14  ;;  %vm17326_vm8 = vcmp.eq.s32.totalorder %v10074_v37, %v10405_v41 }
 0x107   : > { %8181 = vmatprep.subr.msk.bf16.mxu0 %vm8180_vm0, %v9706_v49  ;;  %vm8436_vm2 = vmpackc.low %vm17321_vm10, %vm17320_vm4  ;;  %vm17327_vm0 = vcmp.eq.s32.totalorder %v10077_v40, %v10405_v41  ;;  %vm17328_vm10 = vcmp.eq.s32.totalorder %v10074_v37, %v10411_v36 }
 0x108   : > { %8437 = vmatprep.subr.msk.bf16.mxu1 %vm8436_vm2, %v9706_v49  ;;  %vm8182_vm9 = vmpackc.low %vm17323_vm12, %vm17322_vm6  ;;  %vm17329_vm2 = vcmp.eq.s32.totalorder %v10077_v40, %v10411_v36  ;;  %vm17330_vm12 = vcmp.eq.s32.totalorder %v10074_v37, %v10402_v13 }
 0x109   : > { %8183 = vmatpush1.bf16.msk.msra.mxu0 %vm8182_vm9, %v9706_v49  ;;  %vm8438_vm3 = vmpackc.low %vm17325_vm1, %vm17324_vm11  ;;  %vm17331_vm9 = vcmp.eq.s32.totalorder %v10077_v40, %v10402_v13  ;;  %vm17332_vm1 = vcmp.eq.s32.totalorder %v10074_v37, %v10408_v14 }
 0x10a   : > { %8439 = vmatpush1.bf16.msk.msra.mxu1 %vm8438_vm3, %v9706_v49  ;;  %vm8184_vm4 = vmpackc.low %vm17327_vm0, %vm17326_vm8  ;;  %vm17333_vm3 = vcmp.eq.s32.totalorder %v10077_v40, %v10408_v14  ;;  %vm17334_vm0 = vcmp.eq.s32.totalorder %v10080_v47, %v10405_v41 }
 0x10b   : > { %8185 = vmatprep.subr.msk.bf16.mxu0 %vm8184_vm4, %v9706_v49  ;;  %vm8440_vm6 = vmpackc.low %vm17329_vm2, %vm17328_vm10  ;;  %vm17335_vm4 = vcmp.eq.s32.totalorder %v10083_v48, %v10405_v41  ;;  %vm17336_vm2 = vcmp.eq.s32.totalorder %v10080_v47, %v10411_v36 }
 0x10c   : > { %8441 = vmatprep.subr.msk.bf16.mxu1 %vm8440_vm6, %v9706_v49  ;;  %vm8186_vm11 = vmpackc.low %vm17331_vm9, %vm17330_vm12  ;;  %vm17337_vm6 = vcmp.eq.s32.totalorder %v10083_v48, %v10411_v36  ;;  %vm17338_vm9 = vcmp.eq.s32.totalorder %v10080_v47, %v10402_v13 }
 0x10d   : > { %8187 = vmatpush1.bf16.msk.msra.mxu0 %vm8186_vm11, %v9706_v49  ;;  %vm8442_vm8 = vmpackc.low %vm17333_vm3, %vm17332_vm1  ;;  %vm17339_vm11 = vcmp.eq.s32.totalorder %v10083_v48, %v10402_v13  ;;  %vm17340_vm3 = vcmp.eq.s32.totalorder %v10080_v47, %v10408_v14 }
 0x10e   : > { %8443 = vmatpush1.bf16.msk.msra.mxu1 %vm8442_vm8, %v9706_v49  ;;  %vm8188_vm10 = vmpackc.low %vm17335_vm4, %vm17334_vm0  ;;  %vm17341_vm8 = vcmp.eq.s32.totalorder %v10083_v48, %v10408_v14  ;;  %vm17342_vm4 = vcmp.eq.s32.totalorder %v10086_v51, %v10405_v41 }
 0x10f   : > { %8189 = vmatprep.subr.msk.bf16.mxu0 %vm8188_vm10, %v9706_v49  ;;  %vm8444_vm12 = vmpackc.low %vm17337_vm6, %vm17336_vm2  ;;  %vm17343_vm10 = vcmp.eq.s32.totalorder %v10089_v52, %v10405_v41  ;;  %vm17344_vm6 = vcmp.eq.s32.totalorder %v10086_v51, %v10411_v36 }
 0x110   : > { %8445 = vmatprep.subr.msk.bf16.mxu1 %vm8444_vm12, %v9706_v49  ;;  %3739 = vmatmul.mubr.f32.vlgmr.msra.gmra.mrb[0].mxu0 %v3634_v9  ;;  %vm8190_vm1 = vmpackc.low %vm17339_vm11, %vm17338_vm9  ;;  %vm17345_vm12 = vcmp.eq.s32.totalorder %v10089_v52, %v10411_v36  ;;  %vm17346_vm11 = vcmp.eq.s32.totalorder %v10086_v51, %v10402_v13 }
 0x111   : > { %8191 = vmatpush1.bf16.msk.msra.mxu0 %vm8190_vm1, %v9706_v49  ;;  %4119 = vmatmul.mubr.f32.vlgmr.msra.gmra.mrb[0].mxu1 %v3634_v9  ;;  %vm8446_vm0 = vmpackc.low %vm17341_vm8, %vm17340_vm3  ;;  %vm17347_vm1 = vcmp.eq.s32.totalorder %v10089_v52, %v10402_v13  ;;  %vm17348_vm8 = vcmp.eq.s32.totalorder %v10086_v51, %v10408_v14  ;;  %v3658_v9 = vld [vmem:[%s9962_s30 + $0xc0] sm:$0xff] }
 0x112   : > { %8447 = vmatpush1.bf16.msk.msra.mxu1 %vm8446_vm0, %v9706_v49  ;;  %vm8192_vm2 = vmpackc.low %vm17343_vm10, %vm17342_vm4  ;;  %3744 = vmatprep.mubr.f32.mxu0 %v3643_v10  ;;  %vm17349_vm0 = vcmp.eq.s32.totalorder %v10089_v52, %v10408_v14  ;;  %vm17350_vm10 = vcmp.eq.s32.totalorder %v10092_v55, %v10405_v41 }
 0x113   : > { %8193 = vmatprep.subr.msk.bf16.mxu0 %vm8192_vm2, %v9706_v49  ;;  %vm8448_vm9 = vmpackc.low %vm17345_vm12, %vm17344_vm6  ;;  %4124 = vmatprep.mubr.f32.mxu1 %v3643_v10  ;;  %vm17351_vm2 = vcmp.eq.s32.totalorder %v10095_v56, %v10405_v41  ;;  %vm17352_vm12 = vcmp.eq.s32.totalorder %v10092_v55, %v10411_v36  ;;  %v3667_v10 = vld [vmem:[%s9962_s30 + $0x108] sm:$0xff] }
 0x114   : > { %8449 = vmatprep.subr.msk.bf16.mxu1 %vm8448_vm9, %v9706_v49  ;;  %vm8194_vm3 = vmpackc.low %vm17347_vm1, %vm17346_vm11  ;;  %3745 = vmatmul.mubr.f32.gmra.mrb[2].mxu0 %v3642_v11  ;;  %vm17353_vm9 = vcmp.eq.s32.totalorder %v10095_v56, %v10411_v36  ;;  %vm17354_vm1 = vcmp.eq.s32.totalorder %v10092_v55, %v10402_v13 }
 0x115   : > { %8195 = vmatpush1.bf16.msk.msra.mxu0 %vm8194_vm3, %v9706_v49  ;;  %vm8450_vm4 = vmpackc.low %vm17349_vm0, %vm17348_vm8  ;;  %4125 = vmatmul.mubr.f32.gmra.mrb[2].mxu1 %v3642_v11  ;;  %vm17355_vm3 = vcmp.eq.s32.totalorder %v10095_v56, %v10402_v13  ;;  %vm17356_vm0 = vcmp.eq.s32.totalorder %v10092_v55, %v10408_v14  ;;  %v3666_v11 = vld [vmem:[%s9962_s30 + $0x100] sm:$0xff] }
 0x116   : > { %8451 = vmatpush1.bf16.msk.msra.mxu1 %vm8450_vm4, %v9706_v49  ;;  %vm8196_vm6 = vmpackc.low %vm17351_vm2, %vm17350_vm10  ;;  %3750 = vmatprep.mubr.f32.mxu0 %v3651_v12  ;;  %vm17357_vm4 = vcmp.eq.s32.totalorder %v10095_v56, %v10408_v14  ;;  %vm17358_vm2 = vcmp.eq.s32.totalorder %v10098_v57, %v10405_v41 }
 0x117   : > { %8197 = vmatprep.subr.msk.bf16.mxu0 %vm8196_vm6, %v9706_v49  ;;  %vm8452_vm11 = vmpackc.low %vm17353_vm9, %vm17352_vm12  ;;  %4130 = vmatprep.mubr.f32.mxu1 %v3651_v12  ;;  %vm17359_vm6 = vcmp.eq.s32.totalorder %v10101_v60, %v10405_v41  ;;  %vm17360_vm9 = vcmp.eq.s32.totalorder %v10098_v57, %v10411_v36  ;;  %v3637_v12 = vld [vmem:[%s9962_s30 + $0x18] sm:$0xff] }
 0x118   : > { %8453 = vmatprep.subr.msk.bf16.mxu1 %vm8452_vm11, %v9706_v49  ;;  %vm8198_vm8 = vmpackc.low %vm17355_vm3, %vm17354_vm1  ;;  %3751 = vmatmul.mubr.f32.gmra.mrb[4].mxu0 %v3650_v15  ;;  %vm17361_vm11 = vcmp.eq.s32.totalorder %v10101_v60, %v10411_v36  ;;  %vm17362_vm3 = vcmp.eq.s32.totalorder %v10098_v57, %v10402_v13 }
 0x119   : > { %8199 = vmatpush1.bf16.msk.msra.mxu0 %vm8198_vm8, %v9706_v49  ;;  %vm8454_vm10 = vmpackc.low %vm17357_vm4, %vm17356_vm0  ;;  %4131 = vmatmul.mubr.f32.gmra.mrb[4].mxu1 %v3650_v15  ;;  %vm17363_vm8 = vcmp.eq.s32.totalorder %v10101_v60, %v10402_v13  ;;  %vm17364_vm4 = vcmp.eq.s32.totalorder %v10098_v57, %v10408_v14  ;;  %v17391_v15 = vld [vmem:[#allocation19_spill] sm:$0xff] }
 0x11a   : > { %8455 = vmatpush1.bf16.msk.msra.mxu1 %vm8454_vm10, %v9706_v49  ;;  %vm8200_vm12 = vmpackc.low %vm17359_vm6, %vm17358_vm2  ;;  %3756 = vmatprep.mubr.f32.mxu0 %v3659_v46  ;;  %vm17365_vm10 = vcmp.eq.s32.totalorder %v10101_v60, %v10408_v14  ;;  %vm17366_vm6 = vcmp.eq.s32.totalorder %v10104_v61, %v10405_v41 }
 0x11b   : > { %8201 = vmatprep.subr.msk.bf16.mxu0 %vm8200_vm12, %v9706_v49  ;;  %vm8456_vm1 = vmpackc.low %vm17361_vm11, %vm17360_vm9  ;;  %4136 = vmatprep.mubr.f32.mxu1 %v3659_v46  ;;  %vm17367_vm12 = vcmp.eq.s32.totalorder %v10107_v0, %v10405_v41  ;;  %vm17368_vm11 = vcmp.eq.s32.totalorder %v10104_v61, %v10411_v36  ;;  %v17399_v46 = vld [vmem:[#allocation20_spill] sm:$0xff] }
 0x11c   : > { %8457 = vmatprep.subr.msk.bf16.mxu1 %vm8456_vm1, %v9706_v49  ;;  %vm8202_vm0 = vmpackc.low %vm17363_vm8, %vm17362_vm3  ;;  %3757 = vmatmul.mubr.f32.gmra.mrb[6].mxu0 %v3658_v9  ;;  %vm17369_vm1 = vcmp.eq.s32.totalorder %v10107_v0, %v10411_v36  ;;  %vm17370_vm8 = vcmp.eq.s32.totalorder %v10104_v61, %v10402_v13 }
 0x11d   : > { %8203 = vmatpush1.bf16.msk.msra.mxu0 %vm8202_vm0, %v9706_v49  ;;  %vm8458_vm2 = vmpackc.low %vm17365_vm10, %vm17364_vm4  ;;  %4137 = vmatmul.mubr.f32.gmra.mrb[6].mxu1 %v3658_v9  ;;  %vm17371_vm0 = vcmp.eq.s32.totalorder %v10107_v0, %v10402_v13  ;;  %vm17372_vm10 = vcmp.eq.s32.totalorder %v10104_v61, %v10408_v14  ;;  %v17401_v9 = vld [vmem:[#allocation21_spill] sm:$0xff] }
 0x11e   : > { %8459 = vmatpush1.bf16.msk.msra.mxu1 %vm8458_vm2, %v9706_v49  ;;  %vm8204_vm9 = vmpackc.low %vm17367_vm12, %vm17366_vm6  ;;  %3762 = vmatprep.mubr.f32.mxu0 %v3667_v10  ;;  %vm17373_vm2 = vcmp.eq.s32.totalorder %v10107_v0, %v10408_v14  ;;  %vm17374_vm12 = vcmp.eq.s32.totalorder %v10116_v17, %v10405_v41 }
 0x11f   : > { %8205 = vmatprep.subr.msk.bf16.mxu0 %vm8204_vm9, %v9706_v49  ;;  %vm8460_vm3 = vmpackc.low %vm17369_vm1, %vm17368_vm11  ;;  %4142 = vmatprep.mubr.f32.mxu1 %v3667_v10  ;;  %vm17375_vm9 = vcmp.eq.s32.totalorder %v10119_v20, %v10405_v41  ;;  %vm17376_vm1 = vcmp.eq.s32.totalorder %v10116_v17, %v10411_v36  ;;  %v17409_v10 = vld [vmem:[#allocation22_spill] sm:$0xff] }
 0x120   : > { %8461 = vmatprep.subr.msk.bf16.mxu1 %vm8460_vm3, %v9706_v49  ;;  %vm8206_vm4 = vmpackc.low %vm17371_vm0, %vm17370_vm8  ;;  %3763 = vmatmul.mubr.f32.gmra.mrb[8].mxu0 %v3666_v11  ;;  %vm17377_vm3 = vcmp.eq.s32.totalorder %v10119_v20, %v10411_v36  ;;  %vm17378_vm0 = vcmp.eq.s32.totalorder %v10116_v17, %v10402_v13 }
 0x121   : > { %8207 = vmatpush1.bf16.msk.msra.mxu0 %vm8206_vm4, %v9706_v49  ;;  %vm8462_vm6 = vmpackc.low %vm17373_vm2, %vm17372_vm10  ;;  %4143 = vmatmul.mubr.f32.gmra.mrb[8].mxu1 %v3666_v11  ;;  %vm17379_vm4 = vcmp.eq.s32.totalorder %v10119_v20, %v10402_v13  ;;  %vm17380_vm2 = vcmp.eq.s32.totalorder %v10116_v17, %v10408_v14  ;;  %v17411_v11 = vld [vmem:[#allocation23_spill] sm:$0xff] }
 0x122   : > { %8463 = vmatpush1.bf16.msk.msra.mxu1 %vm8462_vm6, %v9706_v49  ;;  %vm8208_vm11 = vmpackc.low %vm17375_vm9, %vm17374_vm12  ;;  %3833 = vmatprep.mubr.f32.mxu0 %v3637_v12  ;;  %vm17381_vm6 = vcmp.eq.s32.totalorder %v10119_v20, %v10408_v14  ;;  %vm17382_vm9 = vcmp.eq.s32.totalorder %v10128_v25, %v10405_v41 }
 0x123   : > { %8209 = vmatprep.subr.msk.bf16.mxu0 %vm8208_vm11, %v9706_v49  ;;  %vm8464_vm8 = vmpackc.low %vm17377_vm3, %vm17376_vm1  ;;  %4213 = vmatprep.mubr.f32.mxu1 %v3637_v12  ;;  %vm17383_vm11 = vcmp.eq.s32.totalorder %v10131_v28, %v10405_v41  ;;  %vm17384_vm3 = vcmp.eq.s32.totalorder %v10128_v25, %v10411_v36  ;;  %v17419_v12 = vld [vmem:[#allocation24_spill] sm:$0xff] }
 0x124   : > { %8465 = vmatprep.subr.msk.bf16.mxu1 %vm8464_vm8, %v9706_v49  ;;  %vm8210_vm10 = vmpackc.low %vm17379_vm4, %vm17378_vm0  ;;  %vm17385_vm8 = vcmp.eq.s32.totalorder %v10131_v28, %v10411_v36  ;;  %vm17386_vm4 = vcmp.eq.s32.totalorder %v10128_v25, %v10402_v13 }
 0x125   : > { %8211 = vmatpush1.bf16.msk.msra.mxu0 %vm8210_vm10, %v9706_v49  ;;  %vm8466_vm12 = vmpackc.low %vm17381_vm6, %vm17380_vm2  ;;  %vm17387_vm10 = vcmp.eq.s32.totalorder %v10131_v28, %v10402_v13  ;;  %vm17388_vm6 = vcmp.eq.s32.totalorder %v10128_v25, %v10408_v14 }
 0x126   : > { %8467 = vmatpush1.bf16.msk.msra.mxu1 %vm8466_vm12, %v9706_v49  ;;  %vm8212_vm1 = vmpackc.low %vm17383_vm11, %vm17382_vm9  ;;  %vm17389_vm12 = vcmp.eq.s32.totalorder %v10131_v28, %v10408_v14  ;;  %vm17390_vm11 = vcmp.eq.s32.totalorder %v10134_v29, %v10405_v41 }
 0x127   : > { %8213 = vmatprep.subr.msk.bf16.mxu0 %vm8212_vm1, %v9706_v49  ;;  %vm8468_vm0 = vmpackc.low %vm17385_vm8, %vm17384_vm3  ;;  %vm17392_vm1 = vcmp.eq.s32.totalorder %v17391_v15, %v10405_v41  ;;  %vm17393_vm8 = vcmp.eq.s32.totalorder %v10134_v29, %v10411_v36 }
 0x128   : > { %8469 = vmatprep.subr.msk.bf16.mxu1 %vm8468_vm0, %v9706_v49  ;;  %vm8214_vm2 = vmpackc.low %vm17387_vm10, %vm17386_vm4  ;;  %vm17394_vm0 = vcmp.eq.s32.totalorder %v17391_v15, %v10411_v36  ;;  %vm17395_vm10 = vcmp.eq.s32.totalorder %v10134_v29, %v10402_v13 }
 0x129   : > { %8215 = vmatpush1.bf16.msk.msra.mxu0 %vm8214_vm2, %v9706_v49  ;;  %vm8470_vm9 = vmpackc.low %vm17389_vm12, %vm17388_vm6  ;;  %vm17396_vm2 = vcmp.eq.s32.totalorder %v17391_v15, %v10402_v13  ;;  %vm17397_vm12 = vcmp.eq.s32.totalorder %v10134_v29, %v10408_v14 }
 0x12a   : > { %8471 = vmatpush1.bf16.msk.msra.mxu1 %vm8470_vm9, %v9706_v49  ;;  %vm8216_vm3 = vmpackc.low %vm17392_vm1, %vm17390_vm11  ;;  %vm17398_vm9 = vcmp.eq.s32.totalorder %v17391_v15, %v10408_v14  ;;  %vm17400_vm1 = vcmp.eq.s32.totalorder %v17399_v46, %v10405_v41 }
 0x12b   : > { %8217 = vmatprep.subr.msk.bf16.mxu0 %vm8216_vm3, %v9706_v49  ;;  %vm8472_vm4 = vmpackc.low %vm17394_vm0, %vm17393_vm8  ;;  %vm17402_vm3 = vcmp.eq.s32.totalorder %v17401_v9, %v10405_v41  ;;  %vm17403_vm0 = vcmp.eq.s32.totalorder %v17399_v46, %v10411_v36 }
 0x12c   : > { %8473 = vmatprep.subr.msk.bf16.mxu1 %vm8472_vm4, %v9706_v49  ;;  %vm8218_vm6 = vmpackc.low %vm17396_vm2, %vm17395_vm10  ;;  %vm17404_vm4 = vcmp.eq.s32.totalorder %v17401_v9, %v10411_v36  ;;  %vm17405_vm2 = vcmp.eq.s32.totalorder %v17399_v46, %v10402_v13 }
 0x12d   : > { %8219 = vmatpush1.bf16.msk.msra.mxu0 %vm8218_vm6, %v9706_v49  ;;  %vm8474_vm11 = vmpackc.low %vm17398_vm9, %vm17397_vm12  ;;  %vm17406_vm6 = vcmp.eq.s32.totalorder %v17401_v9, %v10402_v13  ;;  %vm17407_vm9 = vcmp.eq.s32.totalorder %v17399_v46, %v10408_v14  ;;  %v17491_v46 = vld [vmem:[#allocation39_spill] sm:$0xff] }
 0x12e   : > { %8475 = vmatpush1.bf16.msk.msra.mxu1 %vm8474_vm11, %v9706_v49  ;;  %vm8220_vm8 = vmpackc.low %vm17402_vm3, %vm17400_vm1  ;;  %vm17408_vm11 = vcmp.eq.s32.totalorder %v17401_v9, %v10408_v14  ;;  %vm17410_vm3 = vcmp.eq.s32.totalorder %v17409_v10, %v10405_v41  ;;  %v17489_v9 = vld [vmem:[#allocation38_spill] sm:$0xff] }
 0x12f   : > { %8221 = vmatprep.subr.msk.bf16.mxu0 %vm8220_vm8, %v9706_v49  ;;  %vm8476_vm10 = vmpackc.low %vm17404_vm4, %vm17403_vm0  ;;  %vm17412_vm8 = vcmp.eq.s32.totalorder %v17411_v11, %v10405_v41  ;;  %vm17413_vm4 = vcmp.eq.s32.totalorder %v17409_v10, %v10411_v36 }
 0x130   : > { %8477 = vmatprep.subr.msk.bf16.mxu1 %vm8476_vm10, %v9706_v49  ;;  %vm8222_vm12 = vmpackc.low %vm17406_vm6, %vm17405_vm2  ;;  %vm17414_vm10 = vcmp.eq.s32.totalorder %v17411_v11, %v10411_v36  ;;  %vm17415_vm6 = vcmp.eq.s32.totalorder %v17409_v10, %v10402_v13 }
 0x131   : > { %8223 = vmatpush1.bf16.msk.msra.mxu0 %vm8222_vm12, %v9706_v49  ;;  %vm8478_vm1 = vmpackc.low %vm17408_vm11, %vm17407_vm9  ;;  %vm17416_vm12 = vcmp.eq.s32.totalorder %v17411_v11, %v10402_v13  ;;  %vm17417_vm11 = vcmp.eq.s32.totalorder %v17409_v10, %v10408_v14  ;;  %v17481_v10 = vld [vmem:[#allocation37_spill] sm:$0xff] }
 0x132   : > { %8479 = vmatpush1.bf16.msk.msra.mxu1 %vm8478_vm1, %v9706_v49  ;;  %vm8224_vm0 = vmpackc.low %vm17412_vm8, %vm17410_vm3  ;;  %vm17418_vm1 = vcmp.eq.s32.totalorder %v17411_v11, %v10408_v14  ;;  %vm17420_vm8 = vcmp.eq.s32.totalorder %v17419_v12, %v10405_v41  ;;  %v17431_v11 = vld [vmem:[#allocation27_spill] sm:$0xff] }
 0x133   : > { %8225 = vmatprep.subr.msk.bf16.mxu0 %vm8224_vm0, %v9706_v49  ;;  %vm8480_vm2 = vmpackc.low %vm17414_vm10, %vm17413_vm4  ;;  %vm17422_vm0 = vcmp.eq.s32.totalorder %v17421_v54, %v10405_v41  ;;  %vm17423_vm10 = vcmp.eq.s32.totalorder %v17419_v12, %v10411_v36 }
 0x134   : > { %8481 = vmatprep.subr.msk.bf16.mxu1 %vm8480_vm2, %v9706_v49  ;;  %vm8226_vm9 = vmpackc.low %vm17416_vm12, %vm17415_vm6  ;;  %vm17424_vm2 = vcmp.eq.s32.totalorder %v17421_v54, %v10411_v36  ;;  %vm17425_vm12 = vcmp.eq.s32.totalorder %v17419_v12, %v10402_v13 }
 0x135   : > { %8227 = vmatpush1.bf16.msk.msra.mxu0 %vm8226_vm9, %v9706_v49  ;;  %vm8482_vm3 = vmpackc.low %vm17418_vm1, %vm17417_vm11  ;;  %vm17426_vm9 = vcmp.eq.s32.totalorder %v17421_v54, %v10402_v13  ;;  %vm17427_vm1 = vcmp.eq.s32.totalorder %v17419_v12, %v10408_v14  ;;  %v17441_v12 = vld [vmem:[#allocation29_spill] sm:$0xff] }
 0x136   : > { %8483 = vmatpush1.bf16.msk.msra.mxu1 %vm8482_vm3, %v9706_v49  ;;  %vm8228_vm4 = vmpackc.low %vm17422_vm0, %vm17420_vm8  ;;  %vm17428_vm3 = vcmp.eq.s32.totalorder %v17421_v54, %v10408_v14  ;;  %vm17430_vm0 = vcmp.eq.s32.totalorder %v17429_v53, %v10405_v41  ;;  %v17439_v54 = vld [vmem:[#allocation28_spill] sm:$0xff] }
 0x137   : > { %8229 = vmatprep.subr.msk.bf16.mxu0 %vm8228_vm4, %v9706_v49  ;;  %vm8484_vm6 = vmpackc.low %vm17424_vm2, %vm17423_vm10  ;;  %vm17432_vm4 = vcmp.eq.s32.totalorder %v17431_v11, %v10405_v41  ;;  %vm17433_vm2 = vcmp.eq.s32.totalorder %v17429_v53, %v10411_v36 }
 0x138   : > { %8485 = vmatprep.subr.msk.bf16.mxu1 %vm8484_vm6, %v9706_v49  ;;  %vm8230_vm11 = vmpackc.low %vm17426_vm9, %vm17425_vm12  ;;  %vm17434_vm6 = vcmp.eq.s32.totalorder %v17431_v11, %v10411_v36  ;;  %vm17435_vm9 = vcmp.eq.s32.totalorder %v17429_v53, %v10402_v13 }
 0x139   : > { %8231 = vmatpush1.bf16.msk.msra.mxu0 %vm8230_vm11, %v9706_v49  ;;  %vm8486_vm8 = vmpackc.low %vm17428_vm3, %vm17427_vm1  ;;  %vm17436_vm11 = vcmp.eq.s32.totalorder %v17431_v11, %v10402_v13  ;;  %vm17437_vm3 = vcmp.eq.s32.totalorder %v17429_v53, %v10408_v14  ;;  %v17451_v53 = vld [vmem:[#allocation31_spill] sm:$0xff] }
 0x13a   : > { %8487 = vmatpush1.bf16.msk.msra.mxu1 %vm8486_vm8, %v9706_v49  ;;  %vm8232_vm10 = vmpackc.low %vm17432_vm4, %vm17430_vm0  ;;  %vm17438_vm8 = vcmp.eq.s32.totalorder %v17431_v11, %v10408_v14  ;;  %vm17440_vm4 = vcmp.eq.s32.totalorder %v17439_v54, %v10405_v41  ;;  %v17449_v11 = vld [vmem:[#allocation30_spill] sm:$0xff] }
 0x13b   : > { %8233 = vmatprep.subr.msk.bf16.mxu0 %vm8232_vm10, %v9706_v49  ;;  %vm8488_vm12 = vmpackc.low %vm17434_vm6, %vm17433_vm2  ;;  %vm17442_vm10 = vcmp.eq.s32.totalorder %v17441_v12, %v10405_v41  ;;  %vm17443_vm6 = vcmp.eq.s32.totalorder %v17439_v54, %v10411_v36 }
 0x13c   : > { %8489 = vmatprep.subr.msk.bf16.mxu1 %vm8488_vm12, %v9706_v49  ;;  %vm8234_vm1 = vmpackc.low %vm17436_vm11, %vm17435_vm9  ;;  %vm17444_vm12 = vcmp.eq.s32.totalorder %v17441_v12, %v10411_v36  ;;  %vm17445_vm11 = vcmp.eq.s32.totalorder %v17439_v54, %v10402_v13 }
 0x13d   : > { %8235 = vmatpush1.bf16.msk.msra.mxu0 %vm8234_vm1, %v9706_v49  ;;  %vm8490_vm0 = vmpackc.low %vm17438_vm8, %vm17437_vm3  ;;  %vm17446_vm1 = vcmp.eq.s32.totalorder %v17441_v12, %v10402_v13  ;;  %vm17447_vm8 = vcmp.eq.s32.totalorder %v17439_v54, %v10408_v14  ;;  %v17461_v54 = vld [vmem:[#allocation33_spill] sm:$0xff] }
 0x13e   : > { %8491 = vmatpush1.bf16.msk.msra.mxu1 %vm8490_vm0, %v9706_v49  ;;  %vm8236_vm2 = vmpackc.low %vm17442_vm10, %vm17440_vm4  ;;  %vm17448_vm0 = vcmp.eq.s32.totalorder %v17441_v12, %v10408_v14  ;;  %vm17450_vm10 = vcmp.eq.s32.totalorder %v17449_v11, %v10405_v41  ;;  %v17459_v12 = vld [vmem:[#allocation32_spill] sm:$0xff] }
 0x13f   : > { %8237 = vmatprep.subr.msk.bf16.mxu0 %vm8236_vm2, %v9706_v49  ;;  %vm8492_vm9 = vmpackc.low %vm17444_vm12, %vm17443_vm6  ;;  %vm17452_vm2 = vcmp.eq.s32.totalorder %v17451_v53, %v10405_v41  ;;  %vm17453_vm12 = vcmp.eq.s32.totalorder %v17449_v11, %v10411_v36 }
 0x140   : > { %8493 = vmatprep.subr.msk.bf16.mxu1 %vm8492_vm9, %v9706_v49  ;;  %vm8238_vm3 = vmpackc.low %vm17446_vm1, %vm17445_vm11  ;;  %vm17454_vm9 = vcmp.eq.s32.totalorder %v17451_v53, %v10411_v36  ;;  %vm17455_vm1 = vcmp.eq.s32.totalorder %v17449_v11, %v10402_v13 }
 0x141   : > { %8239 = vmatpush1.bf16.msk.msra.mxu0 %vm8238_vm3, %v9706_v49  ;;  %vm8494_vm4 = vmpackc.low %vm17448_vm0, %vm17447_vm8  ;;  %vm17456_vm3 = vcmp.eq.s32.totalorder %v17451_v53, %v10402_v13  ;;  %vm17457_vm0 = vcmp.eq.s32.totalorder %v17449_v11, %v10408_v14  ;;  %v17471_v11 = vld [vmem:[#allocation35_spill] sm:$0xff] }
 0x142   : > { %8495 = vmatpush1.bf16.msk.msra.mxu1 %vm8494_vm4, %v9706_v49  ;;  %vm8240_vm6 = vmpackc.low %vm17452_vm2, %vm17450_vm10  ;;  %vm17458_vm4 = vcmp.eq.s32.totalorder %v17451_v53, %v10408_v14  ;;  %vm17460_vm2 = vcmp.eq.s32.totalorder %v17459_v12, %v10405_v41  ;;  %v17469_v53 = vld [vmem:[#allocation34_spill] sm:$0xff] }
 0x143   : > { %8241 = vmatprep.subr.msk.bf16.mxu0 %vm8240_vm6, %v9706_v49  ;;  %vm8496_vm11 = vmpackc.low %vm17454_vm9, %vm17453_vm12  ;;  %vm17462_vm6 = vcmp.eq.s32.totalorder %v17461_v54, %v10405_v41  ;;  %vm17463_vm9 = vcmp.eq.s32.totalorder %v17459_v12, %v10411_v36 }
 0x144   : > { %8497 = vmatprep.subr.msk.bf16.mxu1 %vm8496_vm11, %v9706_v49  ;;  %vm8242_vm8 = vmpackc.low %vm17456_vm3, %vm17455_vm1  ;;  %vm17464_vm11 = vcmp.eq.s32.totalorder %v17461_v54, %v10411_v36  ;;  %vm17465_vm3 = vcmp.eq.s32.totalorder %v17459_v12, %v10402_v13 }
 0x145   : > { %8243 = vmatpush1.bf16.msk.msra.mxu0 %vm8242_vm8, %v9706_v49  ;;  %vm8498_vm10 = vmpackc.low %vm17458_vm4, %vm17457_vm0  ;;  %vm17466_vm8 = vcmp.eq.s32.totalorder %v17461_v54, %v10402_v13  ;;  %vm17467_vm4 = vcmp.eq.s32.totalorder %v17459_v12, %v10408_v14  ;;  %v17479_v12 = vld [vmem:[#allocation36_spill] sm:$0xff] }
 0x146   : > { %8499 = vmatpush1.bf16.msk.msra.mxu1 %vm8498_vm10, %v9706_v49  ;;  %vm8244_vm12 = vmpackc.low %vm17462_vm6, %vm17460_vm2  ;;  %vm17468_vm10 = vcmp.eq.s32.totalorder %v17461_v54, %v10408_v14  ;;  %vm17470_vm6 = vcmp.eq.s32.totalorder %v17469_v53, %v10405_v41  ;;  %v3636_v54 = vld [vmem:[%s9962_s30 + $0x10] sm:$0xff] }
 0x147   : > { %8245 = vmatprep.subr.msk.bf16.mxu0 %vm8244_vm12, %v9706_v49  ;;  %vm8500_vm1 = vmpackc.low %vm17464_vm11, %vm17463_vm9  ;;  %vm17472_vm12 = vcmp.eq.s32.totalorder %v17471_v11, %v10405_v41  ;;  %vm17473_vm11 = vcmp.eq.s32.totalorder %v17469_v53, %v10411_v36 }
 0x148   : > { %8501 = vmatprep.subr.msk.bf16.mxu1 %vm8500_vm1, %v9706_v49  ;;  %vm8246_vm0 = vmpackc.low %vm17466_vm8, %vm17465_vm3  ;;  %vm17474_vm1 = vcmp.eq.s32.totalorder %v17471_v11, %v10411_v36  ;;  %vm17475_vm8 = vcmp.eq.s32.totalorder %v17469_v53, %v10402_v13 }
 0x149   : > { %8247 = vmatpush1.bf16.msk.msra.mxu0 %vm8246_vm0, %v9706_v49  ;;  %vm8502_vm2 = vmpackc.low %vm17468_vm10, %vm17467_vm4  ;;  %vm17476_vm0 = vcmp.eq.s32.totalorder %v17471_v11, %v10402_v13  ;;  %vm17477_vm10 = vcmp.eq.s32.totalorder %v17469_v53, %v10408_v14  ;;  %v3644_v53 = vld [vmem:[%s9962_s30 + $0x50] sm:$0xff] }
 0x14a   : > { %8503 = vmatpush1.bf16.msk.msra.mxu1 %vm8502_vm2, %v9706_v49  ;;  %vm8248_vm9 = vmpackc.low %vm17472_vm12, %vm17470_vm6  ;;  %vm17478_vm2 = vcmp.eq.s32.totalorder %v17471_v11, %v10408_v14  ;;  %vm17480_vm12 = vcmp.eq.s32.totalorder %v17479_v12, %v10405_v41  ;;  %v3645_v11 = vld [vmem:[%s9962_s30 + $0x58] sm:$0xff] }
 0x14b   : > { %8249 = vmatprep.subr.msk.bf16.mxu0 %vm8248_vm9, %v9706_v49  ;;  %vm8504_vm3 = vmpackc.low %vm17474_vm1, %vm17473_vm11  ;;  %vm17482_vm9 = vcmp.eq.s32.totalorder %v17481_v10, %v10405_v41  ;;  %vm17483_vm1 = vcmp.eq.s32.totalorder %v17479_v12, %v10411_v36 }
 0x14c   : > { %8505 = vmatprep.subr.msk.bf16.mxu1 %vm8504_vm3, %v9706_v49  ;;  %vm8250_vm4 = vmpackc.low %vm17476_vm0, %vm17475_vm8  ;;  %vm17484_vm3 = vcmp.eq.s32.totalorder %v17481_v10, %v10411_v36  ;;  %vm17485_vm0 = vcmp.eq.s32.totalorder %v17479_v12, %v10402_v13 }
 0x14d   : > { %8251 = vmatpush1.bf16.msk.msra.mxu0 %vm8250_vm4, %v9706_v49  ;;  %vm8506_vm6 = vmpackc.low %vm17478_vm2, %vm17477_vm10  ;;  %vm17486_vm4 = vcmp.eq.s32.totalorder %v17481_v10, %v10402_v13  ;;  %vm17487_vm2 = vcmp.eq.s32.totalorder %v17479_v12, %v10408_v14  ;;  %v17501_v12 = vld [vmem:[#allocation41_spill] sm:$0xff] }
 0x14e   : > { %8507 = vmatpush1.bf16.msk.msra.mxu1 %vm8506_vm6, %v9706_v49  ;;  %vm8252_vm11 = vmpackc.low %vm17482_vm9, %vm17480_vm12  ;;  %vm17488_vm6 = vcmp.eq.s32.totalorder %v17481_v10, %v10408_v14  ;;  %vm17490_vm9 = vcmp.eq.s32.totalorder %v17489_v9, %v10405_v41  ;;  %v17499_v10 = vld [vmem:[#allocation40_spill] sm:$0xff] }
 0x14f   : > { %8253 = vmatprep.subr.msk.bf16.mxu0 %vm8252_vm11, %v9706_v49  ;;  %vm8508_vm8 = vmpackc.low %vm17484_vm3, %vm17483_vm1  ;;  %vm17492_vm11 = vcmp.eq.s32.totalorder %v17491_v46, %v10405_v41  ;;  %vm17493_vm3 = vcmp.eq.s32.totalorder %v17489_v9, %v10411_v36 }
 0x150   : > { %8509 = vmatprep.subr.msk.bf16.mxu1 %vm8508_vm8, %v9706_v49  ;;  %3834 = vmatmul.mubr.f32.vlgmr.msra.gmra.mrb[0].mxu0 %v3636_v54  ;;  %vm8254_vm10 = vmpackc.low %vm17486_vm4, %vm17485_vm0  ;;  %vm17494_vm8 = vcmp.eq.s32.totalorder %v17491_v46, %v10411_v36  ;;  %vm17495_vm4 = vcmp.eq.s32.totalorder %v17489_v9, %v10402_v13 }
 0x151   : > { %8255 = vmatpush1.bf16.msk.msra.mxu0 %vm8254_vm10, %v9706_v49  ;;  %4214 = vmatmul.mubr.f32.vlgmr.msra.gmra.mrb[0].mxu1 %v3636_v54  ;;  %vm8510_vm12 = vmpackc.low %vm17488_vm6, %vm17487_vm2  ;;  %v3653_v54 = vld [vmem:[%s9962_s30 + $0x98] sm:$0xff]  ;;  %vm17496_vm10 = vcmp.eq.s32.totalorder %v17491_v46, %v10402_v13  ;;  %vm17497_vm6 = vcmp.eq.s32.totalorder %v17489_v9, %v10408_v14  ;;  %v17511_v9 = vld [vmem:[#allocation43_spill] sm:$0xff] }
 0x152   : > { %8511 = vmatpush1.bf16.msk.msra.mxu1 %vm8510_vm12, %v9706_v49  ;;  %vm8256_vm1 = vmpackc.low %vm17492_vm11, %vm17490_vm9  ;;  %3839 = vmatprep.mubr.f32.mxu0 %v3645_v11  ;;  %vm17498_vm12 = vcmp.eq.s32.totalorder %v17491_v46, %v10408_v14  ;;  %vm17500_vm11 = vcmp.eq.s32.totalorder %v17499_v10, %v10405_v41  ;;  %v17509_v46 = vld [vmem:[#allocation42_spill] sm:$0xff] }
 0x153   : > { %8257 = vmatprep.subr.msk.bf16.mxu0 %vm8256_vm1, %v9706_v49  ;;  %vm8512_vm0 = vmpackc.low %vm17494_vm8, %vm17493_vm3  ;;  %4219 = vmatprep.mubr.f32.mxu1 %v3645_v11  ;;  %v3652_v11 = vld [vmem:[%s9962_s30 + $0x90] sm:$0xff]  ;;  %vm17502_vm1 = vcmp.eq.s32.totalorder %v17501_v12, %v10405_v41  ;;  %vm17503_vm8 = vcmp.eq.s32.totalorder %v17499_v10, %v10411_v36 }
 0x154   : > { %8513 = vmatprep.subr.msk.bf16.mxu1 %vm8512_vm0, %v9706_v49  ;;  %vm8258_vm2 = vmpackc.low %vm17496_vm10, %vm17495_vm4  ;;  %3840 = vmatmul.mubr.f32.gmra.mrb[2].mxu0 %v3644_v53  ;;  %vm17504_vm0 = vcmp.eq.s32.totalorder %v17501_v12, %v10411_v36  ;;  %vm17505_vm10 = vcmp.eq.s32.totalorder %v17499_v10, %v10402_v13 }
 0x155   : > { %8259 = vmatpush1.bf16.msk.msra.mxu0 %vm8258_vm2, %v9706_v49  ;;  %vm8514_vm9 = vmpackc.low %vm17498_vm12, %vm17497_vm6  ;;  %4220 = vmatmul.mubr.f32.gmra.mrb[2].mxu1 %v3644_v53  ;;  %v3661_v53 = vld [vmem:[%s9962_s30 + $0xd8] sm:$0xff]  ;;  %vm17506_vm2 = vcmp.eq.s32.totalorder %v17501_v12, %v10402_v13  ;;  %vm17507_vm12 = vcmp.eq.s32.totalorder %v17499_v10, %v10408_v14  ;;  %v17521_v10 = vld [vmem:[#allocation45_spill] sm:$0xff] }
 0x156   : > { %8515 = vmatpush1.bf16.msk.msra.mxu1 %vm8514_vm9, %v9706_v49  ;;  %vm8260_vm3 = vmpackc.low %vm17502_vm1, %vm17500_vm11  ;;  %3845 = vmatprep.mubr.f32.mxu0 %v3653_v54  ;;  %vm17508_vm9 = vcmp.eq.s32.totalorder %v17501_v12, %v10408_v14  ;;  %vm17510_vm1 = vcmp.eq.s32.totalorder %v17509_v46, %v10405_v41  ;;  %v17519_v12 = vld [vmem:[#allocation44_spill] sm:$0xff] }
 0x157   : > { %8261 = vmatprep.subr.msk.bf16.mxu0 %vm8260_vm3, %v9706_v49  ;;  %vm8516_vm4 = vmpackc.low %vm17504_vm0, %vm17503_vm8  ;;  %4225 = vmatprep.mubr.f32.mxu1 %v3653_v54  ;;  %v3660_v54 = vld [vmem:[%s9962_s30 + $0xd0] sm:$0xff]  ;;  %vm17512_vm3 = vcmp.eq.s32.totalorder %v17511_v9, %v10405_v41  ;;  %vm17513_vm0 = vcmp.eq.s32.totalorder %v17509_v46, %v10411_v36 }
 0x158   : > { %8517 = vmatprep.subr.msk.bf16.mxu1 %vm8516_vm4, %v9706_v49  ;;  %vm8262_vm6 = vmpackc.low %vm17506_vm2, %vm17505_vm10  ;;  %3846 = vmatmul.mubr.f32.gmra.mrb[4].mxu0 %v3652_v11  ;;  %vm17514_vm4 = vcmp.eq.s32.totalorder %v17511_v9, %v10411_v36  ;;  %vm17515_vm2 = vcmp.eq.s32.totalorder %v17509_v46, %v10402_v13 }
 0x159   : > { %8263 = vmatpush1.bf16.msk.msra.mxu0 %vm8262_vm6, %v9706_v49  ;;  %vm8518_vm11 = vmpackc.low %vm17508_vm9, %vm17507_vm12  ;;  %4226 = vmatmul.mubr.f32.gmra.mrb[4].mxu1 %v3652_v11  ;;  %v3669_v11 = vld [vmem:[%s9962_s30 + $0x118] sm:$0xff]  ;;  %vm17516_vm6 = vcmp.eq.s32.totalorder %v17511_v9, %v10402_v13  ;;  %vm17517_vm9 = vcmp.eq.s32.totalorder %v17509_v46, %v10408_v14  ;;  %v17651_v46 = vld [vmem:[#allocation71_spill] sm:$0xff] }
 0x15a   : > { %8519 = vmatpush1.bf16.msk.msra.mxu1 %vm8518_vm11, %v9706_v49  ;;  %vm8264_vm8 = vmpackc.low %vm17512_vm3, %vm17510_vm1  ;;  %3851 = vmatprep.mubr.f32.mxu0 %v3661_v53  ;;  %vm17518_vm11 = vcmp.eq.s32.totalorder %v17511_v9, %v10408_v14  ;;  %vm17520_vm3 = vcmp.eq.s32.totalorder %v17519_v12, %v10405_v41  ;;  %v17531_v9 = vld [vmem:[#allocation47_spill] sm:$0xff] }
 0x15b   : > { %8265 = vmatprep.subr.msk.bf16.mxu0 %vm8264_vm8, %v9706_v49  ;;  %vm8520_vm10 = vmpackc.low %vm17514_vm4, %vm17513_vm0  ;;  %4231 = vmatprep.mubr.f32.mxu1 %v3661_v53  ;;  %v3668_v53 = vld [vmem:[%s9962_s30 + $0x110] sm:$0xff]  ;;  %vm17522_vm8 = vcmp.eq.s32.totalorder %v17521_v10, %v10405_v41  ;;  %vm17523_vm4 = vcmp.eq.s32.totalorder %v17519_v12, %v10411_v36 }
 0x15c   : > { %8521 = vmatprep.subr.msk.bf16.mxu1 %vm8520_vm10, %v9706_v49  ;;  %vm8266_vm12 = vmpackc.low %vm17516_vm6, %vm17515_vm2  ;;  %3852 = vmatmul.mubr.f32.gmra.mrb[6].mxu0 %v3660_v54  ;;  %vm17524_vm10 = vcmp.eq.s32.totalorder %v17521_v10, %v10411_v36  ;;  %vm17525_vm6 = vcmp.eq.s32.totalorder %v17519_v12, %v10402_v13 }
 0x15d   : > { %8267 = vmatpush1.bf16.msk.msra.mxu0 %vm8266_vm12, %v9706_v49  ;;  %vm8522_vm1 = vmpackc.low %vm17518_vm11, %vm17517_vm9  ;;  %4232 = vmatmul.mubr.f32.gmra.mrb[6].mxu1 %v3660_v54  ;;  %v3639_v54 = vld [vmem:[%s9962_s30 + $0x28] sm:$0xff]  ;;  %vm17526_vm12 = vcmp.eq.s32.totalorder %v17521_v10, %v10402_v13  ;;  %vm17527_vm11 = vcmp.eq.s32.totalorder %v17519_v12, %v10408_v14  ;;  %v17649_v12 = vld [vmem:[#allocation70_spill] sm:$0xff] }
 0x15e   : > { %8523 = vmatpush1.bf16.msk.msra.mxu1 %vm8522_vm1, %v9706_v49  ;;  %vm8268_vm0 = vmpackc.low %vm17522_vm8, %vm17520_vm3  ;;  %3857 = vmatprep.mubr.f32.mxu0 %v3669_v11  ;;  %vm17528_vm1 = vcmp.eq.s32.totalorder %v17521_v10, %v10408_v14  ;;  %v17641_v10 = vld [vmem:[#allocation69_spill] sm:$0xff] }
 0x15f   : > { %8269 = vmatprep.subr.msk.bf16.mxu0 %vm8268_vm0, %v9706_v49  ;;  %vm8524_vm2 = vmpackc.low %vm17524_vm10, %vm17523_vm4  ;;  %4237 = vmatprep.mubr.f32.mxu1 %v3669_v11  ;;  %v17529_v11 = vld [vmem:[#allocation46_spill] sm:$0xff]  ;;  %vm17532_vm0 = vcmp.eq.s32.totalorder %v17531_v9, %v10405_v41 }
 0x160   : > { %8525 = vmatprep.subr.msk.bf16.mxu1 %vm8524_vm2, %v9706_v49  ;;  %vm8270_vm9 = vmpackc.low %vm17526_vm12, %vm17525_vm6  ;;  %3858 = vmatmul.mubr.f32.gmra.mrb[8].mxu0 %v3668_v53  ;;  %vm17530_vm8 = vcmp.eq.s32.totalorder %v17529_v11, %v10405_v41  ;;  %vm17533_vm10 = vcmp.eq.s32.totalorder %v17529_v11, %v10411_v36  ;;  %vm17534_vm2 = vcmp.eq.s32.totalorder %v17531_v9, %v10411_v36 }
 0x161   : > { %8271 = vmatpush1.bf16.msk.msra.mxu0 %vm8270_vm9, %v9706_v49  ;;  %vm8526_vm3 = vmpackc.low %vm17528_vm1, %vm17527_vm11  ;;  %4238 = vmatmul.mubr.f32.gmra.mrb[8].mxu1 %v3668_v53  ;;  %vm17535_vm12 = vcmp.eq.s32.totalorder %v17529_v11, %v10402_v13  ;;  %vm17536_vm9 = vcmp.eq.s32.totalorder %v17531_v9, %v10402_v13  ;;  %vm17537_vm1 = vcmp.eq.s32.totalorder %v17529_v11, %v10408_v14  ;;  %v17539_v53 = vld [vmem:[#allocation48_spill] sm:$0xff]  ;;  %v17551_v11 = vld [vmem:[#allocation51_spill] sm:$0xff] }
 0x162   : > { %8527 = vmatpush1.bf16.msk.msra.mxu1 %vm8526_vm3, %v9706_v49  ;;  %vm8272_vm4 = vmpackc.low %vm17532_vm0, %vm17530_vm8  ;;  %3928 = vmatprep.mubr.f32.mxu0 %v3639_v54  ;;  %vm17538_vm3 = vcmp.eq.s32.totalorder %v17531_v9, %v10408_v14  ;;  %vm17540_vm0 = vcmp.eq.s32.totalorder %v17539_v53, %v10405_v41  ;;  %v17549_v9 = vld [vmem:[#allocation50_spill] sm:$0xff] }
 0x163   : > { %8273 = vmatprep.subr.msk.bf16.mxu0 %vm8272_vm4, %v9706_v49  ;;  %vm8528_vm6 = vmpackc.low %vm17534_vm2, %vm17533_vm10  ;;  %4308 = vmatprep.mubr.f32.mxu1 %v3639_v54  ;;  %v17541_v54 = vld [vmem:[#allocation49_spill] sm:$0xff]  ;;  %vm17543_vm2 = vcmp.eq.s32.totalorder %v17539_v53, %v10411_v36 }
 0x164   : > { %8529 = vmatprep.subr.msk.bf16.mxu1 %vm8528_vm6, %v9706_v49  ;;  %vm8274_vm11 = vmpackc.low %vm17536_vm9, %vm17535_vm12  ;;  %vm17542_vm4 = vcmp.eq.s32.totalorder %v17541_v54, %v10405_v41  ;;  %vm17544_vm6 = vcmp.eq.s32.totalorder %v17541_v54, %v10411_v36  ;;  %vm17545_vm9 = vcmp.eq.s32.totalorder %v17539_v53, %v10402_v13 }
 0x165   : > { %8275 = vmatpush1.bf16.msk.msra.mxu0 %vm8274_vm11, %v9706_v49  ;;  %vm8530_vm8 = vmpackc.low %vm17538_vm3, %vm17537_vm1  ;;  %vm17546_vm11 = vcmp.eq.s32.totalorder %v17541_v54, %v10402_v13  ;;  %vm17547_vm3 = vcmp.eq.s32.totalorder %v17539_v53, %v10408_v14  ;;  %v17561_v53 = vld [vmem:[#allocation53_spill] sm:$0xff] }
 0x166   : > { %8531 = vmatpush1.bf16.msk.msra.mxu1 %vm8530_vm8, %v9706_v49  ;;  %vm8276_vm10 = vmpackc.low %vm17542_vm4, %vm17540_vm0  ;;  %vm17548_vm8 = vcmp.eq.s32.totalorder %v17541_v54, %v10408_v14  ;;  %vm17550_vm4 = vcmp.eq.s32.totalorder %v17549_v9, %v10405_v41  ;;  %v17559_v54 = vld [vmem:[#allocation52_spill] sm:$0xff] }
 0x167   : > { %8277 = vmatprep.subr.msk.bf16.mxu0 %vm8276_vm10, %v9706_v49  ;;  %vm8532_vm12 = vmpackc.low %vm17544_vm6, %vm17543_vm2  ;;  %vm17552_vm10 = vcmp.eq.s32.totalorder %v17551_v11, %v10405_v41  ;;  %vm17553_vm6 = vcmp.eq.s32.totalorder %v17549_v9, %v10411_v36 }
 0x168   : > { %8533 = vmatprep.subr.msk.bf16.mxu1 %vm8532_vm12, %v9706_v49  ;;  %vm8278_vm1 = vmpackc.low %vm17546_vm11, %vm17545_vm9  ;;  %vm17554_vm12 = vcmp.eq.s32.totalorder %v17551_v11, %v10411_v36  ;;  %vm17555_vm11 = vcmp.eq.s32.totalorder %v17549_v9, %v10402_v13 }
 0x169   : > { %8279 = vmatpush1.bf16.msk.msra.mxu0 %vm8278_vm1, %v9706_v49  ;;  %vm8534_vm0 = vmpackc.low %vm17548_vm8, %vm17547_vm3  ;;  %vm17556_vm1 = vcmp.eq.s32.totalorder %v17551_v11, %v10402_v13  ;;  %vm17557_vm8 = vcmp.eq.s32.totalorder %v17549_v9, %v10408_v14  ;;  %v17571_v9 = vld [vmem:[#allocation55_spill] sm:$0xff] }
 0x16a   : > { %8535 = vmatpush1.bf16.msk.msra.mxu1 %vm8534_vm0, %v9706_v49  ;;  %vm8280_vm2 = vmpackc.low %vm17552_vm10, %vm17550_vm4  ;;  %vm17558_vm0 = vcmp.eq.s32.totalorder %v17551_v11, %v10408_v14  ;;  %vm17560_vm10 = vcmp.eq.s32.totalorder %v17559_v54, %v10405_v41  ;;  %v17569_v11 = vld [vmem:[#allocation54_spill] sm:$0xff] }
 0x16b   : > { %8281 = vmatprep.subr.msk.bf16.mxu0 %vm8280_vm2, %v9706_v49  ;;  %vm8536_vm9 = vmpackc.low %vm17554_vm12, %vm17553_vm6  ;;  %vm17562_vm2 = vcmp.eq.s32.totalorder %v17561_v53, %v10405_v41  ;;  %vm17563_vm12 = vcmp.eq.s32.totalorder %v17559_v54, %v10411_v36 }
 0x16c   : > { %8537 = vmatprep.subr.msk.bf16.mxu1 %vm8536_vm9, %v9706_v49  ;;  %vm8282_vm3 = vmpackc.low %vm17556_vm1, %vm17555_vm11  ;;  %vm17564_vm9 = vcmp.eq.s32.totalorder %v17561_v53, %v10411_v36  ;;  %vm17565_vm1 = vcmp.eq.s32.totalorder %v17559_v54, %v10402_v13 }
 0x16d   : > { %8283 = vmatpush1.bf16.msk.msra.mxu0 %vm8282_vm3, %v9706_v49  ;;  %vm8538_vm4 = vmpackc.low %vm17558_vm0, %vm17557_vm8  ;;  %vm17566_vm3 = vcmp.eq.s32.totalorder %v17561_v53, %v10402_v13  ;;  %vm17567_vm0 = vcmp.eq.s32.totalorder %v17559_v54, %v10408_v14  ;;  %v17581_v54 = vld [vmem:[#allocation57_spill] sm:$0xff] }
 0x16e   : > { %8539 = vmatpush1.bf16.msk.msra.mxu1 %vm8538_vm4, %v9706_v49  ;;  %vm8284_vm6 = vmpackc.low %vm17562_vm2, %vm17560_vm10  ;;  %vm17568_vm4 = vcmp.eq.s32.totalorder %v17561_v53, %v10408_v14  ;;  %vm17570_vm2 = vcmp.eq.s32.totalorder %v17569_v11, %v10405_v41  ;;  %v17579_v53 = vld [vmem:[#allocation56_spill] sm:$0xff] }
 0x16f   : > { %8285 = vmatprep.subr.msk.bf16.mxu0 %vm8284_vm6, %v9706_v49  ;;  %vm8540_vm11 = vmpackc.low %vm17564_vm9, %vm17563_vm12  ;;  %vm17572_vm6 = vcmp.eq.s32.totalorder %v17571_v9, %v10405_v41  ;;  %vm17573_vm9 = vcmp.eq.s32.totalorder %v17569_v11, %v10411_v36 }
 0x170   : > { %8541 = vmatprep.subr.msk.bf16.mxu1 %vm8540_vm11, %v9706_v49  ;;  %vm8286_vm8 = vmpackc.low %vm17566_vm3, %vm17565_vm1  ;;  %vm17574_vm11 = vcmp.eq.s32.totalorder %v17571_v9, %v10411_v36  ;;  %vm17575_vm3 = vcmp.eq.s32.totalorder %v17569_v11, %v10402_v13 }
 0x171   : > { %8287 = vmatpush1.bf16.msk.msra.mxu0 %vm8286_vm8, %v9706_v49  ;;  %vm8542_vm10 = vmpackc.low %vm17568_vm4, %vm17567_vm0  ;;  %vm17576_vm8 = vcmp.eq.s32.totalorder %v17571_v9, %v10402_v13  ;;  %vm17577_vm4 = vcmp.eq.s32.totalorder %v17569_v11, %v10408_v14  ;;  %v17591_v11 = vld [vmem:[#allocation59_spill] sm:$0xff] }
 0x172   : > { %8543 = vmatpush1.bf16.msk.msra.mxu1 %vm8542_vm10, %v9706_v49  ;;  %vm8288_vm12 = vmpackc.low %vm17572_vm6, %vm17570_vm2  ;;  %vm17578_vm10 = vcmp.eq.s32.totalorder %v17571_v9, %v10408_v14  ;;  %vm17580_vm6 = vcmp.eq.s32.totalorder %v17579_v53, %v10405_v41  ;;  %v17589_v9 = vld [vmem:[#allocation58_spill] sm:$0xff] }
 0x173   : > { %8289 = vmatprep.subr.msk.bf16.mxu0 %vm8288_vm12, %v9706_v49  ;;  %vm8544_vm1 = vmpackc.low %vm17574_vm11, %vm17573_vm9  ;;  %vm17582_vm12 = vcmp.eq.s32.totalorder %v17581_v54, %v10405_v41  ;;  %vm17583_vm11 = vcmp.eq.s32.totalorder %v17579_v53, %v10411_v36 }
 0x174   : > { %8545 = vmatprep.subr.msk.bf16.mxu1 %vm8544_vm1, %v9706_v49  ;;  %vm8290_vm0 = vmpackc.low %vm17576_vm8, %vm17575_vm3  ;;  %vm17584_vm1 = vcmp.eq.s32.totalorder %v17581_v54, %v10411_v36  ;;  %vm17585_vm8 = vcmp.eq.s32.totalorder %v17579_v53, %v10402_v13 }
 0x175   : > { %8291 = vmatpush1.bf16.msk.msra.mxu0 %vm8290_vm0, %v9706_v49  ;;  %vm8546_vm2 = vmpackc.low %vm17578_vm10, %vm17577_vm4  ;;  %vm17586_vm0 = vcmp.eq.s32.totalorder %v17581_v54, %v10402_v13  ;;  %vm17587_vm10 = vcmp.eq.s32.totalorder %v17579_v53, %v10408_v14  ;;  %v17601_v53 = vld [vmem:[#allocation61_spill] sm:$0xff] }
 0x176   : > { %8547 = vmatpush1.bf16.msk.msra.mxu1 %vm8546_vm2, %v9706_v49  ;;  %vm8292_vm9 = vmpackc.low %vm17582_vm12, %vm17580_vm6  ;;  %vm17588_vm2 = vcmp.eq.s32.totalorder %v17581_v54, %v10408_v14  ;;  %vm17590_vm12 = vcmp.eq.s32.totalorder %v17589_v9, %v10405_v41  ;;  %v17599_v54 = vld [vmem:[#allocation60_spill] sm:$0xff] }
 0x177   : > { %8293 = vmatprep.subr.msk.bf16.mxu0 %vm8292_vm9, %v9706_v49  ;;  %vm8548_vm3 = vmpackc.low %vm17584_vm1, %vm17583_vm11  ;;  %vm17592_vm9 = vcmp.eq.s32.totalorder %v17591_v11, %v10405_v41  ;;  %vm17593_vm1 = vcmp.eq.s32.totalorder %v17589_v9, %v10411_v36 }
 0x178   : > { %8549 = vmatprep.subr.msk.bf16.mxu1 %vm8548_vm3, %v9706_v49  ;;  %vm8294_vm4 = vmpackc.low %vm17586_vm0, %vm17585_vm8  ;;  %vm17594_vm3 = vcmp.eq.s32.totalorder %v17591_v11, %v10411_v36  ;;  %vm17595_vm0 = vcmp.eq.s32.totalorder %v17589_v9, %v10402_v13 }
 0x179   : > { %8295 = vmatpush1.bf16.msk.msra.mxu0 %vm8294_vm4, %v9706_v49  ;;  %vm8550_vm6 = vmpackc.low %vm17588_vm2, %vm17587_vm10  ;;  %vm17596_vm4 = vcmp.eq.s32.totalorder %v17591_v11, %v10402_v13  ;;  %vm17597_vm2 = vcmp.eq.s32.totalorder %v17589_v9, %v10408_v14  ;;  %v17611_v9 = vld [vmem:[#allocation63_spill] sm:$0xff] }
 0x17a   : > { %8551 = vmatpush1.bf16.msk.msra.mxu1 %vm8550_vm6, %v9706_v49  ;;  %vm8296_vm11 = vmpackc.low %vm17592_vm9, %vm17590_vm12  ;;  %vm17598_vm6 = vcmp.eq.s32.totalorder %v17591_v11, %v10408_v14  ;;  %vm17600_vm9 = vcmp.eq.s32.totalorder %v17599_v54, %v10405_v41  ;;  %v17609_v11 = vld [vmem:[#allocation62_spill] sm:$0xff] }
 0x17b   : > { %8297 = vmatprep.subr.msk.bf16.mxu0 %vm8296_vm11, %v9706_v49  ;;  %vm8552_vm8 = vmpackc.low %vm17594_vm3, %vm17593_vm1  ;;  %vm17602_vm11 = vcmp.eq.s32.totalorder %v17601_v53, %v10405_v41  ;;  %vm17603_vm3 = vcmp.eq.s32.totalorder %v17599_v54, %v10411_v36 }
 0x17c   : > { %8553 = vmatprep.subr.msk.bf16.mxu1 %vm8552_vm8, %v9706_v49  ;;  %vm8298_vm10 = vmpackc.low %vm17596_vm4, %vm17595_vm0  ;;  %vm17604_vm8 = vcmp.eq.s32.totalorder %v17601_v53, %v10411_v36  ;;  %vm17605_vm4 = vcmp.eq.s32.totalorder %v17599_v54, %v10402_v13 }
 0x17d   : > { %8299 = vmatpush1.bf16.msk.msra.mxu0 %vm8298_vm10, %v9706_v49  ;;  %vm8554_vm12 = vmpackc.low %vm17598_vm6, %vm17597_vm2  ;;  %vm17606_vm10 = vcmp.eq.s32.totalorder %v17601_v53, %v10402_v13  ;;  %vm17607_vm6 = vcmp.eq.s32.totalorder %v17599_v54, %v10408_v14  ;;  %v17621_v54 = vld [vmem:[#allocation65_spill] sm:$0xff] }
 0x17e   : > { %8555 = vmatpush1.bf16.msk.msra.mxu1 %vm8554_vm12, %v9706_v49  ;;  %vm8300_vm1 = vmpackc.low %vm17602_vm11, %vm17600_vm9  ;;  %vm17608_vm12 = vcmp.eq.s32.totalorder %v17601_v53, %v10408_v14  ;;  %vm17610_vm11 = vcmp.eq.s32.totalorder %v17609_v11, %v10405_v41  ;;  %v17619_v53 = vld [vmem:[#allocation64_spill] sm:$0xff] }
 0x17f   : > { %8301 = vmatprep.subr.msk.bf16.mxu0 %vm8300_vm1, %v9706_v49  ;;  %vm8556_vm0 = vmpackc.low %vm17604_vm8, %vm17603_vm3  ;;  %vm17612_vm1 = vcmp.eq.s32.totalorder %v17611_v9, %v10405_v41  ;;  %vm17613_vm8 = vcmp.eq.s32.totalorder %v17609_v11, %v10411_v36 }
 0x180   : > { %8557 = vmatprep.subr.msk.bf16.mxu1 %vm8556_vm0, %v9706_v49  ;;  %vm8302_vm2 = vmpackc.low %vm17606_vm10, %vm17605_vm4  ;;  %vm17614_vm0 = vcmp.eq.s32.totalorder %v17611_v9, %v10411_v36  ;;  %vm17615_vm10 = vcmp.eq.s32.totalorder %v17609_v11, %v10402_v13 }
 0x181   : > { %8303 = vmatpush1.bf16.msk.msra.mxu0 %vm8302_vm2, %v9706_v49  ;;  %vm8558_vm9 = vmpackc.low %vm17608_vm12, %vm17607_vm6  ;;  %vm17616_vm2 = vcmp.eq.s32.totalorder %v17611_v9, %v10402_v13  ;;  %vm17617_vm12 = vcmp.eq.s32.totalorder %v17609_v11, %v10408_v14  ;;  %v17631_v11 = vld [vmem:[#allocation67_spill] sm:$0xff] }
 0x182   : > { %8559 = vmatpush1.bf16.msk.msra.mxu1 %vm8558_vm9, %v9706_v49  ;;  %vm8304_vm3 = vmpackc.low %vm17612_vm1, %vm17610_vm11  ;;  %vm17618_vm9 = vcmp.eq.s32.totalorder %v17611_v9, %v10408_v14  ;;  %vm17620_vm1 = vcmp.eq.s32.totalorder %v17619_v53, %v10405_v41  ;;  %v17629_v9 = vld [vmem:[#allocation66_spill] sm:$0xff] }
 0x183   : > { %8305 = vmatprep.subr.msk.bf16.mxu0 %vm8304_vm3, %v9706_v49  ;;  %vm8560_vm4 = vmpackc.low %vm17614_vm0, %vm17613_vm8  ;;  %vm17622_vm3 = vcmp.eq.s32.totalorder %v17621_v54, %v10405_v41  ;;  %vm17623_vm0 = vcmp.eq.s32.totalorder %v17619_v53, %v10411_v36 }
 0x184   : > { %8561 = vmatprep.subr.msk.bf16.mxu1 %vm8560_vm4, %v9706_v49  ;;  %vm8306_vm6 = vmpackc.low %vm17616_vm2, %vm17615_vm10  ;;  %vm17624_vm4 = vcmp.eq.s32.totalorder %v17621_v54, %v10411_v36  ;;  %vm17625_vm2 = vcmp.eq.s32.totalorder %v17619_v53, %v10402_v13 }
 0x185   : > { %8307 = vmatpush1.bf16.msk.msra.mxu0 %vm8306_vm6, %v9706_v49  ;;  %vm8562_vm11 = vmpackc.low %vm17618_vm9, %vm17617_vm12  ;;  %vm17626_vm6 = vcmp.eq.s32.totalorder %v17621_v54, %v10402_v13  ;;  %vm17627_vm9 = vcmp.eq.s32.totalorder %v17619_v53, %v10408_v14  ;;  %v17639_v53 = vld [vmem:[#allocation68_spill] sm:$0xff] }
 0x186   : > { %8563 = vmatpush1.bf16.msk.msra.mxu1 %vm8562_vm11, %v9706_v49  ;;  %vm8308_vm8 = vmpackc.low %vm17622_vm3, %vm17620_vm1  ;;  %vm17628_vm11 = vcmp.eq.s32.totalorder %v17621_v54, %v10408_v14  ;;  %vm17630_vm3 = vcmp.eq.s32.totalorder %v17629_v9, %v10405_v41  ;;  %v3638_v54 = vld [vmem:[%s9962_s30 + $0x20] sm:$0xff] }
 0x187   : > { %8309 = vmatprep.subr.msk.bf16.mxu0 %vm8308_vm8, %v9706_v49  ;;  %vm8564_vm10 = vmpackc.low %vm17624_vm4, %vm17623_vm0  ;;  %vm17632_vm8 = vcmp.eq.s32.totalorder %v17631_v11, %v10405_v41  ;;  %vm17633_vm4 = vcmp.eq.s32.totalorder %v17629_v9, %v10411_v36 }
 0x188   : > { %8565 = vmatprep.subr.msk.bf16.mxu1 %vm8564_vm10, %v9706_v49  ;;  %vm8310_vm12 = vmpackc.low %vm17626_vm6, %vm17625_vm2  ;;  %vm17634_vm10 = vcmp.eq.s32.totalorder %v17631_v11, %v10411_v36  ;;  %vm17635_vm6 = vcmp.eq.s32.totalorder %v17629_v9, %v10402_v13 }
 0x189   : > { %8311 = vmatpush1.bf16.msk.msra.mxu0 %vm8310_vm12, %v9706_v49  ;;  %vm8566_vm1 = vmpackc.low %vm17628_vm11, %vm17627_vm9  ;;  %vm17636_vm12 = vcmp.eq.s32.totalorder %v17631_v11, %v10402_v13  ;;  %vm17637_vm11 = vcmp.eq.s32.totalorder %v17629_v9, %v10408_v14  ;;  %v3646_v9 = vld [vmem:[%s9962_s30 + $0x60] sm:$0xff] }
 0x18a   : > { %8567 = vmatpush1.bf16.msk.msra.mxu1 %vm8566_vm1, %v9706_v49  ;;  %vm8312_vm0 = vmpackc.low %vm17632_vm8, %vm17630_vm3  ;;  %vm17638_vm1 = vcmp.eq.s32.totalorder %v17631_v11, %v10408_v14  ;;  %vm17640_vm8 = vcmp.eq.s32.totalorder %v17639_v53, %v10405_v41  ;;  %v3647_v11 = vld [vmem:[%s9962_s30 + $0x68] sm:$0xff] }
 0x18b   : > { %8313 = vmatprep.subr.msk.bf16.mxu0 %vm8312_vm0, %v9706_v49  ;;  %vm8568_vm2 = vmpackc.low %vm17634_vm10, %vm17633_vm4  ;;  %vm17642_vm0 = vcmp.eq.s32.totalorder %v17641_v10, %v10405_v41  ;;  %vm17643_vm10 = vcmp.eq.s32.totalorder %v17639_v53, %v10411_v36 }
 0x18c   : > { %8569 = vmatprep.subr.msk.bf16.mxu1 %vm8568_vm2, %v9706_v49  ;;  %vm8314_vm9 = vmpackc.low %vm17636_vm12, %vm17635_vm6  ;;  %vm17644_vm2 = vcmp.eq.s32.totalorder %v17641_v10, %v10411_v36  ;;  %vm17645_vm12 = vcmp.eq.s32.totalorder %v17639_v53, %v10402_v13 }
 0x18d   : > { %8315 = vmatpush1.bf16.msk.msra.mxu0 %vm8314_vm9, %v9706_v49  ;;  %vm8570_vm3 = vmpackc.low %vm17638_vm1, %vm17637_vm11  ;;  %vm17646_vm9 = vcmp.eq.s32.totalorder %v17641_v10, %v10402_v13  ;;  %vm17647_vm1 = vcmp.eq.s32.totalorder %v17639_v53, %v10408_v14  ;;  %v17661_v53 = vld [vmem:[#allocation73_spill] sm:$0xff] }
 0x18e   : > { %8571 = vmatpush1.bf16.msk.msra.mxu1 %vm8570_vm3, %v9706_v49  ;;  %vm8316_vm4 = vmpackc.low %vm17642_vm0, %vm17640_vm8  ;;  %vm17648_vm3 = vcmp.eq.s32.totalorder %v17641_v10, %v10408_v14  ;;  %vm17650_vm0 = vcmp.eq.s32.totalorder %v17649_v12, %v10405_v41  ;;  %v17659_v10 = vld [vmem:[#allocation72_spill] sm:$0xff] }
 0x18f   : > { %8317 = vmatprep.subr.msk.bf16.mxu0 %vm8316_vm4, %v9706_v49  ;;  %vm8572_vm6 = vmpackc.low %vm17644_vm2, %vm17643_vm10  ;;  %vm17652_vm4 = vcmp.eq.s32.totalorder %v17651_v46, %v10405_v41  ;;  %vm17653_vm2 = vcmp.eq.s32.totalorder %v17649_v12, %v10411_v36 }
 0x190   : > { %8573 = vmatprep.subr.msk.bf16.mxu1 %vm8572_vm6, %v9706_v49  ;;  %3929 = vmatmul.mubr.f32.vlgmr.msra.gmra.mrb[0].mxu0 %v3638_v54  ;;  %vm8318_vm11 = vmpackc.low %vm17646_vm9, %vm17645_vm12  ;;  %vm17654_vm6 = vcmp.eq.s32.totalorder %v17651_v46, %v10411_v36  ;;  %vm17655_vm9 = vcmp.eq.s32.totalorder %v17649_v12, %v10402_v13 }
 0x191   : > { %8319 = vmatpush1.bf16.msk.msra.mxu0 %vm8318_vm11, %v9706_v49  ;;  %4309 = vmatmul.mubr.f32.vlgmr.msra.gmra.mrb[0].mxu1 %v3638_v54  ;;  %vm8574_vm8 = vmpackc.low %vm17648_vm3, %vm17647_vm1  ;;  %v3655_v54 = vld [vmem:[%s9962_s30 + $0xa8] sm:$0xff]  ;;  %vm17656_vm11 = vcmp.eq.s32.totalorder %v17651_v46, %v10402_v13  ;;  %vm17657_vm3 = vcmp.eq.s32.totalorder %v17649_v12, %v10408_v14  ;;  %v17671_v12 = vld [vmem:[#allocation75_spill] sm:$0xff] }
 0x192   : > { %8575 = vmatpush1.bf16.msk.msra.mxu1 %vm8574_vm8, %v9706_v49  ;;  %vm8320_vm10 = vmpackc.low %vm17652_vm4, %vm17650_vm0  ;;  %3934 = vmatprep.mubr.f32.mxu0 %v3647_v11  ;;  %vm17658_vm8 = vcmp.eq.s32.totalorder %v17651_v46, %v10408_v14  ;;  %vm17660_vm4 = vcmp.eq.s32.totalorder %v17659_v10, %v10405_v41  ;;  %v17669_v46 = vld [vmem:[#allocation74_spill] sm:$0xff] }
 0x193   : > { %8321 = vmatprep.subr.msk.bf16.mxu0 %vm8320_vm10, %v9706_v49  ;;  %vm8576_vm12 = vmpackc.low %vm17654_vm6, %vm17653_vm2  ;;  %4314 = vmatprep.mubr.f32.mxu1 %v3647_v11  ;;  %v3654_v11 = vld [vmem:[%s9962_s30 + $0xa0] sm:$0xff]  ;;  %vm17662_vm10 = vcmp.eq.s32.totalorder %v17661_v53, %v10405_v41  ;;  %vm17663_vm6 = vcmp.eq.s32.totalorder %v17659_v10, %v10411_v36 }
 0x194   : > { %8577 = vmatprep.subr.msk.bf16.mxu1 %vm8576_vm12, %v9706_v49  ;;  %vm8322_vm1 = vmpackc.low %vm17656_vm11, %vm17655_vm9  ;;  %3935 = vmatmul.mubr.f32.gmra.mrb[2].mxu0 %v3646_v9  ;;  %vm17664_vm12 = vcmp.eq.s32.totalorder %v17661_v53, %v10411_v36  ;;  %vm17665_vm11 = vcmp.eq.s32.totalorder %v17659_v10, %v10402_v13 }
 0x195   : > { %8323 = vmatpush1.bf16.msk.msra.mxu0 %vm8322_vm1, %v9706_v49  ;;  %vm8578_vm0 = vmpackc.low %vm17658_vm8, %vm17657_vm3  ;;  %4315 = vmatmul.mubr.f32.gmra.mrb[2].mxu1 %v3646_v9  ;;  %v3663_v9 = vld [vmem:[%s9962_s30 + $0xe8] sm:$0xff]  ;;  %vm17666_vm1 = vcmp.eq.s32.totalorder %v17661_v53, %v10402_v13  ;;  %vm17667_vm8 = vcmp.eq.s32.totalorder %v17659_v10, %v10408_v14  ;;  %v17681_v10 = vld [vmem:[#allocation77_spill] sm:$0xff] }
 0x196   : > { %8579 = vmatpush1.bf16.msk.msra.mxu1 %vm8578_vm0, %v9706_v49  ;;  %vm8324_vm2 = vmpackc.low %vm17662_vm10, %vm17660_vm4  ;;  %3940 = vmatprep.mubr.f32.mxu0 %v3655_v54  ;;  %vm17668_vm0 = vcmp.eq.s32.totalorder %v17661_v53, %v10408_v14  ;;  %vm17670_vm10 = vcmp.eq.s32.totalorder %v17669_v46, %v10405_v41  ;;  %v17679_v53 = vld [vmem:[#allocation76_spill] sm:$0xff] }
 0x197   : > { %8325 = vmatprep.subr.msk.bf16.mxu0 %vm8324_vm2, %v9706_v49  ;;  %vm8580_vm9 = vmpackc.low %vm17664_vm12, %vm17663_vm6  ;;  %4320 = vmatprep.mubr.f32.mxu1 %v3655_v54  ;;  %v3662_v54 = vld [vmem:[%s9962_s30 + $0xe0] sm:$0xff]  ;;  %vm17672_vm2 = vcmp.eq.s32.totalorder %v17671_v12, %v10405_v41  ;;  %vm17673_vm12 = vcmp.eq.s32.totalorder %v17669_v46, %v10411_v36 }
 0x198   : > { %8581 = vmatprep.subr.msk.bf16.mxu1 %vm8580_vm9, %v9706_v49  ;;  %vm8326_vm3 = vmpackc.low %vm17666_vm1, %vm17665_vm11  ;;  %3941 = vmatmul.mubr.f32.gmra.mrb[4].mxu0 %v3654_v11  ;;  %vm17674_vm9 = vcmp.eq.s32.totalorder %v17671_v12, %v10411_v36  ;;  %vm17675_vm1 = vcmp.eq.s32.totalorder %v17669_v46, %v10402_v13 }
 0x199   : > { %8327 = vmatpush1.bf16.msk.msra.mxu0 %vm8326_vm3, %v9706_v49  ;;  %vm8582_vm4 = vmpackc.low %vm17668_vm0, %vm17667_vm8  ;;  %4321 = vmatmul.mubr.f32.gmra.mrb[4].mxu1 %v3654_v11  ;;  %v3671_v11 = vld [vmem:[%s9962_s30 + $0x128] sm:$0xff]  ;;  %vm17676_vm3 = vcmp.eq.s32.totalorder %v17671_v12, %v10402_v13  ;;  %vm17677_vm0 = vcmp.eq.s32.totalorder %v17669_v46, %v10408_v14 }
 0x19a   : > { %8583 = vmatpush1.bf16.msk.msra.mxu1 %vm8582_vm4, %v9706_v49  ;;  %vm8328_vm6 = vmpackc.low %vm17672_vm2, %vm17670_vm10  ;;  %3946 = vmatprep.mubr.f32.mxu0 %v3663_v9  ;;  %vm17678_vm4 = vcmp.eq.s32.totalorder %v17671_v12, %v10408_v14  ;;  %vm17680_vm2 = vcmp.eq.s32.totalorder %v17679_v53, %v10405_v41  ;;  %v17691_v12 = vld [vmem:[#allocation79_spill] sm:$0xff] }
 0x19b   : > { %8329 = vmatprep.subr.msk.bf16.mxu0 %vm8328_vm6, %v9706_v49  ;;  %vm8584_vm11 = vmpackc.low %vm17674_vm9, %vm17673_vm12  ;;  %4326 = vmatprep.mubr.f32.mxu1 %v3663_v9  ;;  %v3670_v9 = vld [vmem:[%s9962_s30 + $0x120] sm:$0xff]  ;;  %vm17682_vm6 = vcmp.eq.s32.totalorder %v17681_v10, %v10405_v41  ;;  %vm17683_vm9 = vcmp.eq.s32.totalorder %v17679_v53, %v10411_v36 }
 0x19c   : > { %8585 = vmatprep.subr.msk.bf16.mxu1 %vm8584_vm11, %v9706_v49  ;;  %vm8330_vm8 = vmpackc.low %vm17676_vm3, %vm17675_vm1  ;;  %3947 = vmatmul.mubr.f32.gmra.mrb[6].mxu0 %v3662_v54  ;;  %vm17684_vm11 = vcmp.eq.s32.totalorder %v17681_v10, %v10411_v36  ;;  %vm17685_vm3 = vcmp.eq.s32.totalorder %v17679_v53, %v10402_v13 }
 0x19d   : > { %8331 = vmatpush1.bf16.msk.msra.mxu0 %vm8330_vm8, %v9706_v49  ;;  %vm8586_vm10 = vmpackc.low %vm17678_vm4, %vm17677_vm0  ;;  %4327 = vmatmul.mubr.f32.gmra.mrb[6].mxu1 %v3662_v54  ;;  %v3641_v54 = vld [vmem:[%s9962_s30 + $0x38] sm:$0xff]  ;;  %vm17686_vm8 = vcmp.eq.s32.totalorder %v17681_v10, %v10402_v13  ;;  %vm17687_vm4 = vcmp.eq.s32.totalorder %v17679_v53, %v10408_v14 }
 0x19e   : > { %8587 = vmatpush1.bf16.msk.msra.mxu1 %vm8586_vm10, %v9706_v49  ;;  %vm8332_vm12 = vmpackc.low %vm17682_vm6, %vm17680_vm2  ;;  %3952 = vmatprep.mubr.f32.mxu0 %v3671_v11  ;;  %vm17688_vm10 = vcmp.eq.s32.totalorder %v17681_v10, %v10408_v14 }
 0x19f   : > { %8333 = vmatprep.subr.msk.bf16.mxu0 %vm8332_vm12, %v9706_v49  ;;  %vm8588_vm1 = vmpackc.low %vm17684_vm11, %vm17683_vm9  ;;  %4332 = vmatprep.mubr.f32.mxu1 %v3671_v11  ;;  %v17689_v11 = vld [vmem:[#allocation78_spill] sm:$0xff]  ;;  %vm17692_vm12 = vcmp.eq.s32.totalorder %v17691_v12, %v10405_v41 }
 0x1a0   : > { %8589 = vmatprep.subr.msk.bf16.mxu1 %vm8588_vm1, %v9706_v49  ;;  %vm8334_vm0 = vmpackc.low %vm17686_vm8, %vm17685_vm3  ;;  %3953 = vmatmul.mubr.f32.gmra.mrb[8].mxu0 %v3670_v9  ;;  %vm17690_vm6 = vcmp.eq.s32.totalorder %v17689_v11, %v10405_v41  ;;  %vm17693_vm11 = vcmp.eq.s32.totalorder %v17689_v11, %v10411_v36  ;;  %vm17694_vm1 = vcmp.eq.s32.totalorder %v17691_v12, %v10411_v36 }
 0x1a1   : > { %8335 = vmatpush1.bf16.msk.msra.mxu0 %vm8334_vm0, %v9706_v49  ;;  %vm8590_vm2 = vmpackc.low %vm17688_vm10, %vm17687_vm4  ;;  %4333 = vmatmul.mubr.f32.gmra.mrb[8].mxu1 %v3670_v9  ;;  %vm17695_vm8 = vcmp.eq.s32.totalorder %v17689_v11, %v10402_v13  ;;  %vm17696_vm0 = vcmp.eq.s32.totalorder %v17691_v12, %v10402_v13  ;;  %vm17697_vm10 = vcmp.eq.s32.totalorder %v17689_v11, %v10408_v14  ;;  %v17699_v9 = vld [vmem:[#allocation80_spill] sm:$0xff]  ;;  %v17711_v11 = vld [vmem:[#allocation83_spill] sm:$0xff] }
 0x1a2   : > { %8591 = vmatpush1.bf16.msk.msra.mxu1 %vm8590_vm2, %v9706_v49  ;;  %vm8336_vm9 = vmpackc.low %vm17692_vm12, %vm17690_vm6  ;;  %4023 = vmatprep.mubr.f32.mxu0 %v3641_v54  ;;  %vm17698_vm2 = vcmp.eq.s32.totalorder %v17691_v12, %v10408_v14  ;;  %vm17700_vm12 = vcmp.eq.s32.totalorder %v17699_v9, %v10405_v41  ;;  %v17709_v12 = vld [vmem:[#allocation82_spill] sm:$0xff] }
 0x1a3   : > { %8337 = vmatprep.subr.msk.bf16.mxu0 %vm8336_vm9, %v9706_v49  ;;  %vm8592_vm3 = vmpackc.low %vm17694_vm1, %vm17693_vm11  ;;  %4403 = vmatprep.mubr.f32.mxu1 %v3641_v54  ;;  %v17701_v54 = vld [vmem:[#allocation81_spill] sm:$0xff]  ;;  %vm17703_vm1 = vcmp.eq.s32.totalorder %v17699_v9, %v10411_v36 }
 0x1a4   : > { %8593 = vmatprep.subr.msk.bf16.mxu1 %vm8592_vm3, %v9706_v49  ;;  %vm8338_vm4 = vmpackc.low %vm17696_vm0, %vm17695_vm8  ;;  %vm17702_vm9 = vcmp.eq.s32.totalorder %v17701_v54, %v10405_v41  ;;  %vm17704_vm3 = vcmp.eq.s32.totalorder %v17701_v54, %v10411_v36  ;;  %vm17705_vm0 = vcmp.eq.s32.totalorder %v17699_v9, %v10402_v13 }
 0x1a5   : > { %8339 = vmatpush1.bf16.msk.msra.mxu0 %vm8338_vm4, %v9706_v49  ;;  %vm8594_vm6 = vmpackc.low %vm17698_vm2, %vm17697_vm10  ;;  %vm17706_vm4 = vcmp.eq.s32.totalorder %v17701_v54, %v10402_v13  ;;  %vm17707_vm2 = vcmp.eq.s32.totalorder %v17699_v9, %v10408_v14  ;;  %v17721_v9 = vld [vmem:[#allocation85_spill] sm:$0xff] }
 0x1a6   : > { %8595 = vmatpush1.bf16.msk.msra.mxu1 %vm8594_vm6, %v9706_v49  ;;  %vm8340_vm11 = vmpackc.low %vm17702_vm9, %vm17700_vm12  ;;  %vm17708_vm6 = vcmp.eq.s32.totalorder %v17701_v54, %v10408_v14  ;;  %vm17710_vm9 = vcmp.eq.s32.totalorder %v17709_v12, %v10405_v41  ;;  %v17719_v54 = vld [vmem:[#allocation84_spill] sm:$0xff] }
 0x1a7   : > { %8341 = vmatprep.subr.msk.bf16.mxu0 %vm8340_vm11, %v9706_v49  ;;  %vm8596_vm8 = vmpackc.low %vm17704_vm3, %vm17703_vm1  ;;  %vm17712_vm11 = vcmp.eq.s32.totalorder %v17711_v11, %v10405_v41  ;;  %vm17713_vm3 = vcmp.eq.s32.totalorder %v17709_v12, %v10411_v36 }
 0x1a8   : > { %8597 = vmatprep.subr.msk.bf16.mxu1 %vm8596_vm8, %v9706_v49  ;;  %vm8342_vm10 = vmpackc.low %vm17706_vm4, %vm17705_vm0  ;;  %vm17714_vm8 = vcmp.eq.s32.totalorder %v17711_v11, %v10411_v36  ;;  %vm17715_vm4 = vcmp.eq.s32.totalorder %v17709_v12, %v10402_v13 }
 0x1a9   : > { %8343 = vmatpush1.bf16.msk.msra.mxu0 %vm8342_vm10, %v9706_v49  ;;  %vm8598_vm12 = vmpackc.low %vm17708_vm6, %vm17707_vm2  ;;  %vm17716_vm10 = vcmp.eq.s32.totalorder %v17711_v11, %v10402_v13  ;;  %vm17717_vm6 = vcmp.eq.s32.totalorder %v17709_v12, %v10408_v14  ;;  %v17731_v12 = vld [vmem:[#allocation87_spill] sm:$0xff] }
 0x1aa   : > { %8599 = vmatpush1.bf16.msk.msra.mxu1 %vm8598_vm12, %v9706_v49  ;;  %vm8344_vm1 = vmpackc.low %vm17712_vm11, %vm17710_vm9  ;;  %vm17718_vm12 = vcmp.eq.s32.totalorder %v17711_v11, %v10408_v14  ;;  %vm17720_vm11 = vcmp.eq.s32.totalorder %v17719_v54, %v10405_v41  ;;  %v17729_v11 = vld [vmem:[#allocation86_spill] sm:$0xff] }
 0x1ab   : > { %8345 = vmatprep.subr.msk.bf16.mxu0 %vm8344_vm1, %v9706_v49  ;;  %vm8600_vm0 = vmpackc.low %vm17714_vm8, %vm17713_vm3  ;;  %vm17722_vm1 = vcmp.eq.s32.totalorder %v17721_v9, %v10405_v41  ;;  %vm17723_vm8 = vcmp.eq.s32.totalorder %v17719_v54, %v10411_v36 }
 0x1ac   : > { %8601 = vmatprep.subr.msk.bf16.mxu1 %vm8600_vm0, %v9706_v49  ;;  %vm8346_vm2 = vmpackc.low %vm17716_vm10, %vm17715_vm4  ;;  %vm17724_vm0 = vcmp.eq.s32.totalorder %v17721_v9, %v10411_v36  ;;  %vm17725_vm10 = vcmp.eq.s32.totalorder %v17719_v54, %v10402_v13 }
 0x1ad   : > { %8347 = vmatpush1.bf16.msk.msra.mxu0 %vm8346_vm2, %v9706_v49  ;;  %vm8602_vm9 = vmpackc.low %vm17718_vm12, %vm17717_vm6  ;;  %vm17726_vm2 = vcmp.eq.s32.totalorder %v17721_v9, %v10402_v13  ;;  %vm17727_vm12 = vcmp.eq.s32.totalorder %v17719_v54, %v10408_v14  ;;  %v17741_v54 = vld [vmem:[#allocation89_spill] sm:$0xff] }
 0x1ae   : > { %8603 = vmatpush1.bf16.msk.msra.mxu1 %vm8602_vm9, %v9706_v49  ;;  %vm8348_vm3 = vmpackc.low %vm17722_vm1, %vm17720_vm11  ;;  %vm17728_vm9 = vcmp.eq.s32.totalorder %v17721_v9, %v10408_v14  ;;  %vm17730_vm1 = vcmp.eq.s32.totalorder %v17729_v11, %v10405_v41  ;;  %v17739_v9 = vld [vmem:[#allocation88_spill] sm:$0xff] }
 0x1af   : > { %8349 = vmatprep.subr.msk.bf16.mxu0 %vm8348_vm3, %v9706_v49  ;;  %vm8604_vm4 = vmpackc.low %vm17724_vm0, %vm17723_vm8  ;;  %vm17732_vm3 = vcmp.eq.s32.totalorder %v17731_v12, %v10405_v41  ;;  %vm17733_vm0 = vcmp.eq.s32.totalorder %v17729_v11, %v10411_v36 }
 0x1b0   : > { %8605 = vmatprep.subr.msk.bf16.mxu1 %vm8604_vm4, %v9706_v49  ;;  %vm8350_vm6 = vmpackc.low %vm17726_vm2, %vm17725_vm10  ;;  %vm17734_vm4 = vcmp.eq.s32.totalorder %v17731_v12, %v10411_v36  ;;  %vm17735_vm2 = vcmp.eq.s32.totalorder %v17729_v11, %v10402_v13 }
 0x1b1   : > { %8351 = vmatpush1.bf16.msk.msra.mxu0 %vm8350_vm6, %v9706_v49  ;;  %vm8606_vm11 = vmpackc.low %vm17728_vm9, %vm17727_vm12  ;;  %vm17736_vm6 = vcmp.eq.s32.totalorder %v17731_v12, %v10402_v13  ;;  %vm17737_vm9 = vcmp.eq.s32.totalorder %v17729_v11, %v10408_v14  ;;  %v17751_v11 = vld [vmem:[#allocation91_spill] sm:$0xff] }
 0x1b2   : > { %8607 = vmatpush1.bf16.msk.msra.mxu1 %vm8606_vm11, %v9706_v49  ;;  %vm8352_vm8 = vmpackc.low %vm17732_vm3, %vm17730_vm1  ;;  %vm17738_vm11 = vcmp.eq.s32.totalorder %v17731_v12, %v10408_v14  ;;  %vm17740_vm3 = vcmp.eq.s32.totalorder %v17739_v9, %v10405_v41  ;;  %v17749_v12 = vld [vmem:[#allocation90_spill] sm:$0xff] }
 0x1b3   : > { %8353 = vmatprep.subr.msk.bf16.mxu0 %vm8352_vm8, %v9706_v49  ;;  %vm8608_vm10 = vmpackc.low %vm17734_vm4, %vm17733_vm0  ;;  %vm17742_vm8 = vcmp.eq.s32.totalorder %v17741_v54, %v10405_v41  ;;  %vm17743_vm4 = vcmp.eq.s32.totalorder %v17739_v9, %v10411_v36 }
 0x1b4   : > { %8609 = vmatprep.subr.msk.bf16.mxu1 %vm8608_vm10, %v9706_v49  ;;  %vm8354_vm12 = vmpackc.low %vm17736_vm6, %vm17735_vm2  ;;  %vm17744_vm10 = vcmp.eq.s32.totalorder %v17741_v54, %v10411_v36  ;;  %vm17745_vm6 = vcmp.eq.s32.totalorder %v17739_v9, %v10402_v13 }
 0x1b5   : > { %8355 = vmatpush1.bf16.msk.msra.mxu0 %vm8354_vm12, %v9706_v49  ;;  %vm8610_vm1 = vmpackc.low %vm17738_vm11, %vm17737_vm9  ;;  %vm17746_vm12 = vcmp.eq.s32.totalorder %v17741_v54, %v10402_v13  ;;  %vm17747_vm11 = vcmp.eq.s32.totalorder %v17739_v9, %v10408_v14  ;;  %v17761_v9 = vld [vmem:[#allocation93_spill] sm:$0xff] }
 0x1b6   : > { %8611 = vmatpush1.bf16.msk.msra.mxu1 %vm8610_vm1, %v9706_v49  ;;  %vm8356_vm0 = vmpackc.low %vm17742_vm8, %vm17740_vm3  ;;  %vm17748_vm1 = vcmp.eq.s32.totalorder %v17741_v54, %v10408_v14  ;;  %vm17750_vm8 = vcmp.eq.s32.totalorder %v17749_v12, %v10405_v41  ;;  %v17759_v54 = vld [vmem:[#allocation92_spill] sm:$0xff] }
 0x1b7   : > { %8357 = vmatprep.subr.msk.bf16.mxu0 %vm8356_vm0, %v9706_v49  ;;  %vm8612_vm2 = vmpackc.low %vm17744_vm10, %vm17743_vm4  ;;  %vm17752_vm0 = vcmp.eq.s32.totalorder %v17751_v11, %v10405_v41  ;;  %vm17753_vm10 = vcmp.eq.s32.totalorder %v17749_v12, %v10411_v36 }
 0x1b8   : > { %8613 = vmatprep.subr.msk.bf16.mxu1 %vm8612_vm2, %v9706_v49  ;;  %vm8358_vm9 = vmpackc.low %vm17746_vm12, %vm17745_vm6  ;;  %vm17754_vm2 = vcmp.eq.s32.totalorder %v17751_v11, %v10411_v36  ;;  %vm17755_vm12 = vcmp.eq.s32.totalorder %v17749_v12, %v10402_v13 }
 0x1b9   : > { %8359 = vmatpush1.bf16.msk.msra.mxu0 %vm8358_vm9, %v9706_v49  ;;  %vm8614_vm3 = vmpackc.low %vm17748_vm1, %vm17747_vm11  ;;  %vm17756_vm9 = vcmp.eq.s32.totalorder %v17751_v11, %v10402_v13  ;;  %vm17757_vm1 = vcmp.eq.s32.totalorder %v17749_v12, %v10408_v14  ;;  %v17771_v12 = vld [vmem:[#allocation95_spill] sm:$0xff] }
 0x1ba   : > { %8615 = vmatpush1.bf16.msk.msra.mxu1 %vm8614_vm3, %v9706_v49  ;;  %vm8360_vm4 = vmpackc.low %vm17752_vm0, %vm17750_vm8  ;;  %vm17758_vm3 = vcmp.eq.s32.totalorder %v17751_v11, %v10408_v14  ;;  %vm17760_vm0 = vcmp.eq.s32.totalorder %v17759_v54, %v10405_v41  ;;  %v17769_v11 = vld [vmem:[#allocation94_spill] sm:$0xff] }
 0x1bb   : > { %8361 = vmatprep.subr.msk.bf16.mxu0 %vm8360_vm4, %v9706_v49  ;;  %vm8616_vm6 = vmpackc.low %vm17754_vm2, %vm17753_vm10  ;;  %vm17762_vm4 = vcmp.eq.s32.totalorder %v17761_v9, %v10405_v41  ;;  %vm17763_vm2 = vcmp.eq.s32.totalorder %v17759_v54, %v10411_v36 }
 0x1bc   : > { %8617 = vmatprep.subr.msk.bf16.mxu1 %vm8616_vm6, %v9706_v49  ;;  %vm8362_vm11 = vmpackc.low %vm17756_vm9, %vm17755_vm12  ;;  %vm17764_vm6 = vcmp.eq.s32.totalorder %v17761_v9, %v10411_v36  ;;  %vm17765_vm9 = vcmp.eq.s32.totalorder %v17759_v54, %v10402_v13 }
 0x1bd   : > { %8363 = vmatpush1.bf16.msk.msra.mxu0 %vm8362_vm11, %v9706_v49  ;;  %vm8618_vm8 = vmpackc.low %vm17758_vm3, %vm17757_vm1  ;;  %vm17766_vm11 = vcmp.eq.s32.totalorder %v17761_v9, %v10402_v13  ;;  %vm17767_vm3 = vcmp.eq.s32.totalorder %v17759_v54, %v10408_v14  ;;  %v17781_v54 = vld [vmem:[#allocation99_spill] sm:$0xff] }
 0x1be   : > { %8619 = vmatpush1.bf16.msk.msra.mxu1 %vm8618_vm8, %v9706_v49  ;;  %vm8364_vm10 = vmpackc.low %vm17762_vm4, %vm17760_vm0  ;;  %vm17768_vm8 = vcmp.eq.s32.totalorder %v17761_v9, %v10408_v14  ;;  %vm17770_vm4 = vcmp.eq.s32.totalorder %v17769_v11, %v10405_v41  ;;  %v17779_v9 = vld [vmem:[#allocation98_spill] sm:$0xff] }
 0x1bf   : > { %8365 = vmatprep.subr.msk.bf16.mxu0 %vm8364_vm10, %v9706_v49  ;;  %vm8620_vm12 = vmpackc.low %vm17764_vm6, %vm17763_vm2  ;;  %vm17772_vm10 = vcmp.eq.s32.totalorder %v17771_v12, %v10405_v41  ;;  %vm17773_vm6 = vcmp.eq.s32.totalorder %v17769_v11, %v10411_v36 }
 0x1c0   : > { %8621 = vmatprep.subr.msk.bf16.mxu1 %vm8620_vm12, %v9706_v49  ;;  %vm8366_vm1 = vmpackc.low %vm17766_vm11, %vm17765_vm9  ;;  %vm17774_vm12 = vcmp.eq.s32.totalorder %v17771_v12, %v10411_v36  ;;  %vm17775_vm11 = vcmp.eq.s32.totalorder %v17769_v11, %v10402_v13 }
 0x1c1   : > { %8367 = vmatpush1.bf16.msk.msra.mxu0 %vm8366_vm1, %v9706_v49  ;;  %vm8622_vm0 = vmpackc.low %vm17768_vm8, %vm17767_vm3  ;;  %vm17776_vm1 = vcmp.eq.s32.totalorder %v17771_v12, %v10402_v13  ;;  %vm17777_vm8 = vcmp.eq.s32.totalorder %v17769_v11, %v10408_v14  ;;  %v17791_v11 = vld [vmem:[#allocation101_spill] sm:$0xff] }
 0x1c2   : > { %8623 = vmatpush1.bf16.msk.msra.mxu1 %vm8622_vm0, %v9706_v49  ;;  %vm8368_vm2 = vmpackc.low %vm17772_vm10, %vm17770_vm4  ;;  %vm17778_vm0 = vcmp.eq.s32.totalorder %v17771_v12, %v10408_v14  ;;  %vm17780_vm10 = vcmp.eq.s32.totalorder %v17779_v9, %v10405_v41  ;;  %v17789_v12 = vld [vmem:[#allocation100_spill] sm:$0xff] }
 0x1c3   : > { %8369 = vmatprep.subr.msk.bf16.mxu0 %vm8368_vm2, %v9706_v49  ;;  %vm8624_vm9 = vmpackc.low %vm17774_vm12, %vm17773_vm6  ;;  %vm17782_vm2 = vcmp.eq.s32.totalorder %v17781_v54, %v10405_v41  ;;  %vm17783_vm12 = vcmp.eq.s32.totalorder %v17779_v9, %v10411_v36 }
 0x1c4   : > { %8625 = vmatprep.subr.msk.bf16.mxu1 %vm8624_vm9, %v9706_v49  ;;  %vm8370_vm3 = vmpackc.low %vm17776_vm1, %vm17775_vm11  ;;  %vm17784_vm9 = vcmp.eq.s32.totalorder %v17781_v54, %v10411_v36  ;;  %vm17785_vm1 = vcmp.eq.s32.totalorder %v17779_v9, %v10402_v13 }
 0x1c5   : > { %8371 = vmatpush1.bf16.msk.msra.mxu0 %vm8370_vm3, %v9706_v49  ;;  %vm8626_vm4 = vmpackc.low %vm17778_vm0, %vm17777_vm8  ;;  %vm17786_vm3 = vcmp.eq.s32.totalorder %v17781_v54, %v10402_v13  ;;  %vm17787_vm0 = vcmp.eq.s32.totalorder %v17779_v9, %v10408_v14 }
 0x1c6   : > { %8627 = vmatpush1.bf16.msk.msra.mxu1 %vm8626_vm4, %v9706_v49  ;;  %vm8372_vm6 = vmpackc.low %vm17782_vm2, %vm17780_vm10  ;;  %vm17788_vm4 = vcmp.eq.s32.totalorder %v17781_v54, %v10408_v14  ;;  %vm17790_vm2 = vcmp.eq.s32.totalorder %v17789_v12, %v10405_v41  ;;  %v3649_v41 = vld [vmem:[%s9962_s30 + $0x78] sm:$0xff] }
 0x1c7   : > { %8373 = vmatprep.subr.msk.bf16.mxu0 %vm8372_vm6, %v9706_v49  ;;  %vm8628_vm11 = vmpackc.low %vm17784_vm9, %vm17783_vm12  ;;  %vm17792_vm12 = vcmp.eq.s32.totalorder %v17789_v12, %v10411_v36  ;;  %v3640_v36 = vld [vmem:[%s9962_s30 + $0x30] sm:$0xff] }
 0x1c8   : > { %8629 = vmatprep.subr.msk.bf16.mxu1 %vm8628_vm11, %v9706_v49  ;;  %vm8374_vm8 = vmpackc.low %vm17786_vm3, %vm17785_vm1  ;;  %vm17793_vm11 = vcmp.eq.s32.totalorder %v17789_v12, %v10402_v13  ;;  %vm17794_vm1 = vcmp.eq.s32.totalorder %v17791_v11, %v10402_v13  ;;  %v3648_v13 = vld [vmem:[%s9962_s30 + $0x70] sm:$0xff] }
 0x1c9   : > { %8375 = vmatpush1.bf16.msk.msra.mxu0 %vm8374_vm8, %v9706_v49  ;;  %vm8630_vm10 = vmpackc.low %vm17788_vm4, %vm17787_vm0  ;;  %vm17797_vm0 = vcmp.eq.s32.totalorder %v9973_v2, %v10417_v33 }
 0x1ca   : > { %8631 = vmatpush1.bf16.msk.msra.mxu1 %vm8630_vm10, %v9706_v49  ;;  %vm8376_vm6 = vmpackc.low %vm1495_vm13, %vm17790_vm2  ;;  %vm17795_vm13 = vcmp.eq.s32.totalorder %v17789_v12, %v10408_v14  ;;  %vm17798_vm10 = vcmp.eq.s32.totalorder %v9969_v1, %v10423_v50  ;;  %vm17799_vm2 = vcmp.eq.s32.totalorder %v9973_v2, %v10423_v50  ;;  %v9409_v14 = vld [vmem:[%s9962_s30 + $0xd0] sm:$0xff] }
 0x1cb   : > { %8377 = vmatprep.subr.msk.bf16.mxu0 %vm8376_vm6, %v9706_v49  ;;  %vm8632_vm9 = vmpackc.low %vm1497_vm15, %vm17792_vm12  ;;  %vm17796_vm15 = vcmp.eq.s32.totalorder %v9969_v1, %v10417_v33  ;;  %vm17800_vm6 = vcmp.eq.s32.totalorder %v9969_v1, %v10414_v21  ;;  %vm17801_vm12 = vcmp.eq.s32.totalorder %v9973_v2, %v10414_v21 }
 0x1cc   : > { %8633 = vmatprep.subr.msk.bf16.mxu1 %vm8632_vm9, %v9706_v49  ;;  %vm8378_vm3 = vmpackc.low %vm17794_vm1, %vm17793_vm11  ;;  %vm17802_vm11 = vcmp.eq.s32.totalorder %v9969_v1, %v10420_v24  ;;  %vm17803_vm1 = vcmp.eq.s32.totalorder %v9973_v2, %v10420_v24  ;;  %v3657_v1 = vld [vmem:[%s9962_s30 + $0xb8] sm:$0xff]  ;;  %v3656_v2 = vld [vmem:[%s9962_s30 + $0xb0] sm:$0xff] }
 0x1cd   : > { %8379 = vmatpush1.bf16.msk.msra.mxu0 %vm8378_vm3, %v9706_v49  ;;  %vm8634_vm8 = vmpackc.low %vm1496_vm14, %vm17795_vm13  ;;  %vm17804_vm13 = vcmp.eq.s32.totalorder %v9976_v3, %v10417_v33 }
 0x1ce   : > { %8635 = vmatpush1.bf16.msk.msra.mxu1 %vm8634_vm8, %v9706_v49  ;;  %vm8636_vm4 = vmpackc.low %vm17797_vm0, %vm17796_vm15  ;;  %vm17805_vm8 = vcmp.eq.s32.totalorder %v9979_v4, %v10417_v33  ;;  %vm17806_vm0 = vcmp.eq.s32.totalorder %v9976_v3, %v10423_v50 }
 0x1cf   : > { %8637 = vmatprep.subr.msk.bf16.mxu0 %vm8636_vm4, %v9706_v49  ;;  %vm8892_vm14 = vmpackc.low %vm17799_vm2, %vm17798_vm10  ;;  %vm17807_vm4 = vcmp.eq.s32.totalorder %v9979_v4, %v10423_v50  ;;  %vm17808_vm2 = vcmp.eq.s32.totalorder %v9976_v3, %v10414_v21 }
 0x1d0   : > { %4024 = vmatmul.mubr.f32.vlgmr.msra.gmra.mrb[0].mxu0 %v3640_v36  ;;  %8893 = vmatprep.subr.msk.bf16.mxu1 %vm8892_vm14, %v9706_v49  ;;  %vm8638_vm9 = vmpackc.low %vm17801_vm12, %vm17800_vm6  ;;  %vm17809_vm14 = vcmp.eq.s32.totalorder %v9979_v4, %v10414_v21  ;;  %vm17810_vm12 = vcmp.eq.s32.totalorder %v9976_v3, %v10420_v24  ;;  %v3665_v3 = vld [vmem:[%s9962_s30 + $0xf8] sm:$0xff] }
 0x1d1   : > { %4404 = vmatmul.mubr.f32.vlgmr.msra.gmra.mrb[0].mxu1 %v3640_v36  ;;  %8639 = vmatpush1.bf16.msk.msra.mxu0 %vm8638_vm9, %v9706_v49  ;;  %vm8894_vm3 = vmpackc.low %vm17803_vm1, %vm17802_vm11  ;;  %vm17811_vm9 = vcmp.eq.s32.totalorder %v9979_v4, %v10420_v24  ;;  %vm17812_vm1 = vcmp.eq.s32.totalorder %v9982_v5, %v10417_v33  ;;  %v3664_v4 = vld [vmem:[%s9962_s30 + $0xf0] sm:$0xff] }
 0x1d2   : > { %8895 = vmatpush1.bf16.msk.msra.mxu1 %vm8894_vm3, %v9706_v49  ;;  %4029 = vmatprep.mubr.f32.mxu0 %v3649_v41  ;;  %vm8640_vm15 = vmpackc.low %vm17805_vm8, %vm17804_vm13  ;;  %vm17813_vm3 = vcmp.eq.s32.totalorder %v9985_v6, %v10417_v33  ;;  %vm17814_vm8 = vcmp.eq.s32.totalorder %v9982_v5, %v10423_v50  ;;  %v18110_v36 = vld [vmem:[#allocation45_spill] sm:$0xff] }
 0x1d3   : > { %4409 = vmatprep.mubr.f32.mxu1 %v3649_v41  ;;  %8641 = vmatprep.subr.msk.bf16.mxu0 %vm8640_vm15, %v9706_v49  ;;  %vm8896_vm10 = vmpackc.low %vm17807_vm4, %vm17806_vm0  ;;  %vm17815_vm15 = vcmp.eq.s32.totalorder %v9985_v6, %v10423_v50  ;;  %vm17816_vm4 = vcmp.eq.s32.totalorder %v9982_v5, %v10414_v21  ;;  %v9410_v41 = vld [vmem:[%s9962_s30 + $0x118] sm:$0xff] }
 0x1d4   : > { %4030 = vmatmul.mubr.f32.gmra.mrb[2].mxu0 %v3648_v13  ;;  %8897 = vmatprep.subr.msk.bf16.mxu1 %vm8896_vm10, %v9706_v49  ;;  %vm8642_vm6 = vmpackc.low %vm17809_vm14, %vm17808_vm2  ;;  %vm17817_vm10 = vcmp.eq.s32.totalorder %v9985_v6, %v10414_v21  ;;  %vm17818_vm14 = vcmp.eq.s32.totalorder %v9982_v5, %v10420_v24  ;;  %v3673_v5 = vld [vmem:[%s9962_s30 + $0x138] sm:$0xff] }
 0x1d5   : > { %4410 = vmatmul.mubr.f32.gmra.mrb[2].mxu1 %v3648_v13  ;;  %8643 = vmatpush1.bf16.msk.msra.mxu0 %vm8642_vm6, %v9706_v49  ;;  %vm8898_vm11 = vmpackc.low %vm17811_vm9, %vm17810_vm12  ;;  %vm17819_vm6 = vcmp.eq.s32.totalorder %v9985_v6, %v10420_v24  ;;  %vm17820_vm9 = vcmp.eq.s32.totalorder %v9988_v7, %v10417_v33  ;;  %v3672_v6 = vld [vmem:[%s9962_s30 + $0x130] sm:$0xff] }
 0x1d6   : > { %8899 = vmatpush1.bf16.msk.msra.mxu1 %vm8898_vm11, %v9706_v49  ;;  %4035 = vmatprep.mubr.f32.mxu0 %v3657_v1  ;;  %vm8644_vm13 = vmpackc.low %vm17813_vm3, %vm17812_vm1  ;;  %vm17821_vm11 = vcmp.eq.s32.totalorder %v9991_v8, %v10417_v33  ;;  %vm17822_vm3 = vcmp.eq.s32.totalorder %v9988_v7, %v10423_v50  ;;  %v9411_v13 = vld [vmem:[%s9962_s30 + $0x110] sm:$0xff] }
 0x1d7   : > { %4415 = vmatprep.mubr.f32.mxu1 %v3657_v1  ;;  %8645 = vmatprep.subr.msk.bf16.mxu0 %vm8644_vm13, %v9706_v49  ;;  %vm8900_vm0 = vmpackc.low %vm17815_vm15, %vm17814_vm8  ;;  %vm17823_vm13 = vcmp.eq.s32.totalorder %v9991_v8, %v10423_v50  ;;  %vm17824_vm15 = vcmp.eq.s32.totalorder %v9988_v7, %v10414_v21  ;;  %v18118_v1 = vld [vmem:[#allocation46_spill] sm:$0xff] }
 0x1d8   : > { %4036 = vmatmul.mubr.f32.gmra.mrb[4].mxu0 %v3656_v2  ;;  %8901 = vmatprep.subr.msk.bf16.mxu1 %vm8900_vm0, %v9706_v49  ;;  %vm8646_vm2 = vmpackc.low %vm17817_vm10, %vm17816_vm4  ;;  %vm17825_vm0 = vcmp.eq.s32.totalorder %v9991_v8, %v10414_v21  ;;  %vm17826_vm10 = vcmp.eq.s32.totalorder %v9988_v7, %v10420_v24  ;;  %v9392_v7 = vld [vmem:[%s9962_s30 + $0x8] sm:$0xff] }
 0x1d9   : > { %4416 = vmatmul.mubr.f32.gmra.mrb[4].mxu1 %v3656_v2  ;;  %8647 = vmatpush1.bf16.msk.msra.mxu0 %vm8646_vm2, %v9706_v49  ;;  %vm8902_vm12 = vmpackc.low %vm17819_vm6, %vm17818_vm14  ;;  %vm17827_vm2 = vcmp.eq.s32.totalorder %v9991_v8, %v10420_v24  ;;  %vm17828_vm6 = vcmp.eq.s32.totalorder %v10008_v18, %v10417_v33  ;;  %v9393_v8 = vld [vmem:[%s9962_s30] sm:$0xff] }
 0x1da   : > { %8903 = vmatpush1.bf16.msk.msra.mxu1 %vm8902_vm12, %v9706_v49  ;;  %4041 = vmatprep.mubr.f32.mxu0 %v3665_v3  ;;  %vm8648_vm1 = vmpackc.low %vm17821_vm11, %vm17820_vm9  ;;  %vm17829_vm12 = vcmp.eq.s32.totalorder %v10011_v19, %v10417_v33  ;;  %vm17830_vm11 = vcmp.eq.s32.totalorder %v10008_v18, %v10423_v50  ;;  %v18120_v2 = vld [vmem:[#allocation47_spill] sm:$0xff] }
 0x1db   : > { %4421 = vmatprep.mubr.f32.mxu1 %v3665_v3  ;;  %8649 = vmatprep.subr.msk.bf16.mxu0 %vm8648_vm1, %v9706_v49  ;;  %vm8904_vm8 = vmpackc.low %vm17823_vm13, %vm17822_vm3  ;;  %vm17831_vm1 = vcmp.eq.s32.totalorder %v10011_v19, %v10423_v50  ;;  %vm17832_vm13 = vcmp.eq.s32.totalorder %v10008_v18, %v10414_v21  ;;  %v9412_v3 = vld [vmem:[%s9962_s30 + $0x28] sm:$0xff] }
 0x1dc   : > { %4042 = vmatmul.mubr.f32.gmra.mrb[6].mxu0 %v3664_v4  ;;  %8905 = vmatprep.subr.msk.bf16.mxu1 %vm8904_vm8, %v9706_v49  ;;  %vm8650_vm4 = vmpackc.low %vm17825_vm0, %vm17824_vm15  ;;  %vm17833_vm8 = vcmp.eq.s32.totalorder %v10011_v19, %v10414_v21  ;;  %vm17834_vm0 = vcmp.eq.s32.totalorder %v10008_v18, %v10420_v24  ;;  %v9394_v18 = vld [vmem:[%s9962_s30 + $0x48] sm:$0xff] }
 0x1dd   : > { %4422 = vmatmul.mubr.f32.gmra.mrb[6].mxu1 %v3664_v4  ;;  %8651 = vmatpush1.bf16.msk.msra.mxu0 %vm8650_vm4, %v9706_v49  ;;  %vm8906_vm14 = vmpackc.low %vm17827_vm2, %vm17826_vm10  ;;  %vm17835_vm4 = vcmp.eq.s32.totalorder %v10011_v19, %v10420_v24  ;;  %vm17836_vm2 = vcmp.eq.s32.totalorder %v10014_v22, %v10417_v33  ;;  %v9395_v19 = vld [vmem:[%s9962_s30 + $0x40] sm:$0xff]  ;;  %v18128_v4 = vld [vmem:[#allocation48_spill] sm:$0xff] }
 0x1de   : > { %8907 = vmatpush1.bf16.msk.msra.mxu1 %vm8906_vm14, %v9706_v49  ;;  %4047 = vmatprep.mubr.f32.mxu0 %v3673_v5  ;;  %vm8652_vm9 = vmpackc.low %vm17829_vm12, %vm17828_vm6  ;;  %vm17837_vm14 = vcmp.eq.s32.totalorder %v10017_v23, %v10417_v33  ;;  %vm17838_vm12 = vcmp.eq.s32.totalorder %v10014_v22, %v10423_v50 }
 0x1df   : > { %4427 = vmatprep.mubr.f32.mxu1 %v3673_v5  ;;  %8653 = vmatprep.subr.msk.bf16.mxu0 %vm8652_vm9, %v9706_v49  ;;  %vm8908_vm3 = vmpackc.low %vm17831_vm1, %vm17830_vm11  ;;  %vm17839_vm9 = vcmp.eq.s32.totalorder %v10017_v23, %v10423_v50  ;;  %vm17840_vm1 = vcmp.eq.s32.totalorder %v10014_v22, %v10414_v21  ;;  %v18130_v5 = vld [vmem:[#allocation49_spill] sm:$0xff] }
 0x1e0   : > { %4048 = vmatmul.mubr.f32.gmra.mrb[8].mxu0 %v3672_v6  ;;  %8909 = vmatprep.subr.msk.bf16.mxu1 %vm8908_vm3, %v9706_v49  ;;  %vm8654_vm15 = vmpackc.low %vm17833_vm8, %vm17832_vm13  ;;  %vm17841_vm3 = vcmp.eq.s32.totalorder %v10017_v23, %v10414_v21  ;;  %vm17842_vm8 = vcmp.eq.s32.totalorder %v10014_v22, %v10420_v24  ;;  %v9396_v22 = vld [vmem:[%s9962_s30 + $0x88] sm:$0xff] }
 0x1e1   : > { %4428 = vmatmul.mubr.f32.gmra.mrb[8].mxu1 %v3672_v6  ;;  %8655 = vmatpush1.bf16.msk.msra.mxu0 %vm8654_vm15, %v9706_v49  ;;  %vm8910_vm10 = vmpackc.low %vm17835_vm4, %vm17834_vm0  ;;  %vm17843_vm15 = vcmp.eq.s32.totalorder %v10017_v23, %v10420_v24  ;;  %vm17844_vm4 = vcmp.eq.s32.totalorder %v10020_v26, %v10417_v33  ;;  %v9397_v23 = vld [vmem:[%s9962_s30 + $0x80] sm:$0xff]  ;;  %v18138_v6 = vld [vmem:[#allocation50_spill] sm:$0xff] }
 0x1e2   : > { %8911 = vmatpush1.bf16.msk.msra.mxu1 %vm8910_vm10, %v9706_v49  ;;  %vm8656_vm6 = vmpackc.low %vm17837_vm14, %vm17836_vm2  ;;  %4498 = vmatprep.mubr.f32.mxu0 %v9392_v7  ;;  %vm17845_vm10 = vcmp.eq.s32.totalorder %v10023_v27, %v10417_v33  ;;  %vm17846_vm14 = vcmp.eq.s32.totalorder %v10020_v26, %v10423_v50 }
 0x1e3   : > { %8657 = vmatprep.subr.msk.bf16.mxu0 %vm8656_vm6, %v9706_v49  ;;  %vm8912_vm11 = vmpackc.low %vm17839_vm9, %vm17838_vm12  ;;  %4878 = vmatprep.mubr.f32.mxu1 %v9392_v7  ;;  %vm17847_vm6 = vcmp.eq.s32.totalorder %v10023_v27, %v10423_v50  ;;  %vm17848_vm9 = vcmp.eq.s32.totalorder %v10020_v26, %v10414_v21  ;;  %v18140_v7 = vld [vmem:[#allocation51_spill] sm:$0xff] }
 0x1e4   : > { %8913 = vmatprep.subr.msk.bf16.mxu1 %vm8912_vm11, %v9706_v49  ;;  %vm8658_vm13 = vmpackc.low %vm17841_vm3, %vm17840_vm1  ;;  %vm17849_vm11 = vcmp.eq.s32.totalorder %v10023_v27, %v10414_v21  ;;  %vm17850_vm3 = vcmp.eq.s32.totalorder %v10020_v26, %v10420_v24  ;;  %v9398_v26 = vld [vmem:[%s9962_s30 + $0xc8] sm:$0xff] }
 0x1e5   : > { %8659 = vmatpush1.bf16.msk.msra.mxu0 %vm8658_vm13, %v9706_v49  ;;  %vm8914_vm0 = vmpackc.low %vm17843_vm15, %vm17842_vm8  ;;  %vm17851_vm13 = vcmp.eq.s32.totalorder %v10023_v27, %v10420_v24  ;;  %vm17852_vm15 = vcmp.eq.s32.totalorder %v10026_v30, %v10417_v33  ;;  %v9399_v27 = vld [vmem:[%s9962_s30 + $0xc0] sm:$0xff] }
 0x1e6   : > { %8915 = vmatpush1.bf16.msk.msra.mxu1 %vm8914_vm0, %v9706_v49  ;;  %vm8660_vm2 = vmpackc.low %vm17845_vm10, %vm17844_vm4  ;;  %vm17853_vm0 = vcmp.eq.s32.totalorder %v10029_v31, %v10417_v33  ;;  %vm17854_vm10 = vcmp.eq.s32.totalorder %v10026_v30, %v10423_v50 }
 0x1e7   : > { %8661 = vmatprep.subr.msk.bf16.mxu0 %vm8660_vm2, %v9706_v49  ;;  %vm8916_vm12 = vmpackc.low %vm17847_vm6, %vm17846_vm14  ;;  %vm17855_vm2 = vcmp.eq.s32.totalorder %v10029_v31, %v10423_v50  ;;  %vm17856_vm6 = vcmp.eq.s32.totalorder %v10026_v30, %v10414_v21 }
 0x1e8   : > { %8917 = vmatprep.subr.msk.bf16.mxu1 %vm8916_vm12, %v9706_v49  ;;  %vm8662_vm1 = vmpackc.low %vm17849_vm11, %vm17848_vm9  ;;  %vm17857_vm12 = vcmp.eq.s32.totalorder %v10029_v31, %v10414_v21  ;;  %vm17858_vm11 = vcmp.eq.s32.totalorder %v10026_v30, %v10420_v24  ;;  %v9400_v30 = vld [vmem:[%s9962_s30 + $0x108] sm:$0xff] }
 0x1e9   : > { %8663 = vmatpush1.bf16.msk.msra.mxu0 %vm8662_vm1, %v9706_v49  ;;  %vm8918_vm8 = vmpackc.low %vm17851_vm13, %vm17850_vm3  ;;  %vm17859_vm1 = vcmp.eq.s32.totalorder %v10029_v31, %v10420_v24  ;;  %vm17860_vm13 = vcmp.eq.s32.totalorder %v10032_v34, %v10417_v33  ;;  %v9401_v31 = vld [vmem:[%s9962_s30 + $0x100] sm:$0xff] }
 0x1ea   : > { %8919 = vmatpush1.bf16.msk.msra.mxu1 %vm8918_vm8, %v9706_v49  ;;  %vm8664_vm4 = vmpackc.low %vm17853_vm0, %vm17852_vm15  ;;  %vm17861_vm8 = vcmp.eq.s32.totalorder %v10035_v35, %v10417_v33  ;;  %vm17862_vm0 = vcmp.eq.s32.totalorder %v10032_v34, %v10423_v50 }
 0x1eb   : > { %8665 = vmatprep.subr.msk.bf16.mxu0 %vm8664_vm4, %v9706_v49  ;;  %vm8920_vm14 = vmpackc.low %vm17855_vm2, %vm17854_vm10  ;;  %vm17863_vm4 = vcmp.eq.s32.totalorder %v10035_v35, %v10423_v50  ;;  %vm17864_vm2 = vcmp.eq.s32.totalorder %v10032_v34, %v10414_v21 }
 0x1ec   : > { %8921 = vmatprep.subr.msk.bf16.mxu1 %vm8920_vm14, %v9706_v49  ;;  %vm8666_vm9 = vmpackc.low %vm17857_vm12, %vm17856_vm6  ;;  %vm17865_vm14 = vcmp.eq.s32.totalorder %v10035_v35, %v10414_v21  ;;  %vm17866_vm12 = vcmp.eq.s32.totalorder %v10032_v34, %v10420_v24  ;;  %v9402_v34 = vld [vmem:[%s9962_s30 + $0x18] sm:$0xff] }
 0x1ed   : > { %8667 = vmatpush1.bf16.msk.msra.mxu0 %vm8666_vm9, %v9706_v49  ;;  %vm8922_vm3 = vmpackc.low %vm17859_vm1, %vm17858_vm11  ;;  %vm17867_vm9 = vcmp.eq.s32.totalorder %v10035_v35, %v10420_v24  ;;  %vm17868_vm1 = vcmp.eq.s32.totalorder %v10038_v38, %v10417_v33  ;;  %v17988_v35 = vld [vmem:[#allocation20_spill] sm:$0xff] }
 0x1ee   : > { %8923 = vmatpush1.bf16.msk.msra.mxu1 %vm8922_vm3, %v9706_v49  ;;  %vm8668_vm15 = vmpackc.low %vm17861_vm8, %vm17860_vm13  ;;  %vm17869_vm3 = vcmp.eq.s32.totalorder %v10041_v39, %v10417_v33  ;;  %vm17870_vm8 = vcmp.eq.s32.totalorder %v10038_v38, %v10423_v50 }
 0x1ef   : > { %8669 = vmatprep.subr.msk.bf16.mxu0 %vm8668_vm15, %v9706_v49  ;;  %vm8924_vm10 = vmpackc.low %vm17863_vm4, %vm17862_vm0  ;;  %vm17871_vm15 = vcmp.eq.s32.totalorder %v10041_v39, %v10423_v50  ;;  %vm17872_vm4 = vcmp.eq.s32.totalorder %v10038_v38, %v10414_v21 }
 0x1f0   : > { %8925 = vmatprep.subr.msk.bf16.mxu1 %vm8924_vm10, %v9706_v49  ;;  %vm8670_vm6 = vmpackc.low %vm17865_vm14, %vm17864_vm2  ;;  %vm17873_vm10 = vcmp.eq.s32.totalorder %v10041_v39, %v10414_v21  ;;  %vm17874_vm14 = vcmp.eq.s32.totalorder %v10038_v38, %v10420_v24  ;;  %v17990_v38 = vld [vmem:[#allocation21_spill] sm:$0xff] }
 0x1f1   : > { %8671 = vmatpush1.bf16.msk.msra.mxu0 %vm8670_vm6, %v9706_v49  ;;  %vm8926_vm11 = vmpackc.low %vm17867_vm9, %vm17866_vm12  ;;  %vm17875_vm6 = vcmp.eq.s32.totalorder %v10041_v39, %v10420_v24  ;;  %vm17876_vm9 = vcmp.eq.s32.totalorder %v10044_v42, %v10417_v33  ;;  %v17998_v39 = vld [vmem:[#allocation22_spill] sm:$0xff] }
 0x1f2   : > { %8927 = vmatpush1.bf16.msk.msra.mxu1 %vm8926_vm11, %v9706_v49  ;;  %vm8672_vm13 = vmpackc.low %vm17869_vm3, %vm17868_vm1  ;;  %vm17877_vm11 = vcmp.eq.s32.totalorder %v10047_v43, %v10417_v33  ;;  %vm17878_vm3 = vcmp.eq.s32.totalorder %v10044_v42, %v10423_v50 }
 0x1f3   : > { %8673 = vmatprep.subr.msk.bf16.mxu0 %vm8672_vm13, %v9706_v49  ;;  %vm8928_vm0 = vmpackc.low %vm17871_vm15, %vm17870_vm8  ;;  %vm17879_vm13 = vcmp.eq.s32.totalorder %v10047_v43, %v10423_v50  ;;  %vm17880_vm15 = vcmp.eq.s32.totalorder %v10044_v42, %v10414_v21 }
 0x1f4   : > { %8929 = vmatprep.subr.msk.bf16.mxu1 %vm8928_vm0, %v9706_v49  ;;  %vm8674_vm2 = vmpackc.low %vm17873_vm10, %vm17872_vm4  ;;  %vm17881_vm0 = vcmp.eq.s32.totalorder %v10047_v43, %v10414_v21  ;;  %vm17882_vm10 = vcmp.eq.s32.totalorder %v10044_v42, %v10420_v24  ;;  %v18000_v42 = vld [vmem:[#allocation23_spill] sm:$0xff] }
 0x1f5   : > { %8675 = vmatpush1.bf16.msk.msra.mxu0 %vm8674_vm2, %v9706_v49  ;;  %vm8930_vm12 = vmpackc.low %vm17875_vm6, %vm17874_vm14  ;;  %vm17883_vm2 = vcmp.eq.s32.totalorder %v10047_v43, %v10420_v24  ;;  %vm17884_vm6 = vcmp.eq.s32.totalorder %v10050_v44, %v10417_v33  ;;  %v18008_v43 = vld [vmem:[#allocation24_spill] sm:$0xff] }
 0x1f6   : > { %8931 = vmatpush1.bf16.msk.msra.mxu1 %vm8930_vm12, %v9706_v49  ;;  %vm8676_vm1 = vmpackc.low %vm17877_vm11, %vm17876_vm9  ;;  %vm17885_vm12 = vcmp.eq.s32.totalorder %v10053_v45, %v10417_v33  ;;  %vm17886_vm11 = vcmp.eq.s32.totalorder %v10050_v44, %v10423_v50 }
 0x1f7   : > { %8677 = vmatprep.subr.msk.bf16.mxu0 %vm8676_vm1, %v9706_v49  ;;  %vm8932_vm8 = vmpackc.low %vm17879_vm13, %vm17878_vm3  ;;  %vm17887_vm1 = vcmp.eq.s32.totalorder %v10053_v45, %v10423_v50  ;;  %vm17888_vm13 = vcmp.eq.s32.totalorder %v10050_v44, %v10414_v21 }
 0x1f8   : > { %8933 = vmatprep.subr.msk.bf16.mxu1 %vm8932_vm8, %v9706_v49  ;;  %vm8678_vm4 = vmpackc.low %vm17881_vm0, %vm17880_vm15  ;;  %vm17889_vm8 = vcmp.eq.s32.totalorder %v10053_v45, %v10414_v21  ;;  %vm17890_vm0 = vcmp.eq.s32.totalorder %v10050_v44, %v10420_v24  ;;  %v18010_v44 = vld [vmem:[#allocation25_spill] sm:$0xff] }
 0x1f9   : > { %8679 = vmatpush1.bf16.msk.msra.mxu0 %vm8678_vm4, %v9706_v49  ;;  %vm8934_vm14 = vmpackc.low %vm17883_vm2, %vm17882_vm10  ;;  %vm17891_vm4 = vcmp.eq.s32.totalorder %v10053_v45, %v10420_v24  ;;  %vm17892_vm2 = vcmp.eq.s32.totalorder %v10056_v58, %v10417_v33  ;;  %v18018_v45 = vld [vmem:[#allocation26_spill] sm:$0xff] }
 0x1fa   : > { %8935 = vmatpush1.bf16.msk.msra.mxu1 %vm8934_vm14, %v9706_v49  ;;  %vm8680_vm9 = vmpackc.low %vm17885_vm12, %vm17884_vm6  ;;  %vm17893_vm14 = vcmp.eq.s32.totalorder %v10059_v59, %v10417_v33  ;;  %vm17894_vm12 = vcmp.eq.s32.totalorder %v10056_v58, %v10423_v50 }
 0x1fb   : > { %8681 = vmatprep.subr.msk.bf16.mxu0 %vm8680_vm9, %v9706_v49  ;;  %vm8936_vm3 = vmpackc.low %vm17887_vm1, %vm17886_vm11  ;;  %vm17895_vm9 = vcmp.eq.s32.totalorder %v10059_v59, %v10423_v50  ;;  %vm17896_vm1 = vcmp.eq.s32.totalorder %v10056_v58, %v10414_v21 }
 0x1fc   : > { %8937 = vmatprep.subr.msk.bf16.mxu1 %vm8936_vm3, %v9706_v49  ;;  %vm8682_vm15 = vmpackc.low %vm17889_vm8, %vm17888_vm13  ;;  %vm17897_vm3 = vcmp.eq.s32.totalorder %v10059_v59, %v10414_v21  ;;  %vm17898_vm8 = vcmp.eq.s32.totalorder %v10056_v58, %v10420_v24  ;;  %v18020_v58 = vld [vmem:[#allocation27_spill] sm:$0xff] }
 0x1fd   : > { %8683 = vmatpush1.bf16.msk.msra.mxu0 %vm8682_vm15, %v9706_v49  ;;  %vm8938_vm10 = vmpackc.low %vm17891_vm4, %vm17890_vm0  ;;  %vm17899_vm15 = vcmp.eq.s32.totalorder %v10059_v59, %v10420_v24  ;;  %vm17900_vm4 = vcmp.eq.s32.totalorder %v10062_v62, %v10417_v33  ;;  %v18028_v59 = vld [vmem:[#allocation28_spill] sm:$0xff] }
 0x1fe   : > { %8939 = vmatpush1.bf16.msk.msra.mxu1 %vm8938_vm10, %v9706_v49  ;;  %vm8684_vm6 = vmpackc.low %vm17893_vm14, %vm17892_vm2  ;;  %vm17901_vm10 = vcmp.eq.s32.totalorder %v10065_v63, %v10417_v33  ;;  %vm17902_vm14 = vcmp.eq.s32.totalorder %v10062_v62, %v10423_v50 }
 0x1ff   : > { %8685 = vmatprep.subr.msk.bf16.mxu0 %vm8684_vm6, %v9706_v49  ;;  %vm8940_vm11 = vmpackc.low %vm17895_vm9, %vm17894_vm12  ;;  %vm17903_vm6 = vcmp.eq.s32.totalorder %v10065_v63, %v10423_v50  ;;  %vm17904_vm9 = vcmp.eq.s32.totalorder %v10062_v62, %v10414_v21 }
 0x200   : > { %8941 = vmatprep.subr.msk.bf16.mxu1 %vm8940_vm11, %v9706_v49  ;;  %vm8686_vm13 = vmpackc.low %vm17897_vm3, %vm17896_vm1  ;;  %vm17905_vm11 = vcmp.eq.s32.totalorder %v10065_v63, %v10414_v21  ;;  %vm17906_vm3 = vcmp.eq.s32.totalorder %v10062_v62, %v10420_v24  ;;  %v18030_v62 = vld [vmem:[#allocation29_spill] sm:$0xff] }
 0x201   : > { %8687 = vmatpush1.bf16.msk.msra.mxu0 %vm8686_vm13, %v9706_v49  ;;  %vm8942_vm0 = vmpackc.low %vm17899_vm15, %vm17898_vm8  ;;  %vm17907_vm13 = vcmp.eq.s32.totalorder %v10065_v63, %v10420_v24  ;;  %vm17908_vm15 = vcmp.eq.s32.totalorder %v10068_v16, %v10417_v33  ;;  %v18038_v63 = vld [vmem:[#allocation30_spill] sm:$0xff] }
 0x202   : > { %8943 = vmatpush1.bf16.msk.msra.mxu1 %vm8942_vm0, %v9706_v49  ;;  %vm8688_vm2 = vmpackc.low %vm17901_vm10, %vm17900_vm4  ;;  %vm17909_vm0 = vcmp.eq.s32.totalorder %v10071_v32, %v10417_v33  ;;  %vm17910_vm10 = vcmp.eq.s32.totalorder %v10068_v16, %v10423_v50 }
 0x203   : > { %8689 = vmatprep.subr.msk.bf16.mxu0 %vm8688_vm2, %v9706_v49  ;;  %vm8944_vm12 = vmpackc.low %vm17903_vm6, %vm17902_vm14  ;;  %vm17911_vm2 = vcmp.eq.s32.totalorder %v10071_v32, %v10423_v50  ;;  %vm17912_vm6 = vcmp.eq.s32.totalorder %v10068_v16, %v10414_v21 }
 0x204   : > { %8945 = vmatprep.subr.msk.bf16.mxu1 %vm8944_vm12, %v9706_v49  ;;  %vm8690_vm1 = vmpackc.low %vm17905_vm11, %vm17904_vm9  ;;  %vm17913_vm12 = vcmp.eq.s32.totalorder %v10071_v32, %v10414_v21  ;;  %vm17914_vm11 = vcmp.eq.s32.totalorder %v10068_v16, %v10420_v24  ;;  %v18040_v16 = vld [vmem:[#allocation31_spill] sm:$0xff] }
 0x205   : > { %8691 = vmatpush1.bf16.msk.msra.mxu0 %vm8690_vm1, %v9706_v49  ;;  %vm8946_vm8 = vmpackc.low %vm17907_vm13, %vm17906_vm3  ;;  %vm17915_vm1 = vcmp.eq.s32.totalorder %v10071_v32, %v10420_v24  ;;  %vm17916_vm13 = vcmp.eq.s32.totalorder %v10074_v37, %v10417_v33  ;;  %v18048_v32 = vld [vmem:[#allocation32_spill] sm:$0xff] }
 0x206   : > { %8947 = vmatpush1.bf16.msk.msra.mxu1 %vm8946_vm8, %v9706_v49  ;;  %vm8692_vm4 = vmpackc.low %vm17909_vm0, %vm17908_vm15  ;;  %vm17917_vm8 = vcmp.eq.s32.totalorder %v10077_v40, %v10417_v33  ;;  %vm17918_vm0 = vcmp.eq.s32.totalorder %v10074_v37, %v10423_v50 }
 0x207   : > { %8693 = vmatprep.subr.msk.bf16.mxu0 %vm8692_vm4, %v9706_v49  ;;  %vm8948_vm14 = vmpackc.low %vm17911_vm2, %vm17910_vm10  ;;  %vm17919_vm4 = vcmp.eq.s32.totalorder %v10077_v40, %v10423_v50  ;;  %vm17920_vm2 = vcmp.eq.s32.totalorder %v10074_v37, %v10414_v21 }
 0x208   : > { %8949 = vmatprep.subr.msk.bf16.mxu1 %vm8948_vm14, %v9706_v49  ;;  %vm8694_vm9 = vmpackc.low %vm17913_vm12, %vm17912_vm6  ;;  %vm17921_vm14 = vcmp.eq.s32.totalorder %v10077_v40, %v10414_v21  ;;  %vm17922_vm12 = vcmp.eq.s32.totalorder %v10074_v37, %v10420_v24  ;;  %v18050_v37 = vld [vmem:[#allocation33_spill] sm:$0xff] }
 0x209   : > { %8695 = vmatpush1.bf16.msk.msra.mxu0 %vm8694_vm9, %v9706_v49  ;;  %vm8950_vm3 = vmpackc.low %vm17915_vm1, %vm17914_vm11  ;;  %vm17923_vm9 = vcmp.eq.s32.totalorder %v10077_v40, %v10420_v24  ;;  %vm17924_vm1 = vcmp.eq.s32.totalorder %v10080_v47, %v10417_v33  ;;  %v18058_v40 = vld [vmem:[#allocation34_spill] sm:$0xff] }
 0x20a   : > { %8951 = vmatpush1.bf16.msk.msra.mxu1 %vm8950_vm3, %v9706_v49  ;;  %vm8696_vm15 = vmpackc.low %vm17917_vm8, %vm17916_vm13  ;;  %vm17925_vm3 = vcmp.eq.s32.totalorder %v10083_v48, %v10417_v33  ;;  %vm17926_vm8 = vcmp.eq.s32.totalorder %v10080_v47, %v10423_v50 }
 0x20b   : > { %8697 = vmatprep.subr.msk.bf16.mxu0 %vm8696_vm15, %v9706_v49  ;;  %vm8952_vm10 = vmpackc.low %vm17919_vm4, %vm17918_vm0  ;;  %vm17927_vm15 = vcmp.eq.s32.totalorder %v10083_v48, %v10423_v50  ;;  %vm17928_vm4 = vcmp.eq.s32.totalorder %v10080_v47, %v10414_v21 }
 0x20c   : > { %8953 = vmatprep.subr.msk.bf16.mxu1 %vm8952_vm10, %v9706_v49  ;;  %vm8698_vm6 = vmpackc.low %vm17921_vm14, %vm17920_vm2  ;;  %vm17929_vm10 = vcmp.eq.s32.totalorder %v10083_v48, %v10414_v21  ;;  %vm17930_vm14 = vcmp.eq.s32.totalorder %v10080_v47, %v10420_v24  ;;  %v18060_v47 = vld [vmem:[#allocation35_spill] sm:$0xff] }
 0x20d   : > { %8699 = vmatpush1.bf16.msk.msra.mxu0 %vm8698_vm6, %v9706_v49  ;;  %vm8954_vm11 = vmpackc.low %vm17923_vm9, %vm17922_vm12  ;;  %vm17931_vm6 = vcmp.eq.s32.totalorder %v10083_v48, %v10420_v24  ;;  %vm17932_vm9 = vcmp.eq.s32.totalorder %v10086_v51, %v10417_v33  ;;  %v18068_v48 = vld [vmem:[#allocation36_spill] sm:$0xff] }
 0x20e   : > { %8955 = vmatpush1.bf16.msk.msra.mxu1 %vm8954_vm11, %v9706_v49  ;;  %vm8700_vm13 = vmpackc.low %vm17925_vm3, %vm17924_vm1  ;;  %vm17933_vm11 = vcmp.eq.s32.totalorder %v10089_v52, %v10417_v33  ;;  %vm17934_vm3 = vcmp.eq.s32.totalorder %v10086_v51, %v10423_v50 }
 0x20f   : > { %8701 = vmatprep.subr.msk.bf16.mxu0 %vm8700_vm13, %v9706_v49  ;;  %vm8956_vm0 = vmpackc.low %vm17927_vm15, %vm17926_vm8  ;;  %vm17935_vm13 = vcmp.eq.s32.totalorder %v10089_v52, %v10423_v50  ;;  %vm17936_vm15 = vcmp.eq.s32.totalorder %v10086_v51, %v10414_v21 }
 0x210   : > { %8957 = vmatprep.subr.msk.bf16.mxu1 %vm8956_vm0, %v9706_v49  ;;  %4499 = vmatmul.mubr.f32.vlgmr.msra.gmra.mrb[10].mxu0 %v9393_v8  ;;  %vm8702_vm2 = vmpackc.low %vm17929_vm10, %vm17928_vm4  ;;  %vm17937_vm0 = vcmp.eq.s32.totalorder %v10089_v52, %v10414_v21  ;;  %vm17938_vm10 = vcmp.eq.s32.totalorder %v10086_v51, %v10420_v24  ;;  %v18070_v51 = vld [vmem:[#allocation37_spill] sm:$0xff] }
 0x211   : > { %8703 = vmatpush1.bf16.msk.msra.mxu0 %vm8702_vm2, %v9706_v49  ;;  %4879 = vmatmul.mubr.f32.vlgmr.msra.gmra.mrb[10].mxu1 %v9393_v8  ;;  %vm8958_vm12 = vmpackc.low %vm17931_vm6, %vm17930_vm14  ;;  %vm17939_vm2 = vcmp.eq.s32.totalorder %v10089_v52, %v10420_v24  ;;  %vm17940_vm6 = vcmp.eq.s32.totalorder %v10092_v55, %v10417_v33  ;;  %v9403_v52 = vld [vmem:[%s9962_s30 + $0x10] sm:$0xff]  ;;  %v18148_v8 = vld [vmem:[#allocation52_spill] sm:$0xff] }
 0x212   : > { %8959 = vmatpush1.bf16.msk.msra.mxu1 %vm8958_vm12, %v9706_v49  ;;  %vm8704_vm1 = vmpackc.low %vm17933_vm11, %vm17932_vm9  ;;  %4504 = vmatprep.mubr.f32.mxu0 %v9394_v18  ;;  %vm17941_vm12 = vcmp.eq.s32.totalorder %v10095_v56, %v10417_v33  ;;  %vm17942_vm11 = vcmp.eq.s32.totalorder %v10092_v55, %v10423_v50 }
 0x213   : > { %8705 = vmatprep.subr.msk.bf16.mxu0 %vm8704_vm1, %v9706_v49  ;;  %vm8960_vm8 = vmpackc.low %vm17935_vm13, %vm17934_vm3  ;;  %4884 = vmatprep.mubr.f32.mxu1 %v9394_v18  ;;  %vm17943_vm1 = vcmp.eq.s32.totalorder %v10095_v56, %v10423_v50  ;;  %vm17944_vm13 = vcmp.eq.s32.totalorder %v10092_v55, %v10414_v21  ;;  %v18150_v18 = vld [vmem:[#allocation53_spill] sm:$0xff] }
 0x214   : > { %8961 = vmatprep.subr.msk.bf16.mxu1 %vm8960_vm8, %v9706_v49  ;;  %vm8706_vm4 = vmpackc.low %vm17937_vm0, %vm17936_vm15  ;;  %4505 = vmatmul.mubr.f32.gmra.mrb[12].mxu0 %v9395_v19  ;;  %vm17945_vm8 = vcmp.eq.s32.totalorder %v10095_v56, %v10414_v21  ;;  %vm17946_vm0 = vcmp.eq.s32.totalorder %v10092_v55, %v10420_v24  ;;  %v18078_v55 = vld [vmem:[#allocation38_spill] sm:$0xff] }
 0x215   : > { %8707 = vmatpush1.bf16.msk.msra.mxu0 %vm8706_vm4, %v9706_v49  ;;  %vm8962_vm14 = vmpackc.low %vm17939_vm2, %vm17938_vm10  ;;  %4885 = vmatmul.mubr.f32.gmra.mrb[12].mxu1 %v9395_v19  ;;  %vm17947_vm4 = vcmp.eq.s32.totalorder %v10095_v56, %v10420_v24  ;;  %vm17948_vm2 = vcmp.eq.s32.totalorder %v10098_v57, %v10417_v33  ;;  %v18080_v56 = vld [vmem:[#allocation39_spill] sm:$0xff]  ;;  %v18158_v19 = vld [vmem:[#allocation54_spill] sm:$0xff] }
 0x216   : > { %8963 = vmatpush1.bf16.msk.msra.mxu1 %vm8962_vm14, %v9706_v49  ;;  %vm8708_vm9 = vmpackc.low %vm17941_vm12, %vm17940_vm6  ;;  %4510 = vmatprep.mubr.f32.mxu0 %v9396_v22  ;;  %vm17949_vm14 = vcmp.eq.s32.totalorder %v10101_v60, %v10417_v33  ;;  %vm17950_vm12 = vcmp.eq.s32.totalorder %v10098_v57, %v10423_v50 }
 0x217   : > { %8709 = vmatprep.subr.msk.bf16.mxu0 %vm8708_vm9, %v9706_v49  ;;  %vm8964_vm3 = vmpackc.low %vm17943_vm1, %vm17942_vm11  ;;  %4890 = vmatprep.mubr.f32.mxu1 %v9396_v22  ;;  %vm17951_vm9 = vcmp.eq.s32.totalorder %v10101_v60, %v10423_v50  ;;  %vm17952_vm1 = vcmp.eq.s32.totalorder %v10098_v57, %v10414_v21  ;;  %v18160_v22 = vld [vmem:[#allocation55_spill] sm:$0xff] }
 0x218   : > { %8965 = vmatprep.subr.msk.bf16.mxu1 %vm8964_vm3, %v9706_v49  ;;  %vm8710_vm15 = vmpackc.low %vm17945_vm8, %vm17944_vm13  ;;  %4511 = vmatmul.mubr.f32.gmra.mrb[14].mxu0 %v9397_v23  ;;  %vm17953_vm3 = vcmp.eq.s32.totalorder %v10101_v60, %v10414_v21  ;;  %vm17954_vm8 = vcmp.eq.s32.totalorder %v10098_v57, %v10420_v24  ;;  %v9404_v57 = vld [vmem:[%s9962_s30 + $0x58] sm:$0xff] }
 0x219   : > { %8711 = vmatpush1.bf16.msk.msra.mxu0 %vm8710_vm15, %v9706_v49  ;;  %vm8966_vm10 = vmpackc.low %vm17947_vm4, %vm17946_vm0  ;;  %4891 = vmatmul.mubr.f32.gmra.mrb[14].mxu1 %v9397_v23  ;;  %vm17955_vm15 = vcmp.eq.s32.totalorder %v10101_v60, %v10420_v24  ;;  %vm17956_vm4 = vcmp.eq.s32.totalorder %v10104_v61, %v10417_v33  ;;  %v9405_v60 = vld [vmem:[%s9962_s30 + $0x50] sm:$0xff]  ;;  %v18168_v23 = vld [vmem:[#allocation56_spill] sm:$0xff] }
 0x21a   : > { %8967 = vmatpush1.bf16.msk.msra.mxu1 %vm8966_vm10, %v9706_v49  ;;  %vm8712_vm6 = vmpackc.low %vm17949_vm14, %vm17948_vm2  ;;  %4516 = vmatprep.mubr.f32.mxu0 %v9398_v26  ;;  %vm17957_vm10 = vcmp.eq.s32.totalorder %v10107_v0, %v10417_v33  ;;  %vm17958_vm14 = vcmp.eq.s32.totalorder %v10104_v61, %v10423_v50 }
 0x21b   : > { %8713 = vmatprep.subr.msk.bf16.mxu0 %vm8712_vm6, %v9706_v49  ;;  %vm8968_vm11 = vmpackc.low %vm17951_vm9, %vm17950_vm12  ;;  %4896 = vmatprep.mubr.f32.mxu1 %v9398_v26  ;;  %vm17959_vm6 = vcmp.eq.s32.totalorder %v10107_v0, %v10423_v50  ;;  %vm17960_vm9 = vcmp.eq.s32.totalorder %v10104_v61, %v10414_v21  ;;  %v18170_v26 = vld [vmem:[#allocation57_spill] sm:$0xff] }
 0x21c   : > { %8969 = vmatprep.subr.msk.bf16.mxu1 %vm8968_vm11, %v9706_v49  ;;  %vm8714_vm13 = vmpackc.low %vm17953_vm3, %vm17952_vm1  ;;  %4517 = vmatmul.mubr.f32.gmra.mrb[16].mxu0 %v9399_v27  ;;  %vm17961_vm11 = vcmp.eq.s32.totalorder %v10107_v0, %v10414_v21  ;;  %vm17962_vm3 = vcmp.eq.s32.totalorder %v10104_v61, %v10420_v24  ;;  %v18088_v61 = vld [vmem:[#allocation40_spill] sm:$0xff] }
 0x21d   : > { %8715 = vmatpush1.bf16.msk.msra.mxu0 %vm8714_vm13, %v9706_v49  ;;  %vm8970_vm0 = vmpackc.low %vm17955_vm15, %vm17954_vm8  ;;  %4897 = vmatmul.mubr.f32.gmra.mrb[16].mxu1 %v9399_v27  ;;  %vm17963_vm13 = vcmp.eq.s32.totalorder %v10107_v0, %v10420_v24  ;;  %vm17964_vm15 = vcmp.eq.s32.totalorder %v10116_v17, %v10417_v33  ;;  %v18090_v0 = vld [vmem:[#allocation41_spill] sm:$0xff]  ;;  %v18178_v27 = vld [vmem:[#allocation58_spill] sm:$0xff] }
 0x21e   : > { %8971 = vmatpush1.bf16.msk.msra.mxu1 %vm8970_vm0, %v9706_v49  ;;  %vm8716_vm2 = vmpackc.low %vm17957_vm10, %vm17956_vm4  ;;  %4522 = vmatprep.mubr.f32.mxu0 %v9400_v30  ;;  %vm17965_vm0 = vcmp.eq.s32.totalorder %v10119_v20, %v10417_v33  ;;  %vm17966_vm10 = vcmp.eq.s32.totalorder %v10116_v17, %v10423_v50 }
 0x21f   : > { %8717 = vmatprep.subr.msk.bf16.mxu0 %vm8716_vm2, %v9706_v49  ;;  %vm8972_vm12 = vmpackc.low %vm17959_vm6, %vm17958_vm14  ;;  %4902 = vmatprep.mubr.f32.mxu1 %v9400_v30  ;;  %vm17967_vm2 = vcmp.eq.s32.totalorder %v10119_v20, %v10423_v50  ;;  %vm17968_vm6 = vcmp.eq.s32.totalorder %v10116_v17, %v10414_v21  ;;  %v18180_v30 = vld [vmem:[#allocation59_spill] sm:$0xff] }
 0x220   : > { %8973 = vmatprep.subr.msk.bf16.mxu1 %vm8972_vm12, %v9706_v49  ;;  %vm8718_vm1 = vmpackc.low %vm17961_vm11, %vm17960_vm9  ;;  %4523 = vmatmul.mubr.f32.gmra.mrb[18].mxu0 %v9401_v31  ;;  %vm17969_vm12 = vcmp.eq.s32.totalorder %v10119_v20, %v10414_v21  ;;  %vm17970_vm11 = vcmp.eq.s32.totalorder %v10116_v17, %v10420_v24  ;;  %v9406_v17 = vld [vmem:[%s9962_s30 + $0x98] sm:$0xff] }
 0x221   : > { %8719 = vmatpush1.bf16.msk.msra.mxu0 %vm8718_vm1, %v9706_v49  ;;  %vm8974_vm8 = vmpackc.low %vm17963_vm13, %vm17962_vm3  ;;  %4903 = vmatmul.mubr.f32.gmra.mrb[18].mxu1 %v9401_v31  ;;  %vm17971_vm1 = vcmp.eq.s32.totalorder %v10119_v20, %v10420_v24  ;;  %vm17972_vm13 = vcmp.eq.s32.totalorder %v10128_v25, %v10417_v33  ;;  %v9407_v20 = vld [vmem:[%s9962_s30 + $0x90] sm:$0xff]  ;;  %v18188_v31 = vld [vmem:[#allocation60_spill] sm:$0xff] }
 0x222   : > { %8975 = vmatpush1.bf16.msk.msra.mxu1 %vm8974_vm8, %v9706_v49  ;;  %vm8720_vm4 = vmpackc.low %vm17965_vm0, %vm17964_vm15  ;;  %4593 = vmatprep.mubr.f32.mxu0 %v9402_v34  ;;  %vm17973_vm8 = vcmp.eq.s32.totalorder %v10131_v28, %v10417_v33  ;;  %vm17974_vm0 = vcmp.eq.s32.totalorder %v10128_v25, %v10423_v50 }
 0x223   : > { %8721 = vmatprep.subr.msk.bf16.mxu0 %vm8720_vm4, %v9706_v49  ;;  %vm8976_vm14 = vmpackc.low %vm17967_vm2, %vm17966_vm10  ;;  %4973 = vmatprep.mubr.f32.mxu1 %v9402_v34  ;;  %vm17975_vm4 = vcmp.eq.s32.totalorder %v10131_v28, %v10423_v50  ;;  %vm17976_vm2 = vcmp.eq.s32.totalorder %v10128_v25, %v10414_v21  ;;  %v18190_v34 = vld [vmem:[#allocation61_spill] sm:$0xff] }
 0x224   : > { %8977 = vmatprep.subr.msk.bf16.mxu1 %vm8976_vm14, %v9706_v49  ;;  %vm8722_vm9 = vmpackc.low %vm17969_vm12, %vm17968_vm6  ;;  %vm17977_vm14 = vcmp.eq.s32.totalorder %v10131_v28, %v10414_v21  ;;  %vm17978_vm12 = vcmp.eq.s32.totalorder %v10128_v25, %v10420_v24  ;;  %v18098_v25 = vld [vmem:[#allocation42_spill] sm:$0xff] }
 0x225   : > { %8723 = vmatpush1.bf16.msk.msra.mxu0 %vm8722_vm9, %v9706_v49  ;;  %vm8978_vm3 = vmpackc.low %vm17971_vm1, %vm17970_vm11  ;;  %vm17979_vm9 = vcmp.eq.s32.totalorder %v10131_v28, %v10420_v24  ;;  %vm17980_vm1 = vcmp.eq.s32.totalorder %v10134_v29, %v10417_v33  ;;  %v18100_v28 = vld [vmem:[#allocation43_spill] sm:$0xff] }
 0x226   : > { %8979 = vmatpush1.bf16.msk.msra.mxu1 %vm8978_vm3, %v9706_v49  ;;  %vm8724_vm15 = vmpackc.low %vm17973_vm8, %vm17972_vm13  ;;  %vm17981_vm3 = vcmp.eq.s32.totalorder %v17391_v15, %v10417_v33  ;;  %vm17982_vm8 = vcmp.eq.s32.totalorder %v10134_v29, %v10423_v50 }
 0x227   : > { %8725 = vmatprep.subr.msk.bf16.mxu0 %vm8724_vm15, %v9706_v49  ;;  %vm8980_vm10 = vmpackc.low %vm17975_vm4, %vm17974_vm0  ;;  %vm17983_vm15 = vcmp.eq.s32.totalorder %v17391_v15, %v10423_v50  ;;  %vm17984_vm4 = vcmp.eq.s32.totalorder %v10134_v29, %v10414_v21 }
 0x228   : > { %8981 = vmatprep.subr.msk.bf16.mxu1 %vm8980_vm10, %v9706_v49  ;;  %vm8726_vm6 = vmpackc.low %vm17977_vm14, %vm17976_vm2  ;;  %vm17985_vm10 = vcmp.eq.s32.totalorder %v17391_v15, %v10414_v21  ;;  %vm17986_vm14 = vcmp.eq.s32.totalorder %v10134_v29, %v10420_v24  ;;  %v9408_v29 = vld [vmem:[%s9962_s30 + $0xd8] sm:$0xff] }
 0x229   : > { %8727 = vmatpush1.bf16.msk.msra.mxu0 %vm8726_vm6, %v9706_v49  ;;  %vm8982_vm11 = vmpackc.low %vm17979_vm9, %vm17978_vm12  ;;  %vm17987_vm6 = vcmp.eq.s32.totalorder %v17391_v15, %v10420_v24  ;;  %vm17989_vm9 = vcmp.eq.s32.totalorder %v17988_v35, %v10417_v33  ;;  %v18108_v15 = vld [vmem:[#allocation44_spill] sm:$0xff] }
 0x22a   : > { %8983 = vmatpush1.bf16.msk.msra.mxu1 %vm8982_vm11, %v9706_v49  ;;  %vm8728_vm13 = vmpackc.low %vm17981_vm3, %vm17980_vm1  ;;  %vm17991_vm11 = vcmp.eq.s32.totalorder %v17990_v38, %v10417_v33  ;;  %vm17992_vm3 = vcmp.eq.s32.totalorder %v17988_v35, %v10423_v50 }
 0x22b   : > { %8729 = vmatprep.subr.msk.bf16.mxu0 %vm8728_vm13, %v9706_v49  ;;  %vm8984_vm0 = vmpackc.low %vm17983_vm15, %vm17982_vm8  ;;  %vm17993_vm13 = vcmp.eq.s32.totalorder %v17990_v38, %v10423_v50  ;;  %vm17994_vm15 = vcmp.eq.s32.totalorder %v17988_v35, %v10414_v21 }
 0x22c   : > { %8985 = vmatprep.subr.msk.bf16.mxu1 %vm8984_vm0, %v9706_v49  ;;  %vm8730_vm2 = vmpackc.low %vm17985_vm10, %vm17984_vm4  ;;  %vm17995_vm0 = vcmp.eq.s32.totalorder %v17990_v38, %v10414_v21  ;;  %vm17996_vm10 = vcmp.eq.s32.totalorder %v17988_v35, %v10420_v24  ;;  %v18198_v35 = vld [vmem:[#allocation62_spill] sm:$0xff] }
 0x22d   : > { %8731 = vmatpush1.bf16.msk.msra.mxu0 %vm8730_vm2, %v9706_v49  ;;  %vm8986_vm12 = vmpackc.low %vm17987_vm6, %vm17986_vm14  ;;  %vm17997_vm2 = vcmp.eq.s32.totalorder %v17990_v38, %v10420_v24  ;;  %vm17999_vm6 = vcmp.eq.s32.totalorder %v17998_v39, %v10417_v33  ;;  %v18200_v38 = vld [vmem:[#allocation63_spill] sm:$0xff] }
 0x22e   : > { %8987 = vmatpush1.bf16.msk.msra.mxu1 %vm8986_vm12, %v9706_v49  ;;  %vm8732_vm1 = vmpackc.low %vm17991_vm11, %vm17989_vm9  ;;  %vm18001_vm12 = vcmp.eq.s32.totalorder %v18000_v42, %v10417_v33  ;;  %vm18002_vm11 = vcmp.eq.s32.totalorder %v17998_v39, %v10423_v50 }
 0x22f   : > { %8733 = vmatprep.subr.msk.bf16.mxu0 %vm8732_vm1, %v9706_v49  ;;  %vm8988_vm8 = vmpackc.low %vm17993_vm13, %vm17992_vm3  ;;  %vm18003_vm1 = vcmp.eq.s32.totalorder %v18000_v42, %v10423_v50  ;;  %vm18004_vm13 = vcmp.eq.s32.totalorder %v17998_v39, %v10414_v21 }
 0x230   : > { %8989 = vmatprep.subr.msk.bf16.mxu1 %vm8988_vm8, %v9706_v49  ;;  %vm8734_vm4 = vmpackc.low %vm17995_vm0, %vm17994_vm15  ;;  %vm18005_vm8 = vcmp.eq.s32.totalorder %v18000_v42, %v10414_v21  ;;  %vm18006_vm0 = vcmp.eq.s32.totalorder %v17998_v39, %v10420_v24  ;;  %v18208_v39 = vld [vmem:[#allocation64_spill] sm:$0xff] }
 0x231   : > { %8735 = vmatpush1.bf16.msk.msra.mxu0 %vm8734_vm4, %v9706_v49  ;;  %vm8990_vm14 = vmpackc.low %vm17997_vm2, %vm17996_vm10  ;;  %vm18007_vm4 = vcmp.eq.s32.totalorder %v18000_v42, %v10420_v24  ;;  %vm18009_vm2 = vcmp.eq.s32.totalorder %v18008_v43, %v10417_v33  ;;  %v18210_v42 = vld [vmem:[#allocation65_spill] sm:$0xff] }
 0x232   : > { %8991 = vmatpush1.bf16.msk.msra.mxu1 %vm8990_vm14, %v9706_v49  ;;  %vm8736_vm9 = vmpackc.low %vm18001_vm12, %vm17999_vm6  ;;  %vm18011_vm14 = vcmp.eq.s32.totalorder %v18010_v44, %v10417_v33  ;;  %vm18012_vm12 = vcmp.eq.s32.totalorder %v18008_v43, %v10423_v50 }
 0x233   : > { %8737 = vmatprep.subr.msk.bf16.mxu0 %vm8736_vm9, %v9706_v49  ;;  %vm8992_vm3 = vmpackc.low %vm18003_vm1, %vm18002_vm11  ;;  %vm18013_vm9 = vcmp.eq.s32.totalorder %v18010_v44, %v10423_v50  ;;  %vm18014_vm1 = vcmp.eq.s32.totalorder %v18008_v43, %v10414_v21 }
 0x234   : > { %8993 = vmatprep.subr.msk.bf16.mxu1 %vm8992_vm3, %v9706_v49  ;;  %vm8738_vm15 = vmpackc.low %vm18005_vm8, %vm18004_vm13  ;;  %vm18015_vm3 = vcmp.eq.s32.totalorder %v18010_v44, %v10414_v21  ;;  %vm18016_vm8 = vcmp.eq.s32.totalorder %v18008_v43, %v10420_v24  ;;  %v18218_v43 = vld [vmem:[#allocation66_spill] sm:$0xff] }
 0x235   : > { %8739 = vmatpush1.bf16.msk.msra.mxu0 %vm8738_vm15, %v9706_v49  ;;  %vm8994_vm10 = vmpackc.low %vm18007_vm4, %vm18006_vm0  ;;  %vm18017_vm15 = vcmp.eq.s32.totalorder %v18010_v44, %v10420_v24  ;;  %vm18019_vm4 = vcmp.eq.s32.totalorder %v18018_v45, %v10417_v33  ;;  %v18220_v44 = vld [vmem:[#allocation67_spill] sm:$0xff] }
 0x236   : > { %8995 = vmatpush1.bf16.msk.msra.mxu1 %vm8994_vm10, %v9706_v49  ;;  %vm8740_vm6 = vmpackc.low %vm18011_vm14, %vm18009_vm2  ;;  %vm18021_vm10 = vcmp.eq.s32.totalorder %v18020_v58, %v10417_v33  ;;  %vm18022_vm14 = vcmp.eq.s32.totalorder %v18018_v45, %v10423_v50 }
 0x237   : > { %8741 = vmatprep.subr.msk.bf16.mxu0 %vm8740_vm6, %v9706_v49  ;;  %vm8996_vm11 = vmpackc.low %vm18013_vm9, %vm18012_vm12  ;;  %vm18023_vm6 = vcmp.eq.s32.totalorder %v18020_v58, %v10423_v50  ;;  %vm18024_vm9 = vcmp.eq.s32.totalorder %v18018_v45, %v10414_v21 }
 0x238   : > { %8997 = vmatprep.subr.msk.bf16.mxu1 %vm8996_vm11, %v9706_v49  ;;  %vm8742_vm13 = vmpackc.low %vm18015_vm3, %vm18014_vm1  ;;  %vm18025_vm11 = vcmp.eq.s32.totalorder %v18020_v58, %v10414_v21  ;;  %vm18026_vm3 = vcmp.eq.s32.totalorder %v18018_v45, %v10420_v24  ;;  %v18228_v45 = vld [vmem:[#allocation68_spill] sm:$0xff] }
 0x239   : > { %8743 = vmatpush1.bf16.msk.msra.mxu0 %vm8742_vm13, %v9706_v49  ;;  %vm8998_vm0 = vmpackc.low %vm18017_vm15, %vm18016_vm8  ;;  %vm18027_vm13 = vcmp.eq.s32.totalorder %v18020_v58, %v10420_v24  ;;  %vm18029_vm15 = vcmp.eq.s32.totalorder %v18028_v59, %v10417_v33  ;;  %v18230_v58 = vld [vmem:[#allocation69_spill] sm:$0xff] }
 0x23a   : > { %8999 = vmatpush1.bf16.msk.msra.mxu1 %vm8998_vm0, %v9706_v49  ;;  %vm8744_vm2 = vmpackc.low %vm18021_vm10, %vm18019_vm4  ;;  %vm18031_vm0 = vcmp.eq.s32.totalorder %v18030_v62, %v10417_v33  ;;  %vm18032_vm10 = vcmp.eq.s32.totalorder %v18028_v59, %v10423_v50 }
 0x23b   : > { %8745 = vmatprep.subr.msk.bf16.mxu0 %vm8744_vm2, %v9706_v49  ;;  %vm9000_vm12 = vmpackc.low %vm18023_vm6, %vm18022_vm14  ;;  %vm18033_vm2 = vcmp.eq.s32.totalorder %v18030_v62, %v10423_v50  ;;  %vm18034_vm6 = vcmp.eq.s32.totalorder %v18028_v59, %v10414_v21 }
 0x23c   : > { %9001 = vmatprep.subr.msk.bf16.mxu1 %vm9000_vm12, %v9706_v49  ;;  %vm8746_vm1 = vmpackc.low %vm18025_vm11, %vm18024_vm9  ;;  %vm18035_vm12 = vcmp.eq.s32.totalorder %v18030_v62, %v10414_v21  ;;  %vm18036_vm11 = vcmp.eq.s32.totalorder %v18028_v59, %v10420_v24  ;;  %v9413_v59 = vld [vmem:[%s9962_s30 + $0x20] sm:$0xff] }
 0x23d   : > { %8747 = vmatpush1.bf16.msk.msra.mxu0 %vm8746_vm1, %v9706_v49  ;;  %vm9002_vm8 = vmpackc.low %vm18027_vm13, %vm18026_vm3  ;;  %vm18037_vm1 = vcmp.eq.s32.totalorder %v18030_v62, %v10420_v24  ;;  %vm18039_vm13 = vcmp.eq.s32.totalorder %v18038_v63, %v10417_v33  ;;  %v18238_v62 = vld [vmem:[#allocation70_spill] sm:$0xff] }
 0x23e   : > { %9003 = vmatpush1.bf16.msk.msra.mxu1 %vm9002_vm8, %v9706_v49  ;;  %vm8748_vm4 = vmpackc.low %vm18031_vm0, %vm18029_vm15  ;;  %vm18041_vm8 = vcmp.eq.s32.totalorder %v18040_v16, %v10417_v33  ;;  %vm18042_vm0 = vcmp.eq.s32.totalorder %v18038_v63, %v10423_v50 }
 0x23f   : > { %8749 = vmatprep.subr.msk.bf16.mxu0 %vm8748_vm4, %v9706_v49  ;;  %vm9004_vm14 = vmpackc.low %vm18033_vm2, %vm18032_vm10  ;;  %vm18043_vm4 = vcmp.eq.s32.totalorder %v18040_v16, %v10423_v50  ;;  %vm18044_vm2 = vcmp.eq.s32.totalorder %v18038_v63, %v10414_v21 }
 0x240   : > { %9005 = vmatprep.subr.msk.bf16.mxu1 %vm9004_vm14, %v9706_v49  ;;  %vm8750_vm9 = vmpackc.low %vm18035_vm12, %vm18034_vm6  ;;  %vm18045_vm14 = vcmp.eq.s32.totalorder %v18040_v16, %v10414_v21  ;;  %vm18046_vm12 = vcmp.eq.s32.totalorder %v18038_v63, %v10420_v24  ;;  %v18240_v63 = vld [vmem:[#allocation71_spill] sm:$0xff] }
 0x241   : > { %8751 = vmatpush1.bf16.msk.msra.mxu0 %vm8750_vm9, %v9706_v49  ;;  %vm9006_vm3 = vmpackc.low %vm18037_vm1, %vm18036_vm11  ;;  %vm18047_vm9 = vcmp.eq.s32.totalorder %v18040_v16, %v10420_v24  ;;  %vm18049_vm1 = vcmp.eq.s32.totalorder %v18048_v32, %v10417_v33  ;;  %v9414_v16 = vld [vmem:[%s9962_s30 + $0x68] sm:$0xff] }
 0x242   : > { %9007 = vmatpush1.bf16.msk.msra.mxu1 %vm9006_vm3, %v9706_v49  ;;  %vm8752_vm15 = vmpackc.low %vm18041_vm8, %vm18039_vm13  ;;  %vm18051_vm3 = vcmp.eq.s32.totalorder %v18050_v37, %v10417_v33  ;;  %vm18052_vm8 = vcmp.eq.s32.totalorder %v18048_v32, %v10423_v50 }
 0x243   : > { %8753 = vmatprep.subr.msk.bf16.mxu0 %vm8752_vm15, %v9706_v49  ;;  %vm9008_vm10 = vmpackc.low %vm18043_vm4, %vm18042_vm0  ;;  %vm18053_vm15 = vcmp.eq.s32.totalorder %v18050_v37, %v10423_v50  ;;  %vm18054_vm4 = vcmp.eq.s32.totalorder %v18048_v32, %v10414_v21 }
 0x244   : > { %9009 = vmatprep.subr.msk.bf16.mxu1 %vm9008_vm10, %v9706_v49  ;;  %vm8754_vm6 = vmpackc.low %vm18045_vm14, %vm18044_vm2  ;;  %vm18055_vm10 = vcmp.eq.s32.totalorder %v18050_v37, %v10414_v21  ;;  %vm18056_vm14 = vcmp.eq.s32.totalorder %v18048_v32, %v10420_v24  ;;  %v9415_v32 = vld [vmem:[%s9962_s30 + $0x60] sm:$0xff] }
 0x245   : > { %8755 = vmatpush1.bf16.msk.msra.mxu0 %vm8754_vm6, %v9706_v49  ;;  %vm9010_vm11 = vmpackc.low %vm18047_vm9, %vm18046_vm12  ;;  %vm18057_vm6 = vcmp.eq.s32.totalorder %v18050_v37, %v10420_v24  ;;  %vm18059_vm9 = vcmp.eq.s32.totalorder %v18058_v40, %v10417_v33  ;;  %v18248_v37 = vld [vmem:[#allocation72_spill] sm:$0xff] }
 0x246   : > { %9011 = vmatpush1.bf16.msk.msra.mxu1 %vm9010_vm11, %v9706_v49  ;;  %vm8756_vm13 = vmpackc.low %vm18051_vm3, %vm18049_vm1  ;;  %vm18061_vm11 = vcmp.eq.s32.totalorder %v18060_v47, %v10417_v33  ;;  %vm18062_vm3 = vcmp.eq.s32.totalorder %v18058_v40, %v10423_v50 }
 0x247   : > { %8757 = vmatprep.subr.msk.bf16.mxu0 %vm8756_vm13, %v9706_v49  ;;  %vm9012_vm0 = vmpackc.low %vm18053_vm15, %vm18052_vm8  ;;  %vm18063_vm13 = vcmp.eq.s32.totalorder %v18060_v47, %v10423_v50  ;;  %vm18064_vm15 = vcmp.eq.s32.totalorder %v18058_v40, %v10414_v21 }
 0x248   : > { %9013 = vmatprep.subr.msk.bf16.mxu1 %vm9012_vm0, %v9706_v49  ;;  %vm8758_vm2 = vmpackc.low %vm18055_vm10, %vm18054_vm4  ;;  %vm18065_vm0 = vcmp.eq.s32.totalorder %v18060_v47, %v10414_v21  ;;  %vm18066_vm10 = vcmp.eq.s32.totalorder %v18058_v40, %v10420_v24  ;;  %v18250_v40 = vld [vmem:[#allocation73_spill] sm:$0xff] }
 0x249   : > { %8759 = vmatpush1.bf16.msk.msra.mxu0 %vm8758_vm2, %v9706_v49  ;;  %vm9014_vm12 = vmpackc.low %vm18057_vm6, %vm18056_vm14  ;;  %vm18067_vm2 = vcmp.eq.s32.totalorder %v18060_v47, %v10420_v24  ;;  %vm18069_vm6 = vcmp.eq.s32.totalorder %v18068_v48, %v10417_v33  ;;  %v9416_v47 = vld [vmem:[%s9962_s30 + $0xa8] sm:$0xff] }
 0x24a   : > { %9015 = vmatpush1.bf16.msk.msra.mxu1 %vm9014_vm12, %v9706_v49  ;;  %vm8760_vm1 = vmpackc.low %vm18061_vm11, %vm18059_vm9  ;;  %vm18071_vm12 = vcmp.eq.s32.totalorder %v18070_v51, %v10417_v33  ;;  %vm18072_vm11 = vcmp.eq.s32.totalorder %v18068_v48, %v10423_v50 }
 0x24b   : > { %8761 = vmatprep.subr.msk.bf16.mxu0 %vm8760_vm1, %v9706_v49  ;;  %vm9016_vm8 = vmpackc.low %vm18063_vm13, %vm18062_vm3  ;;  %vm18073_vm1 = vcmp.eq.s32.totalorder %v18070_v51, %v10423_v50  ;;  %vm18074_vm13 = vcmp.eq.s32.totalorder %v18068_v48, %v10414_v21 }
 0x24c   : > { %9017 = vmatprep.subr.msk.bf16.mxu1 %vm9016_vm8, %v9706_v49  ;;  %vm8762_vm4 = vmpackc.low %vm18065_vm0, %vm18064_vm15  ;;  %vm18075_vm8 = vcmp.eq.s32.totalorder %v18070_v51, %v10414_v21  ;;  %vm18076_vm0 = vcmp.eq.s32.totalorder %v18068_v48, %v10420_v24  ;;  %v9417_v48 = vld [vmem:[%s9962_s30 + $0xa0] sm:$0xff] }
 0x24d   : > { %8763 = vmatpush1.bf16.msk.msra.mxu0 %vm8762_vm4, %v9706_v49  ;;  %vm9018_vm14 = vmpackc.low %vm18067_vm2, %vm18066_vm10  ;;  %vm18077_vm4 = vcmp.eq.s32.totalorder %v18070_v51, %v10420_v24  ;;  %vm18079_vm2 = vcmp.eq.s32.totalorder %v18078_v55, %v10417_v33  ;;  %v18259_v51 = vld [vmem:[#allocation75_spill] sm:$0xff] }
 0x24e   : > { %9019 = vmatpush1.bf16.msk.msra.mxu1 %vm9018_vm14, %v9706_v49  ;;  %vm8764_vm9 = vmpackc.low %vm18071_vm12, %vm18069_vm6  ;;  %vm18081_vm14 = vcmp.eq.s32.totalorder %v18080_v56, %v10417_v33  ;;  %vm18082_vm12 = vcmp.eq.s32.totalorder %v18078_v55, %v10423_v50 }
 0x24f   : > { %8765 = vmatprep.subr.msk.bf16.mxu0 %vm8764_vm9, %v9706_v49  ;;  %vm9020_vm3 = vmpackc.low %vm18073_vm1, %vm18072_vm11  ;;  %vm18083_vm9 = vcmp.eq.s32.totalorder %v18080_v56, %v10423_v50  ;;  %vm18084_vm1 = vcmp.eq.s32.totalorder %v18078_v55, %v10414_v21 }
 0x250   : > { %9021 = vmatprep.subr.msk.bf16.mxu1 %vm9020_vm3, %v9706_v49  ;;  %4594 = vmatmul.mubr.f32.vlgmr.msra.gmra.mrb[10].mxu0 %v9403_v52  ;;  %vm8766_vm15 = vmpackc.low %vm18075_vm8, %vm18074_vm13  ;;  %vm18085_vm3 = vcmp.eq.s32.totalorder %v18080_v56, %v10414_v21  ;;  %vm18086_vm8 = vcmp.eq.s32.totalorder %v18078_v55, %v10420_v24  ;;  %v9419_v55 = vld [vmem:[%s9962_s30 + $0xe0] sm:$0xff] }
 0x251   : > { %8767 = vmatpush1.bf16.msk.msra.mxu0 %vm8766_vm15, %v9706_v49  ;;  %4974 = vmatmul.mubr.f32.vlgmr.msra.gmra.mrb[10].mxu1 %v9403_v52  ;;  %vm9022_vm10 = vmpackc.low %vm18077_vm4, %vm18076_vm0  ;;  %vm18087_vm15 = vcmp.eq.s32.totalorder %v18080_v56, %v10420_v24  ;;  %vm18089_vm4 = vcmp.eq.s32.totalorder %v18088_v61, %v10417_v33  ;;  %v9418_v52 = vld [vmem:[%s9962_s30 + $0xe8] sm:$0xff] }
 0x252   : > { %9023 = vmatpush1.bf16.msk.msra.mxu1 %vm9022_vm10, %v9706_v49  ;;  %vm8768_vm6 = vmpackc.low %vm18081_vm14, %vm18079_vm2  ;;  %4599 = vmatprep.mubr.f32.mxu0 %v9404_v57  ;;  %vm18091_vm10 = vcmp.eq.s32.totalorder %v18090_v0, %v10417_v33  ;;  %vm18092_vm14 = vcmp.eq.s32.totalorder %v18088_v61, %v10423_v50  ;;  %v9420_v56 = vld [vmem:[%s9962_s30 + $0x128] sm:$0xff] }
 0x253   : > { %8769 = vmatprep.subr.msk.bf16.mxu0 %vm8768_vm6, %v9706_v49  ;;  %vm9024_vm11 = vmpackc.low %vm18083_vm9, %vm18082_vm12  ;;  %4979 = vmatprep.mubr.f32.mxu1 %v9404_v57  ;;  %vm18093_vm6 = vcmp.eq.s32.totalorder %v18090_v0, %v10423_v50  ;;  %vm18094_vm9 = vcmp.eq.s32.totalorder %v18088_v61, %v10414_v21  ;;  %v3594_v57 = vld [vmem:[#allocation2] sm:$0xff] }
 0x254   : > { %9025 = vmatprep.subr.msk.bf16.mxu1 %vm9024_vm11, %v9706_v49  ;;  %vm8770_vm13 = vmpackc.low %vm18085_vm3, %vm18084_vm1  ;;  %4600 = vmatmul.mubr.f32.gmra.mrb[12].mxu0 %v9405_v60  ;;  %vm18095_vm11 = vcmp.eq.s32.totalorder %v18090_v0, %v10414_v21  ;;  %vm18096_vm3 = vcmp.eq.s32.totalorder %v18088_v61, %v10420_v24  ;;  %v3595_v61 = vld [vmem:[#allocation2 + $0x8] sm:$0xff] }
 0x255   : > { %8771 = vmatpush1.bf16.msk.msra.mxu0 %vm8770_vm13, %v9706_v49  ;;  %vm9026_vm0 = vmpackc.low %vm18087_vm15, %vm18086_vm8  ;;  %4980 = vmatmul.mubr.f32.gmra.mrb[12].mxu1 %v9405_v60  ;;  %vm18097_vm13 = vcmp.eq.s32.totalorder %v18090_v0, %v10420_v24  ;;  %vm18099_vm15 = vcmp.eq.s32.totalorder %v18098_v25, %v10417_v33  ;;  %v3596_v60 = vld [vmem:[#allocation2 + $0x10] sm:$0xff]  ;;  %v18275_v0 = vld [vmem:[#allocation78_spill] sm:$0xff] }
 0x256   : > { %9027 = vmatpush1.bf16.msk.msra.mxu1 %vm9026_vm0, %v9706_v49  ;;  %vm8772_vm2 = vmpackc.low %vm18091_vm10, %vm18089_vm4  ;;  %4605 = vmatprep.mubr.f32.mxu0 %v9406_v17  ;;  %vm18101_vm0 = vcmp.eq.s32.totalorder %v18100_v28, %v10417_v33  ;;  %vm18102_vm10 = vcmp.eq.s32.totalorder %v18098_v25, %v10423_v50 }
 0x257   : > { %8773 = vmatprep.subr.msk.bf16.mxu0 %vm8772_vm2, %v9706_v49  ;;  %vm9028_vm12 = vmpackc.low %vm18093_vm6, %vm18092_vm14  ;;  %4985 = vmatprep.mubr.f32.mxu1 %v9406_v17  ;;  %vm18103_vm2 = vcmp.eq.s32.totalorder %v18100_v28, %v10423_v50  ;;  %vm18104_vm6 = vcmp.eq.s32.totalorder %v18098_v25, %v10414_v21  ;;  %v18277_v17 = vld [vmem:[#allocation79_spill] sm:$0xff] }
 0x258   : > { %9029 = vmatprep.subr.msk.bf16.mxu1 %vm9028_vm12, %v9706_v49  ;;  %vm8774_vm1 = vmpackc.low %vm18095_vm11, %vm18094_vm9  ;;  %4606 = vmatmul.mubr.f32.gmra.mrb[14].mxu0 %v9407_v20  ;;  %vm18105_vm12 = vcmp.eq.s32.totalorder %v18100_v28, %v10414_v21  ;;  %vm18106_vm11 = vcmp.eq.s32.totalorder %v18098_v25, %v10420_v24  ;;  %v3597_v25 = vld [vmem:[#allocation2 + $0x18] sm:$0xff] }
 0x259   : > { %8775 = vmatpush1.bf16.msk.msra.mxu0 %vm8774_vm1, %v9706_v49  ;;  %vm9030_vm8 = vmpackc.low %vm18097_vm13, %vm18096_vm3  ;;  %4986 = vmatmul.mubr.f32.gmra.mrb[14].mxu1 %v9407_v20  ;;  %vm18107_vm1 = vcmp.eq.s32.totalorder %v18100_v28, %v10420_v24  ;;  %vm18109_vm13 = vcmp.eq.s32.totalorder %v18108_v15, %v10417_v33  ;;  %v9422_v20 = vld [vmem:[%s9962_s30 + $0x38] sm:$0xff] }
 0x25a   : > { %9031 = vmatpush1.bf16.msk.msra.mxu1 %vm9030_vm8, %v9706_v49  ;;  %vm8776_vm4 = vmpackc.low %vm18101_vm0, %vm18099_vm15  ;;  %4611 = vmatprep.mubr.f32.mxu0 %v9408_v29  ;;  %vm18111_vm8 = vcmp.eq.s32.totalorder %v18110_v36, %v10417_v33  ;;  %vm18112_vm0 = vcmp.eq.s32.totalorder %v18108_v15, %v10423_v50 }
 0x25b   : > { %8777 = vmatprep.subr.msk.bf16.mxu0 %vm8776_vm4, %v9706_v49  ;;  %vm9032_vm14 = vmpackc.low %vm18103_vm2, %vm18102_vm10  ;;  %4991 = vmatprep.mubr.f32.mxu1 %v9408_v29  ;;  %vm18113_vm4 = vcmp.eq.s32.totalorder %v18110_v36, %v10423_v50  ;;  %vm18114_vm2 = vcmp.eq.s32.totalorder %v18108_v15, %v10414_v21 }
 0x25c   : > { %9033 = vmatprep.subr.msk.bf16.mxu1 %vm9032_vm14, %v9706_v49  ;;  %vm8778_vm9 = vmpackc.low %vm18105_vm12, %vm18104_vm6  ;;  %4612 = vmatmul.mubr.f32.gmra.mrb[16].mxu0 %v9409_v14  ;;  %vm18115_vm14 = vcmp.eq.s32.totalorder %v18110_v36, %v10414_v21  ;;  %vm18116_vm12 = vcmp.eq.s32.totalorder %v18108_v15, %v10420_v24 }
 0x25d   : > { %8779 = vmatpush1.bf16.msk.msra.mxu0 %vm8778_vm9, %v9706_v49  ;;  %vm9034_vm3 = vmpackc.low %vm18107_vm1, %vm18106_vm11  ;;  %4992 = vmatmul.mubr.f32.gmra.mrb[16].mxu1 %v9409_v14  ;;  %vm18117_vm9 = vcmp.eq.s32.totalorder %v18110_v36, %v10420_v24  ;;  %vm18119_vm1 = vcmp.eq.s32.totalorder %v18118_v1, %v10417_v33 }
 0x25e   : > { %9035 = vmatpush1.bf16.msk.msra.mxu1 %vm9034_vm3, %v9706_v49  ;;  %vm8780_vm15 = vmpackc.low %vm18111_vm8, %vm18109_vm13  ;;  %4617 = vmatprep.mubr.f32.mxu0 %v9410_v41  ;;  %vm18121_vm3 = vcmp.eq.s32.totalorder %v18120_v2, %v10417_v33  ;;  %vm18122_vm8 = vcmp.eq.s32.totalorder %v18118_v1, %v10423_v50 }
 0x25f   : > { %8781 = vmatprep.subr.msk.bf16.mxu0 %vm8780_vm15, %v9706_v49  ;;  %vm9036_vm10 = vmpackc.low %vm18113_vm4, %vm18112_vm0  ;;  %4997 = vmatprep.mubr.f32.mxu1 %v9410_v41  ;;  %vm18123_vm15 = vcmp.eq.s32.totalorder %v18120_v2, %v10423_v50  ;;  %vm18124_vm4 = vcmp.eq.s32.totalorder %v18118_v1, %v10414_v21  ;;  %v3602_v41 = vld [vmem:[#allocation2 + $0x40] sm:$0xff] }
 0x260   : > { %9037 = vmatprep.subr.msk.bf16.mxu1 %vm9036_vm10, %v9706_v49  ;;  %vm8782_vm6 = vmpackc.low %vm18115_vm14, %vm18114_vm2  ;;  %4618 = vmatmul.mubr.f32.gmra.mrb[18].mxu0 %v9411_v13  ;;  %vm18125_vm10 = vcmp.eq.s32.totalorder %v18120_v2, %v10414_v21  ;;  %vm18126_vm14 = vcmp.eq.s32.totalorder %v18118_v1, %v10420_v24  ;;  %v3604_v1 = vld [vmem:[#allocation2 + $0x50] sm:$0xff] }
 0x261   : > { %8783 = vmatpush1.bf16.msk.msra.mxu0 %vm8782_vm6, %v9706_v49  ;;  %vm9038_vm11 = vmpackc.low %vm18117_vm9, %vm18116_vm12  ;;  %4998 = vmatmul.mubr.f32.gmra.mrb[18].mxu1 %v9411_v13  ;;  %vm18127_vm6 = vcmp.eq.s32.totalorder %v18120_v2, %v10420_v24  ;;  %vm18129_vm9 = vcmp.eq.s32.totalorder %v18128_v4, %v10417_v33  ;;  %v3603_v2 = vld [vmem:[#allocation2 + $0x48] sm:$0xff] }
 0x262   : > { %9039 = vmatpush1.bf16.msk.msra.mxu1 %vm9038_vm11, %v9706_v49  ;;  %vm8784_vm13 = vmpackc.low %vm18121_vm3, %vm18119_vm1  ;;  %4688 = vmatprep.mubr.f32.mxu0 %v9412_v3  ;;  %vm18131_vm11 = vcmp.eq.s32.totalorder %v18130_v5, %v10417_v33  ;;  %vm18132_vm3 = vcmp.eq.s32.totalorder %v18128_v4, %v10423_v50 }
 0x263   : > { %8785 = vmatprep.subr.msk.bf16.mxu0 %vm8784_vm13, %v9706_v49  ;;  %vm9040_vm0 = vmpackc.low %vm18123_vm15, %vm18122_vm8  ;;  %5068 = vmatprep.mubr.f32.mxu1 %v9412_v3  ;;  %vm18133_vm13 = vcmp.eq.s32.totalorder %v18130_v5, %v10423_v50  ;;  %vm18134_vm15 = vcmp.eq.s32.totalorder %v18128_v4, %v10414_v21  ;;  %v18285_v3 = vld [vmem:[#allocation80_spill] sm:$0xff] }
 0x264   : > { %9041 = vmatprep.subr.msk.bf16.mxu1 %vm9040_vm0, %v9706_v49  ;;  %vm8786_vm2 = vmpackc.low %vm18125_vm10, %vm18124_vm4  ;;  %vm18135_vm0 = vcmp.eq.s32.totalorder %v18130_v5, %v10414_v21  ;;  %vm18136_vm10 = vcmp.eq.s32.totalorder %v18128_v4, %v10420_v24  ;;  %v18287_v4 = vld [vmem:[#allocation81_spill] sm:$0xff] }
 0x265   : > { %8787 = vmatpush1.bf16.msk.msra.mxu0 %vm8786_vm2, %v9706_v49  ;;  %vm9042_vm12 = vmpackc.low %vm18127_vm6, %vm18126_vm14  ;;  %vm18137_vm2 = vcmp.eq.s32.totalorder %v18130_v5, %v10420_v24  ;;  %vm18139_vm6 = vcmp.eq.s32.totalorder %v18138_v6, %v10417_v33 }
 0x266   : > { %9043 = vmatpush1.bf16.msk.msra.mxu1 %vm9042_vm12, %v9706_v49  ;;  %vm8788_vm1 = vmpackc.low %vm18131_vm11, %vm18129_vm9  ;;  %vm18141_vm12 = vcmp.eq.s32.totalorder %v18140_v7, %v10417_v33  ;;  %vm18142_vm11 = vcmp.eq.s32.totalorder %v18138_v6, %v10423_v50 }
 0x267   : > { %8789 = vmatprep.subr.msk.bf16.mxu0 %vm8788_vm1, %v9706_v49  ;;  %vm9044_vm8 = vmpackc.low %vm18133_vm13, %vm18132_vm3  ;;  %vm18143_vm1 = vcmp.eq.s32.totalorder %v18140_v7, %v10423_v50  ;;  %vm18144_vm13 = vcmp.eq.s32.totalorder %v18138_v6, %v10414_v21 }
 0x268   : > { %9045 = vmatprep.subr.msk.bf16.mxu1 %vm9044_vm8, %v9706_v49  ;;  %vm8790_vm4 = vmpackc.low %vm18135_vm0, %vm18134_vm15  ;;  %vm18145_vm8 = vcmp.eq.s32.totalorder %v18140_v7, %v10414_v21  ;;  %vm18146_vm0 = vcmp.eq.s32.totalorder %v18138_v6, %v10420_v24  ;;  %v3605_v6 = vld [vmem:[#allocation2 + $0x58] sm:$0xff] }
 0x269   : > { %8791 = vmatpush1.bf16.msk.msra.mxu0 %vm8790_vm4, %v9706_v49  ;;  %vm9046_vm14 = vmpackc.low %vm18137_vm2, %vm18136_vm10  ;;  %vm18147_vm4 = vcmp.eq.s32.totalorder %v18140_v7, %v10420_v24  ;;  %vm18149_vm2 = vcmp.eq.s32.totalorder %v18148_v8, %v10417_v33 }
 0x26a   : > { %9047 = vmatpush1.bf16.msk.msra.mxu1 %vm9046_vm14, %v9706_v49  ;;  %vm8792_vm9 = vmpackc.low %vm18141_vm12, %vm18139_vm6  ;;  %vm18151_vm14 = vcmp.eq.s32.totalorder %v18150_v18, %v10417_v33  ;;  %vm18152_vm12 = vcmp.eq.s32.totalorder %v18148_v8, %v10423_v50 }
 0x26b   : > { %8793 = vmatprep.subr.msk.bf16.mxu0 %vm8792_vm9, %v9706_v49  ;;  %vm9048_vm3 = vmpackc.low %vm18143_vm1, %vm18142_vm11  ;;  %vm18153_vm9 = vcmp.eq.s32.totalorder %v18150_v18, %v10423_v50  ;;  %vm18154_vm1 = vcmp.eq.s32.totalorder %v18148_v8, %v10414_v21 }
 0x26c   : > { %9049 = vmatprep.subr.msk.bf16.mxu1 %vm9048_vm3, %v9706_v49  ;;  %vm8794_vm15 = vmpackc.low %vm18145_vm8, %vm18144_vm13  ;;  %vm18155_vm3 = vcmp.eq.s32.totalorder %v18150_v18, %v10414_v21  ;;  %vm18156_vm8 = vcmp.eq.s32.totalorder %v18148_v8, %v10420_v24 }
 0x26d   : > { %8795 = vmatpush1.bf16.msk.msra.mxu0 %vm8794_vm15, %v9706_v49  ;;  %vm9050_vm10 = vmpackc.low %vm18147_vm4, %vm18146_vm0  ;;  %vm18157_vm15 = vcmp.eq.s32.totalorder %v18150_v18, %v10420_v24  ;;  %vm18159_vm4 = vcmp.eq.s32.totalorder %v18158_v19, %v10417_v33 }
 0x26e   : > { %9051 = vmatpush1.bf16.msk.msra.mxu1 %vm9050_vm10, %v9706_v49  ;;  %vm8796_vm6 = vmpackc.low %vm18151_vm14, %vm18149_vm2  ;;  %vm18161_vm10 = vcmp.eq.s32.totalorder %v18160_v22, %v10417_v33  ;;  %vm18162_vm14 = vcmp.eq.s32.totalorder %v18158_v19, %v10423_v50 }
 0x26f   : > { %8797 = vmatprep.subr.msk.bf16.mxu0 %vm8796_vm6, %v9706_v49  ;;  %vm9052_vm11 = vmpackc.low %vm18153_vm9, %vm18152_vm12  ;;  %vm18163_vm6 = vcmp.eq.s32.totalorder %v18160_v22, %v10423_v50  ;;  %vm18164_vm9 = vcmp.eq.s32.totalorder %v18158_v19, %v10414_v21 }
 0x270   : > { %9053 = vmatprep.subr.msk.bf16.mxu1 %vm9052_vm11, %v9706_v49  ;;  %vm8798_vm13 = vmpackc.low %vm18155_vm3, %vm18154_vm1  ;;  %vm18165_vm11 = vcmp.eq.s32.totalorder %v18160_v22, %v10414_v21  ;;  %vm18166_vm3 = vcmp.eq.s32.totalorder %v18158_v19, %v10420_v24 }
 0x271   : > { %8799 = vmatpush1.bf16.msk.msra.mxu0 %vm8798_vm13, %v9706_v49  ;;  %vm9054_vm0 = vmpackc.low %vm18157_vm15, %vm18156_vm8  ;;  %vm18167_vm13 = vcmp.eq.s32.totalorder %v18160_v22, %v10420_v24  ;;  %vm18169_vm15 = vcmp.eq.s32.totalorder %v18168_v23, %v10417_v33 }
 0x272   : > { %9055 = vmatpush1.bf16.msk.msra.mxu1 %vm9054_vm0, %v9706_v49  ;;  %vm8800_vm2 = vmpackc.low %vm18161_vm10, %vm18159_vm4  ;;  %vm18171_vm0 = vcmp.eq.s32.totalorder %v18170_v26, %v10417_v33  ;;  %vm18172_vm10 = vcmp.eq.s32.totalorder %v18168_v23, %v10423_v50 }
 0x273   : > { %8801 = vmatprep.subr.msk.bf16.mxu0 %vm8800_vm2, %v9706_v49  ;;  %vm9056_vm12 = vmpackc.low %vm18163_vm6, %vm18162_vm14  ;;  %vm18173_vm2 = vcmp.eq.s32.totalorder %v18170_v26, %v10423_v50  ;;  %vm18174_vm6 = vcmp.eq.s32.totalorder %v18168_v23, %v10414_v21 }
 0x274   : > { %9057 = vmatprep.subr.msk.bf16.mxu1 %vm9056_vm12, %v9706_v49  ;;  %vm8802_vm1 = vmpackc.low %vm18165_vm11, %vm18164_vm9  ;;  %vm18175_vm12 = vcmp.eq.s32.totalorder %v18170_v26, %v10414_v21  ;;  %vm18176_vm11 = vcmp.eq.s32.totalorder %v18168_v23, %v10420_v24 }
 0x275   : > { %8803 = vmatpush1.bf16.msk.msra.mxu0 %vm8802_vm1, %v9706_v49  ;;  %vm9058_vm8 = vmpackc.low %vm18167_vm13, %vm18166_vm3  ;;  %vm18177_vm1 = vcmp.eq.s32.totalorder %v18170_v26, %v10420_v24  ;;  %vm18179_vm13 = vcmp.eq.s32.totalorder %v18178_v27, %v10417_v33  ;;  %v3610_v26 = vld [vmem:[#allocation2 + $0x80] sm:$0xff] }
 0x276   : > { %9059 = vmatpush1.bf16.msk.msra.mxu1 %vm9058_vm8, %v9706_v49  ;;  %vm8804_vm4 = vmpackc.low %vm18171_vm0, %vm18169_vm15  ;;  %vm18181_vm8 = vcmp.eq.s32.totalorder %v18180_v30, %v10417_v33  ;;  %vm18182_vm0 = vcmp.eq.s32.totalorder %v18178_v27, %v10423_v50 }
 0x277   : > { %8805 = vmatprep.subr.msk.bf16.mxu0 %vm8804_vm4, %v9706_v49  ;;  %vm9060_vm14 = vmpackc.low %vm18173_vm2, %vm18172_vm10  ;;  %vm18183_vm4 = vcmp.eq.s32.totalorder %v18180_v30, %v10423_v50  ;;  %vm18184_vm2 = vcmp.eq.s32.totalorder %v18178_v27, %v10414_v21 }
 0x278   : > { %9061 = vmatprep.subr.msk.bf16.mxu1 %vm9060_vm14, %v9706_v49  ;;  %vm8806_vm9 = vmpackc.low %vm18175_vm12, %vm18174_vm6  ;;  %vm18185_vm14 = vcmp.eq.s32.totalorder %v18180_v30, %v10414_v21  ;;  %vm18186_vm12 = vcmp.eq.s32.totalorder %v18178_v27, %v10420_v24 }
 0x279   : > { %8807 = vmatpush1.bf16.msk.msra.mxu0 %vm8806_vm9, %v9706_v49  ;;  %vm9062_vm3 = vmpackc.low %vm18177_vm1, %vm18176_vm11  ;;  %vm18187_vm9 = vcmp.eq.s32.totalorder %v18180_v30, %v10420_v24  ;;  %vm18189_vm1 = vcmp.eq.s32.totalorder %v18188_v31, %v10417_v33  ;;  %v3612_v30 = vld [vmem:[#allocation2 + $0x90] sm:$0xff] }
 0x27a   : > { %9063 = vmatpush1.bf16.msk.msra.mxu1 %vm9062_vm3, %v9706_v49  ;;  %vm8808_vm15 = vmpackc.low %vm18181_vm8, %vm18179_vm13  ;;  %vm18191_vm3 = vcmp.eq.s32.totalorder %v18190_v34, %v10417_v33  ;;  %vm18192_vm8 = vcmp.eq.s32.totalorder %v18188_v31, %v10423_v50 }
 0x27b   : > { %8809 = vmatprep.subr.msk.bf16.mxu0 %vm8808_vm15, %v9706_v49  ;;  %vm9064_vm10 = vmpackc.low %vm18183_vm4, %vm18182_vm0  ;;  %vm18193_vm15 = vcmp.eq.s32.totalorder %v18190_v34, %v10423_v50  ;;  %vm18194_vm4 = vcmp.eq.s32.totalorder %v18188_v31, %v10414_v21 }
 0x27c   : > { %9065 = vmatprep.subr.msk.bf16.mxu1 %vm9064_vm10, %v9706_v49  ;;  %vm8810_vm6 = vmpackc.low %vm18185_vm14, %vm18184_vm2  ;;  %vm18195_vm10 = vcmp.eq.s32.totalorder %v18190_v34, %v10414_v21  ;;  %vm18196_vm14 = vcmp.eq.s32.totalorder %v18188_v31, %v10420_v24  ;;  %v3611_v31 = vld [vmem:[#allocation2 + $0x88] sm:$0xff] }
 0x27d   : > { %8811 = vmatpush1.bf16.msk.msra.mxu0 %vm8810_vm6, %v9706_v49  ;;  %vm9066_vm11 = vmpackc.low %vm18187_vm9, %vm18186_vm12  ;;  %vm18197_vm6 = vcmp.eq.s32.totalorder %v18190_v34, %v10420_v24  ;;  %vm18199_vm9 = vcmp.eq.s32.totalorder %v18198_v35, %v10417_v33  ;;  %v18295_v34 = vld [vmem:[#allocation82_spill] sm:$0xff] }
 0x27e   : > { %9067 = vmatpush1.bf16.msk.msra.mxu1 %vm9066_vm11, %v9706_v49  ;;  %vm8812_vm13 = vmpackc.low %vm18191_vm3, %vm18189_vm1  ;;  %vm18201_vm11 = vcmp.eq.s32.totalorder %v18200_v38, %v10417_v33  ;;  %vm18202_vm3 = vcmp.eq.s32.totalorder %v18198_v35, %v10423_v50 }
 0x27f   : > { %8813 = vmatprep.subr.msk.bf16.mxu0 %vm8812_vm13, %v9706_v49  ;;  %vm9068_vm0 = vmpackc.low %vm18193_vm15, %vm18192_vm8  ;;  %vm18203_vm13 = vcmp.eq.s32.totalorder %v18200_v38, %v10423_v50  ;;  %vm18204_vm15 = vcmp.eq.s32.totalorder %v18198_v35, %v10414_v21 }
 0x280   : > { %9069 = vmatprep.subr.msk.bf16.mxu1 %vm9068_vm0, %v9706_v49  ;;  %vm8814_vm2 = vmpackc.low %vm18195_vm10, %vm18194_vm4  ;;  %vm18205_vm0 = vcmp.eq.s32.totalorder %v18200_v38, %v10414_v21  ;;  %vm18206_vm10 = vcmp.eq.s32.totalorder %v18198_v35, %v10420_v24  ;;  %v18297_v35 = vld [vmem:[#allocation83_spill] sm:$0xff] }
 0x281   : > { %8815 = vmatpush1.bf16.msk.msra.mxu0 %vm8814_vm2, %v9706_v49  ;;  %vm9070_vm12 = vmpackc.low %vm18197_vm6, %vm18196_vm14  ;;  %vm18207_vm2 = vcmp.eq.s32.totalorder %v18200_v38, %v10420_v24  ;;  %vm18209_vm6 = vcmp.eq.s32.totalorder %v18208_v39, %v10417_v33 }
 0x282   : > { %9071 = vmatpush1.bf16.msk.msra.mxu1 %vm9070_vm12, %v9706_v49  ;;  %vm8816_vm1 = vmpackc.low %vm18201_vm11, %vm18199_vm9  ;;  %vm18211_vm12 = vcmp.eq.s32.totalorder %v18210_v42, %v10417_v33  ;;  %vm18212_vm11 = vcmp.eq.s32.totalorder %v18208_v39, %v10423_v50 }
 0x283   : > { %8817 = vmatprep.subr.msk.bf16.mxu0 %vm8816_vm1, %v9706_v49  ;;  %vm9072_vm8 = vmpackc.low %vm18203_vm13, %vm18202_vm3  ;;  %vm18213_vm1 = vcmp.eq.s32.totalorder %v18210_v42, %v10423_v50  ;;  %vm18214_vm13 = vcmp.eq.s32.totalorder %v18208_v39, %v10414_v21 }
 0x284   : > { %9073 = vmatprep.subr.msk.bf16.mxu1 %vm9072_vm8, %v9706_v49  ;;  %vm8818_vm4 = vmpackc.low %vm18205_vm0, %vm18204_vm15  ;;  %vm18215_vm8 = vcmp.eq.s32.totalorder %v18210_v42, %v10414_v21  ;;  %vm18216_vm0 = vcmp.eq.s32.totalorder %v18208_v39, %v10420_v24  ;;  %v3613_v39 = vld [vmem:[#allocation2 + $0x98] sm:$0xff] }
 0x285   : > { %8819 = vmatpush1.bf16.msk.msra.mxu0 %vm8818_vm4, %v9706_v49  ;;  %vm9074_vm14 = vmpackc.low %vm18207_vm2, %vm18206_vm10  ;;  %vm18217_vm4 = vcmp.eq.s32.totalorder %v18210_v42, %v10420_v24  ;;  %vm18219_vm2 = vcmp.eq.s32.totalorder %v18218_v43, %v10417_v33 }
 0x286   : > { %9075 = vmatpush1.bf16.msk.msra.mxu1 %vm9074_vm14, %v9706_v49  ;;  %vm8820_vm9 = vmpackc.low %vm18211_vm12, %vm18209_vm6  ;;  %vm18221_vm14 = vcmp.eq.s32.totalorder %v18220_v44, %v10417_v33  ;;  %vm18222_vm12 = vcmp.eq.s32.totalorder %v18218_v43, %v10423_v50 }
 0x287   : > { %8821 = vmatprep.subr.msk.bf16.mxu0 %vm8820_vm9, %v9706_v49  ;;  %vm9076_vm3 = vmpackc.low %vm18213_vm1, %vm18212_vm11  ;;  %vm18223_vm9 = vcmp.eq.s32.totalorder %v18220_v44, %v10423_v50  ;;  %vm18224_vm1 = vcmp.eq.s32.totalorder %v18218_v43, %v10414_v21 }
 0x288   : > { %9077 = vmatprep.subr.msk.bf16.mxu1 %vm9076_vm3, %v9706_v49  ;;  %vm8822_vm15 = vmpackc.low %vm18215_vm8, %vm18214_vm13  ;;  %vm18225_vm3 = vcmp.eq.s32.totalorder %v18220_v44, %v10414_v21  ;;  %vm18226_vm8 = vcmp.eq.s32.totalorder %v18218_v43, %v10420_v24 }
 0x289   : > { %8823 = vmatpush1.bf16.msk.msra.mxu0 %vm8822_vm15, %v9706_v49  ;;  %vm9078_vm10 = vmpackc.low %vm18217_vm4, %vm18216_vm0  ;;  %vm18227_vm15 = vcmp.eq.s32.totalorder %v18220_v44, %v10420_v24  ;;  %vm18229_vm4 = vcmp.eq.s32.totalorder %v18228_v45, %v10417_v33 }
 0x28a   : > { %9079 = vmatpush1.bf16.msk.msra.mxu1 %vm9078_vm10, %v9706_v49  ;;  %vm8824_vm6 = vmpackc.low %vm18221_vm14, %vm18219_vm2  ;;  %vm18231_vm10 = vcmp.eq.s32.totalorder %v18230_v58, %v10417_v33  ;;  %vm18232_vm14 = vcmp.eq.s32.totalorder %v18228_v45, %v10423_v50 }
 0x28b   : > { %8825 = vmatprep.subr.msk.bf16.mxu0 %vm8824_vm6, %v9706_v49  ;;  %vm9080_vm11 = vmpackc.low %vm18223_vm9, %vm18222_vm12  ;;  %vm18233_vm6 = vcmp.eq.s32.totalorder %v18230_v58, %v10423_v50  ;;  %vm18234_vm9 = vcmp.eq.s32.totalorder %v18228_v45, %v10414_v21 }
 0x28c   : > { %9081 = vmatprep.subr.msk.bf16.mxu1 %vm9080_vm11, %v9706_v49  ;;  %vm8826_vm13 = vmpackc.low %vm18225_vm3, %vm18224_vm1  ;;  %vm18235_vm11 = vcmp.eq.s32.totalorder %v18230_v58, %v10414_v21  ;;  %vm18236_vm3 = vcmp.eq.s32.totalorder %v18228_v45, %v10420_v24 }
 0x28d   : > { %8827 = vmatpush1.bf16.msk.msra.mxu0 %vm8826_vm13, %v9706_v49  ;;  %vm9082_vm0 = vmpackc.low %vm18227_vm15, %vm18226_vm8  ;;  %vm18237_vm13 = vcmp.eq.s32.totalorder %v18230_v58, %v10420_v24  ;;  %vm18239_vm15 = vcmp.eq.s32.totalorder %v18238_v62, %v10417_v33 }
 0x28e   : > { %9083 = vmatpush1.bf16.msk.msra.mxu1 %vm9082_vm0, %v9706_v49  ;;  %vm8828_vm2 = vmpackc.low %vm18231_vm10, %vm18229_vm4  ;;  %vm18241_vm0 = vcmp.eq.s32.totalorder %v18240_v63, %v10417_v33  ;;  %vm18242_vm10 = vcmp.eq.s32.totalorder %v18238_v62, %v10423_v50 }
 0x28f   : > { %8829 = vmatprep.subr.msk.bf16.mxu0 %vm8828_vm2, %v9706_v49  ;;  %vm9084_vm12 = vmpackc.low %vm18233_vm6, %vm18232_vm14  ;;  %vm18243_vm2 = vcmp.eq.s32.totalorder %v18240_v63, %v10423_v50  ;;  %vm18244_vm6 = vcmp.eq.s32.totalorder %v18238_v62, %v10414_v21 }
 0x290   : > { %9085 = vmatprep.subr.msk.bf16.mxu1 %vm9084_vm12, %v9706_v49  ;;  %4689 = vmatmul.mubr.f32.vlgmr.msra.gmra.mrb[10].mxu0 %v9413_v59  ;;  %vm8830_vm1 = vmpackc.low %vm18235_vm11, %vm18234_vm9  ;;  %vm18245_vm12 = vcmp.eq.s32.totalorder %v18240_v63, %v10414_v21  ;;  %vm18246_vm11 = vcmp.eq.s32.totalorder %v18238_v62, %v10420_v24  ;;  %v3618_v62 = vld [vmem:[#allocation2 + $0xc0] sm:$0xff] }
 0x291   : > { %8831 = vmatpush1.bf16.msk.msra.mxu0 %vm8830_vm1, %v9706_v49  ;;  %5069 = vmatmul.mubr.f32.vlgmr.msra.gmra.mrb[10].mxu1 %v9413_v59  ;;  %vm9086_vm8 = vmpackc.low %vm18237_vm13, %vm18236_vm3  ;;  %vm18247_vm1 = vcmp.eq.s32.totalorder %v18240_v63, %v10420_v24  ;;  %vm18249_vm13 = vcmp.eq.s32.totalorder %v18248_v37, %v10417_v33 }
 0x292   : > { %9087 = vmatpush1.bf16.msk.msra.mxu1 %vm9086_vm8, %v9706_v49  ;;  %vm8832_vm4 = vmpackc.low %vm18241_vm0, %vm18239_vm15  ;;  %4694 = vmatprep.mubr.f32.mxu0 %v9414_v16  ;;  %vm18251_vm8 = vcmp.eq.s32.totalorder %v18250_v40, %v10417_v33  ;;  %vm18252_vm0 = vcmp.eq.s32.totalorder %v18248_v37, %v10423_v50 }
 0x293   : > { %8833 = vmatprep.subr.msk.bf16.mxu0 %vm8832_vm4, %v9706_v49  ;;  %vm9088_vm14 = vmpackc.low %vm18243_vm2, %vm18242_vm10  ;;  %5074 = vmatprep.mubr.f32.mxu1 %v9414_v16  ;;  %vm18253_vm4 = vcmp.eq.s32.totalorder %v18250_v40, %v10423_v50  ;;  %vm18254_vm2 = vcmp.eq.s32.totalorder %v18248_v37, %v10414_v21  ;;  %v3620_v16 = vld [vmem:[#allocation2 + $0xd0] sm:$0xff] }
 0x294   : > { %9089 = vmatprep.subr.msk.bf16.mxu1 %vm9088_vm14, %v9706_v49  ;;  %vm8834_vm9 = vmpackc.low %vm18245_vm12, %vm18244_vm6  ;;  %4695 = vmatmul.mubr.f32.gmra.mrb[12].mxu0 %v9415_v32  ;;  %vm18255_vm14 = vcmp.eq.s32.totalorder %v18250_v40, %v10414_v21  ;;  %vm18256_vm12 = vcmp.eq.s32.totalorder %v18248_v37, %v10420_v24  ;;  %v18305_v37 = vld [vmem:[#allocation84_spill] sm:$0xff] }
 0x295   : > { %8835 = vmatpush1.bf16.msk.msra.mxu0 %vm8834_vm9, %v9706_v49  ;;  %vm9090_vm3 = vmpackc.low %vm18247_vm1, %vm18246_vm11  ;;  %5075 = vmatmul.mubr.f32.gmra.mrb[12].mxu1 %v9415_v32  ;;  %vm18257_vm9 = vcmp.eq.s32.totalorder %v18250_v40, %v10420_v24  ;;  %vm18258_vm1 = vcmp.eq.s32.totalorder %v17669_v46, %v10417_v33  ;;  %v3619_v32 = vld [vmem:[#allocation2 + $0xc8] sm:$0xff]  ;;  %v18307_v40 = vld [vmem:[#allocation85_spill] sm:$0xff] }
 0x296   : > { %9091 = vmatpush1.bf16.msk.msra.mxu1 %vm9090_vm3, %v9706_v49  ;;  %vm8836_vm15 = vmpackc.low %vm18251_vm8, %vm18249_vm13  ;;  %4700 = vmatprep.mubr.f32.mxu0 %v9416_v47  ;;  %vm18260_vm3 = vcmp.eq.s32.totalorder %v18259_v51, %v10417_v33  ;;  %vm18261_vm8 = vcmp.eq.s32.totalorder %v17669_v46, %v10423_v50 }
 0x297   : > { %8837 = vmatprep.subr.msk.bf16.mxu0 %vm8836_vm15, %v9706_v49  ;;  %vm9092_vm10 = vmpackc.low %vm18253_vm4, %vm18252_vm0  ;;  %5080 = vmatprep.mubr.f32.mxu1 %v9416_v47  ;;  %vm18262_vm15 = vcmp.eq.s32.totalorder %v18259_v51, %v10423_v50  ;;  %vm18263_vm4 = vcmp.eq.s32.totalorder %v17669_v46, %v10414_v21 }
 0x298   : > { %9093 = vmatprep.subr.msk.bf16.mxu1 %vm9092_vm10, %v9706_v49  ;;  %vm8838_vm6 = vmpackc.low %vm18255_vm14, %vm18254_vm2  ;;  %4701 = vmatmul.mubr.f32.gmra.mrb[14].mxu0 %v9417_v48  ;;  %vm18264_vm10 = vcmp.eq.s32.totalorder %v18259_v51, %v10414_v21  ;;  %vm18265_vm14 = vcmp.eq.s32.totalorder %v17669_v46, %v10420_v24  ;;  %v9421_v46 = vld [vmem:[%s9962_s30 + $0x120] sm:$0xff] }
 0x299   : > { %8839 = vmatpush1.bf16.msk.msra.mxu0 %vm8838_vm6, %v9706_v49  ;;  %vm9094_vm11 = vmpackc.low %vm18257_vm9, %vm18256_vm12  ;;  %5081 = vmatmul.mubr.f32.gmra.mrb[14].mxu1 %v9417_v48  ;;  %vm18266_vm6 = vcmp.eq.s32.totalorder %v18259_v51, %v10420_v24  ;;  %vm18267_vm9 = vcmp.eq.s32.totalorder %v17679_v53, %v10417_v33  ;;  %v3621_v48 = vld [vmem:[#allocation2 + $0xd8] sm:$0xff] }
 0x29a   : > { %9095 = vmatpush1.bf16.msk.msra.mxu1 %vm9094_vm11, %v9706_v49  ;;  %vm8840_vm13 = vmpackc.low %vm18260_vm3, %vm18258_vm1  ;;  %4706 = vmatprep.mubr.f32.mxu0 %v9418_v52  ;;  %vm18268_vm11 = vcmp.eq.s32.totalorder %v17681_v10, %v10417_v33  ;;  %vm18269_vm3 = vcmp.eq.s32.totalorder %v17679_v53, %v10423_v50 }
 0x29b   : > { %8841 = vmatprep.subr.msk.bf16.mxu0 %vm8840_vm13, %v9706_v49  ;;  %vm9096_vm0 = vmpackc.low %vm18262_vm15, %vm18261_vm8  ;;  %5086 = vmatprep.mubr.f32.mxu1 %v9418_v52  ;;  %vm18270_vm13 = vcmp.eq.s32.totalorder %v17681_v10, %v10423_v50  ;;  %vm18271_vm15 = vcmp.eq.s32.totalorder %v17679_v53, %v10414_v21 }
 0x29c   : > { %9097 = vmatprep.subr.msk.bf16.mxu1 %vm9096_vm0, %v9706_v49  ;;  %vm8842_vm2 = vmpackc.low %vm18264_vm10, %vm18263_vm4  ;;  %4707 = vmatmul.mubr.f32.gmra.mrb[16].mxu0 %v9419_v55  ;;  %vm18272_vm0 = vcmp.eq.s32.totalorder %v17681_v10, %v10414_v21  ;;  %vm18273_vm10 = vcmp.eq.s32.totalorder %v17679_v53, %v10420_v24 }
 0x29d   : > { %8843 = vmatpush1.bf16.msk.msra.mxu0 %vm8842_vm2, %v9706_v49  ;;  %vm9098_vm12 = vmpackc.low %vm18266_vm6, %vm18265_vm14  ;;  %5087 = vmatmul.mubr.f32.gmra.mrb[16].mxu1 %v9419_v55  ;;  %vm18274_vm2 = vcmp.eq.s32.totalorder %v17681_v10, %v10420_v24  ;;  %vm18276_vm6 = vcmp.eq.s32.totalorder %v18275_v0, %v10417_v33 }
 0x29e   : > { %9099 = vmatpush1.bf16.msk.msra.mxu1 %vm9098_vm12, %v9706_v49  ;;  %vm8844_vm1 = vmpackc.low %vm18268_vm11, %vm18267_vm9  ;;  %4712 = vmatprep.mubr.f32.mxu0 %v9420_v56  ;;  %vm18278_vm12 = vcmp.eq.s32.totalorder %v18277_v17, %v10417_v33  ;;  %vm18279_vm11 = vcmp.eq.s32.totalorder %v18275_v0, %v10423_v50 }
 0x29f   : > { %8845 = vmatprep.subr.msk.bf16.mxu0 %vm8844_vm1, %v9706_v49  ;;  %vm9100_vm8 = vmpackc.low %vm18270_vm13, %vm18269_vm3  ;;  %5092 = vmatprep.mubr.f32.mxu1 %v9420_v56  ;;  %vm18280_vm1 = vcmp.eq.s32.totalorder %v18277_v17, %v10423_v50  ;;  %vm18281_vm13 = vcmp.eq.s32.totalorder %v18275_v0, %v10414_v21 }
 0x2a0   : > { %9101 = vmatprep.subr.msk.bf16.mxu1 %vm9100_vm8, %v9706_v49  ;;  %vm8846_vm4 = vmpackc.low %vm18272_vm0, %vm18271_vm15  ;;  %4713 = vmatmul.mubr.f32.gmra.mrb[18].mxu0 %v9421_v46  ;;  %vm18282_vm8 = vcmp.eq.s32.totalorder %v18277_v17, %v10414_v21  ;;  %vm18283_vm0 = vcmp.eq.s32.totalorder %v18275_v0, %v10420_v24  ;;  %v3628_v0 = vld [vmem:[#allocation2 + $0x110] sm:$0xff] }
 0x2a1   : > { %8847 = vmatpush1.bf16.msk.msra.mxu0 %vm8846_vm4, %v9706_v49  ;;  %vm9102_vm14 = vmpackc.low %vm18274_vm2, %vm18273_vm10  ;;  %5093 = vmatmul.mubr.f32.gmra.mrb[18].mxu1 %v9421_v46  ;;  %vm18284_vm4 = vcmp.eq.s32.totalorder %v18277_v17, %v10420_v24  ;;  %vm18286_vm2 = vcmp.eq.s32.totalorder %v18285_v3, %v10417_v33  ;;  %v3627_v17 = vld [vmem:[#allocation2 + $0x108] sm:$0xff] }
 0x2a2   : > { %9103 = vmatpush1.bf16.msk.msra.mxu1 %vm9102_vm14, %v9706_v49  ;;  %vm8848_vm9 = vmpackc.low %vm18278_vm12, %vm18276_vm6  ;;  %4783 = vmatprep.mubr.f32.mxu0 %v9422_v20  ;;  %vm18288_vm14 = vcmp.eq.s32.totalorder %v18287_v4, %v10417_v33  ;;  %vm18289_vm12 = vcmp.eq.s32.totalorder %v18285_v3, %v10423_v50 }
 0x2a3   : > { %v4025_v53 = vpop.f32.mrb[0].mxu0  ;;  %8849 = vmatprep.subr.msk.bf16.mxu0 %vm8848_vm9, %v9706_v49  ;;  %vm9104_vm3 = vmpackc.low %vm18280_vm1, %vm18279_vm11  ;;  %5163 = vmatprep.mubr.f32.mxu1 %v9422_v20  ;;  %vm18290_vm9 = vcmp.eq.s32.totalorder %v18287_v4, %v10423_v50  ;;  %vm18291_vm1 = vcmp.eq.s32.totalorder %v18285_v3, %v10414_v21  ;;  %v18315_v20 = vld [vmem:[#allocation86_spill] sm:$0xff] }
 0x2a4   : > { %v5194_v10 = vadd.f32 %v4025_v53, %v3594_v57  ;;  %v4405_v28 = vpop.f32.mrb[0].mxu1  ;;  %v4027_v29 = vpop.f32.mrb[1].mxu0  ;;  %9105 = vmatprep.subr.msk.bf16.mxu1 %vm9104_vm3, %v9706_v49  ;;  %vm8850_vm15 = vmpackc.low %vm18282_vm8, %vm18281_vm13  ;;  %vm18292_vm3 = vcmp.eq.s32.totalorder %v18287_v4, %v10414_v21  ;;  %vm18293_vm8 = vcmp.eq.s32.totalorder %v18285_v3, %v10420_v24  ;;  %v18317_v53 = vld [vmem:[#allocation87_spill] sm:$0xff]  ;;  %v18335_v3 = vld [vmem:[#allocation90_spill] sm:$0xff] }
 0x2a5   : > { %v5196_v14 = vadd.f32 %v4405_v28, %v3596_v60  ;;  %v5195_v15 = vadd.f32 %v4027_v29, %v3595_v61  ;;  %v4407_v36 = vpop.f32.mrb[1].mxu1  ;;  %8851 = vmatpush1.bf16.msk.msra.mxu0 %vm8850_vm15, %v9706_v49  ;;  %vm9106_vm10 = vmpackc.low %vm18284_vm4, %vm18283_vm0  ;;  %vm18294_vm15 = vcmp.eq.s32.totalorder %v18287_v4, %v10420_v24  ;;  %vm18296_vm4 = vcmp.eq.s32.totalorder %v18295_v34, %v10417_v33  ;;  %v3626_v60 = vld [vmem:[#allocation2 + $0x100] sm:$0xff] }
 0x2a6   : > { %5234 = vst [vmem:[#allocation2] sm:$0xff] %v5194_v10  ;;  %v5197_v13 = vadd.f32 %v4407_v36, %v3597_v25  ;;  %9107 = vmatpush1.bf16.msk.msra.mxu1 %vm9106_vm10, %v9706_v49  ;;  %vm8852_vm6 = vmpackc.low %vm18288_vm14, %vm18286_vm2  ;;  %vm18298_vm10 = vcmp.eq.s32.totalorder %v18297_v35, %v10417_v33  ;;  %vm18299_vm14 = vcmp.eq.s32.totalorder %v18295_v34, %v10423_v50  ;;  %v3629_v10 = vld [vmem:[#allocation2 + $0x118] sm:$0xff]  ;;  %v18337_v4 = vld [vmem:[#allocation91_spill] sm:$0xff] }
 0x2a7   : > { %5236 = vst [vmem:[#allocation2 + $0x10] sm:$0xff] %v5196_v14  ;;  %5235 = vst [vmem:[#allocation2 + $0x8] sm:$0xff] %v5195_v15  ;;  %v4031_v5 = vpop.f32.mrb[2].mxu0  ;;  %8853 = vmatprep.subr.msk.bf16.mxu0 %vm8852_vm6, %v9706_v49  ;;  %vm18300_vm6 = vcmp.eq.s32.totalorder %v18297_v35, %v10423_v50 }
 0x2a8   : > { %vm9108_vm11 = vmpackc.low %vm18290_vm9, %vm18289_vm12  ;;  %5237 = vst [vmem:[#allocation2 + $0x18] sm:$0xff] %v5197_v13  ;;  %v5202_v7 = vadd.f32 %v4031_v5, %v3602_v41  ;;  %v4411_v8 = vpop.f32.mrb[2].mxu1  ;;  %v4033_v18 = vpop.f32.mrb[3].mxu0  ;;  %vm18301_vm9 = vcmp.eq.s32.totalorder %v18295_v34, %v10414_v21  ;;  %v18345_v5 = vld [vmem:[#allocation92_spill] sm:$0xff] }
 0x2a9   : > { %9109 = vmatprep.subr.msk.bf16.mxu1 %vm9108_vm11, %v9706_v49  ;;  %vm8854_vm13 = vmpackc.low %vm18292_vm3, %vm18291_vm1  ;;  %v5204_v19 = vadd.f32 %v4411_v8, %v3604_v1  ;;  %v5203_v22 = vadd.f32 %v4033_v18, %v3603_v2  ;;  %v4413_v23 = vpop.f32.mrb[3].mxu1  ;;  %vm18302_vm11 = vcmp.eq.s32.totalorder %v18297_v35, %v10414_v21  ;;  %vm18303_vm3 = vcmp.eq.s32.totalorder %v18295_v34, %v10420_v24  ;;  %v18325_v1 = vld [vmem:[#allocation88_spill] sm:$0xff]  ;;  %v18327_v2 = vld [vmem:[#allocation89_spill] sm:$0xff] }
 0x2aa   : > { %8855 = vmatpush1.bf16.msk.msra.mxu0 %vm8854_vm13, %v9706_v49  ;;  %vm9110_vm0 = vmpackc.low %vm18294_vm15, %vm18293_vm8  ;;  %5242 = vst [vmem:[#allocation2 + $0x40] sm:$0xff] %v5202_v7  ;;  %v5205_v27 = vadd.f32 %v4413_v23, %v3605_v6  ;;  %vm18304_vm13 = vcmp.eq.s32.totalorder %v18297_v35, %v10420_v24  ;;  %vm18306_vm15 = vcmp.eq.s32.totalorder %v18305_v37, %v10417_v33  ;;  %v18347_v6 = vld [vmem:[#allocation93_spill] sm:$0xff]  ;;  %v18355_v7 = vld [vmem:[#allocation94_spill] sm:$0xff] }
 0x2ab   : > { %9111 = vmatpush1.bf16.msk.msra.mxu1 %vm9110_vm0, %v9706_v49  ;;  %vm8856_vm2 = vmpackc.low %vm18298_vm10, %vm18296_vm4  ;;  %5244 = vst [vmem:[#allocation2 + $0x50] sm:$0xff] %v5204_v19  ;;  %v4037_v38 = vpop.f32.mrb[4].mxu0  ;;  %vm18308_vm0 = vcmp.eq.s32.totalorder %v18307_v40, %v10417_v33  ;;  %vm18309_vm10 = vcmp.eq.s32.totalorder %v18305_v37, %v10423_v50  ;;  %v18357_v8 = vld [vmem:[#allocation95_spill] sm:$0xff]  ;;  %v3600_v19 = vld [vmem:[#allocation2 + $0x30] sm:$0xff] }
 0x2ac   : > { %5243 = vst [vmem:[#allocation2 + $0x48] sm:$0xff] %v5203_v22  ;;  %8857 = vmatprep.subr.msk.bf16.mxu0 %vm8856_vm2, %v9706_v49  ;;  %vm9112_vm12 = vmpackc.low %vm18300_vm6, %vm18299_vm14  ;;  %v5210_v42 = vadd.f32 %v4037_v38, %v3610_v26  ;;  %v4417_v43 = vpop.f32.mrb[4].mxu1  ;;  %v4039_v44 = vpop.f32.mrb[5].mxu0  ;;  %vm18310_vm2 = vcmp.eq.s32.totalorder %v18307_v40, %v10423_v50  ;;  %vm18311_vm6 = vcmp.eq.s32.totalorder %v18305_v37, %v10414_v21  ;;  %v3598_v18 = vld [vmem:[#allocation2 + $0x20] sm:$0xff]  ;;  %v3599_v22 = vld [vmem:[#allocation2 + $0x28] sm:$0xff] }
 0x2ad   : > { %5245 = vst [vmem:[#allocation2 + $0x58] sm:$0xff] %v5205_v27  ;;  %9113 = vmatprep.subr.msk.bf16.mxu1 %vm9112_vm12, %v9706_v49  ;;  %vm8858_vm1 = vmpackc.low %vm18302_vm11, %vm18301_vm9  ;;  %v5212_v45 = vadd.f32 %v4417_v43, %v3612_v30  ;;  %v5211_v58 = vadd.f32 %v4039_v44, %v3611_v31  ;;  %v4419_v59 = vpop.f32.mrb[5].mxu1  ;;  %vm18312_vm12 = vcmp.eq.s32.totalorder %v18307_v40, %v10414_v21  ;;  %v3601_v26 = vld [vmem:[#allocation2 + $0x38] sm:$0xff]  ;;  %v3608_v43 = vld [vmem:[#allocation2 + $0x70] sm:$0xff] }
 0x2ae   : > { %8859 = vmatpush1.bf16.msk.msra.mxu0 %vm8858_vm1, %v9706_v49  ;;  %vm9114_vm8 = vmpackc.low %vm18304_vm13, %vm18303_vm3  ;;  %5250 = vst [vmem:[#allocation2 + $0x80] sm:$0xff] %v5210_v42  ;;  %v5213_v63 = vadd.f32 %v4419_v59, %v3613_v39  ;;  %vm18313_vm11 = vcmp.eq.s32.totalorder %v18305_v37, %v10420_v24  ;;  %vm18314_vm1 = vcmp.eq.s32.totalorder %v18307_v40, %v10420_v24  ;;  %v3606_v39 = vld [vmem:[#allocation2 + $0x60] sm:$0xff]  ;;  %v3607_v44 = vld [vmem:[#allocation2 + $0x68] sm:$0xff] }
 0x2af   : > { %9115 = vmatpush1.bf16.msk.msra.mxu1 %vm9114_vm8, %v9706_v49  ;;  %vm8860_vm4 = vmpackc.low %vm18308_vm0, %vm18306_vm15  ;;  %5252 = vst [vmem:[#allocation2 + $0x90] sm:$0xff] %v5212_v45  ;;  %v4043_v47 = vpop.f32.mrb[6].mxu0  ;;  %vm18316_vm13 = vcmp.eq.s32.totalorder %v18315_v20, %v10417_v33  ;;  %vm18318_vm8 = vcmp.eq.s32.totalorder %v18317_v53, %v10417_v33  ;;  %vm18319_vm0 = vcmp.eq.s32.totalorder %v18315_v20, %v10423_v50  ;;  %v3614_v40 = vld [vmem:[#allocation2 + $0xa0] sm:$0xff] }
 0x2b0   : > { %5251 = vst [vmem:[#allocation2 + $0x88] sm:$0xff] %v5211_v58  ;;  %8861 = vmatprep.subr.msk.bf16.mxu0 %vm8860_vm4, %v9706_v49  ;;  %vm9116_vm14 = vmpackc.low %vm18310_vm2, %vm18309_vm10  ;;  %v5218_v51 = vadd.f32 %v4043_v47, %v3618_v62  ;;  %v4423_v52 = vpop.f32.mrb[6].mxu1  ;;  %v4045_v55 = vpop.f32.mrb[7].mxu0  ;;  %vm18320_vm4 = vcmp.eq.s32.totalorder %v18317_v53, %v10423_v50  ;;  %vm18321_vm2 = vcmp.eq.s32.totalorder %v18315_v20, %v10414_v21  ;;  %v3609_v58 = vld [vmem:[#allocation2 + $0x78] sm:$0xff] }
 0x2b1   : > { %5253 = vst [vmem:[#allocation2 + $0x98] sm:$0xff] %v5213_v63  ;;  %9117 = vmatprep.subr.msk.bf16.mxu1 %vm9116_vm14, %v9706_v49  ;;  %vm8862_vm9 = vmpackc.low %vm18312_vm12, %vm18311_vm6  ;;  %v5220_v56 = vadd.f32 %v4423_v52, %v3620_v16  ;;  %v5219_v46 = vadd.f32 %v4045_v55, %v3619_v32  ;;  %v4425_v57 = vpop.f32.mrb[7].mxu1  ;;  %vm18322_vm14 = vcmp.eq.s32.totalorder %v18317_v53, %v10414_v21  ;;  %v3617_v55 = vld [vmem:[#allocation2 + $0xb8] sm:$0xff] }
 0x2b2   : > { %8863 = vmatpush1.bf16.msk.msra.mxu0 %vm8862_vm9, %v9706_v49  ;;  %vm9118_vm3 = vmpackc.low %vm18314_vm1, %vm18313_vm11  ;;  %5258 = vst [vmem:[#allocation2 + $0xc0] sm:$0xff] %v5218_v51  ;;  %v5221_v61 = vadd.f32 %v4425_v57, %v3621_v48  ;;  %vm18323_vm12 = vcmp.eq.s32.totalorder %v18315_v20, %v10420_v24  ;;  %vm18324_vm9 = vcmp.eq.s32.totalorder %v18317_v53, %v10420_v24  ;;  %v3616_v48 = vld [vmem:[#allocation2 + $0xb0] sm:$0xff]  ;;  %v3615_v51 = vld [vmem:[#allocation2 + $0xa8] sm:$0xff] }
 0x2b3   : > { %9119 = vmatpush1.bf16.msk.msra.mxu1 %vm9118_vm3, %v9706_v49  ;;  %vm8864_vm15 = vmpackc.low %vm18318_vm8, %vm18316_vm13  ;;  %5260 = vst [vmem:[#allocation2 + $0xd0] sm:$0xff] %v5220_v56  ;;  %v4049_v25 = vpop.f32.mrb[8].mxu0  ;;  %vm18326_vm1 = vcmp.eq.s32.totalorder %v18325_v1, %v10417_v33  ;;  %vm18328_vm3 = vcmp.eq.s32.totalorder %v18327_v2, %v10417_v33  ;;  %vm18329_vm8 = vcmp.eq.s32.totalorder %v18325_v1, %v10423_v50  ;;  %v3624_v53 = vld [vmem:[#allocation2 + $0xf0] sm:$0xff] }
 0x2b4   : > { %5259 = vst [vmem:[#allocation2 + $0xc8] sm:$0xff] %v5219_v46  ;;  %8865 = vmatprep.subr.msk.bf16.mxu0 %vm8864_vm15, %v9706_v49  ;;  %vm9120_vm10 = vmpackc.low %vm18320_vm4, %vm18319_vm0  ;;  %v5226_v28 = vadd.f32 %v4049_v25, %v3626_v60  ;;  %v4429_v29 = vpop.f32.mrb[8].mxu1  ;;  %v4051_v14 = vpop.f32.mrb[9].mxu0  ;;  %vm18330_vm15 = vcmp.eq.s32.totalorder %v18327_v2, %v10423_v50  ;;  %vm18331_vm4 = vcmp.eq.s32.totalorder %v18325_v1, %v10414_v21  ;;  %v3623_v25 = vld [vmem:[#allocation2 + $0xe8] sm:$0xff] }
 0x2b5   : > { %5261 = vst [vmem:[#allocation2 + $0xd8] sm:$0xff] %v5221_v61  ;;  %9121 = vmatprep.subr.msk.bf16.mxu1 %vm9120_vm10, %v9706_v49  ;;  %vm8866_vm6 = vmpackc.low %vm18322_vm14, %vm18321_vm2  ;;  %v5228_v15 = vadd.f32 %v4429_v29, %v3628_v0  ;;  %v5227_v36 = vadd.f32 %v4051_v14, %v3627_v17  ;;  %v4431_v41 = vpop.f32.mrb[9].mxu1  ;;  %vm18332_vm10 = vcmp.eq.s32.totalorder %v18327_v2, %v10414_v21  ;;  %v3622_v17 = vld [vmem:[#allocation2 + $0xe0] sm:$0xff] }
 0x2b6   : > { %8867 = vmatpush1.bf16.msk.msra.mxu0 %vm8866_vm6, %v9706_v49  ;;  %vm9122_vm11 = vmpackc.low %vm18324_vm9, %vm18323_vm12  ;;  %5266 = vst [vmem:[#allocation2 + $0x100] sm:$0xff] %v5226_v28  ;;  %v5229_v13 = vadd.f32 %v4431_v41, %v3629_v10  ;;  %vm18333_vm14 = vcmp.eq.s32.totalorder %v18325_v1, %v10420_v24  ;;  %vm18334_vm6 = vcmp.eq.s32.totalorder %v18327_v2, %v10420_v24  ;;  %v3625_v28 = vld [vmem:[#allocation2 + $0xf8] sm:$0xff]  ;;  %v3630_v1 = vld [vmem:[#allocation2 + $0x120] sm:$0xff] }
 0x2b7   : > { %9123 = vmatpush1.bf16.msk.msra.mxu1 %vm9122_vm11, %v9706_v49  ;;  %vm8868_vm13 = vmpackc.low %vm18328_vm3, %vm18326_vm1  ;;  %5268 = vst [vmem:[#allocation2 + $0x110] sm:$0xff] %v5228_v15  ;;  %vm18336_vm9 = vcmp.eq.s32.totalorder %v18335_v3, %v10417_v33  ;;  %vm18338_vm11 = vcmp.eq.s32.totalorder %v18337_v4, %v10417_v33  ;;  %vm18339_vm3 = vcmp.eq.s32.totalorder %v18335_v3, %v10423_v50 }
 0x2b8   : > { %5267 = vst [vmem:[#allocation2 + $0x108] sm:$0xff] %v5227_v36  ;;  %8869 = vmatprep.subr.msk.bf16.mxu0 %vm8868_vm13, %v9706_v49  ;;  %vm9124_vm0 = vmpackc.low %vm18330_vm15, %vm18329_vm8  ;;  %vm18340_vm13 = vcmp.eq.s32.totalorder %v18337_v4, %v10423_v50  ;;  %vm18341_vm15 = vcmp.eq.s32.totalorder %v18335_v3, %v10414_v21 }
 0x2b9   : > { %5269 = vst [vmem:[#allocation2 + $0x118] sm:$0xff] %v5229_v13  ;;  %9125 = vmatprep.subr.msk.bf16.mxu1 %vm9124_vm0, %v9706_v49  ;;  %vm8870_vm2 = vmpackc.low %vm18332_vm10, %vm18331_vm4  ;;  %vm18342_vm0 = vcmp.eq.s32.totalorder %v18337_v4, %v10414_v21  ;;  %vm18343_vm10 = vcmp.eq.s32.totalorder %v18335_v3, %v10420_v24  ;;  %v3632_v3 = vld [vmem:[#allocation2 + $0x130] sm:$0xff] }
 0x2ba   : > { %8871 = vmatpush1.bf16.msk.msra.mxu0 %vm8870_vm2, %v9706_v49  ;;  %vm9126_vm12 = vmpackc.low %vm18334_vm6, %vm18333_vm14  ;;  %vm18344_vm2 = vcmp.eq.s32.totalorder %v18337_v4, %v10420_v24  ;;  %vm18346_vm6 = vcmp.eq.s32.totalorder %v18345_v5, %v10417_v33  ;;  %v3631_v4 = vld [vmem:[#allocation2 + $0x128] sm:$0xff] }
 0x2bb   : > { %9127 = vmatpush1.bf16.msk.msra.mxu1 %vm9126_vm12, %v9706_v49  ;;  %vm8872_vm1 = vmpackc.low %vm18338_vm11, %vm18336_vm9  ;;  %vm18348_vm12 = vcmp.eq.s32.totalorder %v18347_v6, %v10417_v33  ;;  %vm18349_vm11 = vcmp.eq.s32.totalorder %v18345_v5, %v10423_v50 }
 0x2bc   : > { %8873 = vmatprep.subr.msk.bf16.mxu0 %vm8872_vm1, %v9706_v49  ;;  %vm9128_vm8 = vmpackc.low %vm18340_vm13, %vm18339_vm3  ;;  %vm18350_vm1 = vcmp.eq.s32.totalorder %v18347_v6, %v10423_v50  ;;  %vm18351_vm13 = vcmp.eq.s32.totalorder %v18345_v5, %v10414_v21 }
 0x2bd   : > { %9129 = vmatprep.subr.msk.bf16.mxu1 %vm9128_vm8, %v9706_v49  ;;  %vm8874_vm4 = vmpackc.low %vm18342_vm0, %vm18341_vm15  ;;  %vm18352_vm8 = vcmp.eq.s32.totalorder %v18347_v6, %v10414_v21  ;;  %vm18353_vm0 = vcmp.eq.s32.totalorder %v18345_v5, %v10420_v24 }
 0x2be   : > { %8875 = vmatpush1.bf16.msk.msra.mxu0 %vm8874_vm4, %v9706_v49  ;;  %vm9130_vm14 = vmpackc.low %vm18344_vm2, %vm18343_vm10  ;;  %vm18354_vm4 = vcmp.eq.s32.totalorder %v18347_v6, %v10420_v24  ;;  %vm18356_vm2 = vcmp.eq.s32.totalorder %v18355_v7, %v10417_v33  ;;  %v3633_v6 = vld [vmem:[#allocation2 + $0x138] sm:$0xff] }
 0x2bf   : > { %9131 = vmatpush1.bf16.msk.msra.mxu1 %vm9130_vm14, %v9706_v49  ;;  %vm8876_vm9 = vmpackc.low %vm18348_vm12, %vm18346_vm6  ;;  %vm18358_vm14 = vcmp.eq.s32.totalorder %v18357_v8, %v10417_v33  ;;  %vm18359_vm12 = vcmp.eq.s32.totalorder %v18355_v7, %v10423_v50 }
 0x2c0   : > { %8877 = vmatprep.subr.msk.bf16.mxu0 %vm8876_vm9, %v9706_v49  ;;  %vm9132_vm3 = vmpackc.low %vm18350_vm1, %vm18349_vm11  ;;  %vm18360_vm9 = vcmp.eq.s32.totalorder %v18357_v8, %v10423_v50  ;;  %vm18361_vm1 = vcmp.eq.s32.totalorder %v18355_v7, %v10414_v21 }
 0x2c1   : > { %9133 = vmatprep.subr.msk.bf16.mxu1 %vm9132_vm3, %v9706_v49  ;;  %vm8878_vm15 = vmpackc.low %vm18352_vm8, %vm18351_vm13  ;;  %vm18362_vm3 = vcmp.eq.s32.totalorder %v18357_v8, %v10414_v21  ;;  %vm18363_vm8 = vcmp.eq.s32.totalorder %v18355_v7, %v10420_v24 }
 0x2c2   : > { %8879 = vmatpush1.bf16.msk.msra.mxu0 %vm8878_vm15, %v9706_v49  ;;  %vm9134_vm10 = vmpackc.low %vm18354_vm4, %vm18353_vm0  ;;  %vm18364_vm15 = vcmp.eq.s32.totalorder %v18357_v8, %v10420_v24  ;;  %vm18365_vm4 = vcmp.eq.s32.totalorder %v17779_v9, %v10417_v33 }
 0x2c3   : > { %9135 = vmatpush1.bf16.msk.msra.mxu1 %vm9134_vm10, %v9706_v49  ;;  %vm8880_vm6 = vmpackc.low %vm18358_vm14, %vm18356_vm2  ;;  %vm18366_vm10 = vcmp.eq.s32.totalorder %v17781_v54, %v10417_v33  ;;  %vm18367_vm14 = vcmp.eq.s32.totalorder %v17779_v9, %v10423_v50 }
 0x2c4   : > { %8881 = vmatprep.subr.msk.bf16.mxu0 %vm8880_vm6, %v9706_v49  ;;  %vm9136_vm11 = vmpackc.low %vm18360_vm9, %vm18359_vm12  ;;  %vm18368_vm6 = vcmp.eq.s32.totalorder %v17781_v54, %v10423_v50  ;;  %vm18369_vm9 = vcmp.eq.s32.totalorder %v17779_v9, %v10414_v21 }
 0x2c5   : > { %9137 = vmatprep.subr.msk.bf16.mxu1 %vm9136_vm11, %v9706_v49  ;;  %vm8882_vm13 = vmpackc.low %vm18362_vm3, %vm18361_vm1  ;;  %vm18370_vm11 = vcmp.eq.s32.totalorder %v17781_v54, %v10414_v21  ;;  %vm18371_vm3 = vcmp.eq.s32.totalorder %v17779_v9, %v10420_v24  ;;  %v9430_v9 = vld [vmem:[%s9962_s30 + $0x138] sm:$0xff] }
 0x2c6   : > { %8883 = vmatpush1.bf16.msk.msra.mxu0 %vm8882_vm13, %v9706_v49  ;;  %vm9138_vm0 = vmpackc.low %vm18364_vm15, %vm18363_vm8  ;;  %vm18372_vm13 = vcmp.eq.s32.totalorder %v17781_v54, %v10420_v24  ;;  %vm18373_vm15 = vcmp.eq.s32.totalorder %v17789_v12, %v10417_v33  ;;  %v9423_v33 = vld [vmem:[%s9962_s30 + $0x30] sm:$0xff] }
 0x2c7   : > { %9139 = vmatpush1.bf16.msk.msra.mxu1 %vm9138_vm0, %v9706_v49  ;;  %vm8884_vm2 = vmpackc.low %vm18366_vm10, %vm18365_vm4  ;;  %vm18374_vm4 = vcmp.eq.s32.totalorder %v17789_v12, %v10423_v50  ;;  %v9424_v50 = vld [vmem:[%s9962_s30 + $0x78] sm:$0xff]  ;;  %v9431_v54 = vld [vmem:[%s9962_s30 + $0x130] sm:$0xff] }
 0x2c8   : > { %8885 = vmatprep.subr.msk.bf16.mxu0 %vm8884_vm2, %v9706_v49  ;;  %vm9140_vm12 = vmpackc.low %vm18368_vm6, %vm18367_vm14  ;;  %vm18375_vm2 = vcmp.eq.s32.totalorder %v17789_v12, %v10414_v21  ;;  %vm18376_vm14 = vcmp.eq.s32.totalorder %v17791_v11, %v10414_v21  ;;  %v9425_v21 = vld [vmem:[%s9962_s30 + $0x70] sm:$0xff] }
 0x2c9   : > { %9141 = vmatprep.subr.msk.bf16.mxu1 %vm9140_vm12, %v9706_v49  ;;  %vm8886_vm1 = vmpackc.low %vm18370_vm11, %vm18369_vm9  ;;  %vm18378_vm12 = vcmp.eq.s32.totalorder %v17791_v11, %v10420_v24  ;;  %v9429_v11 = vld [vmem:[%s9962_s30 + $0xf0] sm:$0xff] }
 0x2ca   : > { %8887 = vmatpush1.bf16.msk.msra.mxu0 %vm8886_vm1, %v9706_v49  ;;  %vm9142_vm8 = vmpackc.low %vm18372_vm13, %vm18371_vm3 }
 0x2cb   : > { %9143 = vmatpush1.bf16.msk.msra.mxu1 %vm9142_vm8, %v9706_v49  ;;  %vm8888_vm0 = vmpackc.low %vm1499_vm5, %vm18373_vm15  ;;  %vm18377_vm5 = vcmp.eq.s32.totalorder %v17789_v12, %v10420_v24  ;;  %v9426_v12 = vld [vmem:[%s9962_s30 + $0xb8] sm:$0xff]  ;;  %v9427_v24 = vld [vmem:[%s9962_s30 + $0xb0] sm:$0xff] }
 0x2cc   : > { %8889 = vmatprep.subr.msk.bf16.mxu0 %vm8888_vm0, %v9706_v49  ;;  %vm9144_vm10 = vmpackc.low %vm1501_vm7, %vm18374_vm4 }
 0x2cd   : > { %9145 = vmatprep.subr.msk.bf16.mxu1 %vm9144_vm10, %v9706_v49  ;;  %vm8890_vm6 = vmpackc.low %vm18376_vm14, %vm18375_vm2 }
 0x2ce   : > { %8891 = vmatpush1.bf16.msk.msra.mxu0 %vm8890_vm6, %v9706_v49  ;;  %vm9146_vm9 = vmpackc.low %vm18378_vm12, %vm18377_vm5 }
 0x2cf   : > { %9147 = vmatpush1.bf16.msk.msra.mxu1 %vm9146_vm9, %v9706_v49  ;;  %v9428_v49 = vld [vmem:[%s9962_s30 + $0xf8] sm:$0xff] }
 0x2d1   : > { %4784 = vmatmul.mubr.f32.vlgmr.msra.gmra.mrb[10].mxu0 %v9423_v33 }
 0x2d2   : > { %5164 = vmatmul.mubr.f32.vlgmr.msra.gmra.mrb[10].mxu1 %v9423_v33  ;;  %4789 = vmatprep.mubr.f32.mxu0 %v9424_v50 }
 0x2d3   : > { %5169 = vmatprep.mubr.f32.mxu1 %v9424_v50 }
 0x2d5   : > { %4790 = vmatmul.mubr.f32.gmra.mrb[12].mxu0 %v9425_v21 }
 0x2d6   : > { %5170 = vmatmul.mubr.f32.gmra.mrb[12].mxu1 %v9425_v21  ;;  %4795 = vmatprep.mubr.f32.mxu0 %v9426_v12 }
 0x2d7   : > { %5175 = vmatprep.mubr.f32.mxu1 %v9426_v12 }
 0x2d9   : > { %4796 = vmatmul.mubr.f32.gmra.mrb[14].mxu0 %v9427_v24 }
 0x2da   : > { %5176 = vmatmul.mubr.f32.gmra.mrb[14].mxu1 %v9427_v24  ;;  %4801 = vmatprep.mubr.f32.mxu0 %v9428_v49 }
 0x2db   : > { %5181 = vmatprep.mubr.f32.mxu1 %v9428_v49 }
 0x2dd   : > { %4802 = vmatmul.mubr.f32.gmra.mrb[16].mxu0 %v9429_v11 }
 0x2de   : > { %5182 = vmatmul.mubr.f32.gmra.mrb[16].mxu1 %v9429_v11  ;;  %4807 = vmatprep.mubr.f32.mxu0 %v9430_v9 }
 0x2df   : > { %5187 = vmatprep.mubr.f32.mxu1 %v9430_v9 }
 0x2e1   : > { %4808 = vmatmul.mubr.f32.gmra.mrb[18].mxu0 %v9431_v54 }
 0x2e2   : > { %5188 = vmatmul.mubr.f32.gmra.mrb[18].mxu1 %v9431_v54 }
 0x3a4   : > { %v4785_v23 = vpop.f32.mrb[10].mxu0 }
 0x3a5   : > { %v5198_v27 = vadd.f32 %v4785_v23, %v3598_v18  ;;  %v5165_v30 = vpop.f32.mrb[10].mxu1  ;;  %v4787_v31 = vpop.f32.mrb[11].mxu0 }
 0x3a6   : > { %v5200_v34 = vadd.f32 %v5165_v30, %v3600_v19  ;;  %v5199_v35 = vadd.f32 %v4787_v31, %v3599_v22  ;;  %v5167_v38 = vpop.f32.mrb[11].mxu1 }
 0x3a7   : > { %5238 = vst [vmem:[#allocation2 + $0x20] sm:$0xff] %v5198_v27  ;;  %v5201_v42 = vadd.f32 %v5167_v38, %v3601_v26 }
 0x3a8   : > { %5240 = vst [vmem:[#allocation2 + $0x30] sm:$0xff] %v5200_v34  ;;  %5239 = vst [vmem:[#allocation2 + $0x28] sm:$0xff] %v5199_v35  ;;  %v4791_v45 = vpop.f32.mrb[12].mxu0 }
 0x3a9   : > { %5241 = vst [vmem:[#allocation2 + $0x38] sm:$0xff] %v5201_v42  ;;  %v5206_v59 = vadd.f32 %v4791_v45, %v3606_v39  ;;  %v5171_v62 = vpop.f32.mrb[12].mxu1  ;;  %v4793_v63 = vpop.f32.mrb[13].mxu0 }
 0x3aa   : > { %v5208_v16 = vadd.f32 %v5171_v62, %v3608_v43  ;;  %v5207_v32 = vadd.f32 %v4793_v63, %v3607_v44  ;;  %v5173_v37 = vpop.f32.mrb[13].mxu1 }
 0x3ab   : > { %5246 = vst [vmem:[#allocation2 + $0x60] sm:$0xff] %v5206_v59  ;;  %v5209_v47 = vadd.f32 %v5173_v37, %v3609_v58 }
 0x3ac   : > { %5248 = vst [vmem:[#allocation2 + $0x70] sm:$0xff] %v5208_v16  ;;  %5247 = vst [vmem:[#allocation2 + $0x68] sm:$0xff] %v5207_v32  ;;  %v4797_v52 = vpop.f32.mrb[14].mxu0 }
 0x3ad   : > { %5249 = vst [vmem:[#allocation2 + $0x78] sm:$0xff] %v5209_v47  ;;  %v5214_v56 = vadd.f32 %v4797_v52, %v3614_v40  ;;  %v5177_v46 = vpop.f32.mrb[14].mxu1  ;;  %v4799_v57 = vpop.f32.mrb[15].mxu0 }
 0x3ae   : > { %v5216_v60 = vadd.f32 %v5177_v46, %v3616_v48  ;;  %v5215_v61 = vadd.f32 %v4799_v57, %v3615_v51  ;;  %v5179_v0 = vpop.f32.mrb[15].mxu1 }
 0x3af   : > { %5254 = vst [vmem:[#allocation2 + $0xa0] sm:$0xff] %v5214_v56  ;;  %v5217_v20 = vadd.f32 %v5179_v0, %v3617_v55 }
 0x3b0   : > { %5256 = vst [vmem:[#allocation2 + $0xb0] sm:$0xff] %v5216_v60  ;;  %5255 = vst [vmem:[#allocation2 + $0xa8] sm:$0xff] %v5215_v61  ;;  %v4803_v10 = vpop.f32.mrb[16].mxu0 }
 0x3b1   : > { %5257 = vst [vmem:[#allocation2 + $0xb8] sm:$0xff] %v5217_v20  ;;  %v5222_v29 = vadd.f32 %v4803_v10, %v3622_v17  ;;  %v5183_v14 = vpop.f32.mrb[16].mxu1  ;;  %v4805_v15 = vpop.f32.mrb[17].mxu0 }
 0x3b2   : > { %v5224_v36 = vadd.f32 %v5183_v14, %v3624_v53  ;;  %v5223_v41 = vadd.f32 %v4805_v15, %v3623_v25  ;;  %v5185_v13 = vpop.f32.mrb[17].mxu1 }
 0x3b3   : > { %5262 = vst [vmem:[#allocation2 + $0xe0] sm:$0xff] %v5222_v29  ;;  %v5225_v2 = vadd.f32 %v5185_v13, %v3625_v28  ;;  %5277 = sbr.rel (%p8103_p5) target bundleno = 1081 (0x439), region = 44 }
 0x3b4   : > { %5264 = vst [vmem:[#allocation2 + $0xf0] sm:$0xff] %v5224_v36  ;;  %5263 = vst [vmem:[#allocation2 + $0xe8] sm:$0xff] %v5223_v41  ;;  %v4809_v5 = vpop.f32.mrb[18].mxu0 }
 0x3b5   : > { %5265 = vst [vmem:[#allocation2 + $0xf8] sm:$0xff] %v5225_v2  ;;  %v5230_v7 = vadd.f32 %v4809_v5, %v3630_v1  ;;  %v5189_v8 = vpop.f32.mrb[18].mxu1  ;;  %v4811_v33 = vpop.f32.mrb[19].mxu0 }
 0x3b6   : > { %v5232_v50 = vadd.f32 %v5189_v8, %v3632_v3  ;;  %v5231_v21 = vadd.f32 %v4811_v33, %v3631_v4  ;;  %v5191_v12 = vpop.f32.mrb[19].mxu1 }
 0x3b7   : > { %5270 = vst [vmem:[#allocation2 + $0x120] sm:$0xff] %v5230_v7  ;;  %v5233_v24 = vadd.f32 %v5191_v12, %v3633_v6 }
 0x3b8   : > { %5272 = vst [vmem:[#allocation2 + $0x130] sm:$0xff] %v5232_v50  ;;  %5271 = vst [vmem:[#allocation2 + $0x128] sm:$0xff] %v5231_v21 }
 0x3b9   : > { %5273 = vst [vmem:[#allocation2 + $0x138] sm:$0xff] %v5233_v24 }
 0x3ba   : > { %v18379_v49 = vld [vmem:[#allocation15_spill] sm:$0xff]  ;;  %v18380_v9 = vld [vmem:[#allocation16_spill] sm:$0xff]  ;;  %v18381_v18 = vld [vmem:[#allocation17_spill] sm:$0xff]  ;;  %v9707_v34 = vmov 0  }
 0x3bb   : > { %v5278_v11 = vand.u32 2147483647, %v18379_v49  ;;  %v5279_v54 = vand.u32 2147483647, %v18380_v9  ;;  %v5280_v19 = vand.u32 2147483647, %v18381_v18 }
 0x3bc   : > { %v18382_v22 = vld [vmem:[#allocation18_spill] sm:$0xff]  ;;  %v5330_v58 = vld [vmem:[#allocation2] sm:$0xff]  ;;  %v5331_v59 = vld [vmem:[#allocation2 + $0x8] sm:$0xff] }
 0x3bd   : > { %v5281_v23 = vand.u32 2147483647, %v18382_v22  ;;  %vm16147_vm7 = vcmp.lt.f32.partialorder %v5278_v11, 1.5  ;;  %vm16151_vm11 = vcmp.lt.f32.partialorder %v5279_v54, 1.5  ;;  %vm16155_vm1 = vcmp.lt.f32.partialorder %v5280_v19, 1.5  ;;  %v5332_v37 = vld [vmem:[#allocation2 + $0x10] sm:$0xff] }
 0x3be   : > { %v5286_v35 = vsel %vm16147_vm7, 1, %v9707_v34  ;;  %v5287_v38 = vsel %vm16151_vm11, 1, %v9707_v34  ;;  %v5288_v39 = vsel %vm16155_vm1, 1, %v9707_v34  ;;  %v5333_v40 = vld [vmem:[#allocation2 + $0x18] sm:$0xff]  ;;  %v5334_v47 = vld [vmem:[#allocation2 + $0x20] sm:$0xff]  ;;  %v5335_v48 = vld [vmem:[#allocation2 + $0x28] sm:$0xff] }
 0x3bf   : > { %vm16159_vm3 = vcmp.lt.f32.partialorder %v5281_v23, 1.5  ;;  %v8104_v43 = vrot.slane %v5286_v35, 9  ;;  %v8105_v44 = vrot.slane %v5287_v38, 9  ;;  %v8106_v45 = vrot.slane %v5288_v39, 9  ;;  %v5336_v46 = vld [vmem:[#allocation2 + $0x30] sm:$0xff]  ;;  %v5337_v57 = vld [vmem:[#allocation2 + $0x38] sm:$0xff] }
 0x3c0   : > { %v5289_v42 = vsel %vm16159_vm3, 1, %v9707_v34  ;;  %v8108_v63 = vrot.slane %v5286_v35, 10  ;;  %v8109_v16 = vrot.slane %v5287_v38, 10  ;;  %v8110_v32 = vrot.slane %v5288_v39, 10  ;;  %v5338_v60 = vld [vmem:[#allocation2 + $0x40] sm:$0xff]  ;;  %v5339_v61 = vld [vmem:[#allocation2 + $0x48] sm:$0xff] }
 0x3c1   : > { %v8107_v62 = vrot.slane %v5289_v42, 9  ;;  %vm16171_vm13 = vcmp.ne.s32.totalorder %v8104_v43, 0  ;;  %vm16175_vm8 = vcmp.ne.s32.totalorder %v8105_v44, 0  ;;  %vm16179_vm15 = vcmp.ne.s32.totalorder %v8106_v45, 0  ;;  %v5340_v17 = vld [vmem:[#allocation2 + $0x50] sm:$0xff]  ;;  %v5341_v20 = vld [vmem:[#allocation2 + $0x58] sm:$0xff] }
 0x3c2   : > { %v8111_v56 = vrot.slane %v5289_v42, 10  ;;  %vm5302_vm4 = vmand %vm16147_vm7, %vm16171_vm13  ;;  %vm16195_vm2 = vcmp.ne.s32.totalorder %v8108_v63, 0  ;;  %vm16199_vm14 = vcmp.ne.s32.totalorder %v8109_v16, 0  ;;  %v5342_v10 = vld [vmem:[#allocation2 + $0x60] sm:$0xff]  ;;  %v5343_v28 = vld [vmem:[#allocation2 + $0x68] sm:$0xff]  ;;  %vm16207_vm5 = vcmp.ne.s32.totalorder %v8110_v32, 0 }
 0x3c3   : > { %vm16183_vm0 = vcmp.ne.s32.totalorder %v8107_v62, 0  ;;  %vm5303_vm10 = vmand %vm16151_vm11, %vm16175_vm8  ;;  %v5344_v15 = vld [vmem:[#allocation2 + $0x70] sm:$0xff]  ;;  %v5345_v36 = vld [vmem:[#allocation2 + $0x78] sm:$0xff]  ;;  %v5370_v41 = vmul.f32 0.5, %v5330_v58  ;;  %v5371_v13 = vmul.f32 0.5, %v5331_v59  ;;  %v5372_v3 = vmul.f32 0.5, %v5332_v37 }
 0x3c4   : > { %vm16211_vm12 = vcmp.ne.s32.totalorder %v8111_v56, 0  ;;  %v5346_v1 = vld [vmem:[#allocation2 + $0x80] sm:$0xff]  ;;  %v5347_v2 = vld [vmem:[#allocation2 + $0x88] sm:$0xff]  ;;  %v5373_v4 = vmul.f32 0.5, %v5333_v40  ;;  %v5374_v5 = vmul.f32 0.5, %v5334_v47  ;;  %v5375_v6 = vmul.f32 0.5, %v5335_v48  ;;  %vm16226_vm6 = vmand %vm5302_vm4, %vm16195_vm2 }
 0x3c5   : > { %v5348_v8 = vld [vmem:[#allocation2 + $0x90] sm:$0xff]  ;;  %v5349_v33 = vld [vmem:[#allocation2 + $0x98] sm:$0xff]  ;;  %v5376_v50 = vmul.f32 0.5, %v5336_v46  ;;  %v5377_v21 = vmul.f32 0.5, %v5337_v57  ;;  %v5378_v12 = vmul.f32 0.5, %v5338_v60  ;;  %v16230_v24 = vmul.f32 0.5, %v5339_v61  ;;  %vm16239_vm9 = vmand %vm5303_vm10, %vm16199_vm14 }
 0x3c6   : > { %v5350_v11 = vld [vmem:[#allocation2 + $0xa0] sm:$0xff]  ;;  %v5351_v9 = vld [vmem:[#allocation2 + $0xa8] sm:$0xff]  ;;  %v16243_v54 = vmul.f32 0.5, %v5340_v17  ;;  %v16245_v18 = vmul.f32 0.5, %v5341_v20  ;;  %v16247_v19 = vmul.f32 0.5, %v5342_v10  ;;  %v16249_v22 = vmul.f32 0.5, %v5343_v28  ;;  %vm18411_vm7 = vmand %vm16155_vm1, %vm16179_vm15 }
 0x3c7   : > { %vm5320_vm11 = vmand %vm18411_vm7, %vm16207_vm5  ;;  %v9708_v23 = vmov 0.0   ;;  %v5352_v27 = vld [vmem:[#allocation2 + $0xb0] sm:$0xff]  ;;  %v5353_v34 = vld [vmem:[#allocation2 + $0xb8] sm:$0xff]  ;;  %v16262_v35 = vmul.f32 0.5, %v5344_v15  ;;  %v16264_v38 = vmul.f32 0.5, %v5345_v36  ;;  %v16266_v39 = vmul.f32 0.5, %v5346_v1 }
 0x3c8   : > { %v16260_v26 = vsel %vm16226_vm6, 1.0, %v9708_v23  ;;  %vm18413_vm1 = vmand %vm16159_vm3, %vm16183_vm0  ;;  %v16277_v30 = vsel %vm16239_vm9, 1.0, %v9708_v23  ;;  %v16279_v42 = vmul.f32 0.5, %v5347_v2  ;;  %v16281_v43 = vmul.f32 0.5, %v5348_v8  ;;  %v16293_v62 = vld [vmem:[#allocation2 + $0x100] sm:$0xff]  ;;  %v16299_v32 = vld [vmem:[#allocation2 + $0x108] sm:$0xff] }
 0x3c9   : > { %18412 = vst [vmem:[#allocation102_spill] sm:$0xff] %v16260_v26  ;;  %vm5321_vm13 = vmand %vm18413_vm1, %vm16211_vm12  ;;  %v16283_v44 = vmul.f32 0.5, %v5349_v33  ;;  %v16285_v45 = vsel %vm5320_vm11, 1.0, %v9708_v23  ;;  %v16287_v58 = vmul.f32 0.5, %v5350_v11  ;;  %v16289_v59 = vmul.f32 0.5, %v5351_v9  ;;  %v16301_v37 = vld [vmem:[#allocation2 + $0x110] sm:$0xff] }
 0x3ca   : > { %18414 = vst [vmem:[#allocation103_spill] sm:$0xff] %v16277_v30  ;;  %18415 = vst [vmem:[#allocation104_spill] sm:$0xff] %v16285_v45  ;;  %9432 = vtanh.f32 %v5370_v41  ;;  %v16291_v31 = vsel %vm5321_vm13, 1.0, %v9708_v23  ;;  %v16295_v63 = vmul.f32 0.5, %v5352_v27  ;;  %v16297_v16 = vmul.f32 0.5, %v5353_v34  ;;  %v16303_v40 = vld [vmem:[#allocation2 + $0x118] sm:$0xff] }
 0x3cb   : > { %18416 = vst [vmem:[#allocation105_spill] sm:$0xff] %v16291_v31  ;;  %9434 = vtanh.f32 %v5371_v13  ;;  %v16310_v56 = vld [vmem:[#allocation2 + $0x120] sm:$0xff]  ;;  %v16312_v46 = vld [vmem:[#allocation2 + $0x128] sm:$0xff]  ;;  %v16314_v57 = vld [vmem:[#allocation2 + $0x130] sm:$0xff]  ;;  %v5474_v25 = vand.u32 2147483647, %v16293_v62 }
 0x3cc   : > { %9436 = vtanh.f32 %v5372_v3  ;;  %v16319_v17 = vld [vmem:[#allocation2 + $0x138] sm:$0xff]  ;;  %v5475_v10 = vand.u32 2147483647, %v16299_v32  ;;  %v5476_v28 = vand.u32 2147483647, %v16301_v37  ;;  %vm5778_vm6 = vcmask 1042434  }
 0x3cd   : > { %9438 = vtanh.f32 %v5373_v4  ;;  %v5477_v29 = vand.u32 2147483647, %v16303_v40  ;;  %v5478_v14 = vand.u32 2147483647, %v16310_v56  ;;  %v5479_v15 = vand.u32 2147483647, %v16312_v46 }
 0x3ce   : > { %9440 = vtanh.f32 %v5374_v5  ;;  %v5480_v36 = vand.u32 2147483647, %v16314_v57  ;;  %v5481_v41 = vand.u32 2147483647, %v16319_v17  ;;  %v5482_v13 = vsub.f32 0.0, %v5474_v25 }
 0x3cf   : > { %9442 = vtanh.f32 %v5375_v6  ;;  %v5483_v1 = vsub.f32 0.0, %v5475_v10  ;;  %v5484_v2 = vsub.f32 0.0, %v5476_v28  ;;  %v5485_v3 = vsub.f32 0.0, %v5477_v29  ;;  %v16350_v29 = vld [vmem:[#allocation2 + $0xc0] sm:$0xff] }
 0x3d0   : > { %9444 = vtanh.f32 %v5376_v50  ;;  %v5486_v4 = vsub.f32 0.0, %v5478_v14  ;;  %v5487_v7 = vsub.f32 0.0, %v5479_v15  ;;  %v5488_v33 = vsub.f32 0.0, %v5480_v36 }
 0x3d1   : > { %9446 = vtanh.f32 %v5377_v21  ;;  %v5489_v50 = vsub.f32 0.0, %v5481_v41  ;;  %v16335_v21 = vmul.f32 1.442695, %v5482_v13  ;;  %v16338_v11 = vmul.f32 1.442695, %v5483_v1  ;;  %v16355_v41 = vld [vmem:[#allocation2 + $0xc8] sm:$0xff] }
 0x3d2   : > { %9448 = vtanh.f32 %v5378_v12  ;;  %v16340_v9 = vmul.f32 1.442695, %v5484_v2  ;;  %v16343_v27 = vmul.f32 1.442695, %v5485_v3  ;;  %v16345_v34 = vmul.f32 1.442695, %v5486_v4 }
 0x3d3   : > { %9450 = vtanh.f32 %v16230_v24  ;;  %v16348_v28 = vmul.f32 1.442695, %v5487_v7  ;;  %v16358_v1 = vmul.f32 1.442695, %v5489_v50  ;;  %v16360_v3 = vld [vmem:[#allocation2 + $0xd0] sm:$0xff]  ;;  %vm5780_vm5 = vcmask 1043459  }
 0x3d4   : > { %v9433_v8 = vpop.eup %9432  ;;  %9452 = vtanh.f32 %v16243_v54  ;;  %vm5804_vm12 = vcmask 1040384   ;;  %vm5897_vm9 = vcmask 1043456  }
 0x3d5   : > { %v9435_v49 = vpop.eup %9434  ;;  %9454 = vtanh.f32 %v16245_v18  ;;  %v5418_v12 = vmul.f32 0.5, %v9433_v8 }
 0x3d6   : > { %v9437_v24 = vpop.eup %9436  ;;  %9456 = vtanh.f32 %v16247_v19  ;;  %v5419_v23 = vmul.f32 0.5, %v9435_v49  ;;  %v16353_v19 = vmul.f32 1.442695, %v5488_v33  ;;  %v16365_v33 = vld [vmem:[#allocation2 + $0xd8] sm:$0xff] }
 0x3d7   : > { %v9439_v54 = vpop.eup %9438  ;;  %9458 = vtanh.f32 %v16249_v22  ;;  %v5420_v25 = vmul.f32 0.5, %v9437_v24  ;;  %v5442_v10 = vadd.f32 0.5, %v5418_v12  ;;  %v16371_v24 = vld [vmem:[#allocation2 + $0xe0] sm:$0xff] }
 0x3d8   : > { %v9441_v18 = vpop.eup %9440  ;;  %9460 = vtanh.f32 %v16262_v35  ;;  %v5421_v14 = vmul.f32 0.5, %v9439_v54  ;;  %v5443_v15 = vadd.f32 0.5, %v5419_v23 }
 0x3d9   : > { %v9443_v36 = vpop.eup %9442  ;;  %9462 = vtanh.f32 %v16264_v38  ;;  %v5422_v13 = vmul.f32 0.5, %v9441_v18  ;;  %v5444_v22 = vadd.f32 0.5, %v5420_v25  ;;  %v16369_v50 = vmul.f32 %v5442_v10, %v16350_v29  ;;  %v16377_v18 = vld [vmem:[#allocation2 + $0xe8] sm:$0xff] }
 0x3da   : > { %v9445_v2 = vpop.eup %9444  ;;  %9464 = vtanh.f32 %v16266_v39  ;;  %v5423_v4 = vmul.f32 0.5, %v9443_v36  ;;  %v5445_v35 = vadd.f32 0.5, %v5421_v14  ;;  %v16375_v54 = vmul.f32 %v5443_v15, %v16355_v41 }
 0x3db   : > { %v9447_v8 = vpop.eup %9446  ;;  %9466 = vtanh.f32 %v16279_v42  ;;  %v5424_v38 = vmul.f32 0.5, %v9445_v2  ;;  %v5446_v49 = vadd.f32 0.5, %v5422_v13  ;;  %v16381_v10 = vmul.f32 %v5444_v22, %v16360_v3  ;;  %v16383_v13 = vld [vmem:[#allocation2 + $0xf0] sm:$0xff] }
 0x3dc   : > { %v9449_v12 = vpop.eup %9448  ;;  %9468 = vtanh.f32 %v16281_v43  ;;  %v5425_v39 = vmul.f32 0.5, %v9447_v8  ;;  %v5447_v23 = vadd.f32 0.5, %v5423_v4  ;;  %v16387_v15 = vmul.f32 %v5445_v35, %v16365_v33  ;;  %v16389_v8 = vld [vmem:[#allocation2 + $0xf8] sm:$0xff] }
 0x3dd   : > { %v9451_v25 = vpop.eup %9450  ;;  %9470 = vtanh.f32 %v16283_v44  ;;  %v5426_v42 = vmul.f32 0.5, %v9449_v12  ;;  %v5448_v14 = vadd.f32 0.5, %v5424_v38  ;;  %v16393_v22 = vmul.f32 %v5446_v49, %v16371_v24 }
 0x3de   : > { %v9453_v36 = vpop.eup %9452  ;;  %9472 = vtanh.f32 %v16287_v58  ;;  %v5427_v43 = vmul.f32 0.5, %v9451_v25  ;;  %v5449_v2 = vadd.f32 0.5, %v5425_v39  ;;  %v16397_v39 = vmul.f32 %v5447_v23, %v16377_v18 }
 0x3df   : > { %v9455_v4 = vpop.eup %9454  ;;  %9474 = vtanh.f32 %v16289_v59  ;;  %v5428_v44 = vmul.f32 0.5, %v9453_v36  ;;  %v5450_v38 = vadd.f32 0.5, %v5426_v42  ;;  %v16401_v59 = vmul.f32 %v5448_v14, %v16383_v13 }
 0x3e0   : > { %v9457_v12 = vpop.eup %9456  ;;  %9476 = vtanh.f32 %v16295_v63  ;;  %v5429_v7 = vmul.f32 0.5, %v9455_v4  ;;  %v5451_v58 = vadd.f32 0.5, %v5427_v43  ;;  %v16405_v63 = vmul.f32 %v5449_v2, %v16389_v8 }
 0x3e1   : > { %v9459_v35 = vpop.eup %9458  ;;  %9478 = vtanh.f32 %v16297_v16  ;;  %v5430_v25 = vmul.f32 0.5, %v9457_v12  ;;  %v5452_v55 = vadd.f32 0.5, %v5428_v44  ;;  %v16409_v16 = vmul.f32 %v5450_v38, %v16350_v29 }
 0x3e2   : > { %v9461_v42 = vpop.eup %9460  ;;  %v5431_v36 = vmul.f32 0.5, %v9459_v35  ;;  %v5453_v49 = vadd.f32 0.5, %v5429_v7  ;;  %9480 = vpow2.f32 %v16335_v21  ;;  %v16413_v7 = vmul.f32 %v5451_v58, %v16355_v41 }
 0x3e3   : > { %v9463_v43 = vpop.eup %9462  ;;  %v5432_v4 = vmul.f32 0.5, %v9461_v42  ;;  %v5454_v23 = vadd.f32 0.5, %v5430_v25  ;;  %9482 = vpow2.f32 %v16338_v11  ;;  %v16417_v25 = vmul.f32 %v5452_v55, %v16360_v3 }
 0x3e4   : > { %v9465_v44 = vpop.eup %9464  ;;  %v5433_v12 = vmul.f32 0.5, %v9463_v43  ;;  %v5455_v14 = vadd.f32 0.5, %v5431_v36  ;;  %9484 = vpow2.f32 %v16340_v9  ;;  %v16421_v36 = vmul.f32 %v5453_v49, %v16365_v33 }
 0x3e5   : > { %v9467_v21 = vpop.eup %9466  ;;  %v5434_v35 = vmul.f32 0.5, %v9465_v44  ;;  %v5456_v2 = vadd.f32 0.5, %v5432_v4  ;;  %9486 = vpow2.f32 %v16343_v27  ;;  %v16424_v51 = vmul.f32 %v5454_v23, %v16371_v24 }
 0x3e6   : > { %v9469_v11 = vpop.eup %9468  ;;  %v5435_v42 = vmul.f32 0.5, %v9467_v21  ;;  %v5457_v38 = vadd.f32 0.5, %v5433_v12  ;;  %9488 = vpow2.f32 %v16345_v34  ;;  %v16427_v4 = vmul.f32 %v5455_v14, %v16377_v18 }
 0x3e7   : > { %v9471_v9 = vpop.eup %9470  ;;  %v5436_v43 = vmul.f32 0.5, %v9469_v11  ;;  %v5458_v58 = vadd.f32 0.5, %v5434_v35  ;;  %9490 = vpow2.f32 %v16348_v28  ;;  %v16431_v12 = vmul.f32 %v5456_v2, %v16383_v13 }
 0x3e8   : > { %v9473_v27 = vpop.eup %9472  ;;  %v5437_v55 = vmul.f32 0.5, %v9471_v9  ;;  %v5459_v44 = vadd.f32 0.5, %v5435_v42  ;;  %9492 = vpow2.f32 %v16353_v19  ;;  %v16435_v35 = vmul.f32 %v5457_v38, %v16389_v8 }
 0x3e9   : > { %v9475_v34 = vpop.eup %9474  ;;  %v5438_v49 = vmul.f32 0.5, %v9473_v27  ;;  %v5460_v21 = vadd.f32 0.5, %v5436_v43  ;;  %9494 = vpow2.f32 %v16358_v1  ;;  %v5610_v42 = vrot.slane %v16369_v50, 4 }
 0x3ea   : > { %v9477_v23 = vpop.eup %9476  ;;  %v5439_v11 = vmul.f32 0.5, %v9475_v34  ;;  %v5461_v14 = vadd.f32 0.5, %v5437_v55  ;;  %v16442_v2 = vmul.f32 %v5458_v58, %v16350_v29  ;;  %v16445_v43 = vmul.f32 %v5459_v44, %v16355_v41 }
 0x3eb   : > { %v9479_v9 = vpop.eup %9478  ;;  %v5440_v28 = vmul.f32 0.5, %v9477_v23  ;;  %v16439_v6 = vadd.f32 0.5, %v5438_v49  ;;  %v16450_v55 = vmul.f32 %v5460_v21, %v16360_v3 }
 0x3ec   : > { %18419 = vst [vmem:[#allocation106_spill] sm:$0xff] %v16442_v2  ;;  %18420 = vst [vmem:[#allocation107_spill] sm:$0xff] %v16445_v43  ;;  %v9481_v19 = vpop.eup %9480  ;;  %v5441_v38 = vmul.f32 0.5, %v9479_v9  ;;  %v16447_v27 = vadd.f32 0.5, %v5439_v11  ;;  %v16454_v53 = vmul.f32 %v5461_v14, %v16365_v33  ;;  %v16457_v9 = vadd.f32 %v5610_v42, %v16369_v50 }
 0x3ed   : > { %18421 = vst [vmem:[#allocation108_spill] sm:$0xff] %v16450_v55  ;;  %v9483_v34 = vpop.eup %9482  ;;  %v5506_v5 = vadd.f32 1.0, %v9481_v19  ;;  %v5509_v23 = vmul.f32 -0.5, %v9481_v19  ;;  %v5512_v49 = vand.u32 2147483647, %v9481_v19  ;;  %v16459_v20 = vadd.f32 0.5, %v5440_v28 }
 0x3ee   : > { %18422 = vst [vmem:[#allocation109_spill] sm:$0xff] %v16454_v53  ;;  %v9485_v29 = vpop.eup %9484  ;;  %v5515_v58 = vadd.f32 1.0, %v9483_v34  ;;  %v5518_v41 = vmul.f32 -0.5, %v9483_v34  ;;  %v5521_v44 = vand.u32 2147483647, %v9483_v34  ;;  %v16461_v1 = vadd.f32 0.5, %v5441_v38 }
 0x3ef   : > { %v9487_v11 = vpop.eup %9486  ;;  %9496 = vlog2.f32 %v5506_v5  ;;  %v5510_v3 = vadd.f32 1.0, %v5509_v23  ;;  %v5524_v21 = vadd.f32 1.0, %v9485_v29  ;;  %v5527_v33 = vmul.f32 -0.5, %v9485_v29 }
 0x3f0   : > { %v9489_v0 = vpop.eup %9488  ;;  %9498 = vlog2.f32 %v5515_v58  ;;  %v5519_v61 = vadd.f32 1.0, %v5518_v41  ;;  %vm16463_vm3 = vcmp.lt.f32.partialorder %v5512_v49, 0.0004427343  ;;  %v5530_v60 = vand.u32 2147483647, %v9485_v29 }
 0x3f1   : > { %9500 = vlog2.f32 %v5524_v21  ;;  %v5533_v50 = vadd.f32 1.0, %v9487_v11  ;;  %v9491_v42 = vpop.eup %9490  ;;  %v5511_v47 = vmul.f32 %v9481_v19, %v5510_v3  ;;  %vm16467_vm8 = vcmp.lt.f32.partialorder %v5521_v44, 0.0004427343 }
 0x3f2   : > { %v5528_v5 = vadd.f32 1.0, %v5527_v33  ;;  %v5536_v23 = vmul.f32 -0.5, %v9487_v11  ;;  %v5539_v38 = vand.u32 2147483647, %v9487_v11  ;;  %v9493_v26 = vpop.eup %9492  ;;  %v5520_v58 = vmul.f32 %v9483_v34, %v5519_v61 }
 0x3f3   : > { %9502 = vlog2.f32 %v5533_v50  ;;  %v5542_v41 = vadd.f32 1.0, %v9489_v0  ;;  %v5545_v49 = vmul.f32 -0.5, %v9489_v0  ;;  %v9495_v31 = vpop.eup %9494  ;;  %vm16471_vm15 = vcmp.lt.f32.partialorder %v5530_v60, 0.0004427343 }
 0x3f4   : > { %v5529_v45 = vmul.f32 %v9485_v29, %v5528_v5  ;;  %v5537_v48 = vadd.f32 1.0, %v5536_v23  ;;  %v5548_v19 = vand.u32 2147483647, %v9489_v0  ;;  %v5551_v3 = vadd.f32 1.0, %v9491_v42 }
 0x3f5   : > { %9504 = vlog2.f32 %v5542_v41  ;;  %v5546_v44 = vadd.f32 1.0, %v5545_v49  ;;  %v5554_v30 = vmul.f32 -0.5, %v9491_v42  ;;  %vm16475_vm0 = vcmp.lt.f32.partialorder %v5539_v38, 0.0004427343 }
 0x3f6   : > { %v5538_v33 = vmul.f32 %v9487_v11, %v5537_v48  ;;  %v5557_v61 = vand.u32 2147483647, %v9491_v42  ;;  %v5560_v34 = vadd.f32 1.0, %v9493_v26  ;;  %vm16479_vm4 = vcmp.lt.f32.partialorder %v5548_v19, 0.0004427343 }
 0x3f7   : > { %9506 = vlog2.f32 %v5551_v3  ;;  %v5555_v60 = vadd.f32 1.0, %v5554_v30  ;;  %v5563_v29 = vmul.f32 -0.5, %v9493_v26  ;;  %v5547_v5 = vmul.f32 %v9489_v0, %v5546_v44 }
 0x3f8   : > { %9508 = vlog2.f32 %v5560_v34  ;;  %v5566_v23 = vand.u32 2147483647, %v9493_v26  ;;  %v5569_v41 = vadd.f32 1.0, %v9495_v31  ;;  %vm16483_vm10 = vcmp.lt.f32.partialorder %v5557_v61, 0.0004427343 }
 0x3f9   : > { %v9497_v49 = vpop.eup %9496  ;;  %v5564_v11 = vadd.f32 1.0, %v5563_v29  ;;  %v5572_v38 = vmul.f32 -0.5, %v9495_v31  ;;  %v5575_v53 = vand.u32 2147483647, %v9495_v31  ;;  %v5556_v43 = vmul.f32 %v9491_v42, %v5555_v60 }
 0x3fa   : > { %v9499_v55 = vpop.eup %9498  ;;  %v5508_v19 = vmul.f32 0.6931472, %v9497_v49  ;;  %vm16487_vm2 = vcmp.lt.f32.partialorder %v5566_v23, 0.0004427343  ;;  %9510 = vlog2.f32 %v5569_v41  ;;  %v16493_v61 = vmul.f32 %v16439_v6, %v16371_v24 }
 0x3fb   : > { %v9501_v30 = vpop.eup %9500  ;;  %v5517_v0 = vmul.f32 0.6931472, %v9499_v55  ;;  %v5565_v44 = vmul.f32 %v9493_v26, %v5564_v11  ;;  %v5573_v3 = vadd.f32 1.0, %v5572_v38  ;;  %vm16497_vm14 = vcmp.lt.f32.partialorder %v5575_v53, 0.0004427343 }
 0x3fc   : > { %v5514_v34 = vsel %vm16463_vm3, %v5511_v47, %v5508_v19  ;;  %v5526_v29 = vmul.f32 0.6931472, %v9501_v30  ;;  %v16503_v42 = vmul.f32 %v16447_v27, %v16377_v18  ;;  %v16507_v26 = vmul.f32 %v16459_v20, %v16383_v13 }
 0x3fd   : > { %v9503_v55 = vpop.eup %9502  ;;  %v5523_v6 = vsel %vm16467_vm8, %v5520_v58, %v5517_v0  ;;  %v5574_v24 = vmul.f32 %v9495_v31, %v5573_v3  ;;  %v18439_v47 = vmax.f32 %v16293_v62, 0.0  ;;  %v16517_v53 = vmul.f32 %v16461_v1, %v16389_v8 }
 0x3fe   : > { %v5532_v18 = vsel %vm16471_vm15, %v5529_v45, %v5526_v29  ;;  %v5535_v27 = vmul.f32 0.6931472, %v9503_v55  ;;  %v18440_v20 = vmax.f32 %v16299_v32, 0.0  ;;  %v5612_v28 = vrot.slane %v16457_v9, 2 }
 0x3ff   : > { %v16513_v14 = vadd.f32 %v5514_v34, %v18439_v47  ;;  %v9505_v58 = vpop.eup %9504  ;;  %v18441_v31 = vmax.f32 %v16301_v37, 0.0  ;;  %v18442_v60 = vrot.slane %v16375_v54, 4  ;;  %v5622_v1 = vrot.slane %v16381_v10, 4 }
 0x400   : > { %v16523_v13 = vadd.f32 %v5523_v6, %v18440_v20  ;;  %v5628_v45 = vrot.slane %v16387_v15, 4  ;;  %v5541_v32 = vsel %vm16475_vm0, %v5538_v33, %v5535_v27  ;;  %v5544_v21 = vmul.f32 0.6931472, %v9505_v58 }
 0x401   : > { %v16528_v62 = vadd.f32 %v5532_v18, %v18441_v31  ;;  %v5617_v8 = vadd.f32 %v18442_v60, %v16375_v54  ;;  %v5613_v23 = vadd.f32 %v5612_v28, %v16457_v9  ;;  %v5634_v41 = vrot.slane %v16393_v22, 4  ;;  %v9507_v11 = vpop.eup %9506 }
 0x402   : > { %v18443_v37 = vmax.f32 %v16303_v40, 0.0  ;;  %v5623_v54 = vadd.f32 %v5622_v1, %v16381_v10  ;;  %v5629_v30 = vadd.f32 %v5628_v45, %v16387_v15  ;;  %v9509_v0 = vpop.eup %9508  ;;  %v5550_v52 = vsel %vm16479_vm4, %v5547_v5, %v5544_v21 }
 0x403   : > { %v5618_v19 = vrot.slane %v5617_v8, 2  ;;  %v5553_v33 = vmul.f32 0.6931472, %v9507_v11  ;;  %v5614_v3 = vrot.slane %v5613_v23, 1  ;;  %v5635_v9 = vadd.f32 %v5634_v41, %v16393_v22 }
 0x404   : > { %v16541_v38 = vadd.f32 %v5541_v32, %v18443_v37  ;;  %v5562_v34 = vmul.f32 0.6931472, %v9509_v0  ;;  %v18444_v29 = vmax.f32 %v16310_v56, 0.0  ;;  %v5624_v6 = vrot.slane %v5623_v54, 2  ;;  %v9511_v47 = vpop.eup %9510 }
 0x405   : > { %v5619_v40 = vadd.f32 %v5618_v19, %v5617_v8  ;;  %v5559_v10 = vsel %vm16483_vm10, %v5556_v43, %v5553_v33  ;;  %v16554_v15 = vadd.f32 %v5614_v3, %v5613_v23  ;;  %v5630_v18 = vrot.slane %v5629_v30, 2 }
 0x406   : > { %v16550_v55 = vadd.f32 %v5550_v52, %v18444_v29  ;;  %v5636_v50 = vrot.slane %v5635_v9, 2  ;;  %v5568_v5 = vsel %vm16487_vm2, %v5565_v44, %v5562_v34  ;;  %v5571_v27 = vmul.f32 0.6931472, %v9511_v47 }
 0x407   : > { %v18445_v22 = vmax.f32 %v16312_v46, 0.0  ;;  %v5620_v56 = vrot.slane %v5619_v40, 1  ;;  %v18446_v28 = vmax.f32 %v16314_v57, 0.0  ;;  %v5625_v31 = vadd.f32 %v5624_v6, %v5623_v54 }
 0x408   : > { %v5631_v48 = vadd.f32 %v5630_v18, %v5629_v30  ;;  %v5637_v43 = vadd.f32 %v5636_v50, %v5635_v9  ;;  %v5577_v60 = vsel %vm16497_vm14, %v5574_v24, %v5571_v27  ;;  %v5640_v2 = vrot.slane %v16397_v39, 4 }
 0x409   : > { %v16560_v20 = vadd.f32 %v5559_v10, %v18445_v22  ;;  %v16564_v58 = vadd.f32 %v5568_v5, %v18446_v28  ;;  %v16568_v8 = vadd.f32 %v5620_v56, %v5619_v40  ;;  %v5646_v44 = vrot.slane %v16401_v59, 4 }
 0x40a   : > { %v18447_v46 = vmax.f32 %v16319_v17, 0.0  ;;  %v5626_v45 = vrot.slane %v5625_v31, 1  ;;  %v5632_v57 = vrot.slane %v5631_v48, 1  ;;  %v5638_v32 = vrot.slane %v5637_v43, 1 }
 0x40b   : > { %v5641_v21 = vadd.f32 %v5640_v2, %v16397_v39  ;;  %v5647_v23 = vadd.f32 %v5646_v44, %v16401_v59  ;;  %v5652_v49 = vrot.slane %v16405_v63, 4  ;;  %v5658_v24 = vrot.slane %v16409_v16, 4 }
 0x40c   : > { %v16574_v1 = vadd.f32 %v5577_v60, %v18447_v46  ;;  %v16580_v41 = vadd.f32 %v5626_v45, %v5625_v31  ;;  %v16582_v11 = vadd.f32 %v5632_v57, %v5631_v48  ;;  %v16584_v37 = vadd.f32 %v5638_v32, %v5637_v43 }
 0x40d   : > { %v5664_v17 = vrot.slane %v16413_v7, 4  ;;  %v5642_v19 = vrot.slane %v5641_v21, 2  ;;  %v5648_v54 = vrot.slane %v5647_v23, 2  ;;  %v5653_v30 = vadd.f32 %v5652_v49, %v16405_v63 }
 0x40e   : > { %v5659_v39 = vadd.f32 %v5658_v24, %v16409_v16  ;;  %v5670_v0 = vrot.slane %v16417_v25, 4  ;;  %v5676_v52 = vrot.slane %v16421_v36, 4  ;;  %v5682_v33 = vrot.slane %v16424_v51, 4 }
 0x40f   : > { %v5665_v59 = vadd.f32 %v5664_v17, %v16413_v7  ;;  %v5643_v3 = vadd.f32 %v5642_v19, %v5641_v21  ;;  %v5649_v9 = vadd.f32 %v5648_v54, %v5647_v23  ;;  %v5654_v34 = vrot.slane %v5653_v30, 2  ;;  %v18448_v17 = vld [vmem:[#allocation106_spill] sm:$0xff] }
 0x410   : > { %v5660_v29 = vrot.slane %v5659_v39, 2  ;;  %v5671_v6 = vadd.f32 %v5670_v0, %v16417_v25  ;;  %v5677_v47 = vadd.f32 %v5676_v52, %v16421_v36  ;;  %v5683_v63 = vadd.f32 %v5682_v33, %v16424_v51 }
 0x411   : > { %v5666_v40 = vrot.slane %v5665_v59, 2  ;;  %v5644_v16 = vrot.slane %v5643_v3, 1  ;;  %v5650_v10 = vrot.slane %v5649_v9, 1  ;;  %v5655_v7 = vadd.f32 %v5654_v34, %v5653_v30 }
 0x412   : > { %v5661_v18 = vadd.f32 %v5660_v29, %v5659_v39  ;;  %v5672_v5 = vrot.slane %v5671_v6, 2  ;;  %v5678_v27 = vrot.slane %v5677_v47, 2  ;;  %v5684_v22 = vrot.slane %v5683_v63, 2  ;;  %v18451_v29 = vld [vmem:[#allocation109_spill] sm:$0xff] }
 0x413   : > { %v5667_v50 = vadd.f32 %v5666_v40, %v5665_v59  ;;  %v16596_v56 = vadd.f32 %v5644_v16, %v5643_v3  ;;  %v16598_v28 = vadd.f32 %v5650_v10, %v5649_v9  ;;  %v5656_v31 = vrot.slane %v5655_v7, 1  ;;  %v18449_v59 = vld [vmem:[#allocation107_spill] sm:$0xff] }
 0x414   : > { %v5662_v48 = vrot.slane %v5661_v18, 1  ;;  %v5673_v25 = vadd.f32 %v5672_v5, %v5671_v6  ;;  %v5679_v60 = vadd.f32 %v5678_v27, %v5677_v47  ;;  %v5685_v36 = vadd.f32 %v5684_v22, %v5683_v63 }
 0x415   : > { %v5668_v43 = vrot.slane %v5667_v50, 1  ;;  %v16600_v2 = vadd.f32 %v5656_v31, %v5655_v7  ;;  %v5688_v44 = vrot.slane %v16427_v4, 4  ;;  %v5694_v46 = vrot.slane %v16431_v12, 4 }
 0x416   : > { %v5663_v51 = vadd.f32 %v5662_v48, %v5661_v18  ;;  %v5674_v57 = vrot.slane %v5673_v25, 1  ;;  %v5680_v32 = vrot.slane %v5679_v60, 1  ;;  %v5686_v21 = vrot.slane %v5685_v36, 1 }
 0x417   : > { %v16604_v45 = vadd.f32 %v5668_v43, %v5667_v50  ;;  %v5689_v23 = vadd.f32 %v5688_v44, %v16427_v4  ;;  %v5695_v49 = vadd.f32 %v5694_v46, %v16431_v12  ;;  %v5700_v24 = vrot.slane %v16435_v35, 4  ;;  %v18450_v12 = vld [vmem:[#allocation108_spill] sm:$0xff] }
 0x418   : > { %v5706_v19 = vrot.slane %v18448_v17, 4  ;;  %v5675_v54 = vadd.f32 %v5674_v57, %v5673_v25  ;;  %v5681_v30 = vadd.f32 %v5680_v32, %v5679_v60  ;;  %v5687_v39 = vadd.f32 %v5686_v21, %v5685_v36 }
 0x419   : > { %v5712_v0 = vrot.slane %v18449_v59, 4  ;;  %v5690_v52 = vrot.slane %v5689_v23, 2  ;;  %v5696_v33 = vrot.slane %v5695_v49, 2  ;;  %v5701_v3 = vadd.f32 %v5700_v24, %v16435_v35 }
 0x41a   : > { %v5707_v9 = vadd.f32 %v5706_v19, %v18448_v17  ;;  %v5718_v34 = vrot.slane %v18450_v12, 4  ;;  %v5724_v40 = vrot.slane %v18451_v29, 4  ;;  %v5730_v6 = vrot.slane %v16493_v61, 4 }
 0x41b   : > { %v5713_v4 = vadd.f32 %v5712_v0, %v18449_v59  ;;  %v5691_v47 = vadd.f32 %v5690_v52, %v5689_v23  ;;  %v5697_v63 = vadd.f32 %v5696_v33, %v5695_v49  ;;  %v5702_v16 = vrot.slane %v5701_v3, 2 }
 0x41c   : > { %v5708_v10 = vrot.slane %v5707_v9, 2  ;;  %v5719_v18 = vadd.f32 %v5718_v34, %v18450_v12  ;;  %v5725_v35 = vadd.f32 %v5724_v40, %v18451_v29  ;;  %v5731_v50 = vadd.f32 %v5730_v6, %v16493_v61 }
 0x41d   : > { %v5714_v7 = vrot.slane %v5713_v4, 2  ;;  %v5692_v5 = vrot.slane %v5691_v47, 1  ;;  %v5698_v27 = vrot.slane %v5697_v63, 1  ;;  %v5703_v22 = vadd.f32 %v5702_v16, %v5701_v3 }
 0x41e   : > { %v5709_v31 = vadd.f32 %v5708_v10, %v5707_v9  ;;  %v5720_v43 = vrot.slane %v5719_v18, 2  ;;  %v5726_v25 = vrot.slane %v5725_v35, 2  ;;  %v5732_v60 = vrot.slane %v5731_v50, 2 }
 0x41f   : > { %v5715_v48 = vadd.f32 %v5714_v7, %v5713_v4  ;;  %v5693_v36 = vadd.f32 %v5692_v5, %v5691_v47  ;;  %v5699_v44 = vadd.f32 %v5698_v27, %v5697_v63  ;;  %v5704_v46 = vrot.slane %v5703_v22, 1 }
 0x420   : > { %v5710_v57 = vrot.slane %v5709_v31, 1  ;;  %v5721_v21 = vadd.f32 %v5720_v43, %v5719_v18  ;;  %v5727_v23 = vadd.f32 %v5726_v25, %v5725_v35  ;;  %v5733_v49 = vadd.f32 %v5732_v60, %v5731_v50  ;;  %v18452_v43 = vld [vmem:[#allocation97_spill] sm:$0xff]  ;;  %v18454_v60 = vld [vmem:[#allocation96_spill] sm:$0xff] }
 0x421   : > { %v5716_v32 = vrot.slane %v5715_v48, 1  ;;  %v5705_v24 = vadd.f32 %v5704_v46, %v5703_v22  ;;  %v5736_v61 = vrot.slane %v16503_v42, 4  ;;  %v5742_v19 = vrot.slane %v16507_v26, 4 }
 0x422   : > { %v5711_v17 = vadd.f32 %v5710_v57, %v5709_v31  ;;  %v5722_v0 = vrot.slane %v5721_v21, 1  ;;  %v5728_v52 = vrot.slane %v5727_v23, 1  ;;  %v5734_v33 = vrot.slane %v5733_v49, 1 }
 0x423   : > { %v5717_v59 = vadd.f32 %v5716_v32, %v5715_v48  ;;  %v5737_v3 = vadd.f32 %v5736_v61, %v16503_v42  ;;  %v5743_v9 = vadd.f32 %v5742_v19, %v16507_v26  ;;  %v5748_v4 = vrot.slane %v16517_v53, 4 }
 0x424   : > { %v5779_v12 = vsel %vm5778_vm6, %v5663_v51, %v16554_v15  ;;  %v5723_v34 = vadd.f32 %v5722_v0, %v5721_v21  ;;  %v5729_v29 = vadd.f32 %v5728_v52, %v5727_v23  ;;  %v5735_v40 = vadd.f32 %v5734_v33, %v5733_v49  ;;  %v18457_v23 = vld [vmem:[#allocation102_spill] sm:$0xff] }
 0x425   : > { %v5781_v6 = vsel %vm5780_vm5, %v5711_v17, %v5779_v12  ;;  %v5738_v47 = vrot.slane %v5737_v3, 2  ;;  %v5744_v63 = vrot.slane %v5743_v9, 2  ;;  %v5749_v16 = vadd.f32 %v5748_v4, %v16517_v53 }
 0x426   : > { %v5782_v42 = vsel %vm5778_vm6, %v16604_v45, %v16568_v8  ;;  %v5784_v10 = vsel %vm5778_vm6, %v5675_v54, %v16580_v41  ;;  %v5786_v15 = vsel %vm5778_vm6, %v5681_v30, %v16582_v11  ;;  %v5788_v51 = vsel %vm5778_vm6, %v5687_v39, %v16584_v37 }
 0x427   : > { %v5783_v26 = vsel %vm5780_vm5, %v5717_v59, %v5782_v42  ;;  %v5739_v7 = vadd.f32 %v5738_v47, %v5737_v3  ;;  %v5745_v18 = vadd.f32 %v5744_v63, %v5743_v9  ;;  %v5750_v35 = vrot.slane %v5749_v16, 2 }
 0x428   : > { %v5785_v53 = vsel %vm5780_vm5, %v5723_v34, %v5784_v10  ;;  %v5787_v50 = vsel %vm5780_vm5, %v5729_v29, %v5786_v15  ;;  %v5789_v8 = vsel %vm5780_vm5, %v5735_v40, %v5788_v51  ;;  %v5790_v45 = vsel %vm5778_vm6, %v5693_v36, %v16596_v56 }
 0x429   : > { %v5792_v41 = vsel %vm5778_vm6, %v5699_v44, %v16598_v28  ;;  %v5740_v54 = vrot.slane %v5739_v7, 1  ;;  %v5746_v11 = vrot.slane %v5745_v18, 1  ;;  %v5751_v30 = vadd.f32 %v5750_v35, %v5749_v16 }
 0x42a   : > { %v5794_v37 = vsel %vm5778_vm6, %v5705_v24, %v16600_v2  ;;  %v5805_v39 = vsel %vm5804_vm12, %v16513_v14, %v5781_v6  ;;  %v5806_v5 = vsel %vm5804_vm12, %v16523_v13, %v5783_v26  ;;  %v5807_v27 = vsel %vm5804_vm12, %v16528_v62, %v5785_v53  ;;  %v18453_v2 = vld [vmem:[#allocation103_spill] sm:$0xff]  ;;  %v18455_v14 = vld [vmem:[#allocation104_spill] sm:$0xff]  ;;  %v18456_v62 = vld [vmem:[#allocation105_spill] sm:$0xff] }
 0x42b   : > { %v5808_v56 = vsel %vm5804_vm12, %v16541_v38, %v5787_v50  ;;  %v5741_v22 = vadd.f32 %v5740_v54, %v5739_v7  ;;  %v5747_v28 = vadd.f32 %v5746_v11, %v5745_v18  ;;  %v5752_v31 = vrot.slane %v5751_v30, 1 }
 0x42c   : > { %v5809_v48 = vsel %vm5804_vm12, %v16550_v55, %v5789_v8  ;;  %v5832_v25 = vrot.slane %v18453_v2, %v18452_v43  ;;  %v5836_v36 = vrot.slane %v18455_v14, %v18454_v60  ;;  %v5840_v13 = vrot.slane %v18455_v14, %v18452_v43 }
 0x42d   : > { %v5844_v44 = vrot.slane %v18456_v62, %v18454_v60  ;;  %v5753_v46 = vadd.f32 %v5752_v31, %v5751_v30  ;;  %v5791_v38 = vsel %vm5780_vm5, %v5741_v22, %v5790_v45  ;;  %v5793_v57 = vsel %vm5780_vm5, %v5747_v28, %v5792_v41 }
 0x42e   : > { %v5848_v55 = vrot.slane %v18456_v62, %v18452_v43  ;;  %v5810_v32 = vsel %vm5804_vm12, %v16560_v20, %v5791_v38  ;;  %v5811_v21 = vsel %vm5804_vm12, %v16564_v58, %v5793_v57  ;;  %v18458_v49 = vrot.slane %v18457_v23, %v18454_v60 }
 0x42f   : > { %v18459_v17 = vrot.slane %v18457_v23, %v18452_v43  ;;  %v5795_v19 = vsel %vm5780_vm5, %v5753_v46, %v5794_v37  ;;  %v18460_v59 = vrot.slane %v18453_v2, %v18454_v60  ;;  %v5872_v0 = vrot.slane %v5832_v25, %v18454_v60 }
 0x430   : > { %v5860_v24 = vrot.slane %v18458_v49, %v18454_v60  ;;  %v5876_v58 = vrot.slane %v5836_v36, %v18454_v60  ;;  %v5812_v52 = vsel %vm5804_vm12, %v16574_v1, %v5795_v19  ;;  %v5880_v33 = vrot.slane %v5840_v13, %v18454_v60 }
 0x431   : > { %v5864_v61 = vrot.slane %v18459_v17, %v18454_v60  ;;  %v5868_v20 = vrot.slane %v18460_v59, %v18454_v60  ;;  %v5884_v3 = vrot.slane %v5844_v44, %v18454_v60  ;;  %v5888_v9 = vrot.slane %v5848_v55, %v18454_v60 }
 0x432   : > { %v5889_v4 = vmul.f32 %v5860_v24, %v5805_v39  ;;  %v5892_v29 = vmul.f32 %v5872_v0, %v5808_v56  ;;  %v5893_v40 = vmul.f32 %v5876_v58, %v5809_v48  ;;  %v5894_v6 = vmul.f32 %v5880_v33, %v5810_v32 }
 0x433   : > { %v5890_v12 = vmul.f32 %v5864_v61, %v5806_v5  ;;  %v5891_v34 = vmul.f32 %v5868_v20, %v5807_v27  ;;  %v5895_v47 = vmul.f32 %v5884_v3, %v5811_v21  ;;  %v5896_v1 = vmul.f32 %v5888_v9, %v5812_v52 }
 0x434   : > { %v5898_v63 = vsel %vm5897_vm9, %v5889_v4, 0.0  ;;  %v5901_v26 = vsel %vm5897_vm9, %v5892_v29, 0.0  ;;  %v5902_v10 = vsel %vm5897_vm9, %v5893_v40, 0.0  ;;  %v5903_v15 = vsel %vm5897_vm9, %v5894_v6, 0.0 }
 0x435   : > { %v5899_v16 = vsel %vm5897_vm9, %v5890_v12, 0.0  ;;  %v5900_v42 = vsel %vm5897_vm9, %v5891_v34, 0.0  ;;  %v5904_v51 = vsel %vm5897_vm9, %v5895_v47, 0.0  ;;  %v5905_v7 = vsel %vm5897_vm9, %v5896_v1, 0.0  ;;  %5906 = vst [vmem:[%s12475_s6] sm:$0xff] %v5898_v63  ;;  %5909 = vst [vmem:[%s12475_s6 + $0x18] sm:$0xff] %v5901_v26 }
 0x436   : > { %5907 = vst [vmem:[%s12475_s6 + $0x8] sm:$0xff] %v5899_v16  ;;  %5908 = vst [vmem:[%s12475_s6 + $0x10] sm:$0xff] %v5900_v42 }
 0x437   : > { %5910 = vst [vmem:[%s12475_s6 + $0x20] sm:$0xff] %v5902_v10  ;;  %5911 = vst [vmem:[%s12475_s6 + $0x28] sm:$0xff] %v5903_v15 }
 0x438   : > { %5912 = vst [vmem:[%s12475_s6 + $0x30] sm:$0xff] %v5904_v51  ;;  %5913 = vst [vmem:[%s12475_s6 + $0x38] sm:$0xff] %v5905_v7 }
 0x439 PF: > { %s8123_s15 = sshll.u32 %s9686_s16, 10  ;;  %s5929_s24 = sshll.u32 %s12475_s6, 4  ;;  %s5930_s24 = int_to_ptr.vmem [resolvable:$true] %s5929_s24 }
 0x43a   : > { %s16706_s18 = scalar_lea.hbm %s16766_s2, %s8123_s15  ;;  %s5915_s20 = scalar_lea.sflag [#allocation5], %s9953_s25 }
 0x43b   : > { %s9572_s23 = scalar_lea.vmem %s5930_s24, 1024  ;;  %p18461_p12 = scmp.ne.s32.totalorder %s17037_s7, 0 }
 0x43c   : > { %p9573_p4 = scmp.ne.s32.totalorder %s5930_s24, %s9572_s23  ;;  %s9709_s28 = smov [#allocation8]  }
 0x43d   : > { %s9576_s9 = sshll.u32 %s9709_s28, 4  ;;  %s9577_s9 = int_to_ptr.vmem [resolvable:$false] %s9576_s9 }
 0x43e   : > { %p9574_p9 = pnand %p9573_p4, %p18461_p12  ;;  %s9578_s27 = scalar_lea.vmem %s9577_s9, 2048 }
 0x43f   : > { %p9579_p2 = scmp.lt.s32.totalorder %s5930_s24, %s9577_s9  ;;  %p9580_p7 = scmp.lt.s32.totalorder %s9578_s27, %s9572_s23 }
 0x440   : > { %p9575_p8 = pneg %p9574_p9 }
 0x441   : > { %p9581_p1 = por %p9580_p7, %p9579_p2 }
 0x443   : > { %p9582_p10 = pnand %p9581_p1, %p9575_p8 }
 0x445   : > { %9585 = shalt.err (!%p9582_p10)
}
 0x446   : > { %s9586_s16 = scalar_lea.hbm %s16706_s18, 1024  ;;  %s9590_s5 = scalar_lea.hbm %s16766_s2, 6144 }
 0x447   : > { %p9587_p11 = scmp.ne.s32.totalorder %s16706_s18, %s9586_s16  ;;  %p9591_p6 = scmp.lt.u32.totalorder %s16706_s18, %s16766_s2 }
 0x448   : > { %p9592_p0 = scmp.lt.u32.totalorder %s9590_s5, %s9586_s16  ;;  %p9594_p4 = scmp.lt.u32.totalorder %s9586_s16, %s16706_s18 }
 0x449   : > { %p9588_p3 = pnand %p9587_p11, %p18461_p12 }
 0x44a   : > { %p9593_p5 = por %p9592_p0, %p9591_p6 }
 0x44b   : > { %p9589_p13 = pneg %p9588_p3 }
 0x44c   : > { %p9595_p9 = por %p9594_p4, %p9593_p5 }
 0x44e   : > { %p9596_p8 = pnand %p9595_p9, %p9589_p13 }
 0x450   : > { %9599 = shalt.err (!%p9596_p8)
}
 0x451   : > { %9282 = dma.vmem_to_hbm [thread:$0]  (%p18461_p12), %s5930_s24, 1024, %s16706_s18, %s5915_s20  }
 0x452 PF: > { %p9296_p2 = scmp.ge.s32.totalorder %s9698_s19, 2  ;;  %s5941_s29 = sand.u32 1, %s9670_s12  }
 0x453   : > { %p18462_p7 = scmp.ne.s32.totalorder %s17039_s8, 0  ;;  %s5942_s6 = scalar_lea.sflag [#allocation5], %s5941_s29 }
 0x455   : > { %p9292_p1 = pnand %p9296_p2, %p18462_p7 }
 0x457   : > { %9653 = dma.done.wait (!%p9292_p1), %s5942_s6, 1024  }
 0x458   : > { %9655 = vsyncadd (!%p9292_p1), %s5942_s6, 4294966272  ;;  %s21_s19 = sadd.s32 1, %s9698_s19   ;;  %s18463_s16 = sld [smem:[#allocation12_spill]] }
 0x459   : > { %p18_p10 = scmp.ge.s32.totalorder %s21_s19, 26   ;;  %s18464_s7 = sld [smem:[#allocation13_spill]] }
 0x45a   : > { %s18465_s18 = sld [smem:[#allocation14_spill]]  ;;  %s18466_s9 = smov %s9662_s10 }
 0x45b   : > { %s18467_s10 = smov %s9666_s11  ;;  %s18468_s11 = smov %s9827_s3 }
 0x45c   : > { %s18469_s12 = smov %s9674_s13  ;;  %s18470_s13 = smov %s9678_s14 }
 0x45d   : > { %s18471_s14 = smov %s9830_s4  ;;  %s18472_s15 = smov %s9690_s17 }
 0x45e   :  { %20 = sbr.rel (!%p18_p10) target bundleno = 13 (0xd), region = 94 }
 0x45f   : > { %s18473_s17 = smov %s18464_s7 }
 0x465   :  { %5947 = vsyncpa [#allocation4], 1 }
 0x466   :  { %5949 = vsyncpa [#allocation4 + $0x1], 1 }
 0x467   :  { %5950 = vsyncpa [#allocation7], 1 }
 0x468   :  { %5952 = vsyncpa [#allocation7 + $0x1], 1 }
 0x469   :  { %5953 = vsyncpa [#allocation5], 1 }
 0x46a   :  { %5955 = vsyncpa [#allocation5 + $0x1], 1 }

</bundles_post_ra>
